<compile_context>
chip_gen: v7x
topology: tpu7x:2x2x1
jax: 0.10.0
libtpu: 0.0.40
codegen_flags: <defaults>
</compile_context>

<pallas_src>
import numpy as np
import jax
import jax.numpy as jnp
from jax import lax
from jax.experimental import pallas as pl
from jax.experimental.pallas import tpu as pltpu


# ----------------------------------------------------------------------------
# Host-side constants (row ordering for the fused pool, col2im scatter matrix)
# ----------------------------------------------------------------------------
# conv1 patch rows are ordered (pool tap di, dj, pool out pp, qq); within the
# 11x11 central conv-output raster the needed position is (2pp+di, 2qq+dj).
_POOL_ORDER = np.array(
    [(2 * pp + di) * 11 + (2 * qq + dj)
     for di in range(3) for dj in range(3)
     for pp in range(5) for qq in range(5)],
    dtype=np.int32)


def _build_scatter():
    """col2im for ConvTranspose2d(k=5, s=2, p=2): (in 5x5, tap 5x5) -> out 9x9."""
    s = np.zeros((25, 25, 81), np.float32)
    for iy in range(5):
        for ix in range(5):
            for ki in range(5):
                for kj in range(5):
                    oy, ox = 2 * iy + ki - 2, 2 * ix + kj - 2
                    if 0 <= oy < 9 and 0 <= ox < 9:
                        s[iy * 5 + ix, ki * 5 + kj, oy * 9 + ox] = 1.0
    return s


_SCATTER = _build_scatter()


# ----------------------------------------------------------------------------
# The fused Pallas kernel (one grid step per batch element)
# ----------------------------------------------------------------------------
def _scale2_kernel(p1_ref, s1_ref, w1_ref, b1_ref, w2_ref, b2_ref,
                   w3_ref, b3_ref, w4_ref, b4_ref, w5_ref, out_ref, xbuf):
    f32 = jnp.float32

    # ---- conv1 (9x9/s2) + ReLU + 3x3/s2 maxpool + [1:-1,1:-1] crop --------
    # p1 rows come in 9 groups of 25 (one group per pool tap, (pp,qq) raster),
    # so the pool is a max over the 9 group-wise MXU results.  Bias + ReLU
    # commute with the max and are applied once afterwards.
    pooled = jnp.dot(p1_ref[0, 0], w1_ref[...], preferred_element_type=f32)
    for g in range(1, 9):
        pooled = jnp.maximum(
            pooled,
            jnp.dot(p1_ref[0, g], w1_ref[...], preferred_element_type=f32))
    h1 = jnp.maximum(pooled + b1_ref[...], 0.0)              # (25, 128) f32

    # Row/col index of every flat spatial position r = 5*y + x
    # (y built with a compare staircase -- no vector int div/mod needed).
    r = lax.broadcasted_iota(jnp.int32, (25, 1), 0)
    y = ((r >= 5).astype(jnp.int32) + (r >= 10).astype(jnp.int32)
         + (r >= 15).astype(jnp.int32) + (r >= 20).astype(jnp.int32))
    x = r - 5 * y

    def conv5x5(cin, w_ref, b_ref):
        # 5x5 / stride 1 / pad 2 conv over the 5x5 spatial grid stored in
        # xbuf[12:37, :cin]; xbuf rows 0:12 and 37:49 are zero.  Tap (ki,kj)
        # reads the contiguous 25-row window starting at t = 5*ki + kj and
        # masks the rows whose shifted position falls outside the 5x5 grid.
        acc = jnp.zeros((25, 128), f32)
        for ki in range(5):
            for kj in range(5):
                t = ki * 5 + kj
                win = xbuf[t:t + 25, 0:cin]                  # (25, cin) f32
                m = None
                if ki < 2:
                    m = y >= 2 - ki
                if ki > 2:
                    m = y <= 6 - ki
                if kj < 2:
                    mx = x >= 2 - kj
                    m = mx if m is None else m & mx
                if kj > 2:
                    mx = x <= 6 - kj
                    m = mx if m is None else m & mx
                if m is not None:
                    win = win * m.astype(f32)
                acc = acc + jnp.dot(win.astype(jnp.bfloat16), w_ref[t],
                                    preferred_element_type=f32)
        return jnp.maximum(acc + b_ref[...], 0.0)            # (25, 128) f32

    # ---- conv2: cat([pool(conv1) (128-wide), out_scale1 (64)]) -> 64(->128)
    xbuf[...] = jnp.zeros_like(xbuf)
    xbuf[12:37, :] = jnp.concatenate([h1, s1_ref[0]], axis=1)    # (25, 192)
    h2 = conv5x5(192, w2_ref, b2_ref)

    # ---- conv3 / conv4 (64 -> 64, carried 128-wide) ------------------------
    xbuf[12:37, 0:128] = h2
    h3 = conv5x5(128, w3_ref, b3_ref)
    xbuf[12:37, 0:128] = h3
    h4 = conv5x5(128, w4_ref, b4_ref)

    # ---- ConvTranspose2d channel projection: (25 pix, 64ch) -> 25 taps -----
    # (lane-dense 128-wide output; the spatial scatter happens in the wrapper)
    out_ref[0] = jnp.dot(h4.astype(jnp.bfloat16), w5_ref[...],
                         preferred_element_type=f32)


def _fused_forward(p1, s1, prep):
    n = p1.shape[0]
    return pl.pallas_call(
        _scale2_kernel,
        out_shape=jax.ShapeDtypeStruct((n, 25, 128), jnp.float32),
        grid=(n,),
        in_specs=[
            pl.BlockSpec((1, 9, 25, 256), lambda i: (i, 0, 0, 0)),  # conv1 patches
            pl.BlockSpec((1, 25, 64), lambda i: (i, 0, 0)),         # out_scale1
            pl.BlockSpec((256, 128), lambda i: (0, 0)),             # w1
            pl.BlockSpec((1, 128), lambda i: (0, 0)),               # b1
            pl.BlockSpec((25, 192, 128), lambda i: (0, 0, 0)),      # w2 (per tap)
            pl.BlockSpec((1, 128), lambda i: (0, 0)),               # b2
            pl.BlockSpec((25, 128, 128), lambda i: (0, 0, 0)),      # w3
            pl.BlockSpec((1, 128), lambda i: (0, 0)),               # b3
            pl.BlockSpec((25, 128, 128), lambda i: (0, 0, 0)),      # w4
            pl.BlockSpec((1, 128), lambda i: (0, 0)),               # b4
            pl.BlockSpec((128, 128), lambda i: (0, 0)),             # w5 tap proj
        ],
        out_specs=pl.BlockSpec((1, 25, 128), lambda i: (i, 0, 0)),
        scratch_shapes=[pltpu.VMEM((49, 192), jnp.float32)],
        compiler_params=pltpu.CompilerParams(
            dimension_semantics=("parallel",)),
    )(p1, s1, prep["w1"], prep["b1"], prep["w2"], prep["b2"],
      prep["w3"], prep["b3"], prep["w4"], prep["b4"], prep["w5"])


# ----------------------------------------------------------------------------
# Forward wrapper (layout plumbing + conv1 im2col + final col2im scatter)
# ----------------------------------------------------------------------------
def scale2_forward(prep, img_nchw, out_scale1_nchw):
    n = img_nchw.shape[0]
    x = jnp.transpose(img_nchw, (0, 2, 3, 1))                    # (N,37,37,3)

    # conv1 im2col, restricted to the 11x11 central conv outputs (the only
    # ones that survive pool + crop), rows reordered to (pool-tap, pp, qq).
    core = x[:, 4:33, 4:33, :]                                   # (N,29,29,3)
    rows = jnp.stack([core[:, ki:ki + 21:2] for ki in range(9)], axis=1)
    pat = jnp.stack([rows[:, :, :, kj:kj + 21:2] for kj in range(9)], axis=3)
    pat = pat.transpose(0, 2, 4, 1, 3, 5).reshape(n, 121, 243)   # (y*11+x , ki,kj,c)
    pat = pat[:, _POOL_ORDER, :]                                 # (N,225,243)
    pat = jnp.pad(pat, ((0, 0), (0, 0), (0, 13)))                # K 243 -> 256
    p1 = pat.reshape(n, 9, 25, 256).astype(jnp.bfloat16)

    s1 = jnp.transpose(out_scale1_nchw, (0, 2, 3, 1)).reshape(n, 25, 64)
    s1 = s1.astype(jnp.float32)

    proj = _fused_forward(p1, s1, prep)                          # (N,25,128) f32

    # ConvTranspose2d spatial scatter (col2im) + bias.
    # TODO(synk): this constant 0/1 625->81 scatter-add is left as one tiny
    # XLA einsum; doing it in-kernel would need a row gather with no clean win.
    out = jnp.einsum("nrt,rto->no", proj[:, :, :25], prep["scatter"])
    out = out + prep["b5"][0]
    return out.reshape(n, 1, 9, 9)


# ----------------------------------------------------------------------------
# One-time parameter preprocessing (hoisted out of the forward pass)
# ----------------------------------------------------------------------------
def prepare_params(params):
    f32, bf16 = jnp.float32, jnp.bfloat16

    # conv1: (96,3,9,9) -> (ki,kj,c) x cout, padded to (256,128).
    w1 = jnp.transpose(params["w1"], (2, 3, 1, 0)).reshape(243, 96)
    w1 = jnp.pad(w1, ((0, 13), (0, 32))).astype(bf16)
    b1 = jnp.pad(params["b1"], (0, 32)).reshape(1, 128).astype(f32)

    # conv2: 160 in-channels -> rows [0:96]=conv1 part, [128:192]=out_scale1
    # part (conv1 features are carried 128-wide in the kernel), cout 64->128.
    w2 = jnp.transpose(params["w2"], (2, 3, 1, 0)).reshape(25, 160, 64)
    w2p = jnp.zeros((25, 192, 128), f32)
    w2p = w2p.at[:, 0:96, 0:64].set(w2[:, 0:96, :])
    w2p = w2p.at[:, 128:192, 0:64].set(w2[:, 96:160, :])
    b2 = jnp.pad(params["b2"], (0, 64)).reshape(1, 128).astype(f32)

    def prep64(w, b):
        wt = jnp.transpose(w, (2, 3, 1, 0)).reshape(25, 64, 64)
        wp = jnp.zeros((25, 128, 128), f32).at[:, 0:64, 0:64].set(wt)
        return wp.astype(bf16), jnp.pad(b, (0, 64)).reshape(1, 128).astype(f32)

    w3p, b3 = prep64(params["w3"], params["b3"])
    w4p, b4 = prep64(params["w4"], params["b4"])

    # ConvTranspose2d weight (in=64, out=1, 5, 5): channel -> 25-tap projection.
    w5 = params["w5"][:, 0, :, :].reshape(64, 25)
    w5p = jnp.zeros((128, 128), f32).at[0:64, 0:25].set(w5).astype(bf16)

    return {"w1": w1, "b1": b1, "w2": w2p.astype(bf16), "b2": b2,
            "w3": w3p, "b3": b3, "w4": w4p, "b4": b4, "w5": w5p,
            "b5": params["b5"].astype(f32),
            "scatter": jnp.asarray(_SCATTER)}


# ----------------------------------------------------------------------------
# Pure-XLA reference (semantics check against PyTorch behaviour)
# ----------------------------------------------------------------------------
def scale2_reference(params, img, out_scale1):
    dn = ("NCHW", "OIHW", "NCHW")
    hp = lax.Precision.HIGHEST

    def conv(x, w, b, stride, pad):
        y = lax.conv_general_dilated(x, w, (stride, stride),
                                     [(pad, pad), (pad, pad)],
                                     dimension_numbers=dn, precision=hp)
        return y + b[None, :, None, None]

    x = jnp.maximum(conv(img, params["w1"], params["b1"], 2, 0), 0.0)
    x = lax.reduce_window(x, -jnp.inf, lax.max, (1, 1, 3, 3), (1, 1, 2, 2), "VALID")
    x = x[:, :, 1:-1, 1:-1]
    x = jnp.concatenate([x, out_scale1], axis=1)
    x = jnp.maximum(conv(x, params["w2"], params["b2"], 1, 2), 0.0)
    x = jnp.maximum(conv(x, params["w3"], params["b3"], 1, 2), 0.0)
    x = jnp.maximum(conv(x, params["w4"], params["b4"], 1, 2), 0.0)
    w5 = jnp.transpose(jnp.flip(params["w5"], axis=(2, 3)), (1, 0, 2, 3))
    y = lax.conv_general_dilated(x, w5, (1, 1), [(2, 2), (2, 2)],
                                 lhs_dilation=(2, 2),
                                 dimension_numbers=dn, precision=hp)
    return y + params["b5"][None, :, None, None]


# ----------------------------------------------------------------------------
# Deterministic parameter init (shapes from Scale2.__init__)
# ----------------------------------------------------------------------------
def init_params(key):
    ks = jax.random.split(key, 10)

    def w_init(k, shape, fan_in):
        return jax.random.normal(k, shape, jnp.float32) / jnp.sqrt(fan_in)

    def b_init(k, n):
        return 0.1 * jax.random.normal(k, (n,), jnp.float32)

    return {
        "w1": w_init(ks[0], (96, 3, 9, 9), 3 * 9 * 9),     "b1": b_init(ks[1], 96),
        "w2": w_init(ks[2], (64, 160, 5, 5), 160 * 25),    "b2": b_init(ks[3], 64),
        "w3": w_init(ks[4], (64, 64, 5, 5), 64 * 25),      "b3": b_init(ks[5], 64),
        "w4": w_init(ks[6], (64, 64, 5, 5), 64 * 25),      "b4": b_init(ks[7], 64),
        # ConvTranspose2d weight layout: (in_channels, out_channels, kH, kW)
        "w5": w_init(ks[8], (64, 1, 5, 5), 64 * 25),       "b5": b_init(ks[9], 1),
    }


if __name__ == "__main__":
    key = jax.random.PRNGKey(0)
    k_p, k_img, k_s1 = jax.random.split(key, 3)
    params = init_params(k_p)
    prep = prepare_params(params)        # one-time weight preprocessing

    # img: (N=2, 3, 37, 37) -> conv9/s2 -> 15 -> pool3/s2 -> 7 -> [1:-1] -> 5
    # out_scale1 must be (N, 64, 5, 5) so the channel cat gives 96 + 64 = 160.
    img = jax.random.normal(k_img, (2, 3, 37, 37), jnp.float32)        # NCHW
    out_scale1 = jax.random.normal(k_s1, (2, 64, 5, 5), jnp.float32)   # NCHW

    fwd = jax.jit(scale2_forward)
    out = jax.block_until_ready(fwd(prep, img, out_scale1))
    assert out.shape == (2, 1, 9, 9), out.shape   # (5-1)*2 - 2*2 + 5 = 9

    ref = jax.block_until_ready(scale2_reference(params, img, out_scale1))
    np.testing.assert_allclose(np.asarray(out), np.asarray(ref),
                               rtol=2e-2, atol=2e-2)

    print("KERNEL_OK")
</pallas_src>

<mosaic_0001>
module attributes {stable_mosaic.version = 11 : i64} {
  func.func @_scale2_kernel(%arg0: i32, %arg1: memref<1x9x25x256xbf16, #tpu.memory_space<vmem>>, %arg2: memref<1x25x64xf32, #tpu.memory_space<vmem>>, %arg3: memref<256x128xbf16, #tpu.memory_space<vmem>>, %arg4: memref<1x128xf32, #tpu.memory_space<vmem>>, %arg5: memref<25x192x128xbf16, #tpu.memory_space<vmem>>, %arg6: memref<1x128xf32, #tpu.memory_space<vmem>>, %arg7: memref<25x128x128xbf16, #tpu.memory_space<vmem>>, %arg8: memref<1x128xf32, #tpu.memory_space<vmem>>, %arg9: memref<25x128x128xbf16, #tpu.memory_space<vmem>>, %arg10: memref<1x128xf32, #tpu.memory_space<vmem>>, %arg11: memref<128x128xbf16, #tpu.memory_space<vmem>>, %arg12: memref<1x25x128xf32, #tpu.memory_space<vmem>>, %arg13: memref<49x192xf32, #tpu.memory_space<vmem>>) attributes {dimension_semantics = [#tpu.dimension_semantics<parallel>], iteration_bounds = array<i64: 2>, scalar_prefetch = 0 : i64, scratch_operands = 1 : i64, tpu.core_type = #tpu.core_type<tc>, window_params = [{transform_indices = @transform_0, window_bounds = array<i64: 1, 9, 25, 256>}, {transform_indices = @transform_1, window_bounds = array<i64: 1, 25, 64>}, {pipeline_mode = #tpu.pipeline_mode<synchronous>, transform_indices = @transform_2, window_bounds = array<i64: 256, 128>}, {pipeline_mode = #tpu.pipeline_mode<synchronous>, transform_indices = @transform_3, window_bounds = array<i64: 1, 128>}, {pipeline_mode = #tpu.pipeline_mode<synchronous>, transform_indices = @transform_4, window_bounds = array<i64: 25, 192, 128>}, {pipeline_mode = #tpu.pipeline_mode<synchronous>, transform_indices = @transform_5, window_bounds = array<i64: 1, 128>}, {pipeline_mode = #tpu.pipeline_mode<synchronous>, transform_indices = @transform_6, window_bounds = array<i64: 25, 128, 128>}, {pipeline_mode = #tpu.pipeline_mode<synchronous>, transform_indices = @transform_7, window_bounds = array<i64: 1, 128>}, {pipeline_mode = #tpu.pipeline_mode<synchronous>, transform_indices = @transform_8, window_bounds = array<i64: 25, 128, 128>}, {pipeline_mode = #tpu.pipeline_mode<synchronous>, transform_indices = @transform_9, window_bounds = array<i64: 1, 128>}, {pipeline_mode = #tpu.pipeline_mode<synchronous>, transform_indices = @transform_10, window_bounds = array<i64: 128, 128>}, {transform_indices = @transform_11, window_bounds = array<i64: 1, 25, 128>}]} {
    %c0 = arith.constant 0 : index
    %c0_0 = arith.constant 0 : index
    %c0_1 = arith.constant 0 : index
    %c0_2 = arith.constant 0 : index
    %0 = vector.load %arg1[%c0, %c0_0, %c0_1, %c0_2] : memref<1x9x25x256xbf16, #tpu.memory_space<vmem>>, vector<1x1x25x256xbf16>
    %1 = vector.shape_cast %0 : vector<1x1x25x256xbf16> to vector<25x256xbf16>
    %c0_3 = arith.constant 0 : index
    %c0_4 = arith.constant 0 : index
    %2 = vector.load %arg3[%c0_3, %c0_4] : memref<256x128xbf16, #tpu.memory_space<vmem>>, vector<256x128xbf16>
    %cst = arith.constant dense<0.000000e+00> : vector<25x128xf32>
    %3 = tpu.matmul %1, %2, %cst {dimension_numbers = #tpu.dot_dimension_numbers<[1], [0], [0], [1], [0, 0, 1, 1], [], []>} : vector<25x256xbf16>, vector<256x128xbf16>, vector<25x128xf32> -> vector<25x128xf32>
    %c0_5 = arith.constant 0 : index
    %c1 = arith.constant 1 : index
    %c0_6 = arith.constant 0 : index
    %c0_7 = arith.constant 0 : index
    %4 = vector.load %arg1[%c0_5, %c1, %c0_6, %c0_7] : memref<1x9x25x256xbf16, #tpu.memory_space<vmem>>, vector<1x1x25x256xbf16>
    %5 = vector.shape_cast %4 : vector<1x1x25x256xbf16> to vector<25x256xbf16>
    %c0_8 = arith.constant 0 : index
    %c0_9 = arith.constant 0 : index
    %6 = vector.load %arg3[%c0_8, %c0_9] : memref<256x128xbf16, #tpu.memory_space<vmem>>, vector<256x128xbf16>
    %cst_10 = arith.constant dense<0.000000e+00> : vector<25x128xf32>
    %7 = tpu.matmul %5, %6, %cst_10 {dimension_numbers = #tpu.dot_dimension_numbers<[1], [0], [0], [1], [0, 0, 1, 1], [], []>} : vector<25x256xbf16>, vector<256x128xbf16>, vector<25x128xf32> -> vector<25x128xf32>
    %8 = arith.maximumf %3, %7 : vector<25x128xf32>
    %c0_11 = arith.constant 0 : index
    %c2 = arith.constant 2 : index
    %c0_12 = arith.constant 0 : index
    %c0_13 = arith.constant 0 : index
    %9 = vector.load %arg1[%c0_11, %c2, %c0_12, %c0_13] : memref<1x9x25x256xbf16, #tpu.memory_space<vmem>>, vector<1x1x25x256xbf16>
    %10 = vector.shape_cast %9 : vector<1x1x25x256xbf16> to vector<25x256xbf16>
    %c0_14 = arith.constant 0 : index
    %c0_15 = arith.constant 0 : index
    %11 = vector.load %arg3[%c0_14, %c0_15] : memref<256x128xbf16, #tpu.memory_space<vmem>>, vector<256x128xbf16>
    %cst_16 = arith.constant dense<0.000000e+00> : vector<25x128xf32>
    %12 = tpu.matmul %10, %11, %cst_16 {dimension_numbers = #tpu.dot_dimension_numbers<[1], [0], [0], [1], [0, 0, 1, 1], [], []>} : vector<25x256xbf16>, vector<256x128xbf16>, vector<25x128xf32> -> vector<25x128xf32>
    %13 = arith.maximumf %8, %12 : vector<25x128xf32>
    %c0_17 = arith.constant 0 : index
    %c3 = arith.constant 3 : index
    %c0_18 = arith.constant 0 : index
    %c0_19 = arith.constant 0 : index
    %14 = vector.load %arg1[%c0_17, %c3, %c0_18, %c0_19] : memref<1x9x25x256xbf16, #tpu.memory_space<vmem>>, vector<1x1x25x256xbf16>
    %15 = vector.shape_cast %14 : vector<1x1x25x256xbf16> to vector<25x256xbf16>
    %c0_20 = arith.constant 0 : index
    %c0_21 = arith.constant 0 : index
    %16 = vector.load %arg3[%c0_20, %c0_21] : memref<256x128xbf16, #tpu.memory_space<vmem>>, vector<256x128xbf16>
    %cst_22 = arith.constant dense<0.000000e+00> : vector<25x128xf32>
    %17 = tpu.matmul %15, %16, %cst_22 {dimension_numbers = #tpu.dot_dimension_numbers<[1], [0], [0], [1], [0, 0, 1, 1], [], []>} : vector<25x256xbf16>, vector<256x128xbf16>, vector<25x128xf32> -> vector<25x128xf32>
    %18 = arith.maximumf %13, %17 : vector<25x128xf32>
    %c0_23 = arith.constant 0 : index
    %c4 = arith.constant 4 : index
    %c0_24 = arith.constant 0 : index
    %c0_25 = arith.constant 0 : index
    %19 = vector.load %arg1[%c0_23, %c4, %c0_24, %c0_25] : memref<1x9x25x256xbf16, #tpu.memory_space<vmem>>, vector<1x1x25x256xbf16>
    %20 = vector.shape_cast %19 : vector<1x1x25x256xbf16> to vector<25x256xbf16>
    %c0_26 = arith.constant 0 : index
    %c0_27 = arith.constant 0 : index
    %21 = vector.load %arg3[%c0_26, %c0_27] : memref<256x128xbf16, #tpu.memory_space<vmem>>, vector<256x128xbf16>
    %cst_28 = arith.constant dense<0.000000e+00> : vector<25x128xf32>
    %22 = tpu.matmul %20, %21, %cst_28 {dimension_numbers = #tpu.dot_dimension_numbers<[1], [0], [0], [1], [0, 0, 1, 1], [], []>} : vector<25x256xbf16>, vector<256x128xbf16>, vector<25x128xf32> -> vector<25x128xf32>
    %23 = arith.maximumf %18, %22 : vector<25x128xf32>
    %c0_29 = arith.constant 0 : index
    %c5 = arith.constant 5 : index
    %c0_30 = arith.constant 0 : index
    %c0_31 = arith.constant 0 : index
    %24 = vector.load %arg1[%c0_29, %c5, %c0_30, %c0_31] : memref<1x9x25x256xbf16, #tpu.memory_space<vmem>>, vector<1x1x25x256xbf16>
    %25 = vector.shape_cast %24 : vector<1x1x25x256xbf16> to vector<25x256xbf16>
    %c0_32 = arith.constant 0 : index
    %c0_33 = arith.constant 0 : index
    %26 = vector.load %arg3[%c0_32, %c0_33] : memref<256x128xbf16, #tpu.memory_space<vmem>>, vector<256x128xbf16>
    %cst_34 = arith.constant dense<0.000000e+00> : vector<25x128xf32>
    %27 = tpu.matmul %25, %26, %cst_34 {dimension_numbers = #tpu.dot_dimension_numbers<[1], [0], [0], [1], [0, 0, 1, 1], [], []>} : vector<25x256xbf16>, vector<256x128xbf16>, vector<25x128xf32> -> vector<25x128xf32>
    %28 = arith.maximumf %23, %27 : vector<25x128xf32>
    %c0_35 = arith.constant 0 : index
    %c6 = arith.constant 6 : index
    %c0_36 = arith.constant 0 : index
    %c0_37 = arith.constant 0 : index
    %29 = vector.load %arg1[%c0_35, %c6, %c0_36, %c0_37] : memref<1x9x25x256xbf16, #tpu.memory_space<vmem>>, vector<1x1x25x256xbf16>
    %30 = vector.shape_cast %29 : vector<1x1x25x256xbf16> to vector<25x256xbf16>
    %c0_38 = arith.constant 0 : index
    %c0_39 = arith.constant 0 : index
    %31 = vector.load %arg3[%c0_38, %c0_39] : memref<256x128xbf16, #tpu.memory_space<vmem>>, vector<256x128xbf16>
    %cst_40 = arith.constant dense<0.000000e+00> : vector<25x128xf32>
    %32 = tpu.matmul %30, %31, %cst_40 {dimension_numbers = #tpu.dot_dimension_numbers<[1], [0], [0], [1], [0, 0, 1, 1], [], []>} : vector<25x256xbf16>, vector<256x128xbf16>, vector<25x128xf32> -> vector<25x128xf32>
    %33 = arith.maximumf %28, %32 : vector<25x128xf32>
    %c0_41 = arith.constant 0 : index
    %c7 = arith.constant 7 : index
    %c0_42 = arith.constant 0 : index
    %c0_43 = arith.constant 0 : index
    %34 = vector.load %arg1[%c0_41, %c7, %c0_42, %c0_43] : memref<1x9x25x256xbf16, #tpu.memory_space<vmem>>, vector<1x1x25x256xbf16>
    %35 = vector.shape_cast %34 : vector<1x1x25x256xbf16> to vector<25x256xbf16>
    %c0_44 = arith.constant 0 : index
    %c0_45 = arith.constant 0 : index
    %36 = vector.load %arg3[%c0_44, %c0_45] : memref<256x128xbf16, #tpu.memory_space<vmem>>, vector<256x128xbf16>
    %cst_46 = arith.constant dense<0.000000e+00> : vector<25x128xf32>
    %37 = tpu.matmul %35, %36, %cst_46 {dimension_numbers = #tpu.dot_dimension_numbers<[1], [0], [0], [1], [0, 0, 1, 1], [], []>} : vector<25x256xbf16>, vector<256x128xbf16>, vector<25x128xf32> -> vector<25x128xf32>
    %38 = arith.maximumf %33, %37 : vector<25x128xf32>
    %c0_47 = arith.constant 0 : index
    %c8 = arith.constant 8 : index
    %c0_48 = arith.constant 0 : index
    %c0_49 = arith.constant 0 : index
    %39 = vector.load %arg1[%c0_47, %c8, %c0_48, %c0_49] : memref<1x9x25x256xbf16, #tpu.memory_space<vmem>>, vector<1x1x25x256xbf16>
    %40 = vector.shape_cast %39 : vector<1x1x25x256xbf16> to vector<25x256xbf16>
    %c0_50 = arith.constant 0 : index
    %c0_51 = arith.constant 0 : index
    %41 = vector.load %arg3[%c0_50, %c0_51] : memref<256x128xbf16, #tpu.memory_space<vmem>>, vector<256x128xbf16>
    %cst_52 = arith.constant dense<0.000000e+00> : vector<25x128xf32>
    %42 = tpu.matmul %40, %41, %cst_52 {dimension_numbers = #tpu.dot_dimension_numbers<[1], [0], [0], [1], [0, 0, 1, 1], [], []>} : vector<25x256xbf16>, vector<256x128xbf16>, vector<25x128xf32> -> vector<25x128xf32>
    %43 = arith.maximumf %38, %42 : vector<25x128xf32>
    %c0_53 = arith.constant 0 : index
    %c0_54 = arith.constant 0 : index
    %44 = vector.load %arg4[%c0_53, %c0_54] : memref<1x128xf32, #tpu.memory_space<vmem>>, vector<1x128xf32>
    %45 = vector.broadcast %44 : vector<1x128xf32> to vector<25x128xf32>
    %46 = arith.addf %43, %45 : vector<25x128xf32>
    %cst_55 = arith.constant 0.000000e+00 : f32
    %47 = vector.broadcast %cst_55 : f32 to vector<25x128xf32>
    %48 = arith.maximumf %46, %47 : vector<25x128xf32>
    %49 = tpu.iota {dimensions = array<i32: 0>} : vector<25x1xi32>
    %c5_i32 = arith.constant 5 : i32
    %50 = vector.broadcast %c5_i32 : i32 to vector<25x1xi32>
    %51 = arith.cmpi sge, %49, %50 : vector<25x1xi32>
    %52 = arith.extui %51 : vector<25x1xi1> to vector<25x1xi32>
    %c10_i32 = arith.constant 10 : i32
    %53 = vector.broadcast %c10_i32 : i32 to vector<25x1xi32>
    %54 = arith.cmpi sge, %49, %53 : vector<25x1xi32>
    %55 = arith.extui %54 : vector<25x1xi1> to vector<25x1xi32>
    %56 = arith.addi %52, %55 : vector<25x1xi32>
    %c15_i32 = arith.constant 15 : i32
    %57 = vector.broadcast %c15_i32 : i32 to vector<25x1xi32>
    %58 = arith.cmpi sge, %49, %57 : vector<25x1xi32>
    %59 = arith.extui %58 : vector<25x1xi1> to vector<25x1xi32>
    %60 = arith.addi %56, %59 : vector<25x1xi32>
    %c20_i32 = arith.constant 20 : i32
    %61 = vector.broadcast %c20_i32 : i32 to vector<25x1xi32>
    %62 = arith.cmpi sge, %49, %61 : vector<25x1xi32>
    %63 = arith.extui %62 : vector<25x1xi1> to vector<25x1xi32>
    %64 = arith.addi %60, %63 : vector<25x1xi32>
    %c5_i32_56 = arith.constant 5 : i32
    %65 = vector.broadcast %c5_i32_56 : i32 to vector<25x1xi32>
    %66 = arith.muli %65, %64 : vector<25x1xi32>
    %67 = arith.subi %49, %66 : vector<25x1xi32>
    %cst_57 = arith.constant 0.000000e+00 : f32
    %68 = vector.broadcast %cst_57 : f32 to vector<49x192xf32>
    %c0_58 = arith.constant 0 : index
    %c0_59 = arith.constant 0 : index
    %69 = vector.load %arg13[%c0_58, %c0_59] : memref<49x192xf32, #tpu.memory_space<vmem>>, vector<49x192xf32>
    tpu.vector_store %arg13[%c0_58, %c0_59], %68 {strides = array<i32>} : memref<49x192xf32, #tpu.memory_space<vmem>>, vector<49x192xf32>,
    %c0_60 = arith.constant 0 : index
    %c0_61 = arith.constant 0 : index
    %c0_62 = arith.constant 0 : index
    %70 = vector.load %arg2[%c0_60, %c0_61, %c0_62] : memref<1x25x64xf32, #tpu.memory_space<vmem>>, vector<1x25x64xf32>
    %71 = vector.shape_cast %70 : vector<1x25x64xf32> to vector<25x64xf32>
    %72 = tpu.concatenate %48, %71 in 1 : vector<25x128xf32>, vector<25x64xf32> -> vector<25x192xf32>
    %c12 = arith.constant 12 : index
    %c0_63 = arith.constant 0 : index
    %73 = vector.load %arg13[%c12, %c0_63] : memref<49x192xf32, #tpu.memory_space<vmem>>, vector<25x192xf32>
    tpu.vector_store %arg13[%c12, %c0_63], %72 {strides = array<i32>} : memref<49x192xf32, #tpu.memory_space<vmem>>, vector<25x192xf32>,
    %cst_64 = arith.constant 0.000000e+00 : f32
    %74 = vector.broadcast %cst_64 : f32 to vector<25x128xf32>
    %c0_65 = arith.constant 0 : index
    %c0_66 = arith.constant 0 : index
    %75 = vector.load %arg13[%c0_65, %c0_66] : memref<49x192xf32, #tpu.memory_space<vmem>>, vector<25x192xf32>
    %c2_i32 = arith.constant 2 : i32
    %76 = vector.broadcast %c2_i32 : i32 to vector<25x1xi32>
    %77 = arith.cmpi sge, %64, %76 : vector<25x1xi32>
    %c2_i32_67 = arith.constant 2 : i32
    %78 = vector.broadcast %c2_i32_67 : i32 to vector<25x1xi32>
    %79 = arith.cmpi sge, %67, %78 : vector<25x1xi32>
    %80 = arith.andi %77, %79 : vector<25x1xi1>
    %81 = arith.extui %80 : vector<25x1xi1> to vector<25x1xi32>
    %82 = arith.sitofp %81 : vector<25x1xi32> to vector<25x1xf32>
    %83 = vector.broadcast %82 : vector<25x1xf32> to vector<25x192xf32>
    %84 = arith.mulf %75, %83 : vector<25x192xf32>
    %85 = arith.truncf %84 : vector<25x192xf32> to vector<25x192xbf16>
    %c0_68 = arith.constant 0 : index
    %c0_69 = arith.constant 0 : index
    %c0_70 = arith.constant 0 : index
    %86 = vector.load %arg5[%c0_68, %c0_69, %c0_70] : memref<25x192x128xbf16, #tpu.memory_space<vmem>>, vector<1x192x128xbf16>
    %87 = vector.shape_cast %86 : vector<1x192x128xbf16> to vector<192x128xbf16>
    %cst_71 = arith.constant dense<0.000000e+00> : vector<25x128xf32>
    %88 = tpu.matmul %85, %87, %cst_71 {dimension_numbers = #tpu.dot_dimension_numbers<[1], [0], [0], [1], [0, 0, 1, 1], [], []>} : vector<25x192xbf16>, vector<192x128xbf16>, vector<25x128xf32> -> vector<25x128xf32>
    %89 = arith.addf %74, %88 : vector<25x128xf32>
    %c1_72 = arith.constant 1 : index
    %c0_73 = arith.constant 0 : index
    %90 = vector.load %arg13[%c1_72, %c0_73] : memref<49x192xf32, #tpu.memory_space<vmem>>, vector<25x192xf32>
    %c2_i32_74 = arith.constant 2 : i32
    %91 = vector.broadcast %c2_i32_74 : i32 to vector<25x1xi32>
    %92 = arith.cmpi sge, %64, %91 : vector<25x1xi32>
    %c1_i32 = arith.constant 1 : i32
    %93 = vector.broadcast %c1_i32 : i32 to vector<25x1xi32>
    %94 = arith.cmpi sge, %67, %93 : vector<25x1xi32>
    %95 = arith.andi %92, %94 : vector<25x1xi1>
    %96 = arith.extui %95 : vector<25x1xi1> to vector<25x1xi32>
    %97 = arith.sitofp %96 : vector<25x1xi32> to vector<25x1xf32>
    %98 = vector.broadcast %97 : vector<25x1xf32> to vector<25x192xf32>
    %99 = arith.mulf %90, %98 : vector<25x192xf32>
    %100 = arith.truncf %99 : vector<25x192xf32> to vector<25x192xbf16>
    %c1_75 = arith.constant 1 : index
    %c0_76 = arith.constant 0 : index
    %c0_77 = arith.constant 0 : index
    %101 = vector.load %arg5[%c1_75, %c0_76, %c0_77] : memref<25x192x128xbf16, #tpu.memory_space<vmem>>, vector<1x192x128xbf16>
    %102 = vector.shape_cast %101 : vector<1x192x128xbf16> to vector<192x128xbf16>
    %cst_78 = arith.constant dense<0.000000e+00> : vector<25x128xf32>
    %103 = tpu.matmul %100, %102, %cst_78 {dimension_numbers = #tpu.dot_dimension_numbers<[1], [0], [0], [1], [0, 0, 1, 1], [], []>} : vector<25x192xbf16>, vector<192x128xbf16>, vector<25x128xf32> -> vector<25x128xf32>
    %104 = arith.addf %89, %103 : vector<25x128xf32>
    %c2_79 = arith.constant 2 : index
    %c0_80 = arith.constant 0 : index
    %105 = vector.load %arg13[%c2_79, %c0_80] : memref<49x192xf32, #tpu.memory_space<vmem>>, vector<25x192xf32>
    %c2_i32_81 = arith.constant 2 : i32
    %106 = vector.broadcast %c2_i32_81 : i32 to vector<25x1xi32>
    %107 = arith.cmpi sge, %64, %106 : vector<25x1xi32>
    %108 = arith.extui %107 : vector<25x1xi1> to vector<25x1xi32>
    %109 = arith.sitofp %108 : vector<25x1xi32> to vector<25x1xf32>
    %110 = vector.broadcast %109 : vector<25x1xf32> to vector<25x192xf32>
    %111 = arith.mulf %105, %110 : vector<25x192xf32>
    %112 = arith.truncf %111 : vector<25x192xf32> to vector<25x192xbf16>
    %c2_82 = arith.constant 2 : index
    %c0_83 = arith.constant 0 : index
    %c0_84 = arith.constant 0 : index
    %113 = vector.load %arg5[%c2_82, %c0_83, %c0_84] : memref<25x192x128xbf16, #tpu.memory_space<vmem>>, vector<1x192x128xbf16>
    %114 = vector.shape_cast %113 : vector<1x192x128xbf16> to vector<192x128xbf16>
    %cst_85 = arith.constant dense<0.000000e+00> : vector<25x128xf32>
    %115 = tpu.matmul %112, %114, %cst_85 {dimension_numbers = #tpu.dot_dimension_numbers<[1], [0], [0], [1], [0, 0, 1, 1], [], []>} : vector<25x192xbf16>, vector<192x128xbf16>, vector<25x128xf32> -> vector<25x128xf32>
    %116 = arith.addf %104, %115 : vector<25x128xf32>
    %c3_86 = arith.constant 3 : index
    %c0_87 = arith.constant 0 : index
    %117 = vector.load %arg13[%c3_86, %c0_87] : memref<49x192xf32, #tpu.memory_space<vmem>>, vector<25x192xf32>
    %c2_i32_88 = arith.constant 2 : i32
    %118 = vector.broadcast %c2_i32_88 : i32 to vector<25x1xi32>
    %119 = arith.cmpi sge, %64, %118 : vector<25x1xi32>
    %c3_i32 = arith.constant 3 : i32
    %120 = vector.broadcast %c3_i32 : i32 to vector<25x1xi32>
    %121 = arith.cmpi sle, %67, %120 : vector<25x1xi32>
    %122 = arith.andi %119, %121 : vector<25x1xi1>
    %123 = arith.extui %122 : vector<25x1xi1> to vector<25x1xi32>
    %124 = arith.sitofp %123 : vector<25x1xi32> to vector<25x1xf32>
    %125 = vector.broadcast %124 : vector<25x1xf32> to vector<25x192xf32>
    %126 = arith.mulf %117, %125 : vector<25x192xf32>
    %127 = arith.truncf %126 : vector<25x192xf32> to vector<25x192xbf16>
    %c3_89 = arith.constant 3 : index
    %c0_90 = arith.constant 0 : index
    %c0_91 = arith.constant 0 : index
    %128 = vector.load %arg5[%c3_89, %c0_90, %c0_91] : memref<25x192x128xbf16, #tpu.memory_space<vmem>>, vector<1x192x128xbf16>
    %129 = vector.shape_cast %128 : vector<1x192x128xbf16> to vector<192x128xbf16>
    %cst_92 = arith.constant dense<0.000000e+00> : vector<25x128xf32>
    %130 = tpu.matmul %127, %129, %cst_92 {dimension_numbers = #tpu.dot_dimension_numbers<[1], [0], [0], [1], [0, 0, 1, 1], [], []>} : vector<25x192xbf16>, vector<192x128xbf16>, vector<25x128xf32> -> vector<25x128xf32>
    %131 = arith.addf %116, %130 : vector<25x128xf32>
    %c4_93 = arith.constant 4 : index
    %c0_94 = arith.constant 0 : index
    %132 = vector.load %arg13[%c4_93, %c0_94] : memref<49x192xf32, #tpu.memory_space<vmem>>, vector<25x192xf32>
    %c2_i32_95 = arith.constant 2 : i32
    %133 = vector.broadcast %c2_i32_95 : i32 to vector<25x1xi32>
    %134 = arith.cmpi sge, %64, %133 : vector<25x1xi32>
    %c2_i32_96 = arith.constant 2 : i32
    %135 = vector.broadcast %c2_i32_96 : i32 to vector<25x1xi32>
    %136 = arith.cmpi sle, %67, %135 : vector<25x1xi32>
    %137 = arith.andi %134, %136 : vector<25x1xi1>
    %138 = arith.extui %137 : vector<25x1xi1> to vector<25x1xi32>
    %139 = arith.sitofp %138 : vector<25x1xi32> to vector<25x1xf32>
    %140 = vector.broadcast %139 : vector<25x1xf32> to vector<25x192xf32>
    %141 = arith.mulf %132, %140 : vector<25x192xf32>
    %142 = arith.truncf %141 : vector<25x192xf32> to vector<25x192xbf16>
    %c4_97 = arith.constant 4 : index
    %c0_98 = arith.constant 0 : index
    %c0_99 = arith.constant 0 : index
    %143 = vector.load %arg5[%c4_97, %c0_98, %c0_99] : memref<25x192x128xbf16, #tpu.memory_space<vmem>>, vector<1x192x128xbf16>
    %144 = vector.shape_cast %143 : vector<1x192x128xbf16> to vector<192x128xbf16>
    %cst_100 = arith.constant dense<0.000000e+00> : vector<25x128xf32>
    %145 = tpu.matmul %142, %144, %cst_100 {dimension_numbers = #tpu.dot_dimension_numbers<[1], [0], [0], [1], [0, 0, 1, 1], [], []>} : vector<25x192xbf16>, vector<192x128xbf16>, vector<25x128xf32> -> vector<25x128xf32>
    %146 = arith.addf %131, %145 : vector<25x128xf32>
    %c5_101 = arith.constant 5 : index
    %c0_102 = arith.constant 0 : index
    %147 = vector.load %arg13[%c5_101, %c0_102] : memref<49x192xf32, #tpu.memory_space<vmem>>, vector<25x192xf32>
    %c1_i32_103 = arith.constant 1 : i32
    %148 = vector.broadcast %c1_i32_103 : i32 to vector<25x1xi32>
    %149 = arith.cmpi sge, %64, %148 : vector<25x1xi32>
    %c2_i32_104 = arith.constant 2 : i32
    %150 = vector.broadcast %c2_i32_104 : i32 to vector<25x1xi32>
    %151 = arith.cmpi sge, %67, %150 : vector<25x1xi32>
    %152 = arith.andi %149, %151 : vector<25x1xi1>
    %153 = arith.extui %152 : vector<25x1xi1> to vector<25x1xi32>
    %154 = arith.sitofp %153 : vector<25x1xi32> to vector<25x1xf32>
    %155 = vector.broadcast %154 : vector<25x1xf32> to vector<25x192xf32>
    %156 = arith.mulf %147, %155 : vector<25x192xf32>
    %157 = arith.truncf %156 : vector<25x192xf32> to vector<25x192xbf16>
    %c5_105 = arith.constant 5 : index
    %c0_106 = arith.constant 0 : index
    %c0_107 = arith.constant 0 : index
    %158 = vector.load %arg5[%c5_105, %c0_106, %c0_107] : memref<25x192x128xbf16, #tpu.memory_space<vmem>>, vector<1x192x128xbf16>
    %159 = vector.shape_cast %158 : vector<1x192x128xbf16> to vector<192x128xbf16>
    %cst_108 = arith.constant dense<0.000000e+00> : vector<25x128xf32>
    %160 = tpu.matmul %157, %159, %cst_108 {dimension_numbers = #tpu.dot_dimension_numbers<[1], [0], [0], [1], [0, 0, 1, 1], [], []>} : vector<25x192xbf16>, vector<192x128xbf16>, vector<25x128xf32> -> vector<25x128xf32>
    %161 = arith.addf %146, %160 : vector<25x128xf32>
    %c6_109 = arith.constant 6 : index
    %c0_110 = arith.constant 0 : index
    %162 = vector.load %arg13[%c6_109, %c0_110] : memref<49x192xf32, #tpu.memory_space<vmem>>, vector<25x192xf32>
    %c1_i32_111 = arith.constant 1 : i32
    %163 = vector.broadcast %c1_i32_111 : i32 to vector<25x1xi32>
    %164 = arith.cmpi sge, %64, %163 : vector<25x1xi32>
    %c1_i32_112 = arith.constant 1 : i32
    %165 = vector.broadcast %c1_i32_112 : i32 to vector<25x1xi32>
    %166 = arith.cmpi sge, %67, %165 : vector<25x1xi32>
    %167 = arith.andi %164, %166 : vector<25x1xi1>
    %168 = arith.extui %167 : vector<25x1xi1> to vector<25x1xi32>
    %169 = arith.sitofp %168 : vector<25x1xi32> to vector<25x1xf32>
    %170 = vector.broadcast %169 : vector<25x1xf32> to vector<25x192xf32>
    %171 = arith.mulf %162, %170 : vector<25x192xf32>
    %172 = arith.truncf %171 : vector<25x192xf32> to vector<25x192xbf16>
    %c6_113 = arith.constant 6 : index
    %c0_114 = arith.constant 0 : index
    %c0_115 = arith.constant 0 : index
    %173 = vector.load %arg5[%c6_113, %c0_114, %c0_115] : memref<25x192x128xbf16, #tpu.memory_space<vmem>>, vector<1x192x128xbf16>
    %174 = vector.shape_cast %173 : vector<1x192x128xbf16> to vector<192x128xbf16>
    %cst_116 = arith.constant dense<0.000000e+00> : vector<25x128xf32>
    %175 = tpu.matmul %172, %174, %cst_116 {dimension_numbers = #tpu.dot_dimension_numbers<[1], [0], [0], [1], [0, 0, 1, 1], [], []>} : vector<25x192xbf16>, vector<192x128xbf16>, vector<25x128xf32> -> vector<25x128xf32>
    %176 = arith.addf %161, %175 : vector<25x128xf32>
    %c7_117 = arith.constant 7 : index
    %c0_118 = arith.constant 0 : index
    %177 = vector.load %arg13[%c7_117, %c0_118] : memref<49x192xf32, #tpu.memory_space<vmem>>, vector<25x192xf32>
    %c1_i32_119 = arith.constant 1 : i32
    %178 = vector.broadcast %c1_i32_119 : i32 to vector<25x1xi32>
    %179 = arith.cmpi sge, %64, %178 : vector<25x1xi32>
    %180 = arith.extui %179 : vector<25x1xi1> to vector<25x1xi32>
    %181 = arith.sitofp %180 : vector<25x1xi32> to vector<25x1xf32>
    %182 = vector.broadcast %181 : vector<25x1xf32> to vector<25x192xf32>
    %183 = arith.mulf %177, %182 : vector<25x192xf32>
    %184 = arith.truncf %183 : vector<25x192xf32> to vector<25x192xbf16>
    %c7_120 = arith.constant 7 : index
    %c0_121 = arith.constant 0 : index
    %c0_122 = arith.constant 0 : index
    %185 = vector.load %arg5[%c7_120, %c0_121, %c0_122] : memref<25x192x128xbf16, #tpu.memory_space<vmem>>, vector<1x192x128xbf16>
    %186 = vector.shape_cast %185 : vector<1x192x128xbf16> to vector<192x128xbf16>
    %cst_123 = arith.constant dense<0.000000e+00> : vector<25x128xf32>
    %187 = tpu.matmul %184, %186, %cst_123 {dimension_numbers = #tpu.dot_dimension_numbers<[1], [0], [0], [1], [0, 0, 1, 1], [], []>} : vector<25x192xbf16>, vector<192x128xbf16>, vector<25x128xf32> -> vector<25x128xf32>
    %188 = arith.addf %176, %187 : vector<25x128xf32>
    %c8_124 = arith.constant 8 : index
    %c0_125 = arith.constant 0 : index
    %189 = vector.load %arg13[%c8_124, %c0_125] : memref<49x192xf32, #tpu.memory_space<vmem>>, vector<25x192xf32>
    %c1_i32_126 = arith.constant 1 : i32
    %190 = vector.broadcast %c1_i32_126 : i32 to vector<25x1xi32>
    %191 = arith.cmpi sge, %64, %190 : vector<25x1xi32>
    %c3_i32_127 = arith.constant 3 : i32
    %192 = vector.broadcast %c3_i32_127 : i32 to vector<25x1xi32>
    %193 = arith.cmpi sle, %67, %192 : vector<25x1xi32>
    %194 = arith.andi %191, %193 : vector<25x1xi1>
    %195 = arith.extui %194 : vector<25x1xi1> to vector<25x1xi32>
    %196 = arith.sitofp %195 : vector<25x1xi32> to vector<25x1xf32>
    %197 = vector.broadcast %196 : vector<25x1xf32> to vector<25x192xf32>
    %198 = arith.mulf %189, %197 : vector<25x192xf32>
    %199 = arith.truncf %198 : vector<25x192xf32> to vector<25x192xbf16>
    %c8_128 = arith.constant 8 : index
    %c0_129 = arith.constant 0 : index
    %c0_130 = arith.constant 0 : index
    %200 = vector.load %arg5[%c8_128, %c0_129, %c0_130] : memref<25x192x128xbf16, #tpu.memory_space<vmem>>, vector<1x192x128xbf16>
    %201 = vector.shape_cast %200 : vector<1x192x128xbf16> to vector<192x128xbf16>
    %cst_131 = arith.constant dense<0.000000e+00> : vector<25x128xf32>
    %202 = tpu.matmul %199, %201, %cst_131 {dimension_numbers = #tpu.dot_dimension_numbers<[1], [0], [0], [1], [0, 0, 1, 1], [], []>} : vector<25x192xbf16>, vector<192x128xbf16>, vector<25x128xf32> -> vector<25x128xf32>
    %203 = arith.addf %188, %202 : vector<25x128xf32>
    %c9 = arith.constant 9 : index
    %c0_132 = arith.constant 0 : index
    %204 = vector.load %arg13[%c9, %c0_132] : memref<49x192xf32, #tpu.memory_space<vmem>>, vector<25x192xf32>
    %c1_i32_133 = arith.constant 1 : i32
    %205 = vector.broadcast %c1_i32_133 : i32 to vector<25x1xi32>
    %206 = arith.cmpi sge, %64, %205 : vector<25x1xi32>
    %c2_i32_134 = arith.constant 2 : i32
    %207 = vector.broadcast %c2_i32_134 : i32 to vector<25x1xi32>
    %208 = arith.cmpi sle, %67, %207 : vector<25x1xi32>
    %209 = arith.andi %206, %208 : vector<25x1xi1>
    %210 = arith.extui %209 : vector<25x1xi1> to vector<25x1xi32>
    %211 = arith.sitofp %210 : vector<25x1xi32> to vector<25x1xf32>
    %212 = vector.broadcast %211 : vector<25x1xf32> to vector<25x192xf32>
    %213 = arith.mulf %204, %212 : vector<25x192xf32>
    %214 = arith.truncf %213 : vector<25x192xf32> to vector<25x192xbf16>
    %c9_135 = arith.constant 9 : index
    %c0_136 = arith.constant 0 : index
    %c0_137 = arith.constant 0 : index
    %215 = vector.load %arg5[%c9_135, %c0_136, %c0_137] : memref<25x192x128xbf16, #tpu.memory_space<vmem>>, vector<1x192x128xbf16>
    %216 = vector.shape_cast %215 : vector<1x192x128xbf16> to vector<192x128xbf16>
    %cst_138 = arith.constant dense<0.000000e+00> : vector<25x128xf32>
    %217 = tpu.matmul %214, %216, %cst_138 {dimension_numbers = #tpu.dot_dimension_numbers<[1], [0], [0], [1], [0, 0, 1, 1], [], []>} : vector<25x192xbf16>, vector<192x128xbf16>, vector<25x128xf32> -> vector<25x128xf32>
    %218 = arith.addf %203, %217 : vector<25x128xf32>
    %c10 = arith.constant 10 : index
    %c0_139 = arith.constant 0 : index
    %219 = vector.load %arg13[%c10, %c0_139] : memref<49x192xf32, #tpu.memory_space<vmem>>, vector<25x192xf32>
    %c2_i32_140 = arith.constant 2 : i32
    %220 = vector.broadcast %c2_i32_140 : i32 to vector<25x1xi32>
    %221 = arith.cmpi sge, %67, %220 : vector<25x1xi32>
    %222 = arith.extui %221 : vector<25x1xi1> to vector<25x1xi32>
    %223 = arith.sitofp %222 : vector<25x1xi32> to vector<25x1xf32>
    %224 = vector.broadcast %223 : vector<25x1xf32> to vector<25x192xf32>
    %225 = arith.mulf %219, %224 : vector<25x192xf32>
    %226 = arith.truncf %225 : vector<25x192xf32> to vector<25x192xbf16>
    %c10_141 = arith.constant 10 : index
    %c0_142 = arith.constant 0 : index
    %c0_143 = arith.constant 0 : index
    %227 = vector.load %arg5[%c10_141, %c0_142, %c0_143] : memref<25x192x128xbf16, #tpu.memory_space<vmem>>, vector<1x192x128xbf16>
    %228 = vector.shape_cast %227 : vector<1x192x128xbf16> to vector<192x128xbf16>
    %cst_144 = arith.constant dense<0.000000e+00> : vector<25x128xf32>
    %229 = tpu.matmul %226, %228, %cst_144 {dimension_numbers = #tpu.dot_dimension_numbers<[1], [0], [0], [1], [0, 0, 1, 1], [], []>} : vector<25x192xbf16>, vector<192x128xbf16>, vector<25x128xf32> -> vector<25x128xf32>
    %230 = arith.addf %218, %229 : vector<25x128xf32>
    %c11 = arith.constant 11 : index
    %c0_145 = arith.constant 0 : index
    %231 = vector.load %arg13[%c11, %c0_145] : memref<49x192xf32, #tpu.memory_space<vmem>>, vector<25x192xf32>
    %c1_i32_146 = arith.constant 1 : i32
    %232 = vector.broadcast %c1_i32_146 : i32 to vector<25x1xi32>
    %233 = arith.cmpi sge, %67, %232 : vector<25x1xi32>
    %234 = arith.extui %233 : vector<25x1xi1> to vector<25x1xi32>
    %235 = arith.sitofp %234 : vector<25x1xi32> to vector<25x1xf32>
    %236 = vector.broadcast %235 : vector<25x1xf32> to vector<25x192xf32>
    %237 = arith.mulf %231, %236 : vector<25x192xf32>
    %238 = arith.truncf %237 : vector<25x192xf32> to vector<25x192xbf16>
    %c11_147 = arith.constant 11 : index
    %c0_148 = arith.constant 0 : index
    %c0_149 = arith.constant 0 : index
    %239 = vector.load %arg5[%c11_147, %c0_148, %c0_149] : memref<25x192x128xbf16, #tpu.memory_space<vmem>>, vector<1x192x128xbf16>
    %240 = vector.shape_cast %239 : vector<1x192x128xbf16> to vector<192x128xbf16>
    %cst_150 = arith.constant dense<0.000000e+00> : vector<25x128xf32>
    %241 = tpu.matmul %238, %240, %cst_150 {dimension_numbers = #tpu.dot_dimension_numbers<[1], [0], [0], [1], [0, 0, 1, 1], [], []>} : vector<25x192xbf16>, vector<192x128xbf16>, vector<25x128xf32> -> vector<25x128xf32>
    %242 = arith.addf %230, %241 : vector<25x128xf32>
    %c12_151 = arith.constant 12 : index
    %c0_152 = arith.constant 0 : index
    %243 = vector.load %arg13[%c12_151, %c0_152] : memref<49x192xf32, #tpu.memory_space<vmem>>, vector<25x192xf32>
    %244 = arith.truncf %243 : vector<25x192xf32> to vector<25x192xbf16>
    %c12_153 = arith.constant 12 : index
    %c0_154 = arith.constant 0 : index
    %c0_155 = arith.constant 0 : index
    %245 = vector.load %arg5[%c12_153, %c0_154, %c0_155] : memref<25x192x128xbf16, #tpu.memory_space<vmem>>, vector<1x192x128xbf16>
    %246 = vector.shape_cast %245 : vector<1x192x128xbf16> to vector<192x128xbf16>
    %cst_156 = arith.constant dense<0.000000e+00> : vector<25x128xf32>
    %247 = tpu.matmul %244, %246, %cst_156 {dimension_numbers = #tpu.dot_dimension_numbers<[1], [0], [0], [1], [0, 0, 1, 1], [], []>} : vector<25x192xbf16>, vector<192x128xbf16>, vector<25x128xf32> -> vector<25x128xf32>
    %248 = arith.addf %242, %247 : vector<25x128xf32>
    %c13 = arith.constant 13 : index
    %c0_157 = arith.constant 0 : index
    %249 = vector.load %arg13[%c13, %c0_157] : memref<49x192xf32, #tpu.memory_space<vmem>>, vector<25x192xf32>
    %c3_i32_158 = arith.constant 3 : i32
    %250 = vector.broadcast %c3_i32_158 : i32 to vector<25x1xi32>
    %251 = arith.cmpi sle, %67, %250 : vector<25x1xi32>
    %252 = arith.extui %251 : vector<25x1xi1> to vector<25x1xi32>
    %253 = arith.sitofp %252 : vector<25x1xi32> to vector<25x1xf32>
    %254 = vector.broadcast %253 : vector<25x1xf32> to vector<25x192xf32>
    %255 = arith.mulf %249, %254 : vector<25x192xf32>
    %256 = arith.truncf %255 : vector<25x192xf32> to vector<25x192xbf16>
    %c13_159 = arith.constant 13 : index
    %c0_160 = arith.constant 0 : index
    %c0_161 = arith.constant 0 : index
    %257 = vector.load %arg5[%c13_159, %c0_160, %c0_161] : memref<25x192x128xbf16, #tpu.memory_space<vmem>>, vector<1x192x128xbf16>
    %258 = vector.shape_cast %257 : vector<1x192x128xbf16> to vector<192x128xbf16>
    %cst_162 = arith.constant dense<0.000000e+00> : vector<25x128xf32>
    %259 = tpu.matmul %256, %258, %cst_162 {dimension_numbers = #tpu.dot_dimension_numbers<[1], [0], [0], [1], [0, 0, 1, 1], [], []>} : vector<25x192xbf16>, vector<192x128xbf16>, vector<25x128xf32> -> vector<25x128xf32>
    %260 = arith.addf %248, %259 : vector<25x128xf32>
    %c14 = arith.constant 14 : index
    %c0_163 = arith.constant 0 : index
    %261 = vector.load %arg13[%c14, %c0_163] : memref<49x192xf32, #tpu.memory_space<vmem>>, vector<25x192xf32>
    %c2_i32_164 = arith.constant 2 : i32
    %262 = vector.broadcast %c2_i32_164 : i32 to vector<25x1xi32>
    %263 = arith.cmpi sle, %67, %262 : vector<25x1xi32>
    %264 = arith.extui %263 : vector<25x1xi1> to vector<25x1xi32>
    %265 = arith.sitofp %264 : vector<25x1xi32> to vector<25x1xf32>
    %266 = vector.broadcast %265 : vector<25x1xf32> to vector<25x192xf32>
    %267 = arith.mulf %261, %266 : vector<25x192xf32>
    %268 = arith.truncf %267 : vector<25x192xf32> to vector<25x192xbf16>
    %c14_165 = arith.constant 14 : index
    %c0_166 = arith.constant 0 : index
    %c0_167 = arith.constant 0 : index
    %269 = vector.load %arg5[%c14_165, %c0_166, %c0_167] : memref<25x192x128xbf16, #tpu.memory_space<vmem>>, vector<1x192x128xbf16>
    %270 = vector.shape_cast %269 : vector<1x192x128xbf16> to vector<192x128xbf16>
    %cst_168 = arith.constant dense<0.000000e+00> : vector<25x128xf32>
    %271 = tpu.matmul %268, %270, %cst_168 {dimension_numbers = #tpu.dot_dimension_numbers<[1], [0], [0], [1], [0, 0, 1, 1], [], []>} : vector<25x192xbf16>, vector<192x128xbf16>, vector<25x128xf32> -> vector<25x128xf32>
    %272 = arith.addf %260, %271 : vector<25x128xf32>
    %c15 = arith.constant 15 : index
    %c0_169 = arith.constant 0 : index
    %273 = vector.load %arg13[%c15, %c0_169] : memref<49x192xf32, #tpu.memory_space<vmem>>, vector<25x192xf32>
    %c3_i32_170 = arith.constant 3 : i32
    %274 = vector.broadcast %c3_i32_170 : i32 to vector<25x1xi32>
    %275 = arith.cmpi sle, %64, %274 : vector<25x1xi32>
    %c2_i32_171 = arith.constant 2 : i32
    %276 = vector.broadcast %c2_i32_171 : i32 to vector<25x1xi32>
    %277 = arith.cmpi sge, %67, %276 : vector<25x1xi32>
    %278 = arith.andi %275, %277 : vector<25x1xi1>
    %279 = arith.extui %278 : vector<25x1xi1> to vector<25x1xi32>
    %280 = arith.sitofp %279 : vector<25x1xi32> to vector<25x1xf32>
    %281 = vector.broadcast %280 : vector<25x1xf32> to vector<25x192xf32>
    %282 = arith.mulf %273, %281 : vector<25x192xf32>
    %283 = arith.truncf %282 : vector<25x192xf32> to vector<25x192xbf16>
    %c15_172 = arith.constant 15 : index
    %c0_173 = arith.constant 0 : index
    %c0_174 = arith.constant 0 : index
    %284 = vector.load %arg5[%c15_172, %c0_173, %c0_174] : memref<25x192x128xbf16, #tpu.memory_space<vmem>>, vector<1x192x128xbf16>
    %285 = vector.shape_cast %284 : vector<1x192x128xbf16> to vector<192x128xbf16>
    %cst_175 = arith.constant dense<0.000000e+00> : vector<25x128xf32>
    %286 = tpu.matmul %283, %285, %cst_175 {dimension_numbers = #tpu.dot_dimension_numbers<[1], [0], [0], [1], [0, 0, 1, 1], [], []>} : vector<25x192xbf16>, vector<192x128xbf16>, vector<25x128xf32> -> vector<25x128xf32>
    %287 = arith.addf %272, %286 : vector<25x128xf32>
    %c16 = arith.constant 16 : index
    %c0_176 = arith.constant 0 : index
    %288 = vector.load %arg13[%c16, %c0_176] : memref<49x192xf32, #tpu.memory_space<vmem>>, vector<25x192xf32>
    %c3_i32_177 = arith.constant 3 : i32
    %289 = vector.broadcast %c3_i32_177 : i32 to vector<25x1xi32>
    %290 = arith.cmpi sle, %64, %289 : vector<25x1xi32>
    %c1_i32_178 = arith.constant 1 : i32
    %291 = vector.broadcast %c1_i32_178 : i32 to vector<25x1xi32>
    %292 = arith.cmpi sge, %67, %291 : vector<25x1xi32>
    %293 = arith.andi %290, %292 : vector<25x1xi1>
    %294 = arith.extui %293 : vector<25x1xi1> to vector<25x1xi32>
    %295 = arith.sitofp %294 : vector<25x1xi32> to vector<25x1xf32>
    %296 = vector.broadcast %295 : vector<25x1xf32> to vector<25x192xf32>
    %297 = arith.mulf %288, %296 : vector<25x192xf32>
    %298 = arith.truncf %297 : vector<25x192xf32> to vector<25x192xbf16>
    %c16_179 = arith.constant 16 : index
    %c0_180 = arith.constant 0 : index
    %c0_181 = arith.constant 0 : index
    %299 = vector.load %arg5[%c16_179, %c0_180, %c0_181] : memref<25x192x128xbf16, #tpu.memory_space<vmem>>, vector<1x192x128xbf16>
    %300 = vector.shape_cast %299 : vector<1x192x128xbf16> to vector<192x128xbf16>
    %cst_182 = arith.constant dense<0.000000e+00> : vector<25x128xf32>
    %301 = tpu.matmul %298, %300, %cst_182 {dimension_numbers = #tpu.dot_dimension_numbers<[1], [0], [0], [1], [0, 0, 1, 1], [], []>} : vector<25x192xbf16>, vector<192x128xbf16>, vector<25x128xf32> -> vector<25x128xf32>
    %302 = arith.addf %287, %301 : vector<25x128xf32>
    %c17 = arith.constant 17 : index
    %c0_183 = arith.constant 0 : index
    %303 = vector.load %arg13[%c17, %c0_183] : memref<49x192xf32, #tpu.memory_space<vmem>>, vector<25x192xf32>
    %c3_i32_184 = arith.constant 3 : i32
    %304 = vector.broadcast %c3_i32_184 : i32 to vector<25x1xi32>
    %305 = arith.cmpi sle, %64, %304 : vector<25x1xi32>
    %306 = arith.extui %305 : vector<25x1xi1> to vector<25x1xi32>
    %307 = arith.sitofp %306 : vector<25x1xi32> to vector<25x1xf32>
    %308 = vector.broadcast %307 : vector<25x1xf32> to vector<25x192xf32>
    %309 = arith.mulf %303, %308 : vector<25x192xf32>
    %310 = arith.truncf %309 : vector<25x192xf32> to vector<25x192xbf16>
    %c17_185 = arith.constant 17 : index
    %c0_186 = arith.constant 0 : index
    %c0_187 = arith.constant 0 : index
    %311 = vector.load %arg5[%c17_185, %c0_186, %c0_187] : memref<25x192x128xbf16, #tpu.memory_space<vmem>>, vector<1x192x128xbf16>
    %312 = vector.shape_cast %311 : vector<1x192x128xbf16> to vector<192x128xbf16>
    %cst_188 = arith.constant dense<0.000000e+00> : vector<25x128xf32>
    %313 = tpu.matmul %310, %312, %cst_188 {dimension_numbers = #tpu.dot_dimension_numbers<[1], [0], [0], [1], [0, 0, 1, 1], [], []>} : vector<25x192xbf16>, vector<192x128xbf16>, vector<25x128xf32> -> vector<25x128xf32>
    %314 = arith.addf %302, %313 : vector<25x128xf32>
    %c18 = arith.constant 18 : index
    %c0_189 = arith.constant 0 : index
    %315 = vector.load %arg13[%c18, %c0_189] : memref<49x192xf32, #tpu.memory_space<vmem>>, vector<25x192xf32>
    %c3_i32_190 = arith.constant 3 : i32
    %316 = vector.broadcast %c3_i32_190 : i32 to vector<25x1xi32>
    %317 = arith.cmpi sle, %64, %316 : vector<25x1xi32>
    %c3_i32_191 = arith.constant 3 : i32
    %318 = vector.broadcast %c3_i32_191 : i32 to vector<25x1xi32>
    %319 = arith.cmpi sle, %67, %318 : vector<25x1xi32>
    %320 = arith.andi %317, %319 : vector<25x1xi1>
    %321 = arith.extui %320 : vector<25x1xi1> to vector<25x1xi32>
    %322 = arith.sitofp %321 : vector<25x1xi32> to vector<25x1xf32>
    %323 = vector.broadcast %322 : vector<25x1xf32> to vector<25x192xf32>
    %324 = arith.mulf %315, %323 : vector<25x192xf32>
    %325 = arith.truncf %324 : vector<25x192xf32> to vector<25x192xbf16>
    %c18_192 = arith.constant 18 : index
    %c0_193 = arith.constant 0 : index
    %c0_194 = arith.constant 0 : index
    %326 = vector.load %arg5[%c18_192, %c0_193, %c0_194] : memref<25x192x128xbf16, #tpu.memory_space<vmem>>, vector<1x192x128xbf16>
    %327 = vector.shape_cast %326 : vector<1x192x128xbf16> to vector<192x128xbf16>
    %cst_195 = arith.constant dense<0.000000e+00> : vector<25x128xf32>
    %328 = tpu.matmul %325, %327, %cst_195 {dimension_numbers = #tpu.dot_dimension_numbers<[1], [0], [0], [1], [0, 0, 1, 1], [], []>} : vector<25x192xbf16>, vector<192x128xbf16>, vector<25x128xf32> -> vector<25x128xf32>
    %329 = arith.addf %314, %328 : vector<25x128xf32>
    %c19 = arith.constant 19 : index
    %c0_196 = arith.constant 0 : index
    %330 = vector.load %arg13[%c19, %c0_196] : memref<49x192xf32, #tpu.memory_space<vmem>>, vector<25x192xf32>
    %c3_i32_197 = arith.constant 3 : i32
    %331 = vector.broadcast %c3_i32_197 : i32 to vector<25x1xi32>
    %332 = arith.cmpi sle, %64, %331 : vector<25x1xi32>
    %c2_i32_198 = arith.constant 2 : i32
    %333 = vector.broadcast %c2_i32_198 : i32 to vector<25x1xi32>
    %334 = arith.cmpi sle, %67, %333 : vector<25x1xi32>
    %335 = arith.andi %332, %334 : vector<25x1xi1>
    %336 = arith.extui %335 : vector<25x1xi1> to vector<25x1xi32>
    %337 = arith.sitofp %336 : vector<25x1xi32> to vector<25x1xf32>
    %338 = vector.broadcast %337 : vector<25x1xf32> to vector<25x192xf32>
    %339 = arith.mulf %330, %338 : vector<25x192xf32>
    %340 = arith.truncf %339 : vector<25x192xf32> to vector<25x192xbf16>
    %c19_199 = arith.constant 19 : index
    %c0_200 = arith.constant 0 : index
    %c0_201 = arith.constant 0 : index
    %341 = vector.load %arg5[%c19_199, %c0_200, %c0_201] : memref<25x192x128xbf16, #tpu.memory_space<vmem>>, vector<1x192x128xbf16>
    %342 = vector.shape_cast %341 : vector<1x192x128xbf16> to vector<192x128xbf16>
    %cst_202 = arith.constant dense<0.000000e+00> : vector<25x128xf32>
    %343 = tpu.matmul %340, %342, %cst_202 {dimension_numbers = #tpu.dot_dimension_numbers<[1], [0], [0], [1], [0, 0, 1, 1], [], []>} : vector<25x192xbf16>, vector<192x128xbf16>, vector<25x128xf32> -> vector<25x128xf32>
    %344 = arith.addf %329, %343 : vector<25x128xf32>
    %c20 = arith.constant 20 : index
    %c0_203 = arith.constant 0 : index
    %345 = vector.load %arg13[%c20, %c0_203] : memref<49x192xf32, #tpu.memory_space<vmem>>, vector<25x192xf32>
    %c2_i32_204 = arith.constant 2 : i32
    %346 = vector.broadcast %c2_i32_204 : i32 to vector<25x1xi32>
    %347 = arith.cmpi sle, %64, %346 : vector<25x1xi32>
    %c2_i32_205 = arith.constant 2 : i32
    %348 = vector.broadcast %c2_i32_205 : i32 to vector<25x1xi32>
    %349 = arith.cmpi sge, %67, %348 : vector<25x1xi32>
    %350 = arith.andi %347, %349 : vector<25x1xi1>
    %351 = arith.extui %350 : vector<25x1xi1> to vector<25x1xi32>
    %352 = arith.sitofp %351 : vector<25x1xi32> to vector<25x1xf32>
    %353 = vector.broadcast %352 : vector<25x1xf32> to vector<25x192xf32>
    %354 = arith.mulf %345, %353 : vector<25x192xf32>
    %355 = arith.truncf %354 : vector<25x192xf32> to vector<25x192xbf16>
    %c20_206 = arith.constant 20 : index
    %c0_207 = arith.constant 0 : index
    %c0_208 = arith.constant 0 : index
    %356 = vector.load %arg5[%c20_206, %c0_207, %c0_208] : memref<25x192x128xbf16, #tpu.memory_space<vmem>>, vector<1x192x128xbf16>
    %357 = vector.shape_cast %356 : vector<1x192x128xbf16> to vector<192x128xbf16>
    %cst_209 = arith.constant dense<0.000000e+00> : vector<25x128xf32>
    %358 = tpu.matmul %355, %357, %cst_209 {dimension_numbers = #tpu.dot_dimension_numbers<[1], [0], [0], [1], [0, 0, 1, 1], [], []>} : vector<25x192xbf16>, vector<192x128xbf16>, vector<25x128xf32> -> vector<25x128xf32>
    %359 = arith.addf %344, %358 : vector<25x128xf32>
    %c21 = arith.constant 21 : index
    %c0_210 = arith.constant 0 : index
    %360 = vector.load %arg13[%c21, %c0_210] : memref<49x192xf32, #tpu.memory_space<vmem>>, vector<25x192xf32>
    %c2_i32_211 = arith.constant 2 : i32
    %361 = vector.broadcast %c2_i32_211 : i32 to vector<25x1xi32>
    %362 = arith.cmpi sle, %64, %361 : vector<25x1xi32>
    %c1_i32_212 = arith.constant 1 : i32
    %363 = vector.broadcast %c1_i32_212 : i32 to vector<25x1xi32>
    %364 = arith.cmpi sge, %67, %363 : vector<25x1xi32>
    %365 = arith.andi %362, %364 : vector<25x1xi1>
    %366 = arith.extui %365 : vector<25x1xi1> to vector<25x1xi32>
    %367 = arith.sitofp %366 : vector<25x1xi32> to vector<25x1xf32>
    %368 = vector.broadcast %367 : vector<25x1xf32> to vector<25x192xf32>
    %369 = arith.mulf %360, %368 : vector<25x192xf32>
    %370 = arith.truncf %369 : vector<25x192xf32> to vector<25x192xbf16>
    %c21_213 = arith.constant 21 : index
    %c0_214 = arith.constant 0 : index
    %c0_215 = arith.constant 0 : index
    %371 = vector.load %arg5[%c21_213, %c0_214, %c0_215] : memref<25x192x128xbf16, #tpu.memory_space<vmem>>, vector<1x192x128xbf16>
    %372 = vector.shape_cast %371 : vector<1x192x128xbf16> to vector<192x128xbf16>
    %cst_216 = arith.constant dense<0.000000e+00> : vector<25x128xf32>
    %373 = tpu.matmul %370, %372, %cst_216 {dimension_numbers = #tpu.dot_dimension_numbers<[1], [0], [0], [1], [0, 0, 1, 1], [], []>} : vector<25x192xbf16>, vector<192x128xbf16>, vector<25x128xf32> -> vector<25x128xf32>
    %374 = arith.addf %359, %373 : vector<25x128xf32>
    %c22 = arith.constant 22 : index
    %c0_217 = arith.constant 0 : index
    %375 = vector.load %arg13[%c22, %c0_217] : memref<49x192xf32, #tpu.memory_space<vmem>>, vector<25x192xf32>
    %c2_i32_218 = arith.constant 2 : i32
    %376 = vector.broadcast %c2_i32_218 : i32 to vector<25x1xi32>
    %377 = arith.cmpi sle, %64, %376 : vector<25x1xi32>
    %378 = arith.extui %377 : vector<25x1xi1> to vector<25x1xi32>
    %379 = arith.sitofp %378 : vector<25x1xi32> to vector<25x1xf32>
    %380 = vector.broadcast %379 : vector<25x1xf32> to vector<25x192xf32>
    %381 = arith.mulf %375, %380 : vector<25x192xf32>
    %382 = arith.truncf %381 : vector<25x192xf32> to vector<25x192xbf16>
    %c22_219 = arith.constant 22 : index
    %c0_220 = arith.constant 0 : index
    %c0_221 = arith.constant 0 : index
    %383 = vector.load %arg5[%c22_219, %c0_220, %c0_221] : memref<25x192x128xbf16, #tpu.memory_space<vmem>>, vector<1x192x128xbf16>
    %384 = vector.shape_cast %383 : vector<1x192x128xbf16> to vector<192x128xbf16>
    %cst_222 = arith.constant dense<0.000000e+00> : vector<25x128xf32>
    %385 = tpu.matmul %382, %384, %cst_222 {dimension_numbers = #tpu.dot_dimension_numbers<[1], [0], [0], [1], [0, 0, 1, 1], [], []>} : vector<25x192xbf16>, vector<192x128xbf16>, vector<25x128xf32> -> vector<25x128xf32>
    %386 = arith.addf %374, %385 : vector<25x128xf32>
    %c23 = arith.constant 23 : index
    %c0_223 = arith.constant 0 : index
    %387 = vector.load %arg13[%c23, %c0_223] : memref<49x192xf32, #tpu.memory_space<vmem>>, vector<25x192xf32>
    %c2_i32_224 = arith.constant 2 : i32
    %388 = vector.broadcast %c2_i32_224 : i32 to vector<25x1xi32>
    %389 = arith.cmpi sle, %64, %388 : vector<25x1xi32>
    %c3_i32_225 = arith.constant 3 : i32
    %390 = vector.broadcast %c3_i32_225 : i32 to vector<25x1xi32>
    %391 = arith.cmpi sle, %67, %390 : vector<25x1xi32>
    %392 = arith.andi %389, %391 : vector<25x1xi1>
    %393 = arith.extui %392 : vector<25x1xi1> to vector<25x1xi32>
    %394 = arith.sitofp %393 : vector<25x1xi32> to vector<25x1xf32>
    %395 = vector.broadcast %394 : vector<25x1xf32> to vector<25x192xf32>
    %396 = arith.mulf %387, %395 : vector<25x192xf32>
    %397 = arith.truncf %396 : vector<25x192xf32> to vector<25x192xbf16>
    %c23_226 = arith.constant 23 : index
    %c0_227 = arith.constant 0 : index
    %c0_228 = arith.constant 0 : index
    %398 = vector.load %arg5[%c23_226, %c0_227, %c0_228] : memref<25x192x128xbf16, #tpu.memory_space<vmem>>, vector<1x192x128xbf16>
    %399 = vector.shape_cast %398 : vector<1x192x128xbf16> to vector<192x128xbf16>
    %cst_229 = arith.constant dense<0.000000e+00> : vector<25x128xf32>
    %400 = tpu.matmul %397, %399, %cst_229 {dimension_numbers = #tpu.dot_dimension_numbers<[1], [0], [0], [1], [0, 0, 1, 1], [], []>} : vector<25x192xbf16>, vector<192x128xbf16>, vector<25x128xf32> -> vector<25x128xf32>
    %401 = arith.addf %386, %400 : vector<25x128xf32>
    %c24 = arith.constant 24 : index
    %c0_230 = arith.constant 0 : index
    %402 = vector.load %arg13[%c24, %c0_230] : memref<49x192xf32, #tpu.memory_space<vmem>>, vector<25x192xf32>
    %c2_i32_231 = arith.constant 2 : i32
    %403 = vector.broadcast %c2_i32_231 : i32 to vector<25x1xi32>
    %404 = arith.cmpi sle, %64, %403 : vector<25x1xi32>
    %c2_i32_232 = arith.constant 2 : i32
    %405 = vector.broadcast %c2_i32_232 : i32 to vector<25x1xi32>
    %406 = arith.cmpi sle, %67, %405 : vector<25x1xi32>
    %407 = arith.andi %404, %406 : vector<25x1xi1>
    %408 = arith.extui %407 : vector<25x1xi1> to vector<25x1xi32>
    %409 = arith.sitofp %408 : vector<25x1xi32> to vector<25x1xf32>
    %410 = vector.broadcast %409 : vector<25x1xf32> to vector<25x192xf32>
    %411 = arith.mulf %402, %410 : vector<25x192xf32>
    %412 = arith.truncf %411 : vector<25x192xf32> to vector<25x192xbf16>
    %c24_233 = arith.constant 24 : index
    %c0_234 = arith.constant 0 : index
    %c0_235 = arith.constant 0 : index
    %413 = vector.load %arg5[%c24_233, %c0_234, %c0_235] : memref<25x192x128xbf16, #tpu.memory_space<vmem>>, vector<1x192x128xbf16>
    %414 = vector.shape_cast %413 : vector<1x192x128xbf16> to vector<192x128xbf16>
    %cst_236 = arith.constant dense<0.000000e+00> : vector<25x128xf32>
    %415 = tpu.matmul %412, %414, %cst_236 {dimension_numbers = #tpu.dot_dimension_numbers<[1], [0], [0], [1], [0, 0, 1, 1], [], []>} : vector<25x192xbf16>, vector<192x128xbf16>, vector<25x128xf32> -> vector<25x128xf32>
    %416 = arith.addf %401, %415 : vector<25x128xf32>
    %c0_237 = arith.constant 0 : index
    %c0_238 = arith.constant 0 : index
    %417 = vector.load %arg6[%c0_237, %c0_238] : memref<1x128xf32, #tpu.memory_space<vmem>>, vector<1x128xf32>
    %418 = vector.broadcast %417 : vector<1x128xf32> to vector<25x128xf32>
    %419 = arith.addf %416, %418 : vector<25x128xf32>
    %cst_239 = arith.constant 0.000000e+00 : f32
    %420 = vector.broadcast %cst_239 : f32 to vector<25x128xf32>
    %421 = arith.maximumf %419, %420 : vector<25x128xf32>
    %c12_240 = arith.constant 12 : index
    %c0_241 = arith.constant 0 : index
    %422 = vector.load %arg13[%c12_240, %c0_241] : memref<49x192xf32, #tpu.memory_space<vmem>>, vector<25x128xf32>
    tpu.vector_store %arg13[%c12_240, %c0_241], %421 {strides = array<i32>} : memref<49x192xf32, #tpu.memory_space<vmem>>, vector<25x128xf32>,
    %cst_242 = arith.constant 0.000000e+00 : f32
    %423 = vector.broadcast %cst_242 : f32 to vector<25x128xf32>
    %c0_243 = arith.constant 0 : index
    %c0_244 = arith.constant 0 : index
    %424 = vector.load %arg13[%c0_243, %c0_244] : memref<49x192xf32, #tpu.memory_space<vmem>>, vector<25x128xf32>
    %c2_i32_245 = arith.constant 2 : i32
    %425 = vector.broadcast %c2_i32_245 : i32 to vector<25x1xi32>
    %426 = arith.cmpi sge, %64, %425 : vector<25x1xi32>
    %c2_i32_246 = arith.constant 2 : i32
    %427 = vector.broadcast %c2_i32_246 : i32 to vector<25x1xi32>
    %428 = arith.cmpi sge, %67, %427 : vector<25x1xi32>
    %429 = arith.andi %426, %428 : vector<25x1xi1>
    %430 = arith.extui %429 : vector<25x1xi1> to vector<25x1xi32>
    %431 = arith.sitofp %430 : vector<25x1xi32> to vector<25x1xf32>
    %432 = vector.broadcast %431 : vector<25x1xf32> to vector<25x128xf32>
    %433 = arith.mulf %424, %432 : vector<25x128xf32>
    %434 = arith.truncf %433 : vector<25x128xf32> to vector<25x128xbf16>
    %c0_247 = arith.constant 0 : index
    %c0_248 = arith.constant 0 : index
    %c0_249 = arith.constant 0 : index
    %435 = vector.load %arg7[%c0_247, %c0_248, %c0_249] : memref<25x128x128xbf16, #tpu.memory_space<vmem>>, vector<1x128x128xbf16>
    %436 = vector.shape_cast %435 : vector<1x128x128xbf16> to vector<128x128xbf16>
    %cst_250 = arith.constant dense<0.000000e+00> : vector<25x128xf32>
    %437 = tpu.matmul %434, %436, %cst_250 {dimension_numbers = #tpu.dot_dimension_numbers<[1], [0], [0], [1], [0, 0, 1, 1], [], []>} : vector<25x128xbf16>, vector<128x128xbf16>, vector<25x128xf32> -> vector<25x128xf32>
    %438 = arith.addf %423, %437 : vector<25x128xf32>
    %c1_251 = arith.constant 1 : index
    %c0_252 = arith.constant 0 : index
    %439 = vector.load %arg13[%c1_251, %c0_252] : memref<49x192xf32, #tpu.memory_space<vmem>>, vector<25x128xf32>
    %c2_i32_253 = arith.constant 2 : i32
    %440 = vector.broadcast %c2_i32_253 : i32 to vector<25x1xi32>
    %441 = arith.cmpi sge, %64, %440 : vector<25x1xi32>
    %c1_i32_254 = arith.constant 1 : i32
    %442 = vector.broadcast %c1_i32_254 : i32 to vector<25x1xi32>
    %443 = arith.cmpi sge, %67, %442 : vector<25x1xi32>
    %444 = arith.andi %441, %443 : vector<25x1xi1>
    %445 = arith.extui %444 : vector<25x1xi1> to vector<25x1xi32>
    %446 = arith.sitofp %445 : vector<25x1xi32> to vector<25x1xf32>
    %447 = vector.broadcast %446 : vector<25x1xf32> to vector<25x128xf32>
    %448 = arith.mulf %439, %447 : vector<25x128xf32>
    %449 = arith.truncf %448 : vector<25x128xf32> to vector<25x128xbf16>
    %c1_255 = arith.constant 1 : index
    %c0_256 = arith.constant 0 : index
    %c0_257 = arith.constant 0 : index
    %450 = vector.load %arg7[%c1_255, %c0_256, %c0_257] : memref<25x128x128xbf16, #tpu.memory_space<vmem>>, vector<1x128x128xbf16>
    %451 = vector.shape_cast %450 : vector<1x128x128xbf16> to vector<128x128xbf16>
    %cst_258 = arith.constant dense<0.000000e+00> : vector<25x128xf32>
    %452 = tpu.matmul %449, %451, %cst_258 {dimension_numbers = #tpu.dot_dimension_numbers<[1], [0], [0], [1], [0, 0, 1, 1], [], []>} : vector<25x128xbf16>, vector<128x128xbf16>, vector<25x128xf32> -> vector<25x128xf32>
    %453 = arith.addf %438, %452 : vector<25x128xf32>
    %c2_259 = arith.constant 2 : index
    %c0_260 = arith.constant 0 : index
    %454 = vector.load %arg13[%c2_259, %c0_260] : memref<49x192xf32, #tpu.memory_space<vmem>>, vector<25x128xf32>
    %c2_i32_261 = arith.constant 2 : i32
    %455 = vector.broadcast %c2_i32_261 : i32 to vector<25x1xi32>
    %456 = arith.cmpi sge, %64, %455 : vector<25x1xi32>
    %457 = arith.extui %456 : vector<25x1xi1> to vector<25x1xi32>
    %458 = arith.sitofp %457 : vector<25x1xi32> to vector<25x1xf32>
    %459 = vector.broadcast %458 : vector<25x1xf32> to vector<25x128xf32>
    %460 = arith.mulf %454, %459 : vector<25x128xf32>
    %461 = arith.truncf %460 : vector<25x128xf32> to vector<25x128xbf16>
    %c2_262 = arith.constant 2 : index
    %c0_263 = arith.constant 0 : index
    %c0_264 = arith.constant 0 : index
    %462 = vector.load %arg7[%c2_262, %c0_263, %c0_264] : memref<25x128x128xbf16, #tpu.memory_space<vmem>>, vector<1x128x128xbf16>
    %463 = vector.shape_cast %462 : vector<1x128x128xbf16> to vector<128x128xbf16>
    %cst_265 = arith.constant dense<0.000000e+00> : vector<25x128xf32>
    %464 = tpu.matmul %461, %463, %cst_265 {dimension_numbers = #tpu.dot_dimension_numbers<[1], [0], [0], [1], [0, 0, 1, 1], [], []>} : vector<25x128xbf16>, vector<128x128xbf16>, vector<25x128xf32> -> vector<25x128xf32>
    %465 = arith.addf %453, %464 : vector<25x128xf32>
    %c3_266 = arith.constant 3 : index
    %c0_267 = arith.constant 0 : index
    %466 = vector.load %arg13[%c3_266, %c0_267] : memref<49x192xf32, #tpu.memory_space<vmem>>, vector<25x128xf32>
    %c2_i32_268 = arith.constant 2 : i32
    %467 = vector.broadcast %c2_i32_268 : i32 to vector<25x1xi32>
    %468 = arith.cmpi sge, %64, %467 : vector<25x1xi32>
    %c3_i32_269 = arith.constant 3 : i32
    %469 = vector.broadcast %c3_i32_269 : i32 to vector<25x1xi32>
    %470 = arith.cmpi sle, %67, %469 : vector<25x1xi32>
    %471 = arith.andi %468, %470 : vector<25x1xi1>
    %472 = arith.extui %471 : vector<25x1xi1> to vector<25x1xi32>
    %473 = arith.sitofp %472 : vector<25x1xi32> to vector<25x1xf32>
    %474 = vector.broadcast %473 : vector<25x1xf32> to vector<25x128xf32>
    %475 = arith.mulf %466, %474 : vector<25x128xf32>
    %476 = arith.truncf %475 : vector<25x128xf32> to vector<25x128xbf16>
    %c3_270 = arith.constant 3 : index
    %c0_271 = arith.constant 0 : index
    %c0_272 = arith.constant 0 : index
    %477 = vector.load %arg7[%c3_270, %c0_271, %c0_272] : memref<25x128x128xbf16, #tpu.memory_space<vmem>>, vector<1x128x128xbf16>
    %478 = vector.shape_cast %477 : vector<1x128x128xbf16> to vector<128x128xbf16>
    %cst_273 = arith.constant dense<0.000000e+00> : vector<25x128xf32>
    %479 = tpu.matmul %476, %478, %cst_273 {dimension_numbers = #tpu.dot_dimension_numbers<[1], [0], [0], [1], [0, 0, 1, 1], [], []>} : vector<25x128xbf16>, vector<128x128xbf16>, vector<25x128xf32> -> vector<25x128xf32>
    %480 = arith.addf %465, %479 : vector<25x128xf32>
    %c4_274 = arith.constant 4 : index
    %c0_275 = arith.constant 0 : index
    %481 = vector.load %arg13[%c4_274, %c0_275] : memref<49x192xf32, #tpu.memory_space<vmem>>, vector<25x128xf32>
    %c2_i32_276 = arith.constant 2 : i32
    %482 = vector.broadcast %c2_i32_276 : i32 to vector<25x1xi32>
    %483 = arith.cmpi sge, %64, %482 : vector<25x1xi32>
    %c2_i32_277 = arith.constant 2 : i32
    %484 = vector.broadcast %c2_i32_277 : i32 to vector<25x1xi32>
    %485 = arith.cmpi sle, %67, %484 : vector<25x1xi32>
    %486 = arith.andi %483, %485 : vector<25x1xi1>
    %487 = arith.extui %486 : vector<25x1xi1> to vector<25x1xi32>
    %488 = arith.sitofp %487 : vector<25x1xi32> to vector<25x1xf32>
    %489 = vector.broadcast %488 : vector<25x1xf32> to vector<25x128xf32>
    %490 = arith.mulf %481, %489 : vector<25x128xf32>
    %491 = arith.truncf %490 : vector<25x128xf32> to vector<25x128xbf16>
    %c4_278 = arith.constant 4 : index
    %c0_279 = arith.constant 0 : index
    %c0_280 = arith.constant 0 : index
    %492 = vector.load %arg7[%c4_278, %c0_279, %c0_280] : memref<25x128x128xbf16, #tpu.memory_space<vmem>>, vector<1x128x128xbf16>
    %493 = vector.shape_cast %492 : vector<1x128x128xbf16> to vector<128x128xbf16>
    %cst_281 = arith.constant dense<0.000000e+00> : vector<25x128xf32>
    %494 = tpu.matmul %491, %493, %cst_281 {dimension_numbers = #tpu.dot_dimension_numbers<[1], [0], [0], [1], [0, 0, 1, 1], [], []>} : vector<25x128xbf16>, vector<128x128xbf16>, vector<25x128xf32> -> vector<25x128xf32>
    %495 = arith.addf %480, %494 : vector<25x128xf32>
    %c5_282 = arith.constant 5 : index
    %c0_283 = arith.constant 0 : index
    %496 = vector.load %arg13[%c5_282, %c0_283] : memref<49x192xf32, #tpu.memory_space<vmem>>, vector<25x128xf32>
    %c1_i32_284 = arith.constant 1 : i32
    %497 = vector.broadcast %c1_i32_284 : i32 to vector<25x1xi32>
    %498 = arith.cmpi sge, %64, %497 : vector<25x1xi32>
    %c2_i32_285 = arith.constant 2 : i32
    %499 = vector.broadcast %c2_i32_285 : i32 to vector<25x1xi32>
    %500 = arith.cmpi sge, %67, %499 : vector<25x1xi32>
    %501 = arith.andi %498, %500 : vector<25x1xi1>
    %502 = arith.extui %501 : vector<25x1xi1> to vector<25x1xi32>
    %503 = arith.sitofp %502 : vector<25x1xi32> to vector<25x1xf32>
    %504 = vector.broadcast %503 : vector<25x1xf32> to vector<25x128xf32>
    %505 = arith.mulf %496, %504 : vector<25x128xf32>
    %506 = arith.truncf %505 : vector<25x128xf32> to vector<25x128xbf16>
    %c5_286 = arith.constant 5 : index
    %c0_287 = arith.constant 0 : index
    %c0_288 = arith.constant 0 : index
    %507 = vector.load %arg7[%c5_286, %c0_287, %c0_288] : memref<25x128x128xbf16, #tpu.memory_space<vmem>>, vector<1x128x128xbf16>
    %508 = vector.shape_cast %507 : vector<1x128x128xbf16> to vector<128x128xbf16>
    %cst_289 = arith.constant dense<0.000000e+00> : vector<25x128xf32>
    %509 = tpu.matmul %506, %508, %cst_289 {dimension_numbers = #tpu.dot_dimension_numbers<[1], [0], [0], [1], [0, 0, 1, 1], [], []>} : vector<25x128xbf16>, vector<128x128xbf16>, vector<25x128xf32> -> vector<25x128xf32>
    %510 = arith.addf %495, %509 : vector<25x128xf32>
    %c6_290 = arith.constant 6 : index
    %c0_291 = arith.constant 0 : index
    %511 = vector.load %arg13[%c6_290, %c0_291] : memref<49x192xf32, #tpu.memory_space<vmem>>, vector<25x128xf32>
    %c1_i32_292 = arith.constant 1 : i32
    %512 = vector.broadcast %c1_i32_292 : i32 to vector<25x1xi32>
    %513 = arith.cmpi sge, %64, %512 : vector<25x1xi32>
    %c1_i32_293 = arith.constant 1 : i32
    %514 = vector.broadcast %c1_i32_293 : i32 to vector<25x1xi32>
    %515 = arith.cmpi sge, %67, %514 : vector<25x1xi32>
    %516 = arith.andi %513, %515 : vector<25x1xi1>
    %517 = arith.extui %516 : vector<25x1xi1> to vector<25x1xi32>
    %518 = arith.sitofp %517 : vector<25x1xi32> to vector<25x1xf32>
    %519 = vector.broadcast %518 : vector<25x1xf32> to vector<25x128xf32>
    %520 = arith.mulf %511, %519 : vector<25x128xf32>
    %521 = arith.truncf %520 : vector<25x128xf32> to vector<25x128xbf16>
    %c6_294 = arith.constant 6 : index
    %c0_295 = arith.constant 0 : index
    %c0_296 = arith.constant 0 : index
    %522 = vector.load %arg7[%c6_294, %c0_295, %c0_296] : memref<25x128x128xbf16, #tpu.memory_space<vmem>>, vector<1x128x128xbf16>
    %523 = vector.shape_cast %522 : vector<1x128x128xbf16> to vector<128x128xbf16>
    %cst_297 = arith.constant dense<0.000000e+00> : vector<25x128xf32>
    %524 = tpu.matmul %521, %523, %cst_297 {dimension_numbers = #tpu.dot_dimension_numbers<[1], [0], [0], [1], [0, 0, 1, 1], [], []>} : vector<25x128xbf16>, vector<128x128xbf16>, vector<25x128xf32> -> vector<25x128xf32>
    %525 = arith.addf %510, %524 : vector<25x128xf32>
    %c7_298 = arith.constant 7 : index
    %c0_299 = arith.constant 0 : index
    %526 = vector.load %arg13[%c7_298, %c0_299] : memref<49x192xf32, #tpu.memory_space<vmem>>, vector<25x128xf32>
    %c1_i32_300 = arith.constant 1 : i32
    %527 = vector.broadcast %c1_i32_300 : i32 to vector<25x1xi32>
    %528 = arith.cmpi sge, %64, %527 : vector<25x1xi32>
    %529 = arith.extui %528 : vector<25x1xi1> to vector<25x1xi32>
    %530 = arith.sitofp %529 : vector<25x1xi32> to vector<25x1xf32>
    %531 = vector.broadcast %530 : vector<25x1xf32> to vector<25x128xf32>
    %532 = arith.mulf %526, %531 : vector<25x128xf32>
    %533 = arith.truncf %532 : vector<25x128xf32> to vector<25x128xbf16>
    %c7_301 = arith.constant 7 : index
    %c0_302 = arith.constant 0 : index
    %c0_303 = arith.constant 0 : index
    %534 = vector.load %arg7[%c7_301, %c0_302, %c0_303] : memref<25x128x128xbf16, #tpu.memory_space<vmem>>, vector<1x128x128xbf16>
    %535 = vector.shape_cast %534 : vector<1x128x128xbf16> to vector<128x128xbf16>
    %cst_304 = arith.constant dense<0.000000e+00> : vector<25x128xf32>
    %536 = tpu.matmul %533, %535, %cst_304 {dimension_numbers = #tpu.dot_dimension_numbers<[1], [0], [0], [1], [0, 0, 1, 1], [], []>} : vector<25x128xbf16>, vector<128x128xbf16>, vector<25x128xf32> -> vector<25x128xf32>
    %537 = arith.addf %525, %536 : vector<25x128xf32>
    %c8_305 = arith.constant 8 : index
    %c0_306 = arith.constant 0 : index
    %538 = vector.load %arg13[%c8_305, %c0_306] : memref<49x192xf32, #tpu.memory_space<vmem>>, vector<25x128xf32>
    %c1_i32_307 = arith.constant 1 : i32
    %539 = vector.broadcast %c1_i32_307 : i32 to vector<25x1xi32>
    %540 = arith.cmpi sge, %64, %539 : vector<25x1xi32>
    %c3_i32_308 = arith.constant 3 : i32
    %541 = vector.broadcast %c3_i32_308 : i32 to vector<25x1xi32>
    %542 = arith.cmpi sle, %67, %541 : vector<25x1xi32>
    %543 = arith.andi %540, %542 : vector<25x1xi1>
    %544 = arith.extui %543 : vector<25x1xi1> to vector<25x1xi32>
    %545 = arith.sitofp %544 : vector<25x1xi32> to vector<25x1xf32>
    %546 = vector.broadcast %545 : vector<25x1xf32> to vector<25x128xf32>
    %547 = arith.mulf %538, %546 : vector<25x128xf32>
    %548 = arith.truncf %547 : vector<25x128xf32> to vector<25x128xbf16>
    %c8_309 = arith.constant 8 : index
    %c0_310 = arith.constant 0 : index
    %c0_311 = arith.constant 0 : index
    %549 = vector.load %arg7[%c8_309, %c0_310, %c0_311] : memref<25x128x128xbf16, #tpu.memory_space<vmem>>, vector<1x128x128xbf16>
    %550 = vector.shape_cast %549 : vector<1x128x128xbf16> to vector<128x128xbf16>
    %cst_312 = arith.constant dense<0.000000e+00> : vector<25x128xf32>
    %551 = tpu.matmul %548, %550, %cst_312 {dimension_numbers = #tpu.dot_dimension_numbers<[1], [0], [0], [1], [0, 0, 1, 1], [], []>} : vector<25x128xbf16>, vector<128x128xbf16>, vector<25x128xf32> -> vector<25x128xf32>
    %552 = arith.addf %537, %551 : vector<25x128xf32>
    %c9_313 = arith.constant 9 : index
    %c0_314 = arith.constant 0 : index
    %553 = vector.load %arg13[%c9_313, %c0_314] : memref<49x192xf32, #tpu.memory_space<vmem>>, vector<25x128xf32>
    %c1_i32_315 = arith.constant 1 : i32
    %554 = vector.broadcast %c1_i32_315 : i32 to vector<25x1xi32>
    %555 = arith.cmpi sge, %64, %554 : vector<25x1xi32>
    %c2_i32_316 = arith.constant 2 : i32
    %556 = vector.broadcast %c2_i32_316 : i32 to vector<25x1xi32>
    %557 = arith.cmpi sle, %67, %556 : vector<25x1xi32>
    %558 = arith.andi %555, %557 : vector<25x1xi1>
    %559 = arith.extui %558 : vector<25x1xi1> to vector<25x1xi32>
    %560 = arith.sitofp %559 : vector<25x1xi32> to vector<25x1xf32>
    %561 = vector.broadcast %560 : vector<25x1xf32> to vector<25x128xf32>
    %562 = arith.mulf %553, %561 : vector<25x128xf32>
    %563 = arith.truncf %562 : vector<25x128xf32> to vector<25x128xbf16>
    %c9_317 = arith.constant 9 : index
    %c0_318 = arith.constant 0 : index
    %c0_319 = arith.constant 0 : index
    %564 = vector.load %arg7[%c9_317, %c0_318, %c0_319] : memref<25x128x128xbf16, #tpu.memory_space<vmem>>, vector<1x128x128xbf16>
    %565 = vector.shape_cast %564 : vector<1x128x128xbf16> to vector<128x128xbf16>
    %cst_320 = arith.constant dense<0.000000e+00> : vector<25x128xf32>
    %566 = tpu.matmul %563, %565, %cst_320 {dimension_numbers = #tpu.dot_dimension_numbers<[1], [0], [0], [1], [0, 0, 1, 1], [], []>} : vector<25x128xbf16>, vector<128x128xbf16>, vector<25x128xf32> -> vector<25x128xf32>
    %567 = arith.addf %552, %566 : vector<25x128xf32>
    %c10_321 = arith.constant 10 : index
    %c0_322 = arith.constant 0 : index
    %568 = vector.load %arg13[%c10_321, %c0_322] : memref<49x192xf32, #tpu.memory_space<vmem>>, vector<25x128xf32>
    %c2_i32_323 = arith.constant 2 : i32
    %569 = vector.broadcast %c2_i32_323 : i32 to vector<25x1xi32>
    %570 = arith.cmpi sge, %67, %569 : vector<25x1xi32>
    %571 = arith.extui %570 : vector<25x1xi1> to vector<25x1xi32>
    %572 = arith.sitofp %571 : vector<25x1xi32> to vector<25x1xf32>
    %573 = vector.broadcast %572 : vector<25x1xf32> to vector<25x128xf32>
    %574 = arith.mulf %568, %573 : vector<25x128xf32>
    %575 = arith.truncf %574 : vector<25x128xf32> to vector<25x128xbf16>
    %c10_324 = arith.constant 10 : index
    %c0_325 = arith.constant 0 : index
    %c0_326 = arith.constant 0 : index
    %576 = vector.load %arg7[%c10_324, %c0_325, %c0_326] : memref<25x128x128xbf16, #tpu.memory_space<vmem>>, vector<1x128x128xbf16>
    %577 = vector.shape_cast %576 : vector<1x128x128xbf16> to vector<128x128xbf16>
    %cst_327 = arith.constant dense<0.000000e+00> : vector<25x128xf32>
    %578 = tpu.matmul %575, %577, %cst_327 {dimension_numbers = #tpu.dot_dimension_numbers<[1], [0], [0], [1], [0, 0, 1, 1], [], []>} : vector<25x128xbf16>, vector<128x128xbf16>, vector<25x128xf32> -> vector<25x128xf32>
    %579 = arith.addf %567, %578 : vector<25x128xf32>
    %c11_328 = arith.constant 11 : index
    %c0_329 = arith.constant 0 : index
    %580 = vector.load %arg13[%c11_328, %c0_329] : memref<49x192xf32, #tpu.memory_space<vmem>>, vector<25x128xf32>
    %c1_i32_330 = arith.constant 1 : i32
    %581 = vector.broadcast %c1_i32_330 : i32 to vector<25x1xi32>
    %582 = arith.cmpi sge, %67, %581 : vector<25x1xi32>
    %583 = arith.extui %582 : vector<25x1xi1> to vector<25x1xi32>
    %584 = arith.sitofp %583 : vector<25x1xi32> to vector<25x1xf32>
    %585 = vector.broadcast %584 : vector<25x1xf32> to vector<25x128xf32>
    %586 = arith.mulf %580, %585 : vector<25x128xf32>
    %587 = arith.truncf %586 : vector<25x128xf32> to vector<25x128xbf16>
    %c11_331 = arith.constant 11 : index
    %c0_332 = arith.constant 0 : index
    %c0_333 = arith.constant 0 : index
    %588 = vector.load %arg7[%c11_331, %c0_332, %c0_333] : memref<25x128x128xbf16, #tpu.memory_space<vmem>>, vector<1x128x128xbf16>
    %589 = vector.shape_cast %588 : vector<1x128x128xbf16> to vector<128x128xbf16>
    %cst_334 = arith.constant dense<0.000000e+00> : vector<25x128xf32>
    %590 = tpu.matmul %587, %589, %cst_334 {dimension_numbers = #tpu.dot_dimension_numbers<[1], [0], [0], [1], [0, 0, 1, 1], [], []>} : vector<25x128xbf16>, vector<128x128xbf16>, vector<25x128xf32> -> vector<25x128xf32>
    %591 = arith.addf %579, %590 : vector<25x128xf32>
    %c12_335 = arith.constant 12 : index
    %c0_336 = arith.constant 0 : index
    %592 = vector.load %arg13[%c12_335, %c0_336] : memref<49x192xf32, #tpu.memory_space<vmem>>, vector<25x128xf32>
    %593 = arith.truncf %592 : vector<25x128xf32> to vector<25x128xbf16>
    %c12_337 = arith.constant 12 : index
    %c0_338 = arith.constant 0 : index
    %c0_339 = arith.constant 0 : index
    %594 = vector.load %arg7[%c12_337, %c0_338, %c0_339] : memref<25x128x128xbf16, #tpu.memory_space<vmem>>, vector<1x128x128xbf16>
    %595 = vector.shape_cast %594 : vector<1x128x128xbf16> to vector<128x128xbf16>
    %cst_340 = arith.constant dense<0.000000e+00> : vector<25x128xf32>
    %596 = tpu.matmul %593, %595, %cst_340 {dimension_numbers = #tpu.dot_dimension_numbers<[1], [0], [0], [1], [0, 0, 1, 1], [], []>} : vector<25x128xbf16>, vector<128x128xbf16>, vector<25x128xf32> -> vector<25x128xf32>
    %597 = arith.addf %591, %596 : vector<25x128xf32>
    %c13_341 = arith.constant 13 : index
    %c0_342 = arith.constant 0 : index
    %598 = vector.load %arg13[%c13_341, %c0_342] : memref<49x192xf32, #tpu.memory_space<vmem>>, vector<25x128xf32>
    %c3_i32_343 = arith.constant 3 : i32
    %599 = vector.broadcast %c3_i32_343 : i32 to vector<25x1xi32>
    %600 = arith.cmpi sle, %67, %599 : vector<25x1xi32>
    %601 = arith.extui %600 : vector<25x1xi1> to vector<25x1xi32>
    %602 = arith.sitofp %601 : vector<25x1xi32> to vector<25x1xf32>
    %603 = vector.broadcast %602 : vector<25x1xf32> to vector<25x128xf32>
    %604 = arith.mulf %598, %603 : vector<25x128xf32>
    %605 = arith.truncf %604 : vector<25x128xf32> to vector<25x128xbf16>
    %c13_344 = arith.constant 13 : index
    %c0_345 = arith.constant 0 : index
    %c0_346 = arith.constant 0 : index
    %606 = vector.load %arg7[%c13_344, %c0_345, %c0_346] : memref<25x128x128xbf16, #tpu.memory_space<vmem>>, vector<1x128x128xbf16>
    %607 = vector.shape_cast %606 : vector<1x128x128xbf16> to vector<128x128xbf16>
    %cst_347 = arith.constant dense<0.000000e+00> : vector<25x128xf32>
    %608 = tpu.matmul %605, %607, %cst_347 {dimension_numbers = #tpu.dot_dimension_numbers<[1], [0], [0], [1], [0, 0, 1, 1], [], []>} : vector<25x128xbf16>, vector<128x128xbf16>, vector<25x128xf32> -> vector<25x128xf32>
    %609 = arith.addf %597, %608 : vector<25x128xf32>
    %c14_348 = arith.constant 14 : index
    %c0_349 = arith.constant 0 : index
    %610 = vector.load %arg13[%c14_348, %c0_349] : memref<49x192xf32, #tpu.memory_space<vmem>>, vector<25x128xf32>
    %c2_i32_350 = arith.constant 2 : i32
    %611 = vector.broadcast %c2_i32_350 : i32 to vector<25x1xi32>
    %612 = arith.cmpi sle, %67, %611 : vector<25x1xi32>
    %613 = arith.extui %612 : vector<25x1xi1> to vector<25x1xi32>
    %614 = arith.sitofp %613 : vector<25x1xi32> to vector<25x1xf32>
    %615 = vector.broadcast %614 : vector<25x1xf32> to vector<25x128xf32>
    %616 = arith.mulf %610, %615 : vector<25x128xf32>
    %617 = arith.truncf %616 : vector<25x128xf32> to vector<25x128xbf16>
    %c14_351 = arith.constant 14 : index
    %c0_352 = arith.constant 0 : index
    %c0_353 = arith.constant 0 : index
    %618 = vector.load %arg7[%c14_351, %c0_352, %c0_353] : memref<25x128x128xbf16, #tpu.memory_space<vmem>>, vector<1x128x128xbf16>
    %619 = vector.shape_cast %618 : vector<1x128x128xbf16> to vector<128x128xbf16>
    %cst_354 = arith.constant dense<0.000000e+00> : vector<25x128xf32>
    %620 = tpu.matmul %617, %619, %cst_354 {dimension_numbers = #tpu.dot_dimension_numbers<[1], [0], [0], [1], [0, 0, 1, 1], [], []>} : vector<25x128xbf16>, vector<128x128xbf16>, vector<25x128xf32> -> vector<25x128xf32>
    %621 = arith.addf %609, %620 : vector<25x128xf32>
    %c15_355 = arith.constant 15 : index
    %c0_356 = arith.constant 0 : index
    %622 = vector.load %arg13[%c15_355, %c0_356] : memref<49x192xf32, #tpu.memory_space<vmem>>, vector<25x128xf32>
    %c3_i32_357 = arith.constant 3 : i32
    %623 = vector.broadcast %c3_i32_357 : i32 to vector<25x1xi32>
    %624 = arith.cmpi sle, %64, %623 : vector<25x1xi32>
    %c2_i32_358 = arith.constant 2 : i32
    %625 = vector.broadcast %c2_i32_358 : i32 to vector<25x1xi32>
    %626 = arith.cmpi sge, %67, %625 : vector<25x1xi32>
    %627 = arith.andi %624, %626 : vector<25x1xi1>
    %628 = arith.extui %627 : vector<25x1xi1> to vector<25x1xi32>
    %629 = arith.sitofp %628 : vector<25x1xi32> to vector<25x1xf32>
    %630 = vector.broadcast %629 : vector<25x1xf32> to vector<25x128xf32>
    %631 = arith.mulf %622, %630 : vector<25x128xf32>
    %632 = arith.truncf %631 : vector<25x128xf32> to vector<25x128xbf16>
    %c15_359 = arith.constant 15 : index
    %c0_360 = arith.constant 0 : index
    %c0_361 = arith.constant 0 : index
    %633 = vector.load %arg7[%c15_359, %c0_360, %c0_361] : memref<25x128x128xbf16, #tpu.memory_space<vmem>>, vector<1x128x128xbf16>
    %634 = vector.shape_cast %633 : vector<1x128x128xbf16> to vector<128x128xbf16>
    %cst_362 = arith.constant dense<0.000000e+00> : vector<25x128xf32>
    %635 = tpu.matmul %632, %634, %cst_362 {dimension_numbers = #tpu.dot_dimension_numbers<[1], [0], [0], [1], [0, 0, 1, 1], [], []>} : vector<25x128xbf16>, vector<128x128xbf16>, vector<25x128xf32> -> vector<25x128xf32>
    %636 = arith.addf %621, %635 : vector<25x128xf32>
    %c16_363 = arith.constant 16 : index
    %c0_364 = arith.constant 0 : index
    %637 = vector.load %arg13[%c16_363, %c0_364] : memref<49x192xf32, #tpu.memory_space<vmem>>, vector<25x128xf32>
    %c3_i32_365 = arith.constant 3 : i32
    %638 = vector.broadcast %c3_i32_365 : i32 to vector<25x1xi32>
    %639 = arith.cmpi sle, %64, %638 : vector<25x1xi32>
    %c1_i32_366 = arith.constant 1 : i32
    %640 = vector.broadcast %c1_i32_366 : i32 to vector<25x1xi32>
    %641 = arith.cmpi sge, %67, %640 : vector<25x1xi32>
    %642 = arith.andi %639, %641 : vector<25x1xi1>
    %643 = arith.extui %642 : vector<25x1xi1> to vector<25x1xi32>
    %644 = arith.sitofp %643 : vector<25x1xi32> to vector<25x1xf32>
    %645 = vector.broadcast %644 : vector<25x1xf32> to vector<25x128xf32>
    %646 = arith.mulf %637, %645 : vector<25x128xf32>
    %647 = arith.truncf %646 : vector<25x128xf32> to vector<25x128xbf16>
    %c16_367 = arith.constant 16 : index
    %c0_368 = arith.constant 0 : index
    %c0_369 = arith.constant 0 : index
    %648 = vector.load %arg7[%c16_367, %c0_368, %c0_369] : memref<25x128x128xbf16, #tpu.memory_space<vmem>>, vector<1x128x128xbf16>
    %649 = vector.shape_cast %648 : vector<1x128x128xbf16> to vector<128x128xbf16>
    %cst_370 = arith.constant dense<0.000000e+00> : vector<25x128xf32>
    %650 = tpu.matmul %647, %649, %cst_370 {dimension_numbers = #tpu.dot_dimension_numbers<[1], [0], [0], [1], [0, 0, 1, 1], [], []>} : vector<25x128xbf16>, vector<128x128xbf16>, vector<25x128xf32> -> vector<25x128xf32>
    %651 = arith.addf %636, %650 : vector<25x128xf32>
    %c17_371 = arith.constant 17 : index
    %c0_372 = arith.constant 0 : index
    %652 = vector.load %arg13[%c17_371, %c0_372] : memref<49x192xf32, #tpu.memory_space<vmem>>, vector<25x128xf32>
    %c3_i32_373 = arith.constant 3 : i32
    %653 = vector.broadcast %c3_i32_373 : i32 to vector<25x1xi32>
    %654 = arith.cmpi sle, %64, %653 : vector<25x1xi32>
    %655 = arith.extui %654 : vector<25x1xi1> to vector<25x1xi32>
    %656 = arith.sitofp %655 : vector<25x1xi32> to vector<25x1xf32>
    %657 = vector.broadcast %656 : vector<25x1xf32> to vector<25x128xf32>
    %658 = arith.mulf %652, %657 : vector<25x128xf32>
    %659 = arith.truncf %658 : vector<25x128xf32> to vector<25x128xbf16>
    %c17_374 = arith.constant 17 : index
    %c0_375 = arith.constant 0 : index
    %c0_376 = arith.constant 0 : index
    %660 = vector.load %arg7[%c17_374, %c0_375, %c0_376] : memref<25x128x128xbf16, #tpu.memory_space<vmem>>, vector<1x128x128xbf16>
    %661 = vector.shape_cast %660 : vector<1x128x128xbf16> to vector<128x128xbf16>
    %cst_377 = arith.constant dense<0.000000e+00> : vector<25x128xf32>
    %662 = tpu.matmul %659, %661, %cst_377 {dimension_numbers = #tpu.dot_dimension_numbers<[1], [0], [0], [1], [0, 0, 1, 1], [], []>} : vector<25x128xbf16>, vector<128x128xbf16>, vector<25x128xf32> -> vector<25x128xf32>
    %663 = arith.addf %651, %662 : vector<25x128xf32>
    %c18_378 = arith.constant 18 : index
    %c0_379 = arith.constant 0 : index
    %664 = vector.load %arg13[%c18_378, %c0_379] : memref<49x192xf32, #tpu.memory_space<vmem>>, vector<25x128xf32>
    %c3_i32_380 = arith.constant 3 : i32
    %665 = vector.broadcast %c3_i32_380 : i32 to vector<25x1xi32>
    %666 = arith.cmpi sle, %64, %665 : vector<25x1xi32>
    %c3_i32_381 = arith.constant 3 : i32
    %667 = vector.broadcast %c3_i32_381 : i32 to vector<25x1xi32>
    %668 = arith.cmpi sle, %67, %667 : vector<25x1xi32>
    %669 = arith.andi %666, %668 : vector<25x1xi1>
    %670 = arith.extui %669 : vector<25x1xi1> to vector<25x1xi32>
    %671 = arith.sitofp %670 : vector<25x1xi32> to vector<25x1xf32>
    %672 = vector.broadcast %671 : vector<25x1xf32> to vector<25x128xf32>
    %673 = arith.mulf %664, %672 : vector<25x128xf32>
    %674 = arith.truncf %673 : vector<25x128xf32> to vector<25x128xbf16>
    %c18_382 = arith.constant 18 : index
    %c0_383 = arith.constant 0 : index
    %c0_384 = arith.constant 0 : index
    %675 = vector.load %arg7[%c18_382, %c0_383, %c0_384] : memref<25x128x128xbf16, #tpu.memory_space<vmem>>, vector<1x128x128xbf16>
    %676 = vector.shape_cast %675 : vector<1x128x128xbf16> to vector<128x128xbf16>
    %cst_385 = arith.constant dense<0.000000e+00> : vector<25x128xf32>
    %677 = tpu.matmul %674, %676, %cst_385 {dimension_numbers = #tpu.dot_dimension_numbers<[1], [0], [0], [1], [0, 0, 1, 1], [], []>} : vector<25x128xbf16>, vector<128x128xbf16>, vector<25x128xf32> -> vector<25x128xf32>
    %678 = arith.addf %663, %677 : vector<25x128xf32>
    %c19_386 = arith.constant 19 : index
    %c0_387 = arith.constant 0 : index
    %679 = vector.load %arg13[%c19_386, %c0_387] : memref<49x192xf32, #tpu.memory_space<vmem>>, vector<25x128xf32>
    %c3_i32_388 = arith.constant 3 : i32
    %680 = vector.broadcast %c3_i32_388 : i32 to vector<25x1xi32>
    %681 = arith.cmpi sle, %64, %680 : vector<25x1xi32>
    %c2_i32_389 = arith.constant 2 : i32
    %682 = vector.broadcast %c2_i32_389 : i32 to vector<25x1xi32>
    %683 = arith.cmpi sle, %67, %682 : vector<25x1xi32>
    %684 = arith.andi %681, %683 : vector<25x1xi1>
    %685 = arith.extui %684 : vector<25x1xi1> to vector<25x1xi32>
    %686 = arith.sitofp %685 : vector<25x1xi32> to vector<25x1xf32>
    %687 = vector.broadcast %686 : vector<25x1xf32> to vector<25x128xf32>
    %688 = arith.mulf %679, %687 : vector<25x128xf32>
    %689 = arith.truncf %688 : vector<25x128xf32> to vector<25x128xbf16>
    %c19_390 = arith.constant 19 : index
    %c0_391 = arith.constant 0 : index
    %c0_392 = arith.constant 0 : index
    %690 = vector.load %arg7[%c19_390, %c0_391, %c0_392] : memref<25x128x128xbf16, #tpu.memory_space<vmem>>, vector<1x128x128xbf16>
    %691 = vector.shape_cast %690 : vector<1x128x128xbf16> to vector<128x128xbf16>
    %cst_393 = arith.constant dense<0.000000e+00> : vector<25x128xf32>
    %692 = tpu.matmul %689, %691, %cst_393 {dimension_numbers = #tpu.dot_dimension_numbers<[1], [0], [0], [1], [0, 0, 1, 1], [], []>} : vector<25x128xbf16>, vector<128x128xbf16>, vector<25x128xf32> -> vector<25x128xf32>
    %693 = arith.addf %678, %692 : vector<25x128xf32>
    %c20_394 = arith.constant 20 : index
    %c0_395 = arith.constant 0 : index
    %694 = vector.load %arg13[%c20_394, %c0_395] : memref<49x192xf32, #tpu.memory_space<vmem>>, vector<25x128xf32>
    %c2_i32_396 = arith.constant 2 : i32
    %695 = vector.broadcast %c2_i32_396 : i32 to vector<25x1xi32>
    %696 = arith.cmpi sle, %64, %695 : vector<25x1xi32>
    %c2_i32_397 = arith.constant 2 : i32
    %697 = vector.broadcast %c2_i32_397 : i32 to vector<25x1xi32>
    %698 = arith.cmpi sge, %67, %697 : vector<25x1xi32>
    %699 = arith.andi %696, %698 : vector<25x1xi1>
    %700 = arith.extui %699 : vector<25x1xi1> to vector<25x1xi32>
    %701 = arith.sitofp %700 : vector<25x1xi32> to vector<25x1xf32>
    %702 = vector.broadcast %701 : vector<25x1xf32> to vector<25x128xf32>
    %703 = arith.mulf %694, %702 : vector<25x128xf32>
    %704 = arith.truncf %703 : vector<25x128xf32> to vector<25x128xbf16>
    %c20_398 = arith.constant 20 : index
    %c0_399 = arith.constant 0 : index
    %c0_400 = arith.constant 0 : index
    %705 = vector.load %arg7[%c20_398, %c0_399, %c0_400] : memref<25x128x128xbf16, #tpu.memory_space<vmem>>, vector<1x128x128xbf16>
    %706 = vector.shape_cast %705 : vector<1x128x128xbf16> to vector<128x128xbf16>
    %cst_401 = arith.constant dense<0.000000e+00> : vector<25x128xf32>
    %707 = tpu.matmul %704, %706, %cst_401 {dimension_numbers = #tpu.dot_dimension_numbers<[1], [0], [0], [1], [0, 0, 1, 1], [], []>} : vector<25x128xbf16>, vector<128x128xbf16>, vector<25x128xf32> -> vector<25x128xf32>
    %708 = arith.addf %693, %707 : vector<25x128xf32>
    %c21_402 = arith.constant 21 : index
    %c0_403 = arith.constant 0 : index
    %709 = vector.load %arg13[%c21_402, %c0_403] : memref<49x192xf32, #tpu.memory_space<vmem>>, vector<25x128xf32>
    %c2_i32_404 = arith.constant 2 : i32
    %710 = vector.broadcast %c2_i32_404 : i32 to vector<25x1xi32>
    %711 = arith.cmpi sle, %64, %710 : vector<25x1xi32>
    %c1_i32_405 = arith.constant 1 : i32
    %712 = vector.broadcast %c1_i32_405 : i32 to vector<25x1xi32>
    %713 = arith.cmpi sge, %67, %712 : vector<25x1xi32>
    %714 = arith.andi %711, %713 : vector<25x1xi1>
    %715 = arith.extui %714 : vector<25x1xi1> to vector<25x1xi32>
    %716 = arith.sitofp %715 : vector<25x1xi32> to vector<25x1xf32>
    %717 = vector.broadcast %716 : vector<25x1xf32> to vector<25x128xf32>
    %718 = arith.mulf %709, %717 : vector<25x128xf32>
    %719 = arith.truncf %718 : vector<25x128xf32> to vector<25x128xbf16>
    %c21_406 = arith.constant 21 : index
    %c0_407 = arith.constant 0 : index
    %c0_408 = arith.constant 0 : index
    %720 = vector.load %arg7[%c21_406, %c0_407, %c0_408] : memref<25x128x128xbf16, #tpu.memory_space<vmem>>, vector<1x128x128xbf16>
    %721 = vector.shape_cast %720 : vector<1x128x128xbf16> to vector<128x128xbf16>
    %cst_409 = arith.constant dense<0.000000e+00> : vector<25x128xf32>
    %722 = tpu.matmul %719, %721, %cst_409 {dimension_numbers = #tpu.dot_dimension_numbers<[1], [0], [0], [1], [0, 0, 1, 1], [], []>} : vector<25x128xbf16>, vector<128x128xbf16>, vector<25x128xf32> -> vector<25x128xf32>
    %723 = arith.addf %708, %722 : vector<25x128xf32>
    %c22_410 = arith.constant 22 : index
    %c0_411 = arith.constant 0 : index
    %724 = vector.load %arg13[%c22_410, %c0_411] : memref<49x192xf32, #tpu.memory_space<vmem>>, vector<25x128xf32>
    %c2_i32_412 = arith.constant 2 : i32
    %725 = vector.broadcast %c2_i32_412 : i32 to vector<25x1xi32>
    %726 = arith.cmpi sle, %64, %725 : vector<25x1xi32>
    %727 = arith.extui %726 : vector<25x1xi1> to vector<25x1xi32>
    %728 = arith.sitofp %727 : vector<25x1xi32> to vector<25x1xf32>
    %729 = vector.broadcast %728 : vector<25x1xf32> to vector<25x128xf32>
    %730 = arith.mulf %724, %729 : vector<25x128xf32>
    %731 = arith.truncf %730 : vector<25x128xf32> to vector<25x128xbf16>
    %c22_413 = arith.constant 22 : index
    %c0_414 = arith.constant 0 : index
    %c0_415 = arith.constant 0 : index
    %732 = vector.load %arg7[%c22_413, %c0_414, %c0_415] : memref<25x128x128xbf16, #tpu.memory_space<vmem>>, vector<1x128x128xbf16>
    %733 = vector.shape_cast %732 : vector<1x128x128xbf16> to vector<128x128xbf16>
    %cst_416 = arith.constant dense<0.000000e+00> : vector<25x128xf32>
    %734 = tpu.matmul %731, %733, %cst_416 {dimension_numbers = #tpu.dot_dimension_numbers<[1], [0], [0], [1], [0, 0, 1, 1], [], []>} : vector<25x128xbf16>, vector<128x128xbf16>, vector<25x128xf32> -> vector<25x128xf32>
    %735 = arith.addf %723, %734 : vector<25x128xf32>
    %c23_417 = arith.constant 23 : index
    %c0_418 = arith.constant 0 : index
    %736 = vector.load %arg13[%c23_417, %c0_418] : memref<49x192xf32, #tpu.memory_space<vmem>>, vector<25x128xf32>
    %c2_i32_419 = arith.constant 2 : i32
    %737 = vector.broadcast %c2_i32_419 : i32 to vector<25x1xi32>
    %738 = arith.cmpi sle, %64, %737 : vector<25x1xi32>
    %c3_i32_420 = arith.constant 3 : i32
    %739 = vector.broadcast %c3_i32_420 : i32 to vector<25x1xi32>
    %740 = arith.cmpi sle, %67, %739 : vector<25x1xi32>
    %741 = arith.andi %738, %740 : vector<25x1xi1>
    %742 = arith.extui %741 : vector<25x1xi1> to vector<25x1xi32>
    %743 = arith.sitofp %742 : vector<25x1xi32> to vector<25x1xf32>
    %744 = vector.broadcast %743 : vector<25x1xf32> to vector<25x128xf32>
    %745 = arith.mulf %736, %744 : vector<25x128xf32>
    %746 = arith.truncf %745 : vector<25x128xf32> to vector<25x128xbf16>
    %c23_421 = arith.constant 23 : index
    %c0_422 = arith.constant 0 : index
    %c0_423 = arith.constant 0 : index
    %747 = vector.load %arg7[%c23_421, %c0_422, %c0_423] : memref<25x128x128xbf16, #tpu.memory_space<vmem>>, vector<1x128x128xbf16>
    %748 = vector.shape_cast %747 : vector<1x128x128xbf16> to vector<128x128xbf16>
    %cst_424 = arith.constant dense<0.000000e+00> : vector<25x128xf32>
    %749 = tpu.matmul %746, %748, %cst_424 {dimension_numbers = #tpu.dot_dimension_numbers<[1], [0], [0], [1], [0, 0, 1, 1], [], []>} : vector<25x128xbf16>, vector<128x128xbf16>, vector<25x128xf32> -> vector<25x128xf32>
    %750 = arith.addf %735, %749 : vector<25x128xf32>
    %c24_425 = arith.constant 24 : index
    %c0_426 = arith.constant 0 : index
    %751 = vector.load %arg13[%c24_425, %c0_426] : memref<49x192xf32, #tpu.memory_space<vmem>>, vector<25x128xf32>
    %c2_i32_427 = arith.constant 2 : i32
    %752 = vector.broadcast %c2_i32_427 : i32 to vector<25x1xi32>
    %753 = arith.cmpi sle, %64, %752 : vector<25x1xi32>
    %c2_i32_428 = arith.constant 2 : i32
    %754 = vector.broadcast %c2_i32_428 : i32 to vector<25x1xi32>
    %755 = arith.cmpi sle, %67, %754 : vector<25x1xi32>
    %756 = arith.andi %753, %755 : vector<25x1xi1>
    %757 = arith.extui %756 : vector<25x1xi1> to vector<25x1xi32>
    %758 = arith.sitofp %757 : vector<25x1xi32> to vector<25x1xf32>
    %759 = vector.broadcast %758 : vector<25x1xf32> to vector<25x128xf32>
    %760 = arith.mulf %751, %759 : vector<25x128xf32>
    %761 = arith.truncf %760 : vector<25x128xf32> to vector<25x128xbf16>
    %c24_429 = arith.constant 24 : index
    %c0_430 = arith.constant 0 : index
    %c0_431 = arith.constant 0 : index
    %762 = vector.load %arg7[%c24_429, %c0_430, %c0_431] : memref<25x128x128xbf16, #tpu.memory_space<vmem>>, vector<1x128x128xbf16>
    %763 = vector.shape_cast %762 : vector<1x128x128xbf16> to vector<128x128xbf16>
    %cst_432 = arith.constant dense<0.000000e+00> : vector<25x128xf32>
    %764 = tpu.matmul %761, %763, %cst_432 {dimension_numbers = #tpu.dot_dimension_numbers<[1], [0], [0], [1], [0, 0, 1, 1], [], []>} : vector<25x128xbf16>, vector<128x128xbf16>, vector<25x128xf32> -> vector<25x128xf32>
    %765 = arith.addf %750, %764 : vector<25x128xf32>
    %c0_433 = arith.constant 0 : index
    %c0_434 = arith.constant 0 : index
    %766 = vector.load %arg8[%c0_433, %c0_434] : memref<1x128xf32, #tpu.memory_space<vmem>>, vector<1x128xf32>
    %767 = vector.broadcast %766 : vector<1x128xf32> to vector<25x128xf32>
    %768 = arith.addf %765, %767 : vector<25x128xf32>
    %cst_435 = arith.constant 0.000000e+00 : f32
    %769 = vector.broadcast %cst_435 : f32 to vector<25x128xf32>
    %770 = arith.maximumf %768, %769 : vector<25x128xf32>
    %c12_436 = arith.constant 12 : index
    %c0_437 = arith.constant 0 : index
    %771 = vector.load %arg13[%c12_436, %c0_437] : memref<49x192xf32, #tpu.memory_space<vmem>>, vector<25x128xf32>
    tpu.vector_store %arg13[%c12_436, %c0_437], %770 {strides = array<i32>} : memref<49x192xf32, #tpu.memory_space<vmem>>, vector<25x128xf32>,
    %cst_438 = arith.constant 0.000000e+00 : f32
    %772 = vector.broadcast %cst_438 : f32 to vector<25x128xf32>
    %c0_439 = arith.constant 0 : index
    %c0_440 = arith.constant 0 : index
    %773 = vector.load %arg13[%c0_439, %c0_440] : memref<49x192xf32, #tpu.memory_space<vmem>>, vector<25x128xf32>
    %c2_i32_441 = arith.constant 2 : i32
    %774 = vector.broadcast %c2_i32_441 : i32 to vector<25x1xi32>
    %775 = arith.cmpi sge, %64, %774 : vector<25x1xi32>
    %c2_i32_442 = arith.constant 2 : i32
    %776 = vector.broadcast %c2_i32_442 : i32 to vector<25x1xi32>
    %777 = arith.cmpi sge, %67, %776 : vector<25x1xi32>
    %778 = arith.andi %775, %777 : vector<25x1xi1>
    %779 = arith.extui %778 : vector<25x1xi1> to vector<25x1xi32>
    %780 = arith.sitofp %779 : vector<25x1xi32> to vector<25x1xf32>
    %781 = vector.broadcast %780 : vector<25x1xf32> to vector<25x128xf32>
    %782 = arith.mulf %773, %781 : vector<25x128xf32>
    %783 = arith.truncf %782 : vector<25x128xf32> to vector<25x128xbf16>
    %c0_443 = arith.constant 0 : index
    %c0_444 = arith.constant 0 : index
    %c0_445 = arith.constant 0 : index
    %784 = vector.load %arg9[%c0_443, %c0_444, %c0_445] : memref<25x128x128xbf16, #tpu.memory_space<vmem>>, vector<1x128x128xbf16>
    %785 = vector.shape_cast %784 : vector<1x128x128xbf16> to vector<128x128xbf16>
    %cst_446 = arith.constant dense<0.000000e+00> : vector<25x128xf32>
    %786 = tpu.matmul %783, %785, %cst_446 {dimension_numbers = #tpu.dot_dimension_numbers<[1], [0], [0], [1], [0, 0, 1, 1], [], []>} : vector<25x128xbf16>, vector<128x128xbf16>, vector<25x128xf32> -> vector<25x128xf32>
    %787 = arith.addf %772, %786 : vector<25x128xf32>
    %c1_447 = arith.constant 1 : index
    %c0_448 = arith.constant 0 : index
    %788 = vector.load %arg13[%c1_447, %c0_448] : memref<49x192xf32, #tpu.memory_space<vmem>>, vector<25x128xf32>
    %c2_i32_449 = arith.constant 2 : i32
    %789 = vector.broadcast %c2_i32_449 : i32 to vector<25x1xi32>
    %790 = arith.cmpi sge, %64, %789 : vector<25x1xi32>
    %c1_i32_450 = arith.constant 1 : i32
    %791 = vector.broadcast %c1_i32_450 : i32 to vector<25x1xi32>
    %792 = arith.cmpi sge, %67, %791 : vector<25x1xi32>
    %793 = arith.andi %790, %792 : vector<25x1xi1>
    %794 = arith.extui %793 : vector<25x1xi1> to vector<25x1xi32>
    %795 = arith.sitofp %794 : vector<25x1xi32> to vector<25x1xf32>
    %796 = vector.broadcast %795 : vector<25x1xf32> to vector<25x128xf32>
    %797 = arith.mulf %788, %796 : vector<25x128xf32>
    %798 = arith.truncf %797 : vector<25x128xf32> to vector<25x128xbf16>
    %c1_451 = arith.constant 1 : index
    %c0_452 = arith.constant 0 : index
    %c0_453 = arith.constant 0 : index
    %799 = vector.load %arg9[%c1_451, %c0_452, %c0_453] : memref<25x128x128xbf16, #tpu.memory_space<vmem>>, vector<1x128x128xbf16>
    %800 = vector.shape_cast %799 : vector<1x128x128xbf16> to vector<128x128xbf16>
    %cst_454 = arith.constant dense<0.000000e+00> : vector<25x128xf32>
    %801 = tpu.matmul %798, %800, %cst_454 {dimension_numbers = #tpu.dot_dimension_numbers<[1], [0], [0], [1], [0, 0, 1, 1], [], []>} : vector<25x128xbf16>, vector<128x128xbf16>, vector<25x128xf32> -> vector<25x128xf32>
    %802 = arith.addf %787, %801 : vector<25x128xf32>
    %c2_455 = arith.constant 2 : index
    %c0_456 = arith.constant 0 : index
    %803 = vector.load %arg13[%c2_455, %c0_456] : memref<49x192xf32, #tpu.memory_space<vmem>>, vector<25x128xf32>
    %c2_i32_457 = arith.constant 2 : i32
    %804 = vector.broadcast %c2_i32_457 : i32 to vector<25x1xi32>
    %805 = arith.cmpi sge, %64, %804 : vector<25x1xi32>
    %806 = arith.extui %805 : vector<25x1xi1> to vector<25x1xi32>
    %807 = arith.sitofp %806 : vector<25x1xi32> to vector<25x1xf32>
    %808 = vector.broadcast %807 : vector<25x1xf32> to vector<25x128xf32>
    %809 = arith.mulf %803, %808 : vector<25x128xf32>
    %810 = arith.truncf %809 : vector<25x128xf32> to vector<25x128xbf16>
    %c2_458 = arith.constant 2 : index
    %c0_459 = arith.constant 0 : index
    %c0_460 = arith.constant 0 : index
    %811 = vector.load %arg9[%c2_458, %c0_459, %c0_460] : memref<25x128x128xbf16, #tpu.memory_space<vmem>>, vector<1x128x128xbf16>
    %812 = vector.shape_cast %811 : vector<1x128x128xbf16> to vector<128x128xbf16>
    %cst_461 = arith.constant dense<0.000000e+00> : vector<25x128xf32>
    %813 = tpu.matmul %810, %812, %cst_461 {dimension_numbers = #tpu.dot_dimension_numbers<[1], [0], [0], [1], [0, 0, 1, 1], [], []>} : vector<25x128xbf16>, vector<128x128xbf16>, vector<25x128xf32> -> vector<25x128xf32>
    %814 = arith.addf %802, %813 : vector<25x128xf32>
    %c3_462 = arith.constant 3 : index
    %c0_463 = arith.constant 0 : index
    %815 = vector.load %arg13[%c3_462, %c0_463] : memref<49x192xf32, #tpu.memory_space<vmem>>, vector<25x128xf32>
    %c2_i32_464 = arith.constant 2 : i32
    %816 = vector.broadcast %c2_i32_464 : i32 to vector<25x1xi32>
    %817 = arith.cmpi sge, %64, %816 : vector<25x1xi32>
    %c3_i32_465 = arith.constant 3 : i32
    %818 = vector.broadcast %c3_i32_465 : i32 to vector<25x1xi32>
    %819 = arith.cmpi sle, %67, %818 : vector<25x1xi32>
    %820 = arith.andi %817, %819 : vector<25x1xi1>
    %821 = arith.extui %820 : vector<25x1xi1> to vector<25x1xi32>
    %822 = arith.sitofp %821 : vector<25x1xi32> to vector<25x1xf32>
    %823 = vector.broadcast %822 : vector<25x1xf32> to vector<25x128xf32>
    %824 = arith.mulf %815, %823 : vector<25x128xf32>
    %825 = arith.truncf %824 : vector<25x128xf32> to vector<25x128xbf16>
    %c3_466 = arith.constant 3 : index
    %c0_467 = arith.constant 0 : index
    %c0_468 = arith.constant 0 : index
    %826 = vector.load %arg9[%c3_466, %c0_467, %c0_468] : memref<25x128x128xbf16, #tpu.memory_space<vmem>>, vector<1x128x128xbf16>
    %827 = vector.shape_cast %826 : vector<1x128x128xbf16> to vector<128x128xbf16>
    %cst_469 = arith.constant dense<0.000000e+00> : vector<25x128xf32>
    %828 = tpu.matmul %825, %827, %cst_469 {dimension_numbers = #tpu.dot_dimension_numbers<[1], [0], [0], [1], [0, 0, 1, 1], [], []>} : vector<25x128xbf16>, vector<128x128xbf16>, vector<25x128xf32> -> vector<25x128xf32>
    %829 = arith.addf %814, %828 : vector<25x128xf32>
    %c4_470 = arith.constant 4 : index
    %c0_471 = arith.constant 0 : index
    %830 = vector.load %arg13[%c4_470, %c0_471] : memref<49x192xf32, #tpu.memory_space<vmem>>, vector<25x128xf32>
    %c2_i32_472 = arith.constant 2 : i32
    %831 = vector.broadcast %c2_i32_472 : i32 to vector<25x1xi32>
    %832 = arith.cmpi sge, %64, %831 : vector<25x1xi32>
    %c2_i32_473 = arith.constant 2 : i32
    %833 = vector.broadcast %c2_i32_473 : i32 to vector<25x1xi32>
    %834 = arith.cmpi sle, %67, %833 : vector<25x1xi32>
    %835 = arith.andi %832, %834 : vector<25x1xi1>
    %836 = arith.extui %835 : vector<25x1xi1> to vector<25x1xi32>
    %837 = arith.sitofp %836 : vector<25x1xi32> to vector<25x1xf32>
    %838 = vector.broadcast %837 : vector<25x1xf32> to vector<25x128xf32>
    %839 = arith.mulf %830, %838 : vector<25x128xf32>
    %840 = arith.truncf %839 : vector<25x128xf32> to vector<25x128xbf16>
    %c4_474 = arith.constant 4 : index
    %c0_475 = arith.constant 0 : index
    %c0_476 = arith.constant 0 : index
    %841 = vector.load %arg9[%c4_474, %c0_475, %c0_476] : memref<25x128x128xbf16, #tpu.memory_space<vmem>>, vector<1x128x128xbf16>
    %842 = vector.shape_cast %841 : vector<1x128x128xbf16> to vector<128x128xbf16>
    %cst_477 = arith.constant dense<0.000000e+00> : vector<25x128xf32>
    %843 = tpu.matmul %840, %842, %cst_477 {dimension_numbers = #tpu.dot_dimension_numbers<[1], [0], [0], [1], [0, 0, 1, 1], [], []>} : vector<25x128xbf16>, vector<128x128xbf16>, vector<25x128xf32> -> vector<25x128xf32>
    %844 = arith.addf %829, %843 : vector<25x128xf32>
    %c5_478 = arith.constant 5 : index
    %c0_479 = arith.constant 0 : index
    %845 = vector.load %arg13[%c5_478, %c0_479] : memref<49x192xf32, #tpu.memory_space<vmem>>, vector<25x128xf32>
    %c1_i32_480 = arith.constant 1 : i32
    %846 = vector.broadcast %c1_i32_480 : i32 to vector<25x1xi32>
    %847 = arith.cmpi sge, %64, %846 : vector<25x1xi32>
    %c2_i32_481 = arith.constant 2 : i32
    %848 = vector.broadcast %c2_i32_481 : i32 to vector<25x1xi32>
    %849 = arith.cmpi sge, %67, %848 : vector<25x1xi32>
    %850 = arith.andi %847, %849 : vector<25x1xi1>
    %851 = arith.extui %850 : vector<25x1xi1> to vector<25x1xi32>
    %852 = arith.sitofp %851 : vector<25x1xi32> to vector<25x1xf32>
    %853 = vector.broadcast %852 : vector<25x1xf32> to vector<25x128xf32>
    %854 = arith.mulf %845, %853 : vector<25x128xf32>
    %855 = arith.truncf %854 : vector<25x128xf32> to vector<25x128xbf16>
    %c5_482 = arith.constant 5 : index
    %c0_483 = arith.constant 0 : index
    %c0_484 = arith.constant 0 : index
    %856 = vector.load %arg9[%c5_482, %c0_483, %c0_484] : memref<25x128x128xbf16, #tpu.memory_space<vmem>>, vector<1x128x128xbf16>
    %857 = vector.shape_cast %856 : vector<1x128x128xbf16> to vector<128x128xbf16>
    %cst_485 = arith.constant dense<0.000000e+00> : vector<25x128xf32>
    %858 = tpu.matmul %855, %857, %cst_485 {dimension_numbers = #tpu.dot_dimension_numbers<[1], [0], [0], [1], [0, 0, 1, 1], [], []>} : vector<25x128xbf16>, vector<128x128xbf16>, vector<25x128xf32> -> vector<25x128xf32>
    %859 = arith.addf %844, %858 : vector<25x128xf32>
    %c6_486 = arith.constant 6 : index
    %c0_487 = arith.constant 0 : index
    %860 = vector.load %arg13[%c6_486, %c0_487] : memref<49x192xf32, #tpu.memory_space<vmem>>, vector<25x128xf32>
    %c1_i32_488 = arith.constant 1 : i32
    %861 = vector.broadcast %c1_i32_488 : i32 to vector<25x1xi32>
    %862 = arith.cmpi sge, %64, %861 : vector<25x1xi32>
    %c1_i32_489 = arith.constant 1 : i32
    %863 = vector.broadcast %c1_i32_489 : i32 to vector<25x1xi32>
    %864 = arith.cmpi sge, %67, %863 : vector<25x1xi32>
    %865 = arith.andi %862, %864 : vector<25x1xi1>
    %866 = arith.extui %865 : vector<25x1xi1> to vector<25x1xi32>
    %867 = arith.sitofp %866 : vector<25x1xi32> to vector<25x1xf32>
    %868 = vector.broadcast %867 : vector<25x1xf32> to vector<25x128xf32>
    %869 = arith.mulf %860, %868 : vector<25x128xf32>
    %870 = arith.truncf %869 : vector<25x128xf32> to vector<25x128xbf16>
    %c6_490 = arith.constant 6 : index
    %c0_491 = arith.constant 0 : index
    %c0_492 = arith.constant 0 : index
    %871 = vector.load %arg9[%c6_490, %c0_491, %c0_492] : memref<25x128x128xbf16, #tpu.memory_space<vmem>>, vector<1x128x128xbf16>
    %872 = vector.shape_cast %871 : vector<1x128x128xbf16> to vector<128x128xbf16>
    %cst_493 = arith.constant dense<0.000000e+00> : vector<25x128xf32>
    %873 = tpu.matmul %870, %872, %cst_493 {dimension_numbers = #tpu.dot_dimension_numbers<[1], [0], [0], [1], [0, 0, 1, 1], [], []>} : vector<25x128xbf16>, vector<128x128xbf16>, vector<25x128xf32> -> vector<25x128xf32>
    %874 = arith.addf %859, %873 : vector<25x128xf32>
    %c7_494 = arith.constant 7 : index
    %c0_495 = arith.constant 0 : index
    %875 = vector.load %arg13[%c7_494, %c0_495] : memref<49x192xf32, #tpu.memory_space<vmem>>, vector<25x128xf32>
    %c1_i32_496 = arith.constant 1 : i32
    %876 = vector.broadcast %c1_i32_496 : i32 to vector<25x1xi32>
    %877 = arith.cmpi sge, %64, %876 : vector<25x1xi32>
    %878 = arith.extui %877 : vector<25x1xi1> to vector<25x1xi32>
    %879 = arith.sitofp %878 : vector<25x1xi32> to vector<25x1xf32>
    %880 = vector.broadcast %879 : vector<25x1xf32> to vector<25x128xf32>
    %881 = arith.mulf %875, %880 : vector<25x128xf32>
    %882 = arith.truncf %881 : vector<25x128xf32> to vector<25x128xbf16>
    %c7_497 = arith.constant 7 : index
    %c0_498 = arith.constant 0 : index
    %c0_499 = arith.constant 0 : index
    %883 = vector.load %arg9[%c7_497, %c0_498, %c0_499] : memref<25x128x128xbf16, #tpu.memory_space<vmem>>, vector<1x128x128xbf16>
    %884 = vector.shape_cast %883 : vector<1x128x128xbf16> to vector<128x128xbf16>
    %cst_500 = arith.constant dense<0.000000e+00> : vector<25x128xf32>
    %885 = tpu.matmul %882, %884, %cst_500 {dimension_numbers = #tpu.dot_dimension_numbers<[1], [0], [0], [1], [0, 0, 1, 1], [], []>} : vector<25x128xbf16>, vector<128x128xbf16>, vector<25x128xf32> -> vector<25x128xf32>
    %886 = arith.addf %874, %885 : vector<25x128xf32>
    %c8_501 = arith.constant 8 : index
    %c0_502 = arith.constant 0 : index
    %887 = vector.load %arg13[%c8_501, %c0_502] : memref<49x192xf32, #tpu.memory_space<vmem>>, vector<25x128xf32>
    %c1_i32_503 = arith.constant 1 : i32
    %888 = vector.broadcast %c1_i32_503 : i32 to vector<25x1xi32>
    %889 = arith.cmpi sge, %64, %888 : vector<25x1xi32>
    %c3_i32_504 = arith.constant 3 : i32
    %890 = vector.broadcast %c3_i32_504 : i32 to vector<25x1xi32>
    %891 = arith.cmpi sle, %67, %890 : vector<25x1xi32>
    %892 = arith.andi %889, %891 : vector<25x1xi1>
    %893 = arith.extui %892 : vector<25x1xi1> to vector<25x1xi32>
    %894 = arith.sitofp %893 : vector<25x1xi32> to vector<25x1xf32>
    %895 = vector.broadcast %894 : vector<25x1xf32> to vector<25x128xf32>
    %896 = arith.mulf %887, %895 : vector<25x128xf32>
    %897 = arith.truncf %896 : vector<25x128xf32> to vector<25x128xbf16>
    %c8_505 = arith.constant 8 : index
    %c0_506 = arith.constant 0 : index
    %c0_507 = arith.constant 0 : index
    %898 = vector.load %arg9[%c8_505, %c0_506, %c0_507] : memref<25x128x128xbf16, #tpu.memory_space<vmem>>, vector<1x128x128xbf16>
    %899 = vector.shape_cast %898 : vector<1x128x128xbf16> to vector<128x128xbf16>
    %cst_508 = arith.constant dense<0.000000e+00> : vector<25x128xf32>
    %900 = tpu.matmul %897, %899, %cst_508 {dimension_numbers = #tpu.dot_dimension_numbers<[1], [0], [0], [1], [0, 0, 1, 1], [], []>} : vector<25x128xbf16>, vector<128x128xbf16>, vector<25x128xf32> -> vector<25x128xf32>
    %901 = arith.addf %886, %900 : vector<25x128xf32>
    %c9_509 = arith.constant 9 : index
    %c0_510 = arith.constant 0 : index
    %902 = vector.load %arg13[%c9_509, %c0_510] : memref<49x192xf32, #tpu.memory_space<vmem>>, vector<25x128xf32>
    %c1_i32_511 = arith.constant 1 : i32
    %903 = vector.broadcast %c1_i32_511 : i32 to vector<25x1xi32>
    %904 = arith.cmpi sge, %64, %903 : vector<25x1xi32>
    %c2_i32_512 = arith.constant 2 : i32
    %905 = vector.broadcast %c2_i32_512 : i32 to vector<25x1xi32>
    %906 = arith.cmpi sle, %67, %905 : vector<25x1xi32>
    %907 = arith.andi %904, %906 : vector<25x1xi1>
    %908 = arith.extui %907 : vector<25x1xi1> to vector<25x1xi32>
    %909 = arith.sitofp %908 : vector<25x1xi32> to vector<25x1xf32>
    %910 = vector.broadcast %909 : vector<25x1xf32> to vector<25x128xf32>
    %911 = arith.mulf %902, %910 : vector<25x128xf32>
    %912 = arith.truncf %911 : vector<25x128xf32> to vector<25x128xbf16>
    %c9_513 = arith.constant 9 : index
    %c0_514 = arith.constant 0 : index
    %c0_515 = arith.constant 0 : index
    %913 = vector.load %arg9[%c9_513, %c0_514, %c0_515] : memref<25x128x128xbf16, #tpu.memory_space<vmem>>, vector<1x128x128xbf16>
    %914 = vector.shape_cast %913 : vector<1x128x128xbf16> to vector<128x128xbf16>
    %cst_516 = arith.constant dense<0.000000e+00> : vector<25x128xf32>
    %915 = tpu.matmul %912, %914, %cst_516 {dimension_numbers = #tpu.dot_dimension_numbers<[1], [0], [0], [1], [0, 0, 1, 1], [], []>} : vector<25x128xbf16>, vector<128x128xbf16>, vector<25x128xf32> -> vector<25x128xf32>
    %916 = arith.addf %901, %915 : vector<25x128xf32>
    %c10_517 = arith.constant 10 : index
    %c0_518 = arith.constant 0 : index
    %917 = vector.load %arg13[%c10_517, %c0_518] : memref<49x192xf32, #tpu.memory_space<vmem>>, vector<25x128xf32>
    %c2_i32_519 = arith.constant 2 : i32
    %918 = vector.broadcast %c2_i32_519 : i32 to vector<25x1xi32>
    %919 = arith.cmpi sge, %67, %918 : vector<25x1xi32>
    %920 = arith.extui %919 : vector<25x1xi1> to vector<25x1xi32>
    %921 = arith.sitofp %920 : vector<25x1xi32> to vector<25x1xf32>
    %922 = vector.broadcast %921 : vector<25x1xf32> to vector<25x128xf32>
    %923 = arith.mulf %917, %922 : vector<25x128xf32>
    %924 = arith.truncf %923 : vector<25x128xf32> to vector<25x128xbf16>
    %c10_520 = arith.constant 10 : index
    %c0_521 = arith.constant 0 : index
    %c0_522 = arith.constant 0 : index
    %925 = vector.load %arg9[%c10_520, %c0_521, %c0_522] : memref<25x128x128xbf16, #tpu.memory_space<vmem>>, vector<1x128x128xbf16>
    %926 = vector.shape_cast %925 : vector<1x128x128xbf16> to vector<128x128xbf16>
    %cst_523 = arith.constant dense<0.000000e+00> : vector<25x128xf32>
    %927 = tpu.matmul %924, %926, %cst_523 {dimension_numbers = #tpu.dot_dimension_numbers<[1], [0], [0], [1], [0, 0, 1, 1], [], []>} : vector<25x128xbf16>, vector<128x128xbf16>, vector<25x128xf32> -> vector<25x128xf32>
    %928 = arith.addf %916, %927 : vector<25x128xf32>
    %c11_524 = arith.constant 11 : index
    %c0_525 = arith.constant 0 : index
    %929 = vector.load %arg13[%c11_524, %c0_525] : memref<49x192xf32, #tpu.memory_space<vmem>>, vector<25x128xf32>
    %c1_i32_526 = arith.constant 1 : i32
    %930 = vector.broadcast %c1_i32_526 : i32 to vector<25x1xi32>
    %931 = arith.cmpi sge, %67, %930 : vector<25x1xi32>
    %932 = arith.extui %931 : vector<25x1xi1> to vector<25x1xi32>
    %933 = arith.sitofp %932 : vector<25x1xi32> to vector<25x1xf32>
    %934 = vector.broadcast %933 : vector<25x1xf32> to vector<25x128xf32>
    %935 = arith.mulf %929, %934 : vector<25x128xf32>
    %936 = arith.truncf %935 : vector<25x128xf32> to vector<25x128xbf16>
    %c11_527 = arith.constant 11 : index
    %c0_528 = arith.constant 0 : index
    %c0_529 = arith.constant 0 : index
    %937 = vector.load %arg9[%c11_527, %c0_528, %c0_529] : memref<25x128x128xbf16, #tpu.memory_space<vmem>>, vector<1x128x128xbf16>
    %938 = vector.shape_cast %937 : vector<1x128x128xbf16> to vector<128x128xbf16>
    %cst_530 = arith.constant dense<0.000000e+00> : vector<25x128xf32>
    %939 = tpu.matmul %936, %938, %cst_530 {dimension_numbers = #tpu.dot_dimension_numbers<[1], [0], [0], [1], [0, 0, 1, 1], [], []>} : vector<25x128xbf16>, vector<128x128xbf16>, vector<25x128xf32> -> vector<25x128xf32>
    %940 = arith.addf %928, %939 : vector<25x128xf32>
    %c12_531 = arith.constant 12 : index
    %c0_532 = arith.constant 0 : index
    %941 = vector.load %arg13[%c12_531, %c0_532] : memref<49x192xf32, #tpu.memory_space<vmem>>, vector<25x128xf32>
    %942 = arith.truncf %941 : vector<25x128xf32> to vector<25x128xbf16>
    %c12_533 = arith.constant 12 : index
    %c0_534 = arith.constant 0 : index
    %c0_535 = arith.constant 0 : index
    %943 = vector.load %arg9[%c12_533, %c0_534, %c0_535] : memref<25x128x128xbf16, #tpu.memory_space<vmem>>, vector<1x128x128xbf16>
    %944 = vector.shape_cast %943 : vector<1x128x128xbf16> to vector<128x128xbf16>
    %cst_536 = arith.constant dense<0.000000e+00> : vector<25x128xf32>
    %945 = tpu.matmul %942, %944, %cst_536 {dimension_numbers = #tpu.dot_dimension_numbers<[1], [0], [0], [1], [0, 0, 1, 1], [], []>} : vector<25x128xbf16>, vector<128x128xbf16>, vector<25x128xf32> -> vector<25x128xf32>
    %946 = arith.addf %940, %945 : vector<25x128xf32>
    %c13_537 = arith.constant 13 : index
    %c0_538 = arith.constant 0 : index
    %947 = vector.load %arg13[%c13_537, %c0_538] : memref<49x192xf32, #tpu.memory_space<vmem>>, vector<25x128xf32>
    %c3_i32_539 = arith.constant 3 : i32
    %948 = vector.broadcast %c3_i32_539 : i32 to vector<25x1xi32>
    %949 = arith.cmpi sle, %67, %948 : vector<25x1xi32>
    %950 = arith.extui %949 : vector<25x1xi1> to vector<25x1xi32>
    %951 = arith.sitofp %950 : vector<25x1xi32> to vector<25x1xf32>
    %952 = vector.broadcast %951 : vector<25x1xf32> to vector<25x128xf32>
    %953 = arith.mulf %947, %952 : vector<25x128xf32>
    %954 = arith.truncf %953 : vector<25x128xf32> to vector<25x128xbf16>
    %c13_540 = arith.constant 13 : index
    %c0_541 = arith.constant 0 : index
    %c0_542 = arith.constant 0 : index
    %955 = vector.load %arg9[%c13_540, %c0_541, %c0_542] : memref<25x128x128xbf16, #tpu.memory_space<vmem>>, vector<1x128x128xbf16>
    %956 = vector.shape_cast %955 : vector<1x128x128xbf16> to vector<128x128xbf16>
    %cst_543 = arith.constant dense<0.000000e+00> : vector<25x128xf32>
    %957 = tpu.matmul %954, %956, %cst_543 {dimension_numbers = #tpu.dot_dimension_numbers<[1], [0], [0], [1], [0, 0, 1, 1], [], []>} : vector<25x128xbf16>, vector<128x128xbf16>, vector<25x128xf32> -> vector<25x128xf32>
    %958 = arith.addf %946, %957 : vector<25x128xf32>
    %c14_544 = arith.constant 14 : index
    %c0_545 = arith.constant 0 : index
    %959 = vector.load %arg13[%c14_544, %c0_545] : memref<49x192xf32, #tpu.memory_space<vmem>>, vector<25x128xf32>
    %c2_i32_546 = arith.constant 2 : i32
    %960 = vector.broadcast %c2_i32_546 : i32 to vector<25x1xi32>
    %961 = arith.cmpi sle, %67, %960 : vector<25x1xi32>
    %962 = arith.extui %961 : vector<25x1xi1> to vector<25x1xi32>
    %963 = arith.sitofp %962 : vector<25x1xi32> to vector<25x1xf32>
    %964 = vector.broadcast %963 : vector<25x1xf32> to vector<25x128xf32>
    %965 = arith.mulf %959, %964 : vector<25x128xf32>
    %966 = arith.truncf %965 : vector<25x128xf32> to vector<25x128xbf16>
    %c14_547 = arith.constant 14 : index
    %c0_548 = arith.constant 0 : index
    %c0_549 = arith.constant 0 : index
    %967 = vector.load %arg9[%c14_547, %c0_548, %c0_549] : memref<25x128x128xbf16, #tpu.memory_space<vmem>>, vector<1x128x128xbf16>
    %968 = vector.shape_cast %967 : vector<1x128x128xbf16> to vector<128x128xbf16>
    %cst_550 = arith.constant dense<0.000000e+00> : vector<25x128xf32>
    %969 = tpu.matmul %966, %968, %cst_550 {dimension_numbers = #tpu.dot_dimension_numbers<[1], [0], [0], [1], [0, 0, 1, 1], [], []>} : vector<25x128xbf16>, vector<128x128xbf16>, vector<25x128xf32> -> vector<25x128xf32>
    %970 = arith.addf %958, %969 : vector<25x128xf32>
    %c15_551 = arith.constant 15 : index
    %c0_552 = arith.constant 0 : index
    %971 = vector.load %arg13[%c15_551, %c0_552] : memref<49x192xf32, #tpu.memory_space<vmem>>, vector<25x128xf32>
    %c3_i32_553 = arith.constant 3 : i32
    %972 = vector.broadcast %c3_i32_553 : i32 to vector<25x1xi32>
    %973 = arith.cmpi sle, %64, %972 : vector<25x1xi32>
    %c2_i32_554 = arith.constant 2 : i32
    %974 = vector.broadcast %c2_i32_554 : i32 to vector<25x1xi32>
    %975 = arith.cmpi sge, %67, %974 : vector<25x1xi32>
    %976 = arith.andi %973, %975 : vector<25x1xi1>
    %977 = arith.extui %976 : vector<25x1xi1> to vector<25x1xi32>
    %978 = arith.sitofp %977 : vector<25x1xi32> to vector<25x1xf32>
    %979 = vector.broadcast %978 : vector<25x1xf32> to vector<25x128xf32>
    %980 = arith.mulf %971, %979 : vector<25x128xf32>
    %981 = arith.truncf %980 : vector<25x128xf32> to vector<25x128xbf16>
    %c15_555 = arith.constant 15 : index
    %c0_556 = arith.constant 0 : index
    %c0_557 = arith.constant 0 : index
    %982 = vector.load %arg9[%c15_555, %c0_556, %c0_557] : memref<25x128x128xbf16, #tpu.memory_space<vmem>>, vector<1x128x128xbf16>
    %983 = vector.shape_cast %982 : vector<1x128x128xbf16> to vector<128x128xbf16>
    %cst_558 = arith.constant dense<0.000000e+00> : vector<25x128xf32>
    %984 = tpu.matmul %981, %983, %cst_558 {dimension_numbers = #tpu.dot_dimension_numbers<[1], [0], [0], [1], [0, 0, 1, 1], [], []>} : vector<25x128xbf16>, vector<128x128xbf16>, vector<25x128xf32> -> vector<25x128xf32>
    %985 = arith.addf %970, %984 : vector<25x128xf32>
    %c16_559 = arith.constant 16 : index
    %c0_560 = arith.constant 0 : index
    %986 = vector.load %arg13[%c16_559, %c0_560] : memref<49x192xf32, #tpu.memory_space<vmem>>, vector<25x128xf32>
    %c3_i32_561 = arith.constant 3 : i32
    %987 = vector.broadcast %c3_i32_561 : i32 to vector<25x1xi32>
    %988 = arith.cmpi sle, %64, %987 : vector<25x1xi32>
    %c1_i32_562 = arith.constant 1 : i32
    %989 = vector.broadcast %c1_i32_562 : i32 to vector<25x1xi32>
    %990 = arith.cmpi sge, %67, %989 : vector<25x1xi32>
    %991 = arith.andi %988, %990 : vector<25x1xi1>
    %992 = arith.extui %991 : vector<25x1xi1> to vector<25x1xi32>
    %993 = arith.sitofp %992 : vector<25x1xi32> to vector<25x1xf32>
    %994 = vector.broadcast %993 : vector<25x1xf32> to vector<25x128xf32>
    %995 = arith.mulf %986, %994 : vector<25x128xf32>
    %996 = arith.truncf %995 : vector<25x128xf32> to vector<25x128xbf16>
    %c16_563 = arith.constant 16 : index
    %c0_564 = arith.constant 0 : index
    %c0_565 = arith.constant 0 : index
    %997 = vector.load %arg9[%c16_563, %c0_564, %c0_565] : memref<25x128x128xbf16, #tpu.memory_space<vmem>>, vector<1x128x128xbf16>
    %998 = vector.shape_cast %997 : vector<1x128x128xbf16> to vector<128x128xbf16>
    %cst_566 = arith.constant dense<0.000000e+00> : vector<25x128xf32>
    %999 = tpu.matmul %996, %998, %cst_566 {dimension_numbers = #tpu.dot_dimension_numbers<[1], [0], [0], [1], [0, 0, 1, 1], [], []>} : vector<25x128xbf16>, vector<128x128xbf16>, vector<25x128xf32> -> vector<25x128xf32>
    %1000 = arith.addf %985, %999 : vector<25x128xf32>
    %c17_567 = arith.constant 17 : index
    %c0_568 = arith.constant 0 : index
    %1001 = vector.load %arg13[%c17_567, %c0_568] : memref<49x192xf32, #tpu.memory_space<vmem>>, vector<25x128xf32>
    %c3_i32_569 = arith.constant 3 : i32
    %1002 = vector.broadcast %c3_i32_569 : i32 to vector<25x1xi32>
    %1003 = arith.cmpi sle, %64, %1002 : vector<25x1xi32>
    %1004 = arith.extui %1003 : vector<25x1xi1> to vector<25x1xi32>
    %1005 = arith.sitofp %1004 : vector<25x1xi32> to vector<25x1xf32>
    %1006 = vector.broadcast %1005 : vector<25x1xf32> to vector<25x128xf32>
    %1007 = arith.mulf %1001, %1006 : vector<25x128xf32>
    %1008 = arith.truncf %1007 : vector<25x128xf32> to vector<25x128xbf16>
    %c17_570 = arith.constant 17 : index
    %c0_571 = arith.constant 0 : index
    %c0_572 = arith.constant 0 : index
    %1009 = vector.load %arg9[%c17_570, %c0_571, %c0_572] : memref<25x128x128xbf16, #tpu.memory_space<vmem>>, vector<1x128x128xbf16>
    %1010 = vector.shape_cast %1009 : vector<1x128x128xbf16> to vector<128x128xbf16>
    %cst_573 = arith.constant dense<0.000000e+00> : vector<25x128xf32>
    %1011 = tpu.matmul %1008, %1010, %cst_573 {dimension_numbers = #tpu.dot_dimension_numbers<[1], [0], [0], [1], [0, 0, 1, 1], [], []>} : vector<25x128xbf16>, vector<128x128xbf16>, vector<25x128xf32> -> vector<25x128xf32>
    %1012 = arith.addf %1000, %1011 : vector<25x128xf32>
    %c18_574 = arith.constant 18 : index
    %c0_575 = arith.constant 0 : index
    %1013 = vector.load %arg13[%c18_574, %c0_575] : memref<49x192xf32, #tpu.memory_space<vmem>>, vector<25x128xf32>
    %c3_i32_576 = arith.constant 3 : i32
    %1014 = vector.broadcast %c3_i32_576 : i32 to vector<25x1xi32>
    %1015 = arith.cmpi sle, %64, %1014 : vector<25x1xi32>
    %c3_i32_577 = arith.constant 3 : i32
    %1016 = vector.broadcast %c3_i32_577 : i32 to vector<25x1xi32>
    %1017 = arith.cmpi sle, %67, %1016 : vector<25x1xi32>
    %1018 = arith.andi %1015, %1017 : vector<25x1xi1>
    %1019 = arith.extui %1018 : vector<25x1xi1> to vector<25x1xi32>
    %1020 = arith.sitofp %1019 : vector<25x1xi32> to vector<25x1xf32>
    %1021 = vector.broadcast %1020 : vector<25x1xf32> to vector<25x128xf32>
    %1022 = arith.mulf %1013, %1021 : vector<25x128xf32>
    %1023 = arith.truncf %1022 : vector<25x128xf32> to vector<25x128xbf16>
    %c18_578 = arith.constant 18 : index
    %c0_579 = arith.constant 0 : index
    %c0_580 = arith.constant 0 : index
    %1024 = vector.load %arg9[%c18_578, %c0_579, %c0_580] : memref<25x128x128xbf16, #tpu.memory_space<vmem>>, vector<1x128x128xbf16>
    %1025 = vector.shape_cast %1024 : vector<1x128x128xbf16> to vector<128x128xbf16>
    %cst_581 = arith.constant dense<0.000000e+00> : vector<25x128xf32>
    %1026 = tpu.matmul %1023, %1025, %cst_581 {dimension_numbers = #tpu.dot_dimension_numbers<[1], [0], [0], [1], [0, 0, 1, 1], [], []>} : vector<25x128xbf16>, vector<128x128xbf16>, vector<25x128xf32> -> vector<25x128xf32>
    %1027 = arith.addf %1012, %1026 : vector<25x128xf32>
    %c19_582 = arith.constant 19 : index
    %c0_583 = arith.constant 0 : index
    %1028 = vector.load %arg13[%c19_582, %c0_583] : memref<49x192xf32, #tpu.memory_space<vmem>>, vector<25x128xf32>
    %c3_i32_584 = arith.constant 3 : i32
    %1029 = vector.broadcast %c3_i32_584 : i32 to vector<25x1xi32>
    %1030 = arith.cmpi sle, %64, %1029 : vector<25x1xi32>
    %c2_i32_585 = arith.constant 2 : i32
    %1031 = vector.broadcast %c2_i32_585 : i32 to vector<25x1xi32>
    %1032 = arith.cmpi sle, %67, %1031 : vector<25x1xi32>
    %1033 = arith.andi %1030, %1032 : vector<25x1xi1>
    %1034 = arith.extui %1033 : vector<25x1xi1> to vector<25x1xi32>
    %1035 = arith.sitofp %1034 : vector<25x1xi32> to vector<25x1xf32>
    %1036 = vector.broadcast %1035 : vector<25x1xf32> to vector<25x128xf32>
    %1037 = arith.mulf %1028, %1036 : vector<25x128xf32>
    %1038 = arith.truncf %1037 : vector<25x128xf32> to vector<25x128xbf16>
    %c19_586 = arith.constant 19 : index
    %c0_587 = arith.constant 0 : index
    %c0_588 = arith.constant 0 : index
    %1039 = vector.load %arg9[%c19_586, %c0_587, %c0_588] : memref<25x128x128xbf16, #tpu.memory_space<vmem>>, vector<1x128x128xbf16>
    %1040 = vector.shape_cast %1039 : vector<1x128x128xbf16> to vector<128x128xbf16>
    %cst_589 = arith.constant dense<0.000000e+00> : vector<25x128xf32>
    %1041 = tpu.matmul %1038, %1040, %cst_589 {dimension_numbers = #tpu.dot_dimension_numbers<[1], [0], [0], [1], [0, 0, 1, 1], [], []>} : vector<25x128xbf16>, vector<128x128xbf16>, vector<25x128xf32> -> vector<25x128xf32>
    %1042 = arith.addf %1027, %1041 : vector<25x128xf32>
    %c20_590 = arith.constant 20 : index
    %c0_591 = arith.constant 0 : index
    %1043 = vector.load %arg13[%c20_590, %c0_591] : memref<49x192xf32, #tpu.memory_space<vmem>>, vector<25x128xf32>
    %c2_i32_592 = arith.constant 2 : i32
    %1044 = vector.broadcast %c2_i32_592 : i32 to vector<25x1xi32>
    %1045 = arith.cmpi sle, %64, %1044 : vector<25x1xi32>
    %c2_i32_593 = arith.constant 2 : i32
    %1046 = vector.broadcast %c2_i32_593 : i32 to vector<25x1xi32>
    %1047 = arith.cmpi sge, %67, %1046 : vector<25x1xi32>
    %1048 = arith.andi %1045, %1047 : vector<25x1xi1>
    %1049 = arith.extui %1048 : vector<25x1xi1> to vector<25x1xi32>
    %1050 = arith.sitofp %1049 : vector<25x1xi32> to vector<25x1xf32>
    %1051 = vector.broadcast %1050 : vector<25x1xf32> to vector<25x128xf32>
    %1052 = arith.mulf %1043, %1051 : vector<25x128xf32>
    %1053 = arith.truncf %1052 : vector<25x128xf32> to vector<25x128xbf16>
    %c20_594 = arith.constant 20 : index
    %c0_595 = arith.constant 0 : index
    %c0_596 = arith.constant 0 : index
    %1054 = vector.load %arg9[%c20_594, %c0_595, %c0_596] : memref<25x128x128xbf16, #tpu.memory_space<vmem>>, vector<1x128x128xbf16>
    %1055 = vector.shape_cast %1054 : vector<1x128x128xbf16> to vector<128x128xbf16>
    %cst_597 = arith.constant dense<0.000000e+00> : vector<25x128xf32>
    %1056 = tpu.matmul %1053, %1055, %cst_597 {dimension_numbers = #tpu.dot_dimension_numbers<[1], [0], [0], [1], [0, 0, 1, 1], [], []>} : vector<25x128xbf16>, vector<128x128xbf16>, vector<25x128xf32> -> vector<25x128xf32>
    %1057 = arith.addf %1042, %1056 : vector<25x128xf32>
    %c21_598 = arith.constant 21 : index
    %c0_599 = arith.constant 0 : index
    %1058 = vector.load %arg13[%c21_598, %c0_599] : memref<49x192xf32, #tpu.memory_space<vmem>>, vector<25x128xf32>
    %c2_i32_600 = arith.constant 2 : i32
    %1059 = vector.broadcast %c2_i32_600 : i32 to vector<25x1xi32>
    %1060 = arith.cmpi sle, %64, %1059 : vector<25x1xi32>
    %c1_i32_601 = arith.constant 1 : i32
    %1061 = vector.broadcast %c1_i32_601 : i32 to vector<25x1xi32>
    %1062 = arith.cmpi sge, %67, %1061 : vector<25x1xi32>
    %1063 = arith.andi %1060, %1062 : vector<25x1xi1>
    %1064 = arith.extui %1063 : vector<25x1xi1> to vector<25x1xi32>
    %1065 = arith.sitofp %1064 : vector<25x1xi32> to vector<25x1xf32>
    %1066 = vector.broadcast %1065 : vector<25x1xf32> to vector<25x128xf32>
    %1067 = arith.mulf %1058, %1066 : vector<25x128xf32>
    %1068 = arith.truncf %1067 : vector<25x128xf32> to vector<25x128xbf16>
    %c21_602 = arith.constant 21 : index
    %c0_603 = arith.constant 0 : index
    %c0_604 = arith.constant 0 : index
    %1069 = vector.load %arg9[%c21_602, %c0_603, %c0_604] : memref<25x128x128xbf16, #tpu.memory_space<vmem>>, vector<1x128x128xbf16>
    %1070 = vector.shape_cast %1069 : vector<1x128x128xbf16> to vector<128x128xbf16>
    %cst_605 = arith.constant dense<0.000000e+00> : vector<25x128xf32>
    %1071 = tpu.matmul %1068, %1070, %cst_605 {dimension_numbers = #tpu.dot_dimension_numbers<[1], [0], [0], [1], [0, 0, 1, 1], [], []>} : vector<25x128xbf16>, vector<128x128xbf16>, vector<25x128xf32> -> vector<25x128xf32>
    %1072 = arith.addf %1057, %1071 : vector<25x128xf32>
    %c22_606 = arith.constant 22 : index
    %c0_607 = arith.constant 0 : index
    %1073 = vector.load %arg13[%c22_606, %c0_607] : memref<49x192xf32, #tpu.memory_space<vmem>>, vector<25x128xf32>
    %c2_i32_608 = arith.constant 2 : i32
    %1074 = vector.broadcast %c2_i32_608 : i32 to vector<25x1xi32>
    %1075 = arith.cmpi sle, %64, %1074 : vector<25x1xi32>
    %1076 = arith.extui %1075 : vector<25x1xi1> to vector<25x1xi32>
    %1077 = arith.sitofp %1076 : vector<25x1xi32> to vector<25x1xf32>
    %1078 = vector.broadcast %1077 : vector<25x1xf32> to vector<25x128xf32>
    %1079 = arith.mulf %1073, %1078 : vector<25x128xf32>
    %1080 = arith.truncf %1079 : vector<25x128xf32> to vector<25x128xbf16>
    %c22_609 = arith.constant 22 : index
    %c0_610 = arith.constant 0 : index
    %c0_611 = arith.constant 0 : index
    %1081 = vector.load %arg9[%c22_609, %c0_610, %c0_611] : memref<25x128x128xbf16, #tpu.memory_space<vmem>>, vector<1x128x128xbf16>
    %1082 = vector.shape_cast %1081 : vector<1x128x128xbf16> to vector<128x128xbf16>
    %cst_612 = arith.constant dense<0.000000e+00> : vector<25x128xf32>
    %1083 = tpu.matmul %1080, %1082, %cst_612 {dimension_numbers = #tpu.dot_dimension_numbers<[1], [0], [0], [1], [0, 0, 1, 1], [], []>} : vector<25x128xbf16>, vector<128x128xbf16>, vector<25x128xf32> -> vector<25x128xf32>
    %1084 = arith.addf %1072, %1083 : vector<25x128xf32>
    %c23_613 = arith.constant 23 : index
    %c0_614 = arith.constant 0 : index
    %1085 = vector.load %arg13[%c23_613, %c0_614] : memref<49x192xf32, #tpu.memory_space<vmem>>, vector<25x128xf32>
    %c2_i32_615 = arith.constant 2 : i32
    %1086 = vector.broadcast %c2_i32_615 : i32 to vector<25x1xi32>
    %1087 = arith.cmpi sle, %64, %1086 : vector<25x1xi32>
    %c3_i32_616 = arith.constant 3 : i32
    %1088 = vector.broadcast %c3_i32_616 : i32 to vector<25x1xi32>
    %1089 = arith.cmpi sle, %67, %1088 : vector<25x1xi32>
    %1090 = arith.andi %1087, %1089 : vector<25x1xi1>
    %1091 = arith.extui %1090 : vector<25x1xi1> to vector<25x1xi32>
    %1092 = arith.sitofp %1091 : vector<25x1xi32> to vector<25x1xf32>
    %1093 = vector.broadcast %1092 : vector<25x1xf32> to vector<25x128xf32>
    %1094 = arith.mulf %1085, %1093 : vector<25x128xf32>
    %1095 = arith.truncf %1094 : vector<25x128xf32> to vector<25x128xbf16>
    %c23_617 = arith.constant 23 : index
    %c0_618 = arith.constant 0 : index
    %c0_619 = arith.constant 0 : index
    %1096 = vector.load %arg9[%c23_617, %c0_618, %c0_619] : memref<25x128x128xbf16, #tpu.memory_space<vmem>>, vector<1x128x128xbf16>
    %1097 = vector.shape_cast %1096 : vector<1x128x128xbf16> to vector<128x128xbf16>
    %cst_620 = arith.constant dense<0.000000e+00> : vector<25x128xf32>
    %1098 = tpu.matmul %1095, %1097, %cst_620 {dimension_numbers = #tpu.dot_dimension_numbers<[1], [0], [0], [1], [0, 0, 1, 1], [], []>} : vector<25x128xbf16>, vector<128x128xbf16>, vector<25x128xf32> -> vector<25x128xf32>
    %1099 = arith.addf %1084, %1098 : vector<25x128xf32>
    %c24_621 = arith.constant 24 : index
    %c0_622 = arith.constant 0 : index
    %1100 = vector.load %arg13[%c24_621, %c0_622] : memref<49x192xf32, #tpu.memory_space<vmem>>, vector<25x128xf32>
    %c2_i32_623 = arith.constant 2 : i32
    %1101 = vector.broadcast %c2_i32_623 : i32 to vector<25x1xi32>
    %1102 = arith.cmpi sle, %64, %1101 : vector<25x1xi32>
    %c2_i32_624 = arith.constant 2 : i32
    %1103 = vector.broadcast %c2_i32_624 : i32 to vector<25x1xi32>
    %1104 = arith.cmpi sle, %67, %1103 : vector<25x1xi32>
    %1105 = arith.andi %1102, %1104 : vector<25x1xi1>
    %1106 = arith.extui %1105 : vector<25x1xi1> to vector<25x1xi32>
    %1107 = arith.sitofp %1106 : vector<25x1xi32> to vector<25x1xf32>
    %1108 = vector.broadcast %1107 : vector<25x1xf32> to vector<25x128xf32>
    %1109 = arith.mulf %1100, %1108 : vector<25x128xf32>
    %1110 = arith.truncf %1109 : vector<25x128xf32> to vector<25x128xbf16>
    %c24_625 = arith.constant 24 : index
    %c0_626 = arith.constant 0 : index
    %c0_627 = arith.constant 0 : index
    %1111 = vector.load %arg9[%c24_625, %c0_626, %c0_627] : memref<25x128x128xbf16, #tpu.memory_space<vmem>>, vector<1x128x128xbf16>
    %1112 = vector.shape_cast %1111 : vector<1x128x128xbf16> to vector<128x128xbf16>
    %cst_628 = arith.constant dense<0.000000e+00> : vector<25x128xf32>
    %1113 = tpu.matmul %1110, %1112, %cst_628 {dimension_numbers = #tpu.dot_dimension_numbers<[1], [0], [0], [1], [0, 0, 1, 1], [], []>} : vector<25x128xbf16>, vector<128x128xbf16>, vector<25x128xf32> -> vector<25x128xf32>
    %1114 = arith.addf %1099, %1113 : vector<25x128xf32>
    %c0_629 = arith.constant 0 : index
    %c0_630 = arith.constant 0 : index
    %1115 = vector.load %arg10[%c0_629, %c0_630] : memref<1x128xf32, #tpu.memory_space<vmem>>, vector<1x128xf32>
    %1116 = vector.broadcast %1115 : vector<1x128xf32> to vector<25x128xf32>
    %1117 = arith.addf %1114, %1116 : vector<25x128xf32>
    %cst_631 = arith.constant 0.000000e+00 : f32
    %1118 = vector.broadcast %cst_631 : f32 to vector<25x128xf32>
    %1119 = arith.maximumf %1117, %1118 : vector<25x128xf32>
    %1120 = arith.truncf %1119 : vector<25x128xf32> to vector<25x128xbf16>
    %c0_632 = arith.constant 0 : index
    %c0_633 = arith.constant 0 : index
    %1121 = vector.load %arg11[%c0_632, %c0_633] : memref<128x128xbf16, #tpu.memory_space<vmem>>, vector<128x128xbf16>
    %cst_634 = arith.constant dense<0.000000e+00> : vector<25x128xf32>
    %1122 = tpu.matmul %1120, %1121, %cst_634 {dimension_numbers = #tpu.dot_dimension_numbers<[1], [0], [0], [1], [0, 0, 1, 1], [], []>} : vector<25x128xbf16>, vector<128x128xbf16>, vector<25x128xf32> -> vector<25x128xf32>
    %c0_635 = arith.constant 0 : index
    %c0_636 = arith.constant 0 : index
    %c0_637 = arith.constant 0 : index
    %1123 = vector.load %arg12[%c0_635, %c0_636, %c0_637] : memref<1x25x128xf32, #tpu.memory_space<vmem>>, vector<1x25x128xf32>
    %1124 = vector.shape_cast %1123 : vector<1x25x128xf32> to vector<25x128xf32>
    %1125 = vector.shape_cast %1122 : vector<25x128xf32> to vector<1x25x128xf32>
    tpu.vector_store %arg12[%c0_635, %c0_636, %c0_637], %1125 {strides = array<i32>} : memref<1x25x128xf32, #tpu.memory_space<vmem>>, vector<1x25x128xf32>,
    return
  }
  func.func @transform_0(%arg0: i32) -> (i32, i32, i32, i32) {
    %c0_i32 = arith.constant 0 : i32
    %c0_i32_0 = arith.constant 0 : i32
    %c0_i32_1 = arith.constant 0 : i32
    %c0_i32_2 = arith.constant 0 : i32
    return %arg0, %c0_i32, %c0_i32_0, %c0_i32_1 : i32, i32, i32, i32
  }
  func.func @transform_1(%arg0: i32) -> (i32, i32, i32) {
    %c0_i32 = arith.constant 0 : i32
    %c0_i32_0 = arith.constant 0 : i32
    %c0_i32_1 = arith.constant 0 : i32
    return %arg0, %c0_i32, %c0_i32_0 : i32, i32, i32
  }
  func.func @transform_2(%arg0: i32) -> (i32, i32) {
    %c0_i32 = arith.constant 0 : i32
    %c0_i32_0 = arith.constant 0 : i32
    %c0_i32_1 = arith.constant 0 : i32
    return %c0_i32, %c0_i32_0 : i32, i32
  }
  func.func @transform_3(%arg0: i32) -> (i32, i32) {
    %c0_i32 = arith.constant 0 : i32
    %c0_i32_0 = arith.constant 0 : i32
    %c0_i32_1 = arith.constant 0 : i32
    return %c0_i32, %c0_i32_0 : i32, i32
  }
  func.func @transform_4(%arg0: i32) -> (i32, i32, i32) {
    %c0_i32 = arith.constant 0 : i32
    %c0_i32_0 = arith.constant 0 : i32
    %c0_i32_1 = arith.constant 0 : i32
    %c0_i32_2 = arith.constant 0 : i32
    return %c0_i32, %c0_i32_0, %c0_i32_1 : i32, i32, i32
  }
  func.func @transform_5(%arg0: i32) -> (i32, i32) {
    %c0_i32 = arith.constant 0 : i32
    %c0_i32_0 = arith.constant 0 : i32
    %c0_i32_1 = arith.constant 0 : i32
    return %c0_i32, %c0_i32_0 : i32, i32
  }
  func.func @transform_6(%arg0: i32) -> (i32, i32, i32) {
    %c0_i32 = arith.constant 0 : i32
    %c0_i32_0 = arith.constant 0 : i32
    %c0_i32_1 = arith.constant 0 : i32
    %c0_i32_2 = arith.constant 0 : i32
    return %c0_i32, %c0_i32_0, %c0_i32_1 : i32, i32, i32
  }
  func.func @transform_7(%arg0: i32) -> (i32, i32) {
    %c0_i32 = arith.constant 0 : i32
    %c0_i32_0 = arith.constant 0 : i32
    %c0_i32_1 = arith.constant 0 : i32
    return %c0_i32, %c0_i32_0 : i32, i32
  }
  func.func @transform_8(%arg0: i32) -> (i32, i32, i32) {
    %c0_i32 = arith.constant 0 : i32
    %c0_i32_0 = arith.constant 0 : i32
    %c0_i32_1 = arith.constant 0 : i32
    %c0_i32_2 = arith.constant 0 : i32
    return %c0_i32, %c0_i32_0, %c0_i32_1 : i32, i32, i32
  }
  func.func @transform_9(%arg0: i32) -> (i32, i32) {
    %c0_i32 = arith.constant 0 : i32
    %c0_i32_0 = arith.constant 0 : i32
    %c0_i32_1 = arith.constant 0 : i32
    return %c0_i32, %c0_i32_0 : i32, i32
  }
  func.func @transform_10(%arg0: i32) -> (i32, i32) {
    %c0_i32 = arith.constant 0 : i32
    %c0_i32_0 = arith.constant 0 : i32
    %c0_i32_1 = arith.constant 0 : i32
    return %c0_i32, %c0_i32_0 : i32, i32
  }
  func.func @transform_11(%arg0: i32) -> (i32, i32, i32) {
    %c0_i32 = arith.constant 0 : i32
    %c0_i32_0 = arith.constant 0 : i32
    %c0_i32_1 = arith.constant 0 : i32
    return %arg0, %c0_i32, %c0_i32_0 : i32, i32, i32
  }
}

</mosaic_0001>

<bundles_post_ra>
// kernel: scale2_forward.1
= control target key start
LH: loop header
LB: loop body
LE: loop exit
PB: predicated region body
PF: predicated region fallthrough
CT: control target
= control target key end

     0   :  { %s19068_s17 = smov 0   ;;  %s24065_s0 = inlined_call_operand.vmem [shape: bf16[2,9,25,256], index: 0, kind: input, shape index: {}]   ;;  %s24066_s1 = inlined_call_operand.vmem [shape: f32[2,25,64], index: 1, kind: input, shape index: {}]   ;;  %s24067_s2 = inlined_call_operand.vmem [shape: bf16[256,128], index: 2, kind: input, shape index: {}]   ;;  %s24068_s3 = inlined_call_operand.vmem [shape: f32[1,128], index: 3, kind: input, shape index: {}]   ;;  %s24069_s4 = inlined_call_operand.vmem [shape: bf16[25,192,128], index: 4, kind: input, shape index: {}]   ;;  %s24070_s5 = inlined_call_operand.vmem [shape: f32[1,128], index: 5, kind: input, shape index: {}]   ;;  %s24071_s6 = inlined_call_operand.vmem [shape: bf16[25,128,128], index: 6, kind: input, shape index: {}]   ;;  %s24072_s7 = inlined_call_operand.vmem [shape: f32[1,128], index: 7, kind: input, shape index: {}]   ;;  %s24073_s8 = inlined_call_operand.vmem [shape: bf16[25,128,128], index: 8, kind: input, shape index: {}]   ;;  %s24074_s9 = inlined_call_operand.vmem [shape: f32[1,128], index: 9, kind: input, shape index: {}]   ;;  %s24075_s10 = inlined_call_operand.vmem [shape: bf16[128,128], index: 10, kind: input, shape index: {}]   ;;  %s24076_s11 = inlined_call_operand.vmem [shape: f32[2,25,128], index: 11, kind: output, shape index: {}]  }
   0x1 LB: > { %s13923_s18 = sadd.s32 4294967295, %s19003_s17   ;;  %p13927_p0 = scmp.ge.s32.totalorder %s19003_s17, 1  ;;  %s19003_s17 = sphi %s19068_s17, %s21_s17  }
   0x2   : > { %p347_p1 = scmp.lt.s32.totalorder %s19003_s17, 3 }
   0x4   : > { %p348_p2 = pnand %p13927_p0, %p347_p1 }
   0x6   : > { %351 = sbr.rel (%p348_p2) target bundleno = 3461 (0xd85), region = 64 }
   0xd   : > { %v19079_v0 = vld [vmem:[%s24067_s2 + $0x40] sm:$0xff]   ;;  %v19091_v2 = vld [vmem:[%s24067_s2 + $0x48] sm:$0xff]   ;;  %p392_p3 = scmp.lt.s32.totalorder %s13923_s18, 1  ;;  %v19105_v4 = vld [vmem:[%s24067_s2 + $0x50] sm:$0xff]   ;;  %vm24081_vm3 = vcmask 523264   ;;  %vm1357_vm5 = vcmask 523268  }
   0xe   : > { %v19084_v1 = vld [vmem:[%s24067_s2] sm:$0xff]   ;;  %16193 = vmatprep.subr.bf16.mxu0 %v19079_v0  ;;  %16221 = vmatprep.subr.bf16.mxu1 %v19079_v0  ;;  %v19098_v3 = vld [vmem:[%s24067_s2 + $0x8] sm:$0xff]   ;;  %v19114_v5 = vld [vmem:[%s24067_s2 + $0x10] sm:$0xff]   ;;  %vm24124_vm14 = vcmask 1041408  }
   0xf   : > { %16194 = vmatpush3.bf16.msra.mxu0 %v19084_v1  ;;  %16222 = vmatpush3.bf16.msra.mxu1 %v19084_v1  ;;  %s24662_s18 = smov (!%p392_p3, %s13923_s18), 1  ;;  %v19121_v6 = vld [vmem:[%s24067_s2 + $0x58] sm:$0xff]   ;;  %v19136_v8 = vld [vmem:[%s24067_s2 + $0x60] sm:$0xff]   ;;  %v19155_v10 = vld [vmem:[%s24067_s2 + $0x68] sm:$0xff]  }
  0x10   : > { %16195 = vmatprep.subr.bf16.mxu0 %v19091_v2  ;;  %16223 = vmatprep.subr.bf16.mxu1 %v19091_v2  ;;  %s18167_s14 = smul.u32 288, %s24662_s18  ;;  %v19129_v7 = vld [vmem:[%s24067_s2 + $0x18] sm:$0xff]   ;;  %v19148_v9 = vld [vmem:[%s24067_s2 + $0x20] sm:$0xff]   ;;  %v19164_v13 = vld [vmem:[%s24067_s2 + $0x28] sm:$0xff]   ;;  %s16191_s13 = sshll.u32 %s24662_s18, 5 }
  0x11   : > { %v19171_v14 = vld [vmem:[%s24067_s2 + $0x70] sm:$0xff]   ;;  %v19185_v16 = vld [vmem:[%s24067_s2 + $0x78] sm:$0xff]   ;;  %v18957_v46 = vld [vmem:[%s24067_s2 + $0x40] sm:$0xff]   ;;  %s19464_s16 = scalar_lea.vmem %s24066_s1, %s16191_s13  ;;  %s406_s29 = scalar_lea.vmem %s24076_s11, %s16191_s13 }
  0x12   : > { %s19141_s23 = scalar_lea.vmem %s24065_s0, %s18167_s14  ;;  %v19178_v15 = vld [vmem:[%s24067_s2 + $0x30] sm:$0xff]   ;;  %v19192_v17 = vld [vmem:[%s24067_s2 + $0x38] sm:$0xff]   ;;  %v18958_v47 = vld [vmem:[%s24067_s2] sm:$0xff]  }
  0x13   : > { %16196 = vmatpush3.bf16.msra.mxu0 %v19098_v3  ;;  %16224 = vmatpush3.bf16.msra.mxu1 %v19098_v3  ;;  %v18197_v11 = vld [vmem:[%s19141_s23 + $0x4] ss:$8 sps:$4 sm:$0xff]   ;;  %v18195_v18 = vld [vmem:[%s19141_s23] ss:$8 sps:$4 sm:$0xff]   ;;  %v18961_v53 = vld [vmem:[%s24067_s2 + $0x50] sm:$0xff]  }
  0x14   : > { %16197 = vmatprep.subr.bf16.mxu0 %v19105_v4  ;;  %16225 = vmatprep.subr.bf16.mxu1 %v19105_v4  ;;  %v18200_v12 = vld [vmem:[%s19141_s23 + $0x24] ss:$8 sps:$4 sm:$0xff]   ;;  %v18198_v19 = vld [vmem:[%s19141_s23 + $0x20] ss:$8 sps:$4 sm:$0xff]   ;;  %v18962_v54 = vld [vmem:[%s24067_s2 + $0x10] sm:$0xff]  }
  0x15   : > { %592 = vmatprep.mubr.bf16.mxu0 %v18197_v11  ;;  %666 = vmatprep.mubr.bf16.mxu1 %v18200_v12  ;;  %v18201_v20 = vld [vmem:[%s19141_s23 + $0x14] ss:$8 sps:$4 sm:$0x1f]   ;;  %v18205_v22 = vld [vmem:[%s19141_s23 + $0x10] ss:$8 sps:$4 sm:$0x1f]  }
  0x16   : > { %v18203_v21 = vld [vmem:[%s19141_s23 + $0x34] ss:$8 sps:$4 sm:$0x1f]   ;;  %v18206_v23 = vld [vmem:[%s19141_s23 + $0x30] ss:$8 sps:$4 sm:$0x1f]  }
  0x17   : > { %16198 = vmatpush3.bf16.msra.mxu0 %v19114_v5  ;;  %16226 = vmatpush3.bf16.msra.mxu1 %v19114_v5  ;;  %v18209_v24 = vld [vmem:[%s19141_s23 + $0x44] ss:$8 sps:$4 sm:$0xff]   ;;  %v18207_v26 = vld [vmem:[%s19141_s23 + $0x40] ss:$8 sps:$4 sm:$0xff]   ;;  %v18963_v55 = vld [vmem:[%s24067_s2 + $0x58] sm:$0xff]  }
  0x18   : > { %16199 = vmatprep.subr.bf16.mxu0 %v19121_v6  ;;  %16227 = vmatprep.subr.bf16.mxu1 %v19121_v6  ;;  %v18212_v25 = vld [vmem:[%s19141_s23 + $0x64] ss:$8 sps:$4 sm:$0xff]   ;;  %v18210_v27 = vld [vmem:[%s19141_s23 + $0x60] ss:$8 sps:$4 sm:$0xff]   ;;  %v18964_v56 = vld [vmem:[%s24067_s2 + $0x18] sm:$0xff]  }
  0x19   : > { %v18213_v28 = vld [vmem:[%s19141_s23 + $0x54] ss:$8 sps:$4 sm:$0x1f]   ;;  %v18215_v30 = vld [vmem:[%s19141_s23 + $0x50] ss:$8 sps:$4 sm:$0x1f]  }
  0x1a   : > { %v18216_v29 = vld [vmem:[%s19141_s23 + $0x74] ss:$8 sps:$4 sm:$0x1f]   ;;  %v18218_v31 = vld [vmem:[%s19141_s23 + $0x70] ss:$8 sps:$4 sm:$0x1f]  }
  0x1b   : > { %16200 = vmatpush3.bf16.msra.mxu0 %v19129_v7  ;;  %16228 = vmatpush3.bf16.msra.mxu1 %v19129_v7  ;;  %v18221_v32 = vld [vmem:[%s19141_s23 + $0x84] ss:$8 sps:$4 sm:$0xff]   ;;  %v18219_v34 = vld [vmem:[%s19141_s23 + $0x80] ss:$8 sps:$4 sm:$0xff]   ;;  %v18969_v61 = vld [vmem:[%s24067_s2 + $0x70] sm:$0xff]  }
  0x1c   : > { %16201 = vmatprep.subr.bf16.mxu0 %v19136_v8  ;;  %16229 = vmatprep.subr.bf16.mxu1 %v19136_v8  ;;  %v18224_v33 = vld [vmem:[%s19141_s23 + $0xa4] ss:$8 sps:$4 sm:$0xff]   ;;  %v18222_v35 = vld [vmem:[%s19141_s23 + $0xa0] ss:$8 sps:$4 sm:$0xff]   ;;  %v18970_v62 = vld [vmem:[%s24067_s2 + $0x30] sm:$0xff]  }
  0x1d   : > { %v18225_v36 = vld [vmem:[%s19141_s23 + $0x94] ss:$8 sps:$4 sm:$0x1f]   ;;  %v18227_v38 = vld [vmem:[%s19141_s23 + $0x90] ss:$8 sps:$4 sm:$0x1f]  }
  0x1e   : > { %v18228_v37 = vld [vmem:[%s19141_s23 + $0xb4] ss:$8 sps:$4 sm:$0x1f]   ;;  %v18230_v39 = vld [vmem:[%s19141_s23 + $0xb0] ss:$8 sps:$4 sm:$0x1f]  }
  0x1f   : > { %16202 = vmatpush3.bf16.msra.mxu0 %v19148_v9  ;;  %16230 = vmatpush3.bf16.msra.mxu1 %v19148_v9  ;;  %v18233_v40 = vld [vmem:[%s19141_s23 + $0xc4] ss:$8 sps:$4 sm:$0xff]   ;;  %v18231_v42 = vld [vmem:[%s19141_s23 + $0xc0] ss:$8 sps:$4 sm:$0xff]   ;;  %v18971_v63 = vld [vmem:[%s24067_s2 + $0x78] sm:$0xff]  }
  0x20   : > { %16203 = vmatprep.subr.bf16.mxu0 %v19155_v10  ;;  %16231 = vmatprep.subr.bf16.mxu1 %v19155_v10  ;;  %v18236_v41 = vld [vmem:[%s19141_s23 + $0xe4] ss:$8 sps:$4 sm:$0xff]   ;;  %v18234_v43 = vld [vmem:[%s19141_s23 + $0xe0] ss:$8 sps:$4 sm:$0xff]   ;;  %v18257_v12 = vld [vmem:[%s24069_s4 + $0x70] sm:$0xff]  }
  0x21   : > { %v18237_v44 = vld [vmem:[%s19141_s23 + $0xd4] ss:$8 sps:$4 sm:$0x1f]   ;;  %v18959_v48 = vld [vmem:[%s24067_s2 + $0x48] sm:$0xff]   ;;  %v18965_v57 = vld [vmem:[%s24067_s2 + $0x60] sm:$0xff]  }
  0x22   : > { %v18240_v45 = vld [vmem:[%s19141_s23 + $0xf4] ss:$8 sps:$4 sm:$0x1f]   ;;  %v18239_v49 = vld [vmem:[%s19141_s23 + $0xd0] ss:$8 sps:$4 sm:$0x1f]  }
  0x23   : > { %16204 = vmatpush3.bf16.msra.mxu0 %v19164_v13  ;;  %16232 = vmatpush3.bf16.msra.mxu1 %v19164_v13  ;;  %v18242_v50 = vld [vmem:[%s19141_s23 + $0xf0] ss:$8 sps:$4 sm:$0x1f]   ;;  %v18245_v51 = vld [vmem:[%s19141_s23 + $0x104] ss:$8 sps:$4 sm:$0xff]  }
  0x24   : > { %16205 = vmatprep.subr.bf16.mxu0 %v19171_v14  ;;  %16233 = vmatprep.subr.bf16.mxu1 %v19171_v14  ;;  %v18960_v52 = vld [vmem:[%s24067_s2 + $0x8] sm:$0xff]   ;;  %v18966_v58 = vld [vmem:[%s24067_s2 + $0x20] sm:$0xff]  }
  0x25   : > { %v18967_v59 = vld [vmem:[%s24067_s2 + $0x68] sm:$0xff]   ;;  %v18254_v11 = vld [vmem:[%s24069_s4 + $0x20] sm:$0xff]  }
  0x26   : > { %v18968_v60 = vld [vmem:[%s24067_s2 + $0x28] sm:$0xff]  }
  0x27   : > { %16206 = vmatpush3.bf16.msra.mxu0 %v19178_v15  ;;  %16234 = vmatpush3.bf16.msra.mxu1 %v19178_v15 }
  0x28   : > { %16207 = vmatprep.subr.bf16.mxu0 %v19185_v16  ;;  %16235 = vmatprep.subr.bf16.mxu1 %v19185_v16 }
  0x2b   : > { %16208 = vmatpush3.bf16.msra.mxu0 %v19192_v17  ;;  %16236 = vmatpush3.bf16.msra.mxu1 %v19192_v17 }
  0x2c   : > { %16249 = vmatprep.subr.bf16.mxu0 %v19079_v0  ;;  %16277 = vmatprep.subr.bf16.mxu1 %v19079_v0 }
  0x2e   : > { %593 = vmatmul.mubr.bf16.vlgmr.msra.gmra.mrb[0].mxu0 %v18195_v18  ;;  %667 = vmatmul.mubr.bf16.vlgmr.msra.gmra.mrb[0].mxu1 %v18198_v19 }
  0x2f   : > { %16250 = vmatpush3.bf16.msra.mxu0 %v19084_v1  ;;  %16278 = vmatpush3.bf16.msra.mxu1 %v19084_v1 }
  0x30   : > { %16251 = vmatprep.subr.bf16.mxu0 %v19091_v2  ;;  %16279 = vmatprep.subr.bf16.mxu1 %v19091_v2 }
  0x31   : > { %600 = vmatprep.mubr.bf16.mxu0 %v18201_v20  ;;  %674 = vmatprep.mubr.bf16.mxu1 %v18203_v21  ;;  %v18259_v20 = vld [vmem:[%s24069_s4 + $0x78] sm:$0xff]  }
  0x33   : > { %16252 = vmatpush3.bf16.msra.mxu0 %v19098_v3  ;;  %16280 = vmatpush3.bf16.msra.mxu1 %v19098_v3 }
  0x34   : > { %16253 = vmatprep.subr.bf16.mxu0 %v19105_v4  ;;  %16281 = vmatprep.subr.bf16.mxu1 %v19105_v4 }
  0x36   : > { %601 = vmatmul.mubr.bf16.gmra.mrb[4].mxu0 %v18205_v22  ;;  %675 = vmatmul.mubr.bf16.gmra.mrb[4].mxu1 %v18206_v23 }
  0x37   : > { %16254 = vmatpush3.bf16.msra.mxu0 %v19114_v5  ;;  %16282 = vmatpush3.bf16.msra.mxu1 %v19114_v5 }
  0x38   : > { %16255 = vmatprep.subr.bf16.mxu0 %v19121_v6  ;;  %16283 = vmatprep.subr.bf16.mxu1 %v19121_v6 }
  0x39   : > { %744 = vmatprep.mubr.bf16.mxu0 %v18209_v24  ;;  %822 = vmatprep.mubr.bf16.mxu1 %v18212_v25 }
  0x3b   : > { %16256 = vmatpush3.bf16.msra.mxu0 %v19129_v7  ;;  %16284 = vmatpush3.bf16.msra.mxu1 %v19129_v7 }
  0x3c   : > { %16257 = vmatprep.subr.bf16.mxu0 %v19136_v8  ;;  %16285 = vmatprep.subr.bf16.mxu1 %v19136_v8 }
  0x3f   : > { %16258 = vmatpush3.bf16.msra.mxu0 %v19148_v9  ;;  %16286 = vmatpush3.bf16.msra.mxu1 %v19148_v9 }
  0x40   : > { %16259 = vmatprep.subr.bf16.mxu0 %v19155_v10  ;;  %16287 = vmatprep.subr.bf16.mxu1 %v19155_v10 }
  0x43   : > { %16260 = vmatpush3.bf16.msra.mxu0 %v19164_v13  ;;  %16288 = vmatpush3.bf16.msra.mxu1 %v19164_v13 }
  0x44   : > { %16261 = vmatprep.subr.bf16.mxu0 %v19171_v14  ;;  %16289 = vmatprep.subr.bf16.mxu1 %v19171_v14 }
  0x47   : > { %16262 = vmatpush3.bf16.msra.mxu0 %v19178_v15  ;;  %16290 = vmatpush3.bf16.msra.mxu1 %v19178_v15 }
  0x48   : > { %16263 = vmatprep.subr.bf16.mxu0 %v19185_v16  ;;  %16291 = vmatprep.subr.bf16.mxu1 %v19185_v16 }
  0x4b   : > { %16264 = vmatpush3.bf16.msra.mxu0 %v19192_v17  ;;  %16292 = vmatpush3.bf16.msra.mxu1 %v19192_v17 }
  0x4c   : > { %16305 = vmatprep.subr.bf16.mxu0 %v19079_v0  ;;  %16333 = vmatprep.subr.bf16.mxu1 %v19079_v0 }
  0x4e   : > { %745 = vmatmul.mubr.bf16.vlgmr.msra.gmra.mrb[8].mxu0 %v18207_v26  ;;  %823 = vmatmul.mubr.bf16.vlgmr.msra.gmra.mrb[8].mxu1 %v18210_v27 }
  0x4f   : > { %16306 = vmatpush3.bf16.msra.mxu0 %v19084_v1  ;;  %16334 = vmatpush3.bf16.msra.mxu1 %v19084_v1 }
  0x50   : > { %16307 = vmatprep.subr.bf16.mxu0 %v19091_v2  ;;  %16335 = vmatprep.subr.bf16.mxu1 %v19091_v2 }
  0x51   : > { %752 = vmatprep.mubr.bf16.mxu0 %v18213_v28  ;;  %830 = vmatprep.mubr.bf16.mxu1 %v18216_v29 }
  0x53   : > { %16308 = vmatpush3.bf16.msra.mxu0 %v19098_v3  ;;  %16336 = vmatpush3.bf16.msra.mxu1 %v19098_v3 }
  0x54   : > { %16309 = vmatprep.subr.bf16.mxu0 %v19105_v4  ;;  %16337 = vmatprep.subr.bf16.mxu1 %v19105_v4 }
  0x56   : > { %753 = vmatmul.mubr.bf16.gmra.mrb[12].mxu0 %v18215_v30  ;;  %831 = vmatmul.mubr.bf16.gmra.mrb[12].mxu1 %v18218_v31  ;;  %v18260_v30 = vld [vmem:[%s24069_s4 + $0x38] sm:$0xff]  }
  0x57   : > { %16310 = vmatpush3.bf16.msra.mxu0 %v19114_v5  ;;  %16338 = vmatpush3.bf16.msra.mxu1 %v19114_v5 }
  0x58   : > { %16311 = vmatprep.subr.bf16.mxu0 %v19121_v6  ;;  %16339 = vmatprep.subr.bf16.mxu1 %v19121_v6 }
  0x59   : > { %900 = vmatprep.mubr.bf16.mxu0 %v18221_v32  ;;  %978 = vmatprep.mubr.bf16.mxu1 %v18224_v33 }
  0x5b   : > { %16312 = vmatpush3.bf16.msra.mxu0 %v19129_v7  ;;  %16340 = vmatpush3.bf16.msra.mxu1 %v19129_v7 }
  0x5c   : > { %16313 = vmatprep.subr.bf16.mxu0 %v19136_v8  ;;  %16341 = vmatprep.subr.bf16.mxu1 %v19136_v8 }
  0x5f   : > { %16314 = vmatpush3.bf16.msra.mxu0 %v19148_v9  ;;  %16342 = vmatpush3.bf16.msra.mxu1 %v19148_v9 }
  0x60   : > { %16315 = vmatprep.subr.bf16.mxu0 %v19155_v10  ;;  %16343 = vmatprep.subr.bf16.mxu1 %v19155_v10 }
  0x63   : > { %16316 = vmatpush3.bf16.msra.mxu0 %v19164_v13  ;;  %16344 = vmatpush3.bf16.msra.mxu1 %v19164_v13 }
  0x64   : > { %16317 = vmatprep.subr.bf16.mxu0 %v19171_v14  ;;  %16345 = vmatprep.subr.bf16.mxu1 %v19171_v14 }
  0x67   : > { %16318 = vmatpush3.bf16.msra.mxu0 %v19178_v15  ;;  %16346 = vmatpush3.bf16.msra.mxu1 %v19178_v15 }
  0x68   : > { %16319 = vmatprep.subr.bf16.mxu0 %v19185_v16  ;;  %16347 = vmatprep.subr.bf16.mxu1 %v19185_v16 }
  0x6b   : > { %16320 = vmatpush3.bf16.msra.mxu0 %v19192_v17  ;;  %16348 = vmatpush3.bf16.msra.mxu1 %v19192_v17 }
  0x6c   : > { %16361 = vmatprep.subr.bf16.mxu0 %v19079_v0  ;;  %16389 = vmatprep.subr.bf16.mxu1 %v19079_v0  ;;  %v18243_v0 = vld [vmem:[%s19141_s23 + $0x100] ss:$8 sps:$4 sm:$0xff]  }
  0x6e   : > { %901 = vmatmul.mubr.bf16.vlgmr.msra.gmra.mrb[16].mxu0 %v18219_v34  ;;  %979 = vmatmul.mubr.bf16.vlgmr.msra.gmra.mrb[16].mxu1 %v18222_v35 }
  0x6f   : > { %16362 = vmatpush3.bf16.msra.mxu0 %v19084_v1  ;;  %16390 = vmatpush3.bf16.msra.mxu1 %v19084_v1  ;;  %v18246_v1 = vld [vmem:[%s19141_s23 + $0x114] ss:$8 sps:$4 sm:$0x1f]  }
  0x70   : > { %16363 = vmatprep.subr.bf16.mxu0 %v19091_v2  ;;  %16391 = vmatprep.subr.bf16.mxu1 %v19091_v2  ;;  %v18972_v2 = vld [vmem:[%s24067_s2 + $0x38] sm:$0xff]  }
  0x71   : > { %908 = vmatprep.mubr.bf16.mxu0 %v18225_v36  ;;  %986 = vmatprep.mubr.bf16.mxu1 %v18228_v37 }
  0x73   : > { %16364 = vmatpush3.bf16.msra.mxu0 %v19098_v3  ;;  %16392 = vmatpush3.bf16.msra.mxu1 %v19098_v3  ;;  %v18248_v3 = vld [vmem:[%s19141_s23 + $0x110] ss:$8 sps:$4 sm:$0x1f]  }
  0x74   : > { %16365 = vmatprep.subr.bf16.mxu0 %v19105_v4  ;;  %16393 = vmatprep.subr.bf16.mxu1 %v19105_v4  ;;  %v18249_v4 = vld [vmem:[%s24069_s4] sm:$0xff]  }
  0x76   : > { %909 = vmatmul.mubr.bf16.gmra.mrb[20].mxu0 %v18227_v38  ;;  %987 = vmatmul.mubr.bf16.gmra.mrb[20].mxu1 %v18230_v39  ;;  %v18261_v39 = vld [vmem:[%s24069_s4 + $0x80] sm:$0xff]  }
  0x77   : > { %16366 = vmatpush3.bf16.msra.mxu0 %v19114_v5  ;;  %16394 = vmatpush3.bf16.msra.mxu1 %v19114_v5  ;;  %v24097_v5 = vmov 0  }
  0x78   : > { %16367 = vmatprep.subr.bf16.mxu0 %v19121_v6  ;;  %16395 = vmatprep.subr.bf16.mxu1 %v19121_v6  ;;  %v18250_v6 = vld [vmem:[%s24069_s4 + $0x8] sm:$0xff]  }
  0x79   : > { %1056 = vmatprep.mubr.bf16.mxu0 %v18233_v40  ;;  %1134 = vmatprep.mubr.bf16.mxu1 %v18236_v41 }
  0x7b   : > { %16368 = vmatpush3.bf16.msra.mxu0 %v19129_v7  ;;  %16396 = vmatpush3.bf16.msra.mxu1 %v19129_v7  ;;  %v18251_v7 = vld [vmem:[%s24069_s4 + $0x10] sm:$0xff]  }
  0x7c   : > { %16369 = vmatprep.subr.bf16.mxu0 %v19136_v8  ;;  %16397 = vmatprep.subr.bf16.mxu1 %v19136_v8  ;;  %v18252_v8 = vld [vmem:[%s24069_s4 + $0x18] sm:$0xff]  }
  0x7f   : > { %16370 = vmatpush3.bf16.msra.mxu0 %v19148_v9  ;;  %16398 = vmatpush3.bf16.msra.mxu1 %v19148_v9  ;;  %v18253_v9 = vld [vmem:[%s24069_s4 + $0x60] sm:$0xff]  }
  0x80   : > { %16371 = vmatprep.subr.bf16.mxu0 %v19155_v10  ;;  %16399 = vmatprep.subr.bf16.mxu1 %v19155_v10  ;;  %v18255_v10 = vld [vmem:[%s24069_s4 + $0x68] sm:$0xff]  }
  0x83   : > { %16372 = vmatpush3.bf16.msra.mxu0 %v19164_v13  ;;  %16400 = vmatpush3.bf16.msra.mxu1 %v19164_v13  ;;  %v18256_v13 = vld [vmem:[%s24069_s4 + $0x28] sm:$0xff]  }
  0x84   : > { %16373 = vmatprep.subr.bf16.mxu0 %v19171_v14  ;;  %16401 = vmatprep.subr.bf16.mxu1 %v19171_v14  ;;  %v1248_v14 = vlaneseq }
  0x87   : > { %16374 = vmatpush3.bf16.msra.mxu0 %v19178_v15  ;;  %16402 = vmatpush3.bf16.msra.mxu1 %v19178_v15  ;;  %v19413_v15 = vshrl.u32 %v1248_v14, 7  ;;  %v19577_v14 = vld [vmem:[%s19464_s16 + $0x10] sm:$0xff] }
  0x88   : > { %16375 = vmatprep.subr.bf16.mxu0 %v19185_v16  ;;  %16403 = vmatprep.subr.bf16.mxu1 %v19185_v16 }
  0x89   : > { %v1250_v16 = vadd.s32 8, %v19413_v15  ;;  %v1251_v22 = vadd.s32 16, %v19413_v15 }
  0x8b   : > { %16376 = vmatpush3.bf16.msra.mxu0 %v19192_v17  ;;  %16404 = vmatpush3.bf16.msra.mxu1 %v19192_v17  ;;  %v18258_v17 = vld [vmem:[%s24069_s4 + $0x30] sm:$0xff]   ;;  %vm1262_vm0 = vcmp.ge.s32.totalorder %v1250_v16, 10  ;;  %vm1274_vm1 = vcmp.ge.s32.totalorder %v1250_v16, 15  ;;  %vm1287_vm2 = vcmp.ge.s32.totalorder %v1251_v22, 20 }
  0x8c   : > { %16417 = vmatprep.subr.bf16.mxu0 %v18957_v46  ;;  %1614 = vmatprep.subr.bf16.mxu1 %v24097_v5  ;;  %v1266_v21 = vsel %vm1262_vm0, 1, %v24097_v5  ;;  %v1278_v31 = vsel %vm1274_vm1, 1, %v24097_v5  ;;  %v1291_v35 = vsel %vm1287_vm2, 1, %v24097_v5  ;;  %vm24079_vm1 = vcmask 1043456  }
  0x8d   : > { %v1270_v25 = vadd.s32 1, %v1266_v21  ;;  %v19447_v40 = vadd.s32 3, %v1291_v35 }
  0x8e   : > { %1057 = vmatmul.mubr.bf16.vlgmr.msra.gmra.mrb[24].mxu0 %v18231_v42  ;;  %1135 = vmatmul.mubr.bf16.vlgmr.msra.gmra.mrb[24].mxu1 %v18234_v43  ;;  %v18262_v43 = vld [vmem:[%s24069_s4 + $0x40] sm:$0xff]  }
  0x8f   : > { %16418 = vmatpush3.bf16.msra.mxu0 %v18958_v47  ;;  %1064 = vmatprep.mubr.bf16.mxu0 %v18237_v44  ;;  %v19435_v34 = vadd.s32 %v1278_v31, %v1270_v25  ;;  %v1299_v44 = vmul.u32 5, %v19447_v40  ;;  %vm24082_vm6 = vcmp.ge.s32.totalorder %v19447_v40, 2 }
  0x90   : > { %16419 = vmatprep.subr.bf16.mxu0 %v18959_v48  ;;  %1142 = vmatprep.mubr.bf16.mxu1 %v18240_v45  ;;  %v18263_v48 = vld [vmem:[%s24069_s4 + $0x88] sm:$0xff]  }
  0x91   : > { %1615 = vmatpush1.bf16.msra.mxu1 %v18253_v9  ;;  %v1298_v41 = vmul.u32 5, %v19435_v34  ;;  %vm1375_vm4 = vcmp.ge.s32.totalorder %v19435_v34, 2  ;;  %v18267_v9 = vld [vmem:[%s24069_s4 + $0x98] sm:$0xff]  }
  0x92   : > { %1616 = vmatprep.subr.bf16.mxu1 %v24097_v5 }
  0x93   : > { %16420 = vmatpush3.bf16.msra.mxu0 %v18960_v52  ;;  %v19466_v45 = vsub.s32 %v1250_v16, %v1298_v41 }
  0x94   : > { %16421 = vmatprep.subr.bf16.mxu0 %v18961_v53  ;;  %v24099_v53 = vmov 0.0  }
  0x95   : > { %1617 = vmatpush1.bf16.msra.mxu1 %v18255_v10  ;;  %1308 = vst [vmem:[#allocation2 + $0x10] sm:$0xff] %v24099_v53  ;;  %1305 = vst [vmem:[#allocation2] sm:$0xff] %v24099_v53  ;;  %vm24080_vm7 = vcmp.ge.s32.totalorder %v19466_v45, 1  ;;  %vm2004_vm9 = vcmp.le.s32.totalorder %v19466_v45, 3  ;;  %vm24077_vm15 = vcmp.ge.s32.totalorder %v19466_v45, 2  ;;  %v1322_v10 = vld [vmem:[%s19464_s16 + $0x8] sm:$0xff] }
  0x96   : > { %1065 = vmatmul.mubr.bf16.gmra.mrb[28].mxu0 %v18239_v49  ;;  %1143 = vmatmul.mubr.bf16.gmra.mrb[28].mxu1 %v18242_v50  ;;  %v19472_v49 = vld [vmem:[%s19464_s16] sm:$0xff]  ;;  %v19474_v50 = vsub.s32 %v1251_v22, %v1299_v44  ;;  %1314 = vst [vmem:[#allocation2 + $0x40] sm:$0xff] %v24099_v53  ;;  %1316 = vst [vmem:[#allocation2 + $0x50] sm:$0xff] %v24099_v53  ;;  %v1338_v16 = vrot.slane %v1322_v10, 4  ;;  %v24087_v22 = vrot.slane %v19577_v14, 4  ;;  %v19622_v41 = vrot.slane %v24099_v53, 7 }
  0x97   : > { %16422 = vmatpush3.bf16.msra.mxu0 %v18962_v54  ;;  %1212 = vmatprep.mubr.bf16.mxu0 %v18245_v51  ;;  %1318 = vst [vmem:[#allocation2 + $0x60] sm:$0x1] %v24099_v53  ;;  %v1335_v54 = vrot.slane %v19472_v49, 4  ;;  %1307 = vst.msk [vmem:[#allocation2 + $0x8] sm:$0xff] %vm24081_vm3, %v24099_v53 }
  0x98   : > { %16423 = vmatprep.subr.bf16.mxu0 %v18963_v55  ;;  %1618 = vmatprep.subr.bf16.mxu1 %v24097_v5  ;;  %1309 = vst.msk [vmem:[#allocation2 + $0x18] sm:$0xff] %vm24081_vm3, %v24099_v53  ;;  %1311 = vst.msk [vmem:[#allocation2 + $0x28] sm:$0xff] %vm24081_vm3, %v24099_v53  ;;  %vm24093_vm8 = vcmp.ge.s32.totalorder %v19474_v50, 1  ;;  %vm2005_vm11 = vcmp.le.s32.totalorder %v19474_v50, 3  ;;  %v1343_v31 = vsel %vm24079_vm1, %v1338_v16, %v24087_v22 }
  0x99   : > { %1619 = vmatpush1.bf16.msra.mxu1 %v18257_v12  ;;  %1313 = vst.msk [vmem:[#allocation2 + $0x38] sm:$0xff] %vm24081_vm3, %v24099_v53  ;;  %1315 = vst.msk [vmem:[#allocation2 + $0x48] sm:$0xff] %vm24081_vm3, %v24099_v53 }
  0x9a   : > { %1620 = vmatprep.subr.bf16.mxu1 %v24097_v5  ;;  %1317 = vst.msk [vmem:[#allocation2 + $0x58] sm:$0xff] %vm24081_vm3, %v24099_v53  ;;  %vm19524_vm10 = vmand %vm1375_vm4, %vm24080_vm7 }
  0x9b   : > { %16424 = vmatpush3.bf16.msra.mxu0 %v18964_v56  ;;  %1358 = vst.msk [vmem:[#allocation2 + $0x18] sm:$0xf0] %vm1357_vm5, %v1335_v54  ;;  %vm19548_vm12 = vmand %vm24082_vm6, %vm24093_vm8  ;;  %vm2023_vm5 = vcmask 1042432   ;;  %v14021_v35 = vsel %vm19524_vm10, 1.0, %v24099_v53  ;;  %vm24094_vm10 = vcmask 1040384  }
  0x9c   : > { %16425 = vmatprep.subr.bf16.mxu0 %v18965_v57  ;;  %vm2008_vm13 = vmand %vm1375_vm4, %vm2004_vm9  ;;  %1362 = vst.msk [vmem:[#allocation2 + $0x38] sm:$0xff] %vm24081_vm3, %v1343_v31  ;;  %v1456_v44 = vrot.slane %v14021_v35, 7 }
  0x9d   : > { %1621 = vmatpush1.bf16.msra.mxu1 %v18259_v20  ;;  %vm2009_vm0 = vmand %vm24082_vm6, %vm2005_vm11 }
  0x9e   : > { %1622 = vmatprep.subr.bf16.mxu1 %v24097_v5  ;;  %vm1383_vm2 = vmand %vm1375_vm4, %vm24077_vm15  ;;  %v19639_v49 = vsel %vm24094_vm10, %v19622_v41, %v1456_v44 }
  0x9f   : > { %16426 = vmatpush3.bf16.msra.mxu0 %v18966_v58  ;;  %v19588_v21 = vsel %vm1383_vm2, 1.0, %v24099_v53  ;;  %24273 = vst [vmem:[#allocation6_spill] sm:$0xff] %v19639_v49 }
  0xa0   : > { %16427 = vmatprep.subr.bf16.mxu0 %v18967_v59  ;;  %v18264_v59 = vld [vmem:[%s24069_s4 + $0x48] sm:$0xff]   ;;  %24270 = vst [vmem:[#allocation3_spill] sm:$0xff] %v19588_v21 }
  0xa1   : > { %1623 = vmatpush1.bf16.msra.mxu1 %v18261_v39  ;;  %v14022_v39 = vsel %vm19548_vm12, 1.0, %v24099_v53  ;;  %vm24095_vm12 = vcmp.le.s32.totalorder %v19466_v45, 2 }
  0xa2   : > { %1624 = vmatprep.subr.bf16.mxu1 %v24097_v5  ;;  %v19585_v20 = vld [vmem:[#allocation2 + $0x18] sm:$0xff]  ;;  %vm2249_vm2 = vmand %vm1375_vm4, %vm24095_vm12 }
  0xa3   : > { %16428 = vmatpush3.bf16.msra.mxu0 %v18968_v60 }
  0xa4   : > { %16429 = vmatprep.subr.bf16.mxu0 %v18969_v61 }
  0xa5   : > { %1625 = vmatpush1.bf16.msra.mxu1 %v18263_v48  ;;  %v1431_v48 = vld [vmem:[#allocation2 + $0x8] sm:$0xfe] }
  0xa6   : > { %1626 = vmatprep.subr.bf16.mxu1 %v24097_v5 }
  0xa7   : > { %16430 = vmatpush3.bf16.msra.mxu0 %v18970_v62 }
  0xa8   : > { %16431 = vmatprep.subr.bf16.mxu0 %v18971_v63 }
  0xab   : > { %16432 = vmatpush3.bf16.msra.mxu0 %v18972_v2  ;;  %v18273_v2 = vld [vmem:[%s24069_s4 + $0xb0] sm:$0xff]  }
  0xac   : > { %1741 = vmatprep.subr.bf16.mxu0 %v24097_v5 }
  0xae   : > { %1213 = vmatmul.mubr.bf16.vlgmr.msra.gmra.mrb[32].mxu0 %v18243_v0 }
  0xaf   : > { %1220 = vmatprep.mubr.bf16.mxu0 %v18246_v1  ;;  %1742 = vmatpush1.bf16.msra.mxu0 %v18249_v4  ;;  %v18265_v1 = vld [vmem:[%s24069_s4 + $0x90] sm:$0xff]   ;;  %v19537_v4 = vsel %vm24082_vm6, 1.0, %v24099_v53 }
  0xb0   : > { %1743 = vmatprep.subr.bf16.mxu0 %v24097_v5  ;;  %1627 = vmatpush1.bf16.msra.mxu1 %v18265_v1 }
  0xb1   : > { %1628 = vmatprep.subr.bf16.mxu1 %v24097_v5 }
  0xb3   : > { %1744 = vmatpush1.bf16.msra.mxu0 %v18250_v6 }
  0xb4   : > { %1745 = vmatprep.subr.bf16.mxu0 %v24097_v5  ;;  %1629 = vmatpush1.bf16.msra.mxu1 %v18267_v9 }
  0xb5   : > { %1630 = vmatprep.subr.bf16.mxu1 %v24097_v5 }
  0xb6   : > { %1221 = vmatmul.mubr.bf16.gmra.mrb[36].mxu0 %v18248_v3  ;;  %v19532_v3 = vsel %vm1375_vm4, 1.0, %v24099_v53  ;;  %vm24083_vm4 = vcmp.ge.s32.totalorder %v19435_v34, 1 }
  0xb7   : > { %1746 = vmatpush1.bf16.msra.mxu0 %v18251_v7  ;;  %v18266_v7 = vld [vmem:[%s24069_s4 + $0x50] sm:$0xff]   ;;  %v24096_v12 = vrot.slane %v19532_v3, 6 }
  0xb8   : > { %1747 = vmatprep.subr.bf16.mxu0 %v24097_v5 }
  0xbb   : > { %1748 = vmatpush1.bf16.msra.mxu0 %v18252_v8 }
  0xbc   : > { %1749 = vmatprep.subr.bf16.mxu0 %v24097_v5 }
  0xbf   : > { %1750 = vmatpush1.bf16.msra.mxu0 %v18254_v11  ;;  %v19567_v11 = vsel %vm2008_vm13, 1.0, %v24099_v53  ;;  %vm1253_vm13 = vcmp.ge.s32.totalorder %v19413_v15, 5 }
  0xc0   : > { %1751 = vmatprep.subr.bf16.mxu0 %v24097_v5  ;;  %v1257_v10 = vsel %vm1253_vm13, 1, %v24097_v5 }
  0xc3   : > { %1752 = vmatpush1.bf16.msra.mxu0 %v18256_v13  ;;  %v1810_v13 = vrot.slane %v19537_v4, 6 }
  0xc4   : > { %1753 = vmatprep.subr.bf16.mxu0 %v24097_v5 }
  0xc7   : > { %1754 = vmatpush1.bf16.msra.mxu0 %v18258_v17  ;;  %v19580_v17 = vsel %vm2009_vm0, 1.0, %v24099_v53  ;;  %vm24120_vm0 = vcmp.le.s32.totalorder %v19474_v50, 2 }
  0xc8   : > { %1755 = vmatprep.subr.bf16.mxu0 %v24097_v5  ;;  %vm2250_vm15 = vmand %vm24082_vm6, %vm24120_vm0 }
  0xc9   : > { %v19690_v31 = vsel %vm2250_vm15, 1.0, %v24099_v53  ;;  %vm24078_vm15 = vsmask.f32 7424 }
  0xcb   : > { %1756 = vmatpush1.bf16.msra.mxu0 %v18260_v30  ;;  %v18269_v30 = vld [vmem:[%s24069_s4 + $0xa0] sm:$0xff]  }
  0xcc   : > { %1757 = vmatprep.subr.bf16.mxu0 %v24097_v5  ;;  %1631 = vmatpush1.bf16.msra.mxu1 %v18269_v30  ;;  %v1297_v30 = vmul.u32 5, %v1257_v10  ;;  %v24088_v10 = vrot.slane %v19690_v31, 4 }
  0xcd   : > { %1632 = vmatprep.subr.bf16.mxu1 %v24097_v5 }
  0xcf   : > { %1758 = vmatpush1.bf16.msra.mxu0 %v18262_v43 }
  0xd0   : > { %1759 = vmatprep.subr.bf16.mxu0 %v24097_v5 }
  0xd3   : > { %1760 = vmatpush1.bf16.msra.mxu0 %v18264_v59 }
  0xd4   : > { %1761 = vmatprep.subr.bf16.mxu0 %v24097_v5 }
  0xd7   : > { %1762 = vmatpush1.bf16.msra.mxu0 %v18266_v7 }
  0xd8   : > { %1763 = vmatprep.subr.bf16.mxu0 %v24097_v5 }
 0x101   : > { %v16209_v18 = vpop.f32.mrb[0].mxu0  ;;  %v16237_v19 = vpop.f32.mrb[0].mxu1 }
 0x102   : > { %v16210_v23 = vpop.f32.mrb[1].mxu0  ;;  %v16238_v24 = vpop.f32.mrb[1].mxu1 }
 0x103   : > { %v19426_v26 = vadd.f32 %v16210_v23, %v16209_v18  ;;  %v19428_v27 = vadd.f32 %v16238_v24, %v16237_v19  ;;  %v16212_v28 = vpop.f32.mrb[2].mxu0  ;;  %v16240_v29 = vpop.f32.mrb[2].mxu1  ;;  %v18268_v18 = vld [vmem:[%s24069_s4 + $0x58] sm:$0xff]   ;;  %v1367_v19 = vld [vmem:[#allocation2 + $0x8] sm:$0xff]  ;;  %v24102_v23 = vrot.slane %v19567_v11, 5  ;;  %v19597_v24 = vsel %vm24124_vm14, %v24096_v12, %v1810_v13 }
 0x104   : > { %v16213_v32 = vpop.f32.mrb[3].mxu0  ;;  %v16241_v33 = vpop.f32.mrb[3].mxu1  ;;  %24271 = vst [vmem:[#allocation4_spill] sm:$0xff] %v19597_v24  ;;  %v1395_v25 = vmul.f32 0.0, %v1367_v19  ;;  %1764 = vmatpush1.bf16.msra.mxu0 %v18268_v18 }
 0x105   : > { %v683_v36 = vmax.f32 %v19426_v26, %v19428_v27  ;;  %v19440_v37 = vadd.f32 %v16213_v32, %v16212_v28  ;;  %v19442_v38 = vadd.f32 %v16241_v33, %v16240_v29  ;;  %v1397_v28 = vmul.f32 %v19588_v21, %v19585_v20  ;;  %2187 = vmatprep.subr.bf16.mxu0 %v24097_v5 }
 0x106   : > { %v1339_v29 = vsel %vm24079_vm1, %v1335_v54, %v1338_v16  ;;  %v24101_v32 = vrot.slane %v19580_v17, 5 }
 0x107   : > { %v684_v42 = vmax.f32 %v19440_v37, %v19442_v38  ;;  %1360 = vst.msk [vmem:[#allocation2 + $0x28] sm:$0xff] %vm24081_vm3, %v1339_v29  ;;  %v1403_v33 = vpack.c.bf16 %v1397_v28, %v1395_v25  ;;  %v19686_v25 = vsel %vm2249_vm2, 1.0, %v24099_v53  ;;  %vm2462_vm2 = vcmp.ge.s32.totalorder %v19447_v40, 1 }
 0x108   : > { %v19629_v43 = vsel %vm2023_vm5, %v24102_v23, %v24101_v32 }
 0x109   : > { %v16215_v46 = vpop.f32.mrb[4].mxu0  ;;  %v16243_v47 = vpop.f32.mrb[4].mxu1  ;;  %24272 = vst [vmem:[#allocation5_spill] sm:$0xff] %v19629_v43  ;;  %14073 = vmatprep.mubr.msk.bf16.mxu0 %vm24081_vm3, %v1403_v33  ;;  %v24089_v33 = vrot.slane %v19686_v25, 4 }
 0x10a   : > { %v16216_v51 = vpop.f32.mrb[5].mxu0  ;;  %v16244_v52 = vpop.f32.mrb[5].mxu1 }
 0x10b   : > { %v19484_v55 = vadd.f32 %v16216_v51, %v16215_v46  ;;  %v19486_v56 = vadd.f32 %v16244_v52, %v16243_v47  ;;  %v16218_v57 = vpop.f32.mrb[6].mxu0  ;;  %v16246_v58 = vpop.f32.mrb[6].mxu1  ;;  %v1458_v46 = vrot.slane %v14022_v39, 7  ;;  %v18271_v47 = vld [vmem:[%s24069_s4 + $0xa8] sm:$0xff]   ;;  %v24090_v51 = vmov 1.0  }
 0x10c   : > { %v16219_v60 = vpop.f32.mrb[7].mxu0  ;;  %v16247_v61 = vpop.f32.mrb[7].mxu1  ;;  %v19642_v52 = vrot.slane %v24090_v51, 7  ;;  %1633 = vmatpush1.bf16.msra.mxu1 %v18271_v47  ;;  %v19652_v59 = vrot.slane %v24090_v51, 6  ;;  %v19718_v26 = vsel %vm24079_vm1, %v24089_v33, %v24088_v10  ;;  %vm19742_vm1 = vmand %vm2462_vm2, %vm24093_vm8 }
 0x10d   : > { %v685_v62 = vmax.f32 %v19484_v55, %v19486_v56  ;;  %v19511_v63 = vadd.f32 %v16219_v60, %v16218_v57  ;;  %v19513_v0 = vadd.f32 %v16247_v61, %v16246_v58  ;;  %v1467_v57 = vmul.f32 %v19622_v41, %v1431_v48  ;;  %1634 = vmatprep.subr.bf16.mxu1 %v24097_v5  ;;  %v1433_v60 = vld [vmem:[#allocation2 + $0x38] sm:$0x3] }
 0x10e   : > { %24274 = vst [vmem:[#allocation7_spill] sm:$0xff] %v19642_v52  ;;  %v19646_v54 = vld [vmem:[#allocation2 + $0x28] sm:$0xff]  ;;  %v1469_v58 = vmul.f32 %v19639_v49, %v19585_v20  ;;  %24275 = vst [vmem:[#allocation8_spill] sm:$0xff] %v19652_v59  ;;  %v19656_v61 = vsel %vm24094_vm10, %v1456_v44, %v1458_v46  ;;  %v19660_v1 = vsel %vm24094_vm10, %v1458_v46, %v19642_v52 }
 0x10f   : > { %v686_v6 = vmax.f32 %v19511_v63, %v19513_v0  ;;  %24276 = vst [vmem:[#allocation9_spill] sm:$0xff] %v19660_v1  ;;  %v1471_v7 = vmul.f32 %v19656_v61, %v19646_v54  ;;  %v1473_v8 = vmul.f32 %v19660_v1, %v1433_v60  ;;  %v19683_v16 = vsel %vm24124_vm14, %v1810_v13, %v19652_v59  ;;  %v18275_v13 = vld [vmem:[%s24069_s4 + $0xb8] sm:$0xff]  }
 0x110   : > { %v1475_v9 = vpack.c.bf16 %v1469_v58, %v1467_v57  ;;  %24277 = vst [vmem:[#allocation10_spill] sm:$0xff] %v19683_v16  ;;  %1635 = vmatpush1.bf16.msra.mxu1 %v18273_v2  ;;  %24278 = vst [vmem:[#allocation11_spill] sm:$0xff] %v19718_v26 }
 0x111   : > { %v1477_v18 = vpack.c.bf16 %v1473_v8, %v1471_v7  ;;  %1636 = vmatprep.subr.bf16.mxu1 %v24097_v5 }
 0x112   : > { %v1519_v19 = vshll.u32 %v1475_v9, 16  ;;  %v1517_v39 = vshrl.u32 %v1475_v9, 16 }
 0x113   : > { %v1524_v46 = vshll.u32 %v1477_v18, 16 }
 0x114   : > { %v1521_v44 = vrot.slane %v1519_v19, 1  ;;  %1637 = vmatpush1.bf16.msra.mxu1 %v18275_v13 }
 0x115   : > { %v1526_v8 = vrot.slane %v1524_v46, 1  ;;  %1946 = vmatprep.subr.bf16.mxu1 %v24097_v5 }
 0x116   : > { %v1522_v7 = vor.u32 %v1521_v44, %v1517_v39 }
 0x121   : > { %v16265_v28 = vpop.f32.mrb[8].mxu0  ;;  %v16293_v29 = vpop.f32.mrb[8].mxu1 }
 0x122   : > { %v16266_v4 = vpop.f32.mrb[9].mxu0  ;;  %v16294_v35 = vpop.f32.mrb[9].mxu1 }
 0x123   : > { %v16267_v47 = vadd.f32 %v16266_v4, %v16265_v28  ;;  %v16268_v48 = vpop.f32.mrb[10].mxu0  ;;  %v19696_v57 = vadd.f32 %v16294_v35, %v16293_v29  ;;  %v16296_v58 = vpop.f32.mrb[10].mxu1  ;;  %v1527_v29 = vsel %vm24078_vm15, %v1522_v7, %v1526_v8  ;;  %v19710_v4 = vsub.s32 %v19413_v15, %v1297_v30  ;;  %vm19732_vm15 = vmand %vm24083_vm4, %vm24080_vm7 }
 0x124   : > { %v16269_v60 = vpop.f32.mrb[11].mxu0  ;;  %v16297_v2 = vpop.f32.mrb[11].mxu1  ;;  %14059 = vmatprep.mubr.msk.bf16.mxu1 %vm24081_vm3, %v1527_v29  ;;  %vm19751_vm3 = vmand %vm24083_vm4, %vm24095_vm12 }
 0x125   : > { %v19703_v9 = vmax.f32 %v683_v36, %v16267_v47  ;;  %v16270_v19 = vadd.f32 %v16269_v60, %v16268_v48  ;;  %v19705_v28 = vadd.f32 %v16297_v2, %v16296_v58  ;;  %vm24084_vm7 = vcmp.ge.s32.totalorder %v19710_v4, 1  ;;  %vm3337_vm4 = vmand %vm2462_vm2, %vm24120_vm0 }
 0x126   : > { %v1531_v58 = vshrl.u32 %v1477_v18, 16  ;;  %vm19761_vm6 = vmand %vm1253_vm13, %vm24084_vm7  ;;  %v19768_v2 = vsel %vm19732_vm15, 1.0, %v24099_v53  ;;  %vm2316_vm7 = vcmask 1045504   ;;  %vm2244_vm15 = vcmp.le.s32.totalorder %v19710_v4, 2 }
 0x127   : > { %v19723_v27 = vmax.f32 %v684_v42, %v16270_v19  ;;  %v839_v36 = vmax.f32 %v19703_v9, %v19696_v57  ;;  %v24086_v30 = vrot.slane %v19768_v2, 2 }
 0x128   : > { %v19781_v29 = vor.u32 %v1531_v58, %v1526_v8  ;;  %v14361_v8 = vsel %vm3337_vm4, 1.0, %v24099_v53  ;;  %v3790_v58 = vrot.slane %v24090_v51, 5 }
 0x129   : > { %v840_v35 = vmax.f32 %v19723_v27, %v19705_v28  ;;  %v16271_v13 = vpop.f32.mrb[12].mxu0  ;;  %v16299_v37 = vpop.f32.mrb[12].mxu1  ;;  %v19786_v27 = vsel %vm19742_vm1, 1.0, %v24099_v53  ;;  %vm3335_vm1 = vmand %vm1253_vm13, %vm2244_vm15  ;;  %v3354_v38 = vrot.slane %v14361_v8, 7 }
 0x12a   : > { %v16272_v42 = vpop.f32.mrb[13].mxu0  ;;  %v16300_v39 = vpop.f32.mrb[13].mxu1  ;;  %v24085_v56 = vrot.slane %v19786_v27, 2  ;;  %v14359_v0 = vsel %vm3335_vm1, 1.0, %v24099_v53  ;;  %vm24122_vm1 = vcmp.le.s32.totalorder %v19435_v34, 3 }
 0x12b   : > { %v16273_v46 = vadd.f32 %v16272_v42, %v16271_v13  ;;  %v16274_v47 = vpop.f32.mrb[14].mxu0  ;;  %v19755_v48 = vadd.f32 %v16300_v39, %v16299_v37  ;;  %v16302_v57 = vpop.f32.mrb[14].mxu1  ;;  %v19816_v42 = vrot.slane %v14359_v0, 7  ;;  %v19824_v44 = vsel %vm24094_vm10, %v3354_v38, %v19622_v41 }
 0x12c   : > { %v16275_v7 = vpop.f32.mrb[15].mxu0  ;;  %v16303_v9 = vpop.f32.mrb[15].mxu1  ;;  %v19809_v63 = vsel %vm2316_vm7, %v24086_v30, %v24085_v56  ;;  %24290 = vst [vmem:[#allocation15_spill] sm:$0xff] %v19824_v44 }
 0x12d   : > { %v19777_v18 = vmax.f32 %v685_v62, %v16273_v46  ;;  %v16276_v19 = vadd.f32 %v16275_v7, %v16274_v47  ;;  %v19779_v28 = vadd.f32 %v16303_v9, %v16302_v57  ;;  %v14360_v62 = vsel %vm19751_vm3, 1.0, %v24099_v53  ;;  %24287 = vst [vmem:[#allocation12_spill] sm:$0xff] %v19809_v63  ;;  %24288 = vst [vmem:[#allocation13_spill] sm:$0xff] %v19816_v42 }
 0x12e   : > { %vm24123_vm3 = vcmp.le.s32.totalorder %v19710_v4, 3 }
 0x12f   : > { %v19792_v13 = vmax.f32 %v686_v6, %v16276_v19  ;;  %v841_v55 = vmax.f32 %v19777_v18, %v19755_v48  ;;  %v3352_v6 = vrot.slane %v14360_v62, 7  ;;  %vm19830_vm4 = vmand %vm1253_vm13, %vm24123_vm3  ;;  %v19841_v48 = vsel %vm24093_vm8, 1.0, %v24099_v53 }
 0x130   : > { %24294 = vst [vmem:[#allocation17_spill] sm:$0xff] %v19841_v48  ;;  %v24092_v57 = vrot.slane %v19841_v48, 5  ;;  %vm5484_vm8 = vmand %vm24122_vm1, %vm24095_vm12  ;;  %vm1859_vm3 = vcmask 1046528  }
 0x131   : > { %v842_v37 = vmax.f32 %v19792_v13, %v19779_v28  ;;  %v19820_v39 = vsel %vm24094_vm10, %v3352_v6, %v3354_v38  ;;  %v19836_v47 = vsel %vm24094_vm10, %v19816_v42, %v3352_v6  ;;  %vm24121_vm10 = vcmp.le.s32.totalorder %v19447_v40, 3 }
 0x132   : > { %24289 = vst [vmem:[#allocation14_spill] sm:$0xff] %v19820_v39  ;;  %24293 = vst [vmem:[#allocation16_spill] sm:$0xff] %v19836_v47  ;;  %v19848_v7 = vsel %vm2023_vm5, %v24092_v57, %v3790_v58 }
 0x133   : > { %24295 = vst [vmem:[#allocation18_spill] sm:$0xff] %v19848_v7  ;;  %vm5485_vm12 = vmand %vm24121_vm10, %vm24120_vm0  ;;  %vm24319_vm0 = vsmask.f32 7424 }
 0x141   : > { %v16321_v9 = vpop.f32.mrb[16].mxu0  ;;  %v16349_v18 = vpop.f32.mrb[16].mxu1 }
 0x142   : > { %v16322_v19 = vpop.f32.mrb[17].mxu0  ;;  %v16350_v28 = vpop.f32.mrb[17].mxu1 }
 0x143   : > { %v16323_v13 = vadd.f32 %v16322_v19, %v16321_v9  ;;  %v16324_v62 = vpop.f32.mrb[18].mxu0  ;;  %v16351_v8 = vadd.f32 %v16350_v28, %v16349_v18  ;;  %v16352_v0 = vpop.f32.mrb[18].mxu1 }
 0x144   : > { %v16325_v6 = vpop.f32.mrb[19].mxu0  ;;  %v16353_v38 = vpop.f32.mrb[19].mxu1 }
 0x145   : > { %v917_v56 = vmax.f32 %v839_v36, %v16323_v13  ;;  %v16326_v30 = vadd.f32 %v16325_v6, %v16324_v62  ;;  %v16354_v22 = vadd.f32 %v16353_v38, %v16352_v0  ;;  %v19858_v36 = vsel %vm2244_vm15, 1.0, %v24099_v53 }
 0x146   : > { %24296 = vst [vmem:[#allocation19_spill] sm:$0xff] %v19858_v36  ;;  %v19867_v19 = vrot.slane %v19858_v36, 5  ;;  %vm1380_vm15 = vcmp.ge.s32.totalorder %v19474_v50, 2 }
 0x147   : > { %v918_v10 = vmax.f32 %v840_v35, %v16326_v30  ;;  %v995_v33 = vmax.f32 %v917_v56, %v16351_v8  ;;  %v14766_v35 = vsel %vm5484_vm8, 1.0, %v24099_v53  ;;  %v14767_v8 = vsel %vm5485_vm12, 1.0, %v24099_v53  ;;  %vm5273_vm8 = vmand %vm24122_vm1, %vm2004_vm9 }
 0x148   : > { %24297 = vst [vmem:[#allocation20_spill] sm:$0xff] %v19867_v19  ;;  %v5500_v28 = vrot.slane %v14766_v35, 5  ;;  %v19879_v35 = vrot.slane %v24099_v53, 5  ;;  %vm5274_vm12 = vmand %vm24121_vm10, %vm2005_vm11  ;;  %vm24320_vm10 = vcmp.ge.s32.totalorder %v19466_v45, 2  ;;  %vm24321_vm1 = vcmp.ge.s32.totalorder %v19435_v34, 1 }
 0x149   : > { %v996_v51 = vmax.f32 %v918_v10, %v16354_v22  ;;  %v16327_v58 = vpop.f32.mrb[20].mxu0  ;;  %v16355_v57 = vpop.f32.mrb[20].mxu1 }
 0x14a   : > { %v16328_v9 = vpop.f32.mrb[21].mxu0  ;;  %v16356_v18 = vpop.f32.mrb[21].mxu1  ;;  %24299 = vst [vmem:[#allocation22_spill] sm:$0xff] %v19879_v35 }
 0x14b   : > { %v16329_v30 = vadd.f32 %v16328_v9, %v16327_v58  ;;  %v16330_v22 = vpop.f32.mrb[22].mxu0  ;;  %v16357_v10 = vadd.f32 %v16356_v18, %v16355_v57  ;;  %v16358_v56 = vpop.f32.mrb[22].mxu1  ;;  %v19872_v57 = vsel %vm2023_vm5, %v19867_v19, %v5500_v28  ;;  %v5502_v58 = vrot.slane %v14767_v8, 5 }
 0x14c   : > { %v16331_v13 = vpop.f32.mrb[23].mxu0  ;;  %v16359_v62 = vpop.f32.mrb[23].mxu1  ;;  %24298 = vst [vmem:[#allocation21_spill] sm:$0xff] %v19872_v57 }
 0x14d   : > { %v919_v0 = vmax.f32 %v841_v55, %v16329_v30  ;;  %v16332_v6 = vadd.f32 %v16331_v13, %v16330_v22  ;;  %v16360_v38 = vadd.f32 %v16359_v62, %v16358_v56  ;;  %v19886_v30 = vsel %vm2023_vm5, %v5500_v28, %v5502_v58 }
 0x14e   : > { %24300 = vst [vmem:[#allocation23_spill] sm:$0xff] %v19886_v30  ;;  %v19890_v22 = vsel %vm2023_vm5, %v5502_v58, %v19879_v35  ;;  %v19893_v56 = vsel %vm5273_vm8, 1.0, %v24099_v53  ;;  %vm24309_vm8 = vcmp.ge.s32.totalorder %v19447_v40, 2 }
 0x14f   : > { %v920_v9 = vmax.f32 %v842_v37, %v16332_v6  ;;  %v997_v18 = vmax.f32 %v919_v0, %v16357_v10  ;;  %24301 = vst [vmem:[#allocation24_spill] sm:$0xff] %v19890_v22  ;;  %24302 = vst [vmem:[#allocation25_spill] sm:$0xff] %v19893_v56  ;;  %v19896_v37 = vsel %vm5274_vm12, 1.0, %v24099_v53  ;;  %v24111_v10 = vrot.slane %v19893_v56, 6 }
 0x150   : > { %24303 = vst [vmem:[#allocation26_spill] sm:$0xff] %v19896_v37  ;;  %v24110_v13 = vrot.slane %v19896_v37, 6  ;;  %vm1384_vm12 = vmand %vm24309_vm8, %vm1380_vm15  ;;  %vm24312_vm8 = vcmask 1043456  }
 0x151   : > { %v998_v55 = vmax.f32 %v920_v9, %v16360_v38 }
 0x152   : > { %v19905_v28 = vsel %vm24124_vm14, %v24111_v10, %v24110_v13 }
 0x153   : > { %24304 = vst [vmem:[#allocation27_spill] sm:$0xff] %v19905_v28 }
 0x161   : > { %v16377_v62 = vpop.f32.mrb[24].mxu0  ;;  %v16405_v8 = vpop.f32.mrb[24].mxu1 }
 0x162   : > { %v16378_v0 = vpop.f32.mrb[25].mxu0  ;;  %v16406_v6 = vpop.f32.mrb[25].mxu1 }
 0x163   : > { %v16379_v38 = vadd.f32 %v16378_v0, %v16377_v62  ;;  %v16380_v58 = vpop.f32.mrb[26].mxu0  ;;  %v16407_v9 = vadd.f32 %v16406_v6, %v16405_v8  ;;  %v16408_v12 = vpop.f32.mrb[26].mxu1 }
 0x164   : > { %v16381_v5 = vpop.f32.mrb[27].mxu0  ;;  %v16409_v53 = vpop.f32.mrb[27].mxu1 }
 0x165   : > { %v1073_v32 = vmax.f32 %v995_v33, %v16379_v38  ;;  %v16382_v23 = vadd.f32 %v16381_v5, %v16380_v58  ;;  %v16410_v22 = vadd.f32 %v16409_v53, %v16408_v12  ;;  %v2040_v38 = vmul.f32 %v19629_v43, %v19646_v54 }
 0x167   : > { %v1074_v30 = vmax.f32 %v996_v51, %v16382_v23  ;;  %v1151_v37 = vmax.f32 %v1073_v32, %v16407_v9  ;;  %v14017_v23 = vld [vmem:[%s24068_s3] ss:$0 sm:$0xff] }
 0x169   : > { %v1152_v57 = vmax.f32 %v1074_v30, %v16410_v22  ;;  %v16383_v56 = vpop.f32.mrb[28].mxu0  ;;  %v16411_v19 = vpop.f32.mrb[28].mxu1  ;;  %v2000_v30 = vld [vmem:[#allocation2 + $0x8] sm:$0xf8] }
 0x16a   : > { %v16384_v13 = vpop.f32.mrb[29].mxu0  ;;  %v16412_v10 = vpop.f32.mrb[29].mxu1 }
 0x16b   : > { %v16385_v28 = vadd.f32 %v16384_v13, %v16383_v56  ;;  %v16386_v52 = vpop.f32.mrb[30].mxu0  ;;  %v16413_v36 = vadd.f32 %v16412_v10, %v16411_v19  ;;  %v16414_v59 = vpop.f32.mrb[30].mxu1 }
 0x16c   : > { %v16387_v62 = vpop.f32.mrb[31].mxu0  ;;  %v16415_v0 = vpop.f32.mrb[31].mxu1 }
 0x16d   : > { %v1075_v8 = vmax.f32 %v997_v18, %v16385_v28  ;;  %v16388_v6 = vadd.f32 %v16387_v62, %v16386_v52  ;;  %v16416_v7 = vadd.f32 %v16415_v0, %v16414_v59  ;;  %v2002_v18 = vld [vmem:[#allocation2 + $0x38] sm:$0xf]  ;;  %v24305_v52 = vrot.slane %v19567_v11, 5 }
 0x16f   : > { %v1076_v48 = vmax.f32 %v998_v55, %v16388_v6  ;;  %v1153_v33 = vmax.f32 %v1075_v8, %v16413_v36  ;;  %v19914_v59 = vsel %vm2023_vm5, %v19879_v35, %v24305_v52 }
 0x170   : > { %24306 = vst [vmem:[#allocation28_spill] sm:$0xff] %v19914_v59 }
 0x171   : > { %v1154_v5 = vmax.f32 %v1076_v48, %v16416_v7  ;;  %v2036_v48 = vmul.f32 %v19879_v35, %v2000_v30  ;;  %v2038_v7 = vmul.f32 %v19914_v59, %v19585_v20 }
 0x181   : > { %v16433_v53 = vpop.f32.mrb[32].mxu0 }
 0x182   : > { %v16434_v12 = vpop.f32.mrb[33].mxu0 }
 0x183   : > { %v16435_v32 = vadd.f32 %v16434_v12, %v16433_v53  ;;  %v16436_v51 = vpop.f32.mrb[34].mxu0 }
 0x184   : > { %v16437_v22 = vpop.f32.mrb[35].mxu0 }
 0x185   : > { %v1229_v19 = vmax.f32 %v1151_v37, %v16435_v32  ;;  %v16438_v56 = vadd.f32 %v16437_v22, %v16436_v51  ;;  %v24310_v51 = vmov 0.0  }
 0x186   : > { %v19934_v30 = vsel %vm1384_vm12, 1.0, %v24310_v51  ;;  %vm24313_vm12 = vmmov %vm24312_vm8 }
 0x187   : > { %v1240_v10 = vadd.f32 %v14017_v23, %v1229_v19  ;;  %v1230_v13 = vmax.f32 %v1152_v57, %v16438_v56  ;;  %v24307_v57 = vrot.slane %v19580_v17, 5  ;;  %v2044_v17 = vpack.c.bf16 %v2038_v7, %v2036_v48  ;;  %24311 = vst [vmem:[#allocation30_spill] sm:$0xff] %v19934_v30  ;;  %v1373_v48 = vld [vmem:[#allocation2 + $0x38] sm:$0x1] }
 0x189   : > { %v1244_v36 = vmax.f32 %v1240_v10, 0.0  ;;  %v1241_v55 = vadd.f32 %v14017_v23, %v1230_v13  ;;  %v16439_v37 = vpop.f32.mrb[36].mxu0  ;;  %v19924_v28 = vsel %vm2023_vm5, %v24307_v57, %v19879_v35  ;;  %v1430_v13 = vld [vmem:[#allocation2] sm:$0xfe]  ;;  %v2094_v7 = vshll.u32 %v2044_v17, 16 }
 0x18a   : > { %24308 = vst [vmem:[#allocation29_spill] sm:$0xff] %v19924_v28  ;;  %v16440_v11 = vpop.f32.mrb[37].mxu0  ;;  %v2042_v58 = vmul.f32 %v19924_v28, %v2002_v18  ;;  %v2091_v18 = vshrl.u32 %v2044_v17, 16 }
 0x18b   : > { %v1334_v9 = vrot.slane %v1244_v36, 4  ;;  %v1245_v62 = vmax.f32 %v1241_v55, 0.0  ;;  %v16441_v0 = vadd.f32 %v16440_v11, %v16439_v37  ;;  %v16442_v8 = vpop.f32.mrb[38].mxu0  ;;  %v2096_v17 = vrot.slane %v2094_v7, 2 }
 0x18c   : > { %v16443_v6 = vpop.f32.mrb[39].mxu0  ;;  %v2046_v22 = vpack.c.bf16 %v2042_v58, %v2040_v38  ;;  %v1466_v58 = vmul.f32 %v19622_v41, %v1430_v13  ;;  %v24315_v13 = vmov 0  }
 0x18d   : > { %1356 = vst [vmem:[#allocation2 + $0x10] sm:$0xf0] %v1334_v9  ;;  %v1336_v53 = vrot.slane %v1245_v62, 4  ;;  %v1231_v12 = vmax.f32 %v1153_v33, %v16441_v0  ;;  %v16444_v32 = vadd.f32 %v16443_v6, %v16442_v8  ;;  %v1399_v33 = vmul.f32 %v19934_v30, %v19646_v54  ;;  %v18270_v0 = vld [vmem:[%s24069_s4 + $0x120] sm:$0xff]  }
 0x18e   : > { %v2099_v55 = vshrl.u32 %v2046_v22, 16  ;;  %v2102_v37 = vshll.u32 %v2046_v22, 16  ;;  %v2093_v6 = vrot.slane %v2091_v18, 1 }
 0x18f   : > { %v19937_v19 = vsel %vm24312_vm8, %v1334_v9, %v1336_v53  ;;  %v1242_v56 = vadd.f32 %v14017_v23, %v1231_v12  ;;  %v1232_v10 = vmax.f32 %v1154_v5, %v16444_v32  ;;  %v1405_v8 = vpack.c.bf16 %v1373_v48, %v1399_v33  ;;  %v19964_v48 = vld [vmem:[#allocation2] sm:$0xff] }
 0x190   : > { %1359 = vst [vmem:[#allocation2 + $0x20] sm:$0xff] %v19937_v19  ;;  %v2104_v22 = vrot.slane %v2102_v37, 2  ;;  %v2097_v18 = vor.u32 %v2096_v17, %v2093_v6  ;;  %v19967_v7 = vrot.slane %v19964_v48, 6  ;;  %v14279_v15 = vsel %vm2462_vm2, 1.0, %v19964_v48 }
 0x191   : > { %v1246_v52 = vmax.f32 %v1242_v56, 0.0  ;;  %v1243_v36 = vadd.f32 %v14017_v23, %v1232_v10  ;;  %v18272_v10 = vld [vmem:[%s24069_s4 + $0x128] sm:$0xff]  }
 0x192   : > { %24316 = vst [vmem:[#allocation31_spill] sm:$0xff] %v19967_v7 }
 0x193   : > { %v1340_v57 = vrot.slane %v1246_v52, 4  ;;  %v1247_v11 = vmax.f32 %v1243_v36, 0.0 }
 0x194   : > { %v19942_v38 = vld [vmem:[#allocation2 + $0x10] sm:$0xff] }
 0x195   : > { %v1341_v5 = vsel %vm24313_vm12, %v1336_v53, %v1340_v57  ;;  %v1344_v9 = vrot.slane %v1247_v11, 4  ;;  %v1396_v62 = vmul.f32 %v19588_v21, %v19942_v38  ;;  %v1468_v23 = vmul.f32 %v19639_v49, %v19942_v38 }
 0x196   : > { %1361 = vst [vmem:[#allocation2 + $0x30] sm:$0xff] %v1341_v5  ;;  %v2101_v53 = vrot.slane %v2099_v55, 1  ;;  %vm24314_vm12 = vcmask 523264   ;;  %v18274_v55 = vld [vmem:[%s24069_s4 + $0x130] sm:$0xff]   ;;  %v1470_v11 = vmul.f32 %v19656_v61, %v19937_v19  ;;  %v1791_v5 = vld [vmem:[#allocation2 + $0x8] sm:$0xfc] }
 0x197   : > { %v1345_v12 = vsel %vm24312_vm8, %v1340_v57, %v1344_v9  ;;  %v1402_v32 = vpack.c.bf16 %v1396_v62, %v24310_v51  ;;  %v1474_v56 = vpack.c.bf16 %v1468_v23, %v1466_v58  ;;  %v1398_v51 = vmul.f32 %v19934_v30, %v19937_v19  ;;  %v1793_v9 = vld [vmem:[#allocation2 + $0x38] sm:$0x7] }
 0x198   : > { %1363 = vst [vmem:[#allocation2 + $0x40] sm:$0x1f] %v1345_v12  ;;  %v19960_v52 = vor.u32 %v2104_v22, %v2101_v53  ;;  %vm24127_vm8 = vsmask.f32 6400  ;;  %v1819_v17 = vmul.f32 %v19967_v7, %v1791_v5  ;;  %v1825_v53 = vmul.f32 %v19683_v16, %v1793_v9  ;;  %v18281_v5 = vld [vmem:[%s24069_s4 + $0xd0] sm:$0xff]  }
 0x199   : > { %1774 = vmatmul.mubr.bf16.vlgmr.msra.gmra.mrb[40].mxu0 %v1402_v32  ;;  %v1507_v36 = vshll.u32 %v1474_v56, 16  ;;  %v1823_v32 = vmul.f32 %v19597_v24, %v19646_v54  ;;  %v1505_v22 = vshrl.u32 %v1474_v56, 16  ;;  %v18278_v56 = vld [vmem:[%s24069_s4 + $0x140] sm:$0xff]  }
 0x19a   : > { %2188 = vmatpush1.bf16.msra.mxu0 %v18270_v0  ;;  %14074 = vmatprep.mubr.msk.bf16.mxu0 %vm24314_vm12, %v1405_v8  ;;  %v2106_v62 = vsel %vm24127_vm8, %v2097_v18, %v19960_v52  ;;  %v24317_v8 = vrot.slane %v19532_v3, 6  ;;  %v18276_v3 = vld [vmem:[%s24069_s4 + $0x138] sm:$0xff]   ;;  %v1999_v9 = vld [vmem:[#allocation2] sm:$0xf8] }
 0x19b   : > { %2189 = vmatprep.subr.bf16.mxu0 %v24315_v13  ;;  %v1509_v0 = vrot.slane %v1507_v36, 1  ;;  %v1829_v36 = vpack.c.bf16 %v1825_v53, %v1823_v32  ;;  %v18283_v53 = vld [vmem:[%s24069_s4 + $0xd8] sm:$0xff]  }
 0x19c   : > { %v19982_v6 = vsel %vm24124_vm14, %v19967_v7, %v24317_v8  ;;  %vm20031_vm14 = vmand %vm2462_vm2, %vm1380_vm15 }
 0x19d   : > { %v1372_v33 = vld [vmem:[#allocation2 + $0x30] sm:$0x1]  ;;  %24318 = vst [vmem:[#allocation32_spill] sm:$0xff] %v19982_v6  ;;  %v1821_v12 = vmul.f32 %v19982_v6, %v19585_v20  ;;  %v1510_v18 = vor.u32 %v1509_v0, %v1505_v22  ;;  %v18277_v20 = vld [vmem:[%s24069_s4 + $0xc0] sm:$0xff]   ;;  %v14197_v32 = vsel %vm20031_vm14, 1.0, %v19964_v48  ;;  %vm2480_vm14 = vcmask 1044480  }
 0x19e   : > { %v1432_v37 = vld [vmem:[#allocation2 + $0x30] sm:$0x3]  ;;  %2190 = vmatpush1.bf16.msra.mxu0 %v18272_v10  ;;  %v1404_v57 = vpack.c.bf16 %v1372_v33, %v1398_v51 }
 0x19f   : > { %v1472_v58 = vmul.f32 %v19660_v1, %v1432_v37  ;;  %2191 = vmatprep.subr.bf16.mxu0 %v24315_v13  ;;  %v1827_v54 = vpack.c.bf16 %v1821_v12, %v1819_v17  ;;  %v18282_v17 = vld [vmem:[%s24069_s4 + $0x150] sm:$0xff]  }
 0x1a0   : > { %v2001_v22 = vld [vmem:[#allocation2 + $0x30] sm:$0xf] }
 0x1a1   : > { %v1476_v23 = vpack.c.bf16 %v1472_v58, %v1470_v11  ;;  %1782 = vmatmul.mubr.bf16.gmra.mrb[44].mxu0 %v1404_v57  ;;  %v1863_v37 = vrot.slane %v1827_v54, 1  ;;  %v20009_v57 = vrot.slane %v1829_v36, 1  ;;  %v18280_v11 = vld [vmem:[%s24069_s4 + $0x148] sm:$0xff]   ;;  %v2484_v54 = vrot.slane %v14197_v32, 3  ;;  %v18285_v36 = vld [vmem:[%s24069_s4 + $0xe0] sm:$0xff]   ;;  %v20100_v32 = vld [vmem:[#allocation2 + $0x18] sm:$0xff] }
 0x1a2   : > { %2192 = vmatpush1.bf16.msra.mxu0 %v18274_v55  ;;  %14153 = vmatprep.mubr.msk.bf16.mxu0 %vm24314_vm12, %v2106_v62  ;;  %v18279_v55 = vld [vmem:[%s24069_s4 + $0xc8] sm:$0xff]  }
 0x1a3   : > { %v1512_v10 = vshll.u32 %v1476_v23, 16  ;;  %2193 = vmatprep.subr.bf16.mxu0 %v24315_v13  ;;  %v1528_v58 = vshrl.u32 %v1476_v23, 16  ;;  %v1865_v0 = vsel %vm1859_vm3, %v1863_v37, %v20009_v57  ;;  %v18287_v62 = vld [vmem:[%s24069_s4 + $0xe8] sm:$0xff]  }
 0x1a5   : > { %v1514_v51 = vrot.slane %v1512_v10, 1  ;;  %v2035_v10 = vmul.f32 %v19879_v35, %v1999_v9  ;;  %v2459_v9 = vld [vmem:[#allocation2 + $0x38] sm:$0x3f] }
 0x1a6   : > { %2194 = vmatpush1.bf16.msra.mxu0 %v18276_v3 }
 0x1a7   : > { %v1515_v33 = vsel %vm24319_vm0, %v1510_v18, %v1514_v51  ;;  %2195 = vmatprep.subr.bf16.mxu0 %v24315_v13  ;;  %vm1378_vm0 = vcmp.ge.s32.totalorder %v19710_v4, 2  ;;  %v1530_v23 = vor.u32 %v1528_v58, %v1514_v51  ;;  %v18284_v18 = vld [vmem:[%s24069_s4 + $0x158] sm:$0xff]   ;;  %v2037_v51 = vmul.f32 %v19914_v59, %v19942_v38 }
 0x1a8   : > { %1647 = vmatmul.mubr.bf16.vlgmr.msra.gmra.mrb[32].mxu1 %v1515_v33  ;;  %v18286_v33 = vld [vmem:[%s24069_s4 + $0x160] sm:$0xff]  }
 0x1a9   : > { %1947 = vmatpush1.bf16.msra.mxu1 %v18277_v20  ;;  %14060 = vmatprep.mubr.msk.bf16.mxu1 %vm24314_vm12, %v19781_v29  ;;  %vm20020_vm12 = vmand %vm24321_vm1, %vm24320_vm10  ;;  %vm24328_vm1 = vcmask 523264   ;;  %v2039_v29 = vmul.f32 %v19629_v43, %v19937_v19 }
 0x1aa   : > { %1948 = vmatprep.subr.bf16.mxu1 %v24315_v13  ;;  %2196 = vmatpush1.bf16.msra.mxu0 %v18278_v56  ;;  %vm20042_vm10 = vmand %vm1253_vm13, %vm1378_vm0  ;;  %v14196_v12 = vsel %vm20020_vm12, 1.0, %v19964_v48  ;;  %v2041_v56 = vmul.f32 %v19924_v28, %v2001_v22  ;;  %v18289_v22 = vld [vmem:[%s24069_s4 + $0xf0] sm:$0xff]  }
 0x1ab   : > { %2197 = vmatprep.subr.bf16.mxu0 %v24315_v13  ;;  %v14195_v3 = vsel %vm20042_vm10, 1.0, %v19964_v48  ;;  %v2482_v20 = vrot.slane %v14196_v12, 3  ;;  %vm24334_vm12 = vmmov %vm24328_vm1  ;;  %vm2529_vm10 = vsmask.f32 5376 }
 0x1ac   : > { %v20078_v37 = vrot.slane %v14195_v3, 3  ;;  %v18288_v3 = vld [vmem:[%s24069_s4 + $0x168] sm:$0xff]  }
 0x1ad   : > { %1949 = vmatpush1.bf16.msra.mxu1 %v18279_v55  ;;  %v2457_v55 = vld [vmem:[#allocation2 + $0x8] sm:$0xe0]  ;;  %v20094_v8 = vsel %vm2480_vm14, %v2482_v20, %v2484_v54 }
 0x1ae   : > { %1950 = vmatprep.subr.bf16.mxu1 %v24315_v13  ;;  %2198 = vmatpush1.bf16.msra.mxu0 %v18280_v11  ;;  %24329 = vst [vmem:[#allocation33_spill] sm:$0xff] %v20078_v37  ;;  %v24330_v11 = vmov 1.0   ;;  %24332 = vst [vmem:[#allocation35_spill] sm:$0xff] %v20094_v8  ;;  %v2493_v12 = vmul.f32 %v20078_v37, %v2457_v55 }
 0x1af   : > { %2199 = vmatprep.subr.bf16.mxu0 %v24315_v13  ;;  %v2486_v58 = vrot.slane %v24330_v11, 3 }
 0x1b0   : > { %1655 = vmatmul.mubr.bf16.gmra.mrb[36].mxu1 %v1530_v23  ;;  %v2045_v23 = vpack.c.bf16 %v2041_v56, %v2039_v29  ;;  %v18291_v29 = vld [vmem:[%s24069_s4 + $0xf8] sm:$0xff]  }
 0x1b1   : > { %1951 = vmatpush1.bf16.msra.mxu1 %v18281_v5  ;;  %14113 = vmatprep.mubr.msk.bf16.mxu1 %vm24328_vm1, %v1865_v0  ;;  %v2043_v5 = vpack.c.bf16 %v2037_v51, %v2035_v10  ;;  %v20090_v0 = vsel %vm2480_vm14, %v20078_v37, %v2482_v20  ;;  %v20110_v51 = vld [vmem:[#allocation2 + $0x28] sm:$0xff]  ;;  %vm24336_vm1 = vcmask 1043456  }
 0x1b2   : > { %1952 = vmatprep.subr.bf16.mxu1 %v24315_v13  ;;  %2200 = vmatpush1.bf16.msra.mxu0 %v18282_v17  ;;  %24331 = vst [vmem:[#allocation34_spill] sm:$0xff] %v20090_v0  ;;  %v20097_v17 = vsel %vm2480_vm14, %v2484_v54, %v2486_v58  ;;  %v2497_v20 = vmul.f32 %v20110_v51, %v20094_v8  ;;  %v2085_v56 = vshll.u32 %v2045_v23, 16 }
 0x1b3   : > { %2201 = vmatprep.subr.bf16.mxu0 %v24315_v13  ;;  %24333 = vst [vmem:[#allocation36_spill] sm:$0xff] %v20097_v17  ;;  %v2074_v10 = vshrl.u32 %v2043_v5, 16  ;;  %v2499_v54 = vmul.f32 %v20097_v17, %v2459_v9 }
 0x1b5   : > { %1953 = vmatpush1.bf16.msra.mxu1 %v18283_v53  ;;  %v2495_v53 = vmul.f32 %v20100_v32, %v20090_v0  ;;  %v2503_v58 = vpack.c.bf16 %v2499_v54, %v2497_v20 }
 0x1b6   : > { %1954 = vmatprep.subr.bf16.mxu1 %v24315_v13  ;;  %2202 = vmatpush1.bf16.msra.mxu0 %v18284_v18  ;;  %v2077_v18 = vshll.u32 %v2043_v5, 16  ;;  %v18292_v5 = vld [vmem:[%s24069_s4 + $0x178] sm:$0xff]  }
 0x1b7   : > { %2203 = vmatprep.subr.bf16.mxu0 %v24315_v13  ;;  %v2501_v55 = vpack.c.bf16 %v2495_v53, %v2493_v12  ;;  %v2076_v12 = vrot.slane %v2074_v10, 1  ;;  %v2559_v20 = vshll.u32 %v2503_v58, 16  ;;  %v18294_v10 = vld [vmem:[%s24069_s4 + $0x1e0] sm:$0xff]  }
 0x1b8   : > { %v2079_v53 = vrot.slane %v2077_v18, 2 }
 0x1b9   : > { %1955 = vmatpush1.bf16.msra.mxu1 %v18285_v36  ;;  %v18290_v36 = vld [vmem:[%s24069_s4 + $0x170] sm:$0xff]   ;;  %v2551_v43 = vshll.u32 %v2501_v55, 16 }
 0x1ba   : > { %1956 = vmatprep.subr.bf16.mxu1 %v24315_v13  ;;  %2204 = vmatpush1.bf16.msra.mxu0 %v18286_v33  ;;  %v2082_v33 = vshrl.u32 %v2045_v23, 16  ;;  %v2548_v23 = vshrl.u32 %v2501_v55, 16  ;;  %v2561_v55 = vrot.slane %v2559_v20, 3  ;;  %v18298_v20 = vld [vmem:[%s24069_s4 + $0x1f0] sm:$0xff]  }
 0x1bb   : > { %2205 = vmatprep.subr.bf16.mxu0 %v24315_v13  ;;  %v2553_v18 = vrot.slane %v2551_v43, 3  ;;  %v18296_v43 = vld [vmem:[%s24069_s4 + $0x1e8] sm:$0xff]  }
 0x1bc   : > { %v2084_v9 = vrot.slane %v2082_v33, 1  ;;  %v2550_v33 = vrot.slane %v2548_v23, 2 }
 0x1bd   : > { %1957 = vmatpush1.bf16.msra.mxu1 %v18287_v62  ;;  %v2087_v62 = vrot.slane %v2085_v56, 2  ;;  %v2080_v56 = vor.u32 %v2079_v53, %v2076_v12  ;;  %v20152_v53 = vrot.slane %v19964_v48, 4 }
 0x1be   : > { %1958 = vmatprep.subr.bf16.mxu1 %v24315_v13  ;;  %2206 = vmatpush1.bf16.msra.mxu0 %v18288_v3  ;;  %v2556_v3 = vshrl.u32 %v2503_v58, 16  ;;  %v1792_v58 = vld [vmem:[#allocation2 + $0x30] sm:$0x7]  ;;  %v2554_v23 = vor.u32 %v2553_v18, %v2550_v33  ;;  %v1822_v33 = vmul.f32 %v19597_v24, %v19937_v19  ;;  %v2243_v18 = vld [vmem:[#allocation2 + $0x38] sm:$0x1f] }
 0x1bf   : > { %2207 = vmatprep.subr.bf16.mxu0 %v24315_v13  ;;  %v2088_v54 = vor.u32 %v2087_v62, %v2084_v9  ;;  %v18295_v9 = vld [vmem:[%s24069_s4 + $0x108] sm:$0xff]   ;;  %v1824_v62 = vmul.f32 %v19683_v16, %v1792_v58 }
 0x1c1   : > { %1959 = vmatpush1.bf16.msra.mxu1 %v18289_v22  ;;  %v18293_v22 = vld [vmem:[%s24069_s4 + $0x100] sm:$0xff]  }
 0x1c2   : > { %1960 = vmatprep.subr.bf16.mxu1 %v24315_v13  ;;  %2208 = vmatpush1.bf16.msra.mxu0 %v18290_v36  ;;  %v2558_v36 = vrot.slane %v2556_v3, 2  ;;  %v18297_v3 = vld [vmem:[%s24069_s4 + $0x110] sm:$0xff]  }
 0x1c3   : > { %2209 = vmatprep.subr.bf16.mxu0 %v24315_v13 }
 0x1c4   : > { %v20149_v12 = vor.u32 %v2561_v55, %v2558_v36  ;;  %v18299_v55 = vld [vmem:[%s24069_s4 + $0x118] sm:$0xff]  }
 0x1c5   : > { %1961 = vmatpush1.bf16.msra.mxu1 %v18291_v29  ;;  %v2089_v29 = vsel %vm24127_vm8, %v2080_v56, %v2088_v54  ;;  %v2241_v56 = vld [vmem:[#allocation2 + $0x8] sm:$0xf0]  ;;  %vm1364_vm8 = vcmask 520192  }
 0x1c6   : > { %1962 = vmatprep.subr.bf16.mxu1 %v24315_v13  ;;  %2210 = vmatpush1.bf16.msra.mxu0 %v18292_v5  ;;  %v1790_v5 = vld [vmem:[#allocation2] sm:$0xfc]  ;;  %v2563_v36 = vsel %vm2529_vm10, %v2554_v23, %v20149_v12 }
 0x1c7   : > { %2644 = vmatprep.subr.bf16.mxu0 %v24315_v13 }
 0x1c9   : > { %1963 = vmatpush1.bf16.msra.mxu1 %v18293_v22  ;;  %2220 = vmatmul.mubr.bf16.vlgmr.msra.gmra.mrb[48].mxu0 %v2089_v29  ;;  %v1820_v22 = vmul.f32 %v19982_v6, %v19942_v38  ;;  %v24335_v29 = vrot.slane %v19686_v25, 4  ;;  %v2280_v25 = vmul.f32 %v20110_v51, %v19718_v26 }
 0x1ca   : > { %1964 = vmatprep.subr.bf16.mxu1 %v24315_v13  ;;  %2645 = vmatpush1.bf16.msra.mxu0 %v18294_v10  ;;  %v1828_v10 = vpack.c.bf16 %v1824_v62, %v1822_v33  ;;  %v2276_v62 = vmul.f32 %v20152_v53, %v2241_v56 }
 0x1cb   : > { %14154 = vmatprep.mubr.msk.bf16.mxu0 %vm24334_vm12, %v19960_v52  ;;  %2646 = vmatprep.subr.bf16.mxu0 %v24315_v13  ;;  %v1818_v52 = vmul.f32 %v19967_v7, %v1790_v5  ;;  %v24338_v5 = vrot.slane %v19690_v31, 4  ;;  %vm24339_vm12 = vmmov %vm24336_vm1  ;;  %v18300_v31 = vld [vmem:[%s24069_s4 + $0x1f8] sm:$0xff]  }
 0x1cd   : > { %1965 = vmatpush1.bf16.msra.mxu1 %v18295_v9  ;;  %v1826_v58 = vpack.c.bf16 %v1820_v22, %v1818_v52  ;;  %v20176_v9 = vsel %vm24336_vm1, %v20152_v53, %v24335_v29  ;;  %v1861_v52 = vrot.slane %v1828_v10, 1  ;;  %vm24341_vm1 = vcmask 523264   ;;  %v18301_v22 = vld [vmem:[%s24069_s4 + $0x180] sm:$0xff]  }
 0x1ce   : > { %1966 = vmatprep.subr.bf16.mxu1 %v24315_v13  ;;  %2647 = vmatpush1.bf16.msra.mxu0 %v18296_v43  ;;  %24337 = vst [vmem:[#allocation37_spill] sm:$0xff] %v20176_v9  ;;  %v20182_v43 = vsel %vm24339_vm12, %v24338_v5, %v20152_v53  ;;  %v2278_v23 = vmul.f32 %v20100_v32, %v20176_v9  ;;  %v18302_v10 = vld [vmem:[%s24069_s4 + $0x200] sm:$0xff]   ;;  %vm24342_vm12 = vmmov %vm24341_vm1 }
 0x1cf   : > { %2648 = vmatprep.subr.bf16.mxu0 %v24315_v13  ;;  %24340 = vst [vmem:[#allocation38_spill] sm:$0xff] %v20182_v43 }
 0x1d0   : > { %v2284_v33 = vpack.c.bf16 %v2278_v23, %v2276_v62  ;;  %v18304_v23 = vld [vmem:[%s24069_s4 + $0x208] sm:$0xff]  }
 0x1d1   : > { %1967 = vmatpush1.bf16.msra.mxu1 %v18297_v3  ;;  %2228 = vmatmul.mubr.bf16.gmra.mrb[52].mxu0 %v2088_v54  ;;  %v2282_v3 = vmul.f32 %v20182_v43, %v2243_v18  ;;  %v1860_v54 = vrot.slane %v1826_v58, 1  ;;  %v24343_v58 = vrot.slane %v19577_v14, 4  ;;  %v18305_v14 = vld [vmem:[%s24069_s4 + $0x190] sm:$0xff]  }
 0x1d2   : > { %1968 = vmatprep.subr.bf16.mxu1 %v24315_v13  ;;  %2649 = vmatpush1.bf16.msra.mxu0 %v18298_v20  ;;  %v1324_v20 = vld [vmem:[%s19464_s16 + $0x18] sm:$0x1]  ;;  %v2320_v5 = vrot.slane %v2284_v33, 2 }
 0x1d3   : > { %14234 = vmatprep.mubr.msk.bf16.mxu0 %vm24341_vm1, %v2563_v36  ;;  %2650 = vmatprep.subr.bf16.mxu0 %v24315_v13  ;;  %v2286_v56 = vpack.c.bf16 %v2282_v3, %v2280_v25  ;;  %v1862_v18 = vsel %vm1859_vm3, %v1860_v54, %v1861_v52  ;;  %v1346_v36 = vrot.slane %v1324_v20, 4  ;;  %vm24344_vm1 = vcmask 1043456   ;;  %v18306_v3 = vld [vmem:[%s24069_s4 + $0x210] sm:$0xff]   ;;  %v18307_v33 = vld [vmem:[%s24069_s4 + $0x198] sm:$0xff]  }
 0x1d4   : > { %v2494_v20 = vmul.f32 %v20090_v0, %v19942_v38 }
 0x1d5   : > { %1969 = vmatpush1.bf16.msra.mxu1 %v18299_v55  ;;  %v18303_v55 = vld [vmem:[%s24069_s4 + $0x188] sm:$0xff]   ;;  %v1347_v29 = vsel %vm24344_vm1, %v24343_v58, %v1346_v36  ;;  %v20215_v62 = vrot.slane %v2286_v56, 2  ;;  %v18310_v58 = vld [vmem:[%s24069_s4 + $0x220] sm:$0xff]   ;;  %vm24355_vm1 = vmmov %vm24342_vm12 }
 0x1d6   : > { %2403 = vmatprep.subr.bf16.mxu1 %v24315_v13  ;;  %2651 = vmatpush1.bf16.msra.mxu0 %v18300_v31  ;;  %1365 = vst.msk [vmem:[#allocation2 + $0x48] sm:$0x1f] %vm1364_vm8, %v1347_v29  ;;  %v14277_v31 = vsel %vm1253_vm13, 1.0, %v19964_v48  ;;  %vm24345_vm8 = vcmp.ge.s32.totalorder %v19435_v34, 1  ;;  %v2496_v29 = vmul.f32 %v20094_v8, %v19937_v19  ;;  %vm24349_vm13 = vmmov %vm24342_vm12 }
 0x1d7   : > { %2652 = vmatprep.subr.bf16.mxu0 %v24315_v13  ;;  %v2322_v25 = vsel %vm2316_vm7, %v2320_v5, %v20215_v62  ;;  %v14278_v54 = vsel %vm24345_vm8, 1.0, %v19964_v48  ;;  %vm24356_vm8 = vmmov %vm24355_vm1 }
 0x1d8   : > { %1979 = vmatmul.mubr.bf16.vlgmr.msra.gmra.mrb[40].mxu1 %v1862_v18  ;;  %v18308_v18 = vld [vmem:[%s24069_s4 + $0x218] sm:$0xff]   ;;  %v2928_v36 = vrot.slane %v14278_v54, 1  ;;  %v18312_v54 = vld [vmem:[%s24069_s4 + $0x228] sm:$0xff]  }
 0x1d9   : > { %2404 = vmatpush1.bf16.msra.mxu1 %v18301_v22  ;;  %14114 = vmatprep.mubr.msk.bf16.mxu1 %vm24342_vm12, %v20009_v57  ;;  %v2456_v57 = vld [vmem:[#allocation2] sm:$0xe0]  ;;  %v2458_v22 = vld [vmem:[#allocation2 + $0x30] sm:$0x3f] }
 0x1da   : > { %2405 = vmatprep.subr.bf16.mxu1 %v24315_v13  ;;  %2653 = vmatpush1.bf16.msra.mxu0 %v18302_v10  ;;  %v2492_v56 = vmul.f32 %v20078_v37, %v2456_v57  ;;  %v2498_v10 = vmul.f32 %v20097_v17, %v2458_v22  ;;  %v2911_v57 = vld [vmem:[#allocation2 + $0x8] sm:$0x80]  ;;  %v20660_v17 = vld [vmem:[#allocation2 + $0x38] sm:$0xff] }
 0x1db   : > { %2654 = vmatprep.subr.bf16.mxu0 %v24315_v13 }
 0x1dc   : > { %v2500_v5 = vpack.c.bf16 %v2494_v20, %v2492_v56 }
 0x1dd   : > { %2406 = vmatpush1.bf16.msra.mxu1 %v18303_v55  ;;  %v18309_v55 = vld [vmem:[%s24069_s4 + $0x1a0] sm:$0xff]  }
 0x1de   : > { %2407 = vmatprep.subr.bf16.mxu1 %v24315_v13  ;;  %2655 = vmatpush1.bf16.msra.mxu0 %v18304_v23  ;;  %v2930_v23 = vrot.slane %v14279_v15, 1  ;;  %v2531_v22 = vshrl.u32 %v2500_v5, 16 }
 0x1df   : > { %2656 = vmatprep.subr.bf16.mxu0 %v24315_v13 }
 0x1e0   : > { %1987 = vmatmul.mubr.bf16.gmra.mrb[44].mxu1 %v1861_v52  ;;  %v20248_v52 = vrot.slane %v14277_v31, 1  ;;  %v20269_v31 = vld [vmem:[#allocation2 + $0x38] sm:$0xff]  ;;  %v20283_v15 = vsel %vm1859_vm3, %v2928_v36, %v2930_v23 }
 0x1e1   : > { %2408 = vmatpush1.bf16.msra.mxu1 %v18305_v14  ;;  %14193 = vmatprep.mubr.msk.bf16.mxu1 %vm24342_vm12, %v2322_v25  ;;  %v2932_v14 = vrot.slane %v24330_v11, 1  ;;  %v18311_v25 = vld [vmem:[%s24069_s4 + $0x1a8] sm:$0xff]   ;;  %vm24357_vm12 = vmmov %vm24355_vm1 }
 0x1e2   : > { %2409 = vmatprep.subr.bf16.mxu1 %v24315_v13  ;;  %24346 = vst [vmem:[#allocation39_spill] sm:$0xff] %v20248_v52  ;;  %2657 = vmatpush1.bf16.msra.mxu0 %v18306_v3  ;;  %v2502_v3 = vpack.c.bf16 %v2498_v10, %v2496_v29  ;;  %v20273_v19 = vsel %vm1859_vm3, %v20248_v52, %v2928_v36  ;;  %v18313_v10 = vld [vmem:[%s24069_s4 + $0x1b0] sm:$0xff]  }
 0x1e3   : > { %2658 = vmatprep.subr.bf16.mxu0 %v24315_v13  ;;  %24347 = vst [vmem:[#allocation40_spill] sm:$0xff] %v20273_v19  ;;  %v2939_v56 = vmul.f32 %v20248_v52, %v2911_v57  ;;  %v2941_v20 = vmul.f32 %v20100_v32, %v20273_v19 }
 0x1e4   : > { %v2542_v29 = vshll.u32 %v2502_v3, 16 }
 0x1e5   : > { %2410 = vmatpush1.bf16.msra.mxu1 %v18307_v33  ;;  %v2534_v33 = vshll.u32 %v2500_v5, 16  ;;  %v2943_v5 = vmul.f32 %v20110_v51, %v20283_v15  ;;  %v2947_v36 = vpack.c.bf16 %v2941_v20, %v2939_v56  ;;  %v18316_v20 = vld [vmem:[%s24069_s4 + $0x238] sm:$0xff]  }
 0x1e6   : > { %2411 = vmatprep.subr.bf16.mxu1 %v24315_v13  ;;  %2659 = vmatpush1.bf16.msra.mxu0 %v18308_v18  ;;  %v20286_v18 = vsel %vm1859_vm3, %v2930_v23, %v2932_v14  ;;  %v14236_v23 = vsel %vm19761_vm6, 1.0, %v19964_v48  ;;  %v18315_v14 = vld [vmem:[%s24069_s4 + $0x1b8] sm:$0xff]   ;;  %v2544_v56 = vrot.slane %v2542_v29, 3  ;;  %v18317_v48 = vld [vmem:[%s24069_s4 + $0x1c0] sm:$0xff]   ;;  %vm2975_vm6 = vsmask.f32 4352 }
 0x1e7   : > { %2660 = vmatprep.subr.bf16.mxu0 %v24315_v13  ;;  %v2945_v57 = vmul.f32 %v20286_v18, %v20269_v31  ;;  %v2536_v8 = vrot.slane %v2534_v33, 3  ;;  %v2994_v37 = vshrl.u32 %v2947_v36, 16  ;;  %v2997_v60 = vshll.u32 %v2947_v36, 16  ;;  %v2242_v33 = vld [vmem:[#allocation2 + $0x30] sm:$0x1f] }
 0x1e8   : > { %v2240_v29 = vld [vmem:[#allocation2] sm:$0xf0] }
 0x1e9   : > { %2412 = vmatpush1.bf16.msra.mxu1 %v18309_v55  ;;  %v2539_v55 = vshrl.u32 %v2502_v3, 16  ;;  %v2533_v3 = vrot.slane %v2531_v22, 2  ;;  %v2949_v0 = vpack.c.bf16 %v2945_v57, %v2943_v5  ;;  %v2996_v5 = vrot.slane %v2994_v37, 3 }
 0x1ea   : > { %2413 = vmatprep.subr.bf16.mxu1 %v24315_v13  ;;  %2661 = vmatpush1.bf16.msra.mxu0 %v18310_v58  ;;  %v18314_v58 = vld [vmem:[%s24069_s4 + $0x230] sm:$0xff]   ;;  %v2999_v57 = vrot.slane %v2997_v60, 4  ;;  %v2281_v37 = vmul.f32 %v20182_v43, %v2242_v33 }
 0x1eb   : > { %2662 = vmatprep.subr.bf16.mxu0 %v24315_v13  ;;  %v3005_v22 = vshll.u32 %v2949_v0, 16  ;;  %v2537_v36 = vor.u32 %v2536_v8, %v2533_v3  ;;  %v20329_v8 = vrot.slane %v24330_v11, 2  ;;  %v2275_v3 = vmul.f32 %v20152_v53, %v2240_v29  ;;  %v18321_v11 = vld [vmem:[%s24069_s4 + $0x1d0] sm:$0xff]   ;;  %v2698_v29 = vld [vmem:[#allocation2 + $0x8] sm:$0xc0] }
 0x1ec   : > { %v18322_v33 = vld [vmem:[%s24069_s4 + $0x2b0] sm:$0xff]  }
 0x1ed   : > { %2414 = vmatpush1.bf16.msra.mxu1 %v18311_v25  ;;  %v2541_v25 = vrot.slane %v2539_v55, 2  ;;  %v18318_v55 = vld [vmem:[%s24069_s4 + $0x2a0] sm:$0xff]   ;;  %24348 = vst [vmem:[#allocation41_spill] sm:$0xff] %v20329_v8 }
 0x1ee   : > { %2415 = vmatprep.subr.bf16.mxu1 %v24315_v13  ;;  %2663 = vmatpush1.bf16.msra.mxu0 %v18312_v54  ;;  %v3002_v54 = vshrl.u32 %v2949_v0, 16  ;;  %v18319_v0 = vld [vmem:[%s24069_s4 + $0x1c8] sm:$0xff]  }
 0x1ef   : > { %2664 = vmatprep.subr.bf16.mxu0 %v24315_v13 }
 0x1f1   : > { %2416 = vmatpush1.bf16.msra.mxu1 %v18313_v10  ;;  %v2545_v10 = vor.u32 %v2544_v56, %v2541_v25  ;;  %v18320_v56 = vld [vmem:[%s24069_s4 + $0x2a8] sm:$0xff]  }
 0x1f2   : > { %2417 = vmatprep.subr.bf16.mxu1 %v24315_v13  ;;  %2665 = vmatpush1.bf16.msra.mxu0 %v18314_v58  ;;  %v3004_v58 = vrot.slane %v3002_v54, 3  ;;  %v3000_v54 = vor.u32 %v2999_v57, %v2996_v5  ;;  %v24351_v57 = vrot.slane %v19768_v2, 2 }
 0x1f3   : > { %2666 = vmatprep.subr.bf16.mxu0 %v24315_v13  ;;  %v2546_v25 = vsel %vm2529_vm10, %v2537_v36, %v2545_v10  ;;  %v18323_v36 = vld [vmem:[%s24069_s4 + $0x1d8] sm:$0xff]  }
 0x1f5   : > { %2418 = vmatpush1.bf16.msra.mxu1 %v18315_v14  ;;  %v3007_v14 = vrot.slane %v3005_v22, 4 }
 0x1f6   : > { %2419 = vmatprep.subr.bf16.mxu1 %v24315_v13  ;;  %2667 = vmatpush1.bf16.msra.mxu0 %v18316_v20  ;;  %v20335_v20 = vld [vmem:[#allocation2 + $0x20] sm:$0xff] }
 0x1f7   : > { %3090 = vmatprep.subr.bf16.mxu0 %v24315_v13  ;;  %v2279_v60 = vmul.f32 %v20335_v20, %v19718_v26  ;;  %v20345_v22 = vor.u32 %v3007_v14, %v3004_v58  ;;  %v18324_v58 = vld [vmem:[%s24069_s4 + $0x2b8] sm:$0xff]   ;;  %v24378_v26 = vld [vmem:[#allocation18_spill] sm:$0xff] }
 0x1f9   : > { %2420 = vmatpush1.bf16.msra.mxu1 %v18317_v48  ;;  %2677 = vmatmul.mubr.bf16.vlgmr.msra.gmra.mrb[56].mxu0 %v2546_v25  ;;  %v2277_v48 = vmul.f32 %v20176_v9, %v19942_v38  ;;  %v2700_v38 = vld [vmem:[#allocation2 + $0x38] sm:$0x7f]  ;;  %v24353_v25 = vrot.slane %v19786_v27, 2 }
 0x1fa   : > { %2421 = vmatprep.subr.bf16.mxu1 %v24315_v13  ;;  %3091 = vmatpush1.bf16.msra.mxu0 %v18318_v55  ;;  %v2285_v55 = vpack.c.bf16 %v2281_v37, %v2279_v60 }
 0x1fb   : > { %14235 = vmatprep.mubr.msk.bf16.mxu0 %vm24349_vm13, %v20149_v12  ;;  %3092 = vmatprep.subr.bf16.mxu0 %v24315_v13  ;;  %v20347_v12 = vrot.slane %v14236_v23, 2  ;;  %v2283_v5 = vpack.c.bf16 %v2277_v48, %v2275_v3  ;;  %v3009_v23 = vsel %vm2975_vm6, %v3000_v54, %v20345_v22  ;;  %v2734_v3 = vmul.f32 %v20110_v51, %v19809_v63  ;;  %v18326_v48 = vld [vmem:[%s24069_s4 + $0x2c0] sm:$0xff]   ;;  %v18327_v54 = vld [vmem:[%s24069_s4 + $0x248] sm:$0xff]   ;;  %vm24358_vm13 = vmmov %vm24355_vm1 }
 0x1fc   : > { %v2318_v14 = vrot.slane %v2285_v55, 2 }
 0x1fd   : > { %24350 = vst [vmem:[#allocation42_spill] sm:$0xff] %v20347_v12  ;;  %2422 = vmatpush1.bf16.msra.mxu1 %v18319_v0  ;;  %v20363_v0 = vsel %vm2316_vm7, %v20347_v12, %v24351_v57  ;;  %v2730_v2 = vmul.f32 %v20347_v12, %v2698_v29  ;;  %v2317_v27 = vrot.slane %v2283_v5, 2  ;;  %v18328_v29 = vld [vmem:[%s24069_s4 + $0x2c8] sm:$0xff]   ;;  %v18331_v57 = vld [vmem:[%s24069_s4 + $0x258] sm:$0xff]  }
 0x1fe   : > { %2423 = vmatprep.subr.bf16.mxu1 %v24315_v13  ;;  %3093 = vmatpush1.bf16.msra.mxu0 %v18320_v56  ;;  %24352 = vst [vmem:[#allocation43_spill] sm:$0xff] %v20363_v0  ;;  %v20372_v56 = vsel %vm2316_vm7, %v24353_v25, %v20329_v8  ;;  %v2732_v37 = vmul.f32 %v20100_v32, %v20363_v0  ;;  %v18325_v32 = vld [vmem:[%s24069_s4 + $0x240] sm:$0xff]   ;;  %v20420_v25 = vld [vmem:[#allocation2 + $0x10] sm:$0xff] }
 0x1ff   : > { %3094 = vmatprep.subr.bf16.mxu0 %v24315_v13  ;;  %24354 = vst [vmem:[#allocation44_spill] sm:$0xff] %v20372_v56  ;;  %v2736_v60 = vmul.f32 %v20372_v56, %v2700_v38  ;;  %v2319_v51 = vsel %vm2316_vm7, %v2317_v27, %v2318_v14  ;;  %v18329_v38 = vld [vmem:[%s24069_s4 + $0x250] sm:$0xff]  }
 0x201   : > { %2424 = vmatpush1.bf16.msra.mxu1 %v18321_v11  ;;  %2685 = vmatmul.mubr.bf16.gmra.mrb[60].mxu0 %v2545_v10  ;;  %v2738_v10 = vpack.c.bf16 %v2732_v37, %v2730_v2  ;;  %v2740_v11 = vpack.c.bf16 %v2736_v60, %v2734_v3  ;;  %v2940_v37 = vmul.f32 %v20420_v25, %v20273_v19  ;;  %v18333_v3 = vld [vmem:[%s24069_s4 + $0x260] sm:$0xff]   ;;  %v3772_v19 = vld [vmem:[#allocation2 + $0x48] sm:$0xf] }
 0x202   : > { %2425 = vmatprep.subr.bf16.mxu1 %v24315_v13  ;;  %3095 = vmatpush1.bf16.msra.mxu0 %v18322_v33  ;;  %v2942_v60 = vmul.f32 %v20335_v20, %v20283_v15 }
 0x203   : > { %14316 = vmatprep.mubr.msk.bf16.mxu0 %vm24355_vm1, %v3009_v23  ;;  %3096 = vmatprep.subr.bf16.mxu0 %v24315_v13  ;;  %v2774_v33 = vrot.slane %v2738_v10, 3  ;;  %v20398_v55 = vrot.slane %v2740_v11, 3  ;;  %v20413_v23 = vld [vmem:[#allocation2 + $0x30] sm:$0xff]  ;;  %v20440_v10 = vld [vmem:[#allocation2 + $0x28] sm:$0xff]  ;;  %v3332_v11 = vld [vmem:[#allocation2 + $0x18] sm:$0xfe] }
 0x204   : > { %v2944_v2 = vmul.f32 %v20286_v18, %v20413_v23  ;;  %vm24359_vm1 = vcmp.ge.s32.totalorder %v19435_v34, 1 }
 0x205   : > { %2426 = vmatpush1.bf16.msra.mxu1 %v18323_v36  ;;  %v2910_v36 = vld [vmem:[#allocation2] sm:$0x80]  ;;  %v2776_v5 = vsel %vm2480_vm14, %v2774_v33, %v20398_v55  ;;  %v18336_v33 = vld [vmem:[%s24069_s4 + $0x2e8] sm:$0xff]  }
 0x206   : > { %2857 = vmatprep.subr.bf16.mxu1 %v24315_v13  ;;  %3097 = vmatpush1.bf16.msra.mxu0 %v18324_v58  ;;  %v2938_v58 = vmul.f32 %v20248_v52, %v2910_v36  ;;  %v3363_v36 = vmul.f32 %v19816_v42, %v3332_v11 }
 0x207   : > { %3098 = vmatprep.subr.bf16.mxu0 %v24315_v13 }
 0x208   : > { %2436 = vmatmul.mubr.bf16.vlgmr.msra.gmra.mrb[48].mxu1 %v2319_v51  ;;  %v2946_v27 = vpack.c.bf16 %v2940_v37, %v2938_v58  ;;  %v2948_v51 = vpack.c.bf16 %v2944_v2, %v2942_v60  ;;  %v18338_v58 = vld [vmem:[%s24069_s4 + $0x2f0] sm:$0xff]   ;;  %v3334_v37 = vld [vmem:[#allocation2 + $0x48] sm:$0x3]  ;;  %v18339_v2 = vld [vmem:[%s24069_s4 + $0x278] sm:$0xff]  }
 0x209   : > { %2858 = vmatpush1.bf16.msra.mxu1 %v18325_v32  ;;  %14194 = vmatprep.mubr.msk.bf16.mxu1 %vm24356_vm8, %v20215_v62  ;;  %v18330_v62 = vld [vmem:[%s24069_s4 + $0x2d0] sm:$0xff]   ;;  %v18334_v32 = vld [vmem:[%s24069_s4 + $0x2e0] sm:$0xff]   ;;  %v3369_v11 = vmul.f32 %v19824_v44, %v3334_v37  ;;  %vm20515_vm8 = vmand %vm24359_vm1, %vm2004_vm9 }
 0x20a   : > { %2859 = vmatprep.subr.bf16.mxu1 %v24315_v13  ;;  %3099 = vmatpush1.bf16.msra.mxu0 %v18326_v48  ;;  %v18335_v48 = vld [vmem:[%s24069_s4 + $0x268] sm:$0xff]   ;;  %vm24365_vm1 = vmmov %vm24358_vm13 }
 0x20b   : > { %3100 = vmatprep.subr.bf16.mxu0 %v24315_v13 }
 0x20d   : > { %2860 = vmatpush1.bf16.msra.mxu1 %v18327_v54  ;;  %v2977_v54 = vshrl.u32 %v2946_v27, 16 }
 0x20e   : > { %2861 = vmatprep.subr.bf16.mxu1 %v24315_v13  ;;  %3101 = vmatpush1.bf16.msra.mxu0 %v18328_v29  ;;  %v2980_v29 = vshll.u32 %v2946_v27, 16 }
 0x20f   : > { %3102 = vmatprep.subr.bf16.mxu0 %v24315_v13 }
 0x210   : > { %2444 = vmatmul.mubr.bf16.gmra.mrb[52].mxu1 %v2318_v14  ;;  %v18332_v14 = vld [vmem:[%s24069_s4 + $0x2d8] sm:$0xff]   ;;  %v2982_v60 = vrot.slane %v2980_v29, 4 }
 0x211   : > { %2862 = vmatpush1.bf16.msra.mxu1 %v18329_v38  ;;  %14275 = vmatprep.mubr.msk.bf16.mxu1 %vm24357_vm12, %v2776_v5  ;;  %v3365_v38 = vmul.f32 %v19836_v47, %v20440_v10  ;;  %v2988_v5 = vshll.u32 %v2948_v51, 16  ;;  %vm24362_vm12 = vsmask.f32 7424 }
 0x212   : > { %2863 = vmatprep.subr.bf16.mxu1 %v24315_v13  ;;  %3103 = vmatpush1.bf16.msra.mxu0 %v18330_v62  ;;  %v2985_v62 = vshrl.u32 %v2948_v51, 16  ;;  %v18340_v51 = vld [vmem:[%s24069_s4 + $0x2f8] sm:$0xff]  }
 0x213   : > { %3104 = vmatprep.subr.bf16.mxu0 %v24315_v13 }
 0x214   : > { %v2987_v27 = vrot.slane %v2985_v62, 3 }
 0x215   : > { %2864 = vmatpush1.bf16.msra.mxu1 %v18331_v57  ;;  %v18337_v57 = vld [vmem:[%s24069_s4 + $0x270] sm:$0xff]  }
 0x216   : > { %2865 = vmatprep.subr.bf16.mxu1 %v24315_v13  ;;  %3105 = vmatpush1.bf16.msra.mxu0 %v18332_v14  ;;  %v3371_v14 = vpack.c.bf16 %v3365_v38, %v3363_v36  ;;  %v2699_v36 = vld [vmem:[#allocation2 + $0x30] sm:$0x7f]  ;;  %v18342_v38 = vld [vmem:[%s24069_s4 + $0x360] sm:$0xff]  }
 0x217   : > { %3106 = vmatprep.subr.bf16.mxu0 %v24315_v13 }
 0x218   : > { %v3412_v37 = vshrl.u32 %v3371_v14, 16 }
 0x219   : > { %2866 = vmatpush1.bf16.msra.mxu1 %v18333_v3  ;;  %v2979_v3 = vrot.slane %v2977_v54, 3  ;;  %v18341_v54 = vld [vmem:[%s24069_s4 + $0x280] sm:$0xff]  }
 0x21a   : > { %2867 = vmatprep.subr.bf16.mxu1 %v24315_v13  ;;  %3107 = vmatpush1.bf16.msra.mxu0 %v18334_v32  ;;  %v3367_v32 = vmul.f32 %v19820_v39, %v20269_v31 }
 0x21b   : > { %3108 = vmatprep.subr.bf16.mxu0 %v24315_v13  ;;  %v2983_v62 = vor.u32 %v2982_v60, %v2979_v3  ;;  %v18344_v3 = vld [vmem:[%s24069_s4 + $0x368] sm:$0xff]   ;;  %v2733_v60 = vmul.f32 %v20335_v20, %v19809_v63 }
 0x21c   : > { %v20477_v31 = vpack.c.bf16 %v3369_v11, %v3367_v32  ;;  %v18345_v11 = vld [vmem:[%s24069_s4 + $0x290] sm:$0xff]  }
 0x21d   : > { %2868 = vmatpush1.bf16.msra.mxu1 %v18335_v48  ;;  %v2990_v48 = vrot.slane %v2988_v5, 4  ;;  %v18343_v5 = vld [vmem:[%s24069_s4 + $0x288] sm:$0xff]  }
 0x21e   : > { %2869 = vmatprep.subr.bf16.mxu1 %v24315_v13  ;;  %3109 = vmatpush1.bf16.msra.mxu0 %v18336_v33  ;;  %v3414_v33 = vshll.u32 %v3371_v14, 16 }
 0x21f   : > { %3110 = vmatprep.subr.bf16.mxu0 %v24315_v13  ;;  %v2991_v29 = vor.u32 %v2990_v48, %v2987_v27  ;;  %v3419_v27 = vshll.u32 %v20477_v31, 16  ;;  %v2731_v48 = vmul.f32 %v20420_v25, %v20363_v0  ;;  %v18347_v25 = vld [vmem:[%s24069_s4 + $0x298] sm:$0xff]  }
 0x221   : > { %2870 = vmatpush1.bf16.msra.mxu1 %v18337_v57  ;;  %v2697_v57 = vld [vmem:[#allocation2] sm:$0xc0]  ;;  %v2992_v32 = vsel %vm2975_vm6, %v2983_v62, %v2991_v29 }
 0x222   : > { %2871 = vmatprep.subr.bf16.mxu1 %v24315_v13  ;;  %3111 = vmatpush1.bf16.msra.mxu0 %v18338_v58  ;;  %v2735_v58 = vmul.f32 %v20372_v56, %v2699_v36 }
 0x223   : > { %3112 = vmatprep.subr.bf16.mxu0 %v24315_v13 }
 0x224   : > { %v2739_v14 = vpack.c.bf16 %v2735_v58, %v2733_v60  ;;  %v18349_v58 = vld [vmem:[%s24069_s4 + $0x300] sm:$0xff]   ;;  %v18351_v60 = vld [vmem:[%s24069_s4 + $0x308] sm:$0xff]  }
 0x225   : > { %2872 = vmatpush1.bf16.msra.mxu1 %v18339_v2  ;;  %v3416_v2 = vrot.slane %v3414_v33, 1  ;;  %v20505_v33 = vrot.slane %v3419_v27, 1 }
 0x226   : > { %2873 = vmatprep.subr.bf16.mxu1 %v24315_v13  ;;  %3113 = vmatpush1.bf16.msra.mxu0 %v18340_v51  ;;  %v2729_v51 = vmul.f32 %v20347_v12, %v2697_v57 }
 0x227   : > { %3509 = vmatprep.subr.bf16.mxu0 %v24315_v13  ;;  %v3417_v20 = vor.u32 %v3416_v2, %v3412_v37  ;;  %v3144_v37 = vld [vmem:[#allocation2 + $0x18] sm:$0xff]  ;;  %v20535_v2 = vld [vmem:[#allocation2] sm:$0xff] }
 0x229   : > { %2874 = vmatpush1.bf16.msra.mxu1 %v18341_v54  ;;  %3123 = vmatmul.mubr.bf16.vlgmr.msra.gmra.mrb[64].mxu0 %v2992_v32  ;;  %v2772_v54 = vrot.slane %v2739_v14, 3  ;;  %v3422_v62 = vsel %vm24362_vm12, %v3417_v20, %v20505_v33  ;;  %v18350_v32 = vld [vmem:[%s24069_s4 + $0x380] sm:$0xff]   ;;  %vm24368_vm12 = vcmp.ge.s32.totalorder %v19466_v45, 1 }
 0x22a   : > { %2875 = vmatprep.subr.bf16.mxu1 %v24315_v13  ;;  %3510 = vmatpush1.bf16.msra.mxu0 %v18342_v38  ;;  %v2737_v38 = vpack.c.bf16 %v2731_v48, %v2729_v51  ;;  %v20570_v51 = vld [vmem:[#allocation2 + $0x20] sm:$0xff]  ;;  %v18352_v48 = vld [vmem:[%s24069_s4 + $0x388] sm:$0xff]   ;;  %v14442_v20 = vsel %vm24368_vm12, 1.0, %v20535_v2 }
 0x22b   : > { %14317 = vmatprep.mubr.msk.bf16.mxu0 %vm24358_vm13, %v20345_v22  ;;  %3511 = vmatprep.subr.bf16.mxu0 %v24315_v13  ;;  %v18346_v22 = vld [vmem:[%s24069_s4 + $0x370] sm:$0xff]   ;;  %v3364_v36 = vmul.f32 %v19836_v47, %v20570_v51 }
 0x22c   : > { %v2771_v57 = vrot.slane %v2737_v38, 3 }
 0x22d   : > { %2876 = vmatpush1.bf16.msra.mxu1 %v18343_v5  ;;  %v18348_v5 = vld [vmem:[%s24069_s4 + $0x378] sm:$0xff]  }
 0x22e   : > { %2877 = vmatprep.subr.bf16.mxu1 %v24315_v13  ;;  %3512 = vmatpush1.bf16.msra.mxu0 %v18344_v3  ;;  %v2773_v27 = vsel %vm2480_vm14, %v2771_v57, %v2772_v54  ;;  %v20549_v3 = vsel %vm19830_vm4, 1.0, %v20535_v2  ;;  %vm3153_vm4 = vmand %vm2462_vm2, %vm2005_vm11  ;;  %v20594_v57 = vsel %vm1378_vm0, 1.0, %v20535_v2  ;;  %vm24371_vm2 = vcmp.ge.s32.totalorder %v19466_v45, 2 }
 0x22f   : > { %3513 = vmatprep.subr.bf16.mxu0 %v24315_v13  ;;  %24364 = vst [vmem:[#allocation46_spill] sm:$0xff] %v20549_v3  ;;  %v3164_v14 = vmul.f32 %v20549_v3, %v3144_v37  ;;  %v20586_v38 = vsel %vm3153_vm4, 1.0, %v20535_v2  ;;  %vm24372_vm0 = vmmov %vm24365_vm1  ;;  %vm24383_vm4 = vcmask 1041408  }
 0x230   : > { %24369 = vst [vmem:[#allocation48_spill] sm:$0xff] %v20586_v38  ;;  %vm24391_vm12 = vmmov %vm24383_vm4 }
 0x231   : > { %2878 = vmatpush1.bf16.msra.mxu1 %v18345_v11  ;;  %3131 = vmatmul.mubr.bf16.gmra.mrb[68].mxu0 %v2991_v29  ;;  %v20540_v29 = vsel %vm20515_vm8, 1.0, %v20535_v2  ;;  %vm24366_vm8 = vcmp.ge.s32.totalorder %v19710_v4, 1 }
 0x232   : > { %2879 = vmatprep.subr.bf16.mxu1 %v24315_v13  ;;  %3514 = vmatpush1.bf16.msra.mxu0 %v18346_v22  ;;  %24363 = vst [vmem:[#allocation45_spill] sm:$0xff] %v20540_v29  ;;  %v3166_v11 = vmul.f32 %v20540_v29, %v20440_v10  ;;  %v20567_v46 = vsel %vm24366_vm8, 1.0, %v20535_v2  ;;  %v18353_v22 = vld [vmem:[%s24069_s4 + $0x310] sm:$0xff]   ;;  %vm24387_vm8 = vmmov %vm24383_vm4 }
 0x233   : > { %14398 = vmatprep.mubr.msk.bf16.mxu0 %vm24358_vm13, %v3422_v62  ;;  %3515 = vmatprep.subr.bf16.mxu0 %v24315_v13  ;;  %24367 = vst [vmem:[#allocation47_spill] sm:$0xff] %v20567_v46  ;;  %v20589_v62 = vrot.slane %v20567_v46, 5  ;;  %vm24380_vm13 = vmmov %vm24372_vm0 }
 0x235   : > { %2880 = vmatpush1.bf16.msra.mxu1 %v18347_v25  ;;  %v3172_v25 = vpack.c.bf16 %v3166_v11, %v3164_v14  ;;  %24370 = vst [vmem:[#allocation49_spill] sm:$0xff] %v20589_v62  ;;  %v20612_v14 = vsel %vm1380_vm15, 1.0, %v20535_v2 }
 0x236   : > { %3278 = vmatprep.subr.bf16.mxu1 %v24315_v13  ;;  %3516 = vmatpush1.bf16.msra.mxu0 %v18348_v5  ;;  %v3786_v5 = vrot.slane %v14442_v20, 5 }
 0x237   : > { %3517 = vmatprep.subr.bf16.mxu0 %v24315_v13 }
 0x238   : > { %2890 = vmatmul.mubr.bf16.vlgmr.msra.gmra.mrb[56].mxu1 %v2773_v27  ;;  %v20603_v27 = vsel %vm24371_vm2, 1.0, %v20535_v2  ;;  %v20639_v20 = vsel %vm2023_vm5, %v20589_v62, %v3786_v5  ;;  %vm24393_vm2 = vmmov %vm24372_vm0 }
 0x239   : > { %3279 = vmatpush1.bf16.msra.mxu1 %v18349_v58  ;;  %14276 = vmatprep.mubr.msk.bf16.mxu1 %vm24365_vm1, %v20398_v55  ;;  %v3331_v55 = vld [vmem:[#allocation2 + $0x10] sm:$0xfe]  ;;  %24374 = vst [vmem:[#allocation51_spill] sm:$0xff] %v20639_v20  ;;  %v3799_v12 = vmul.f32 %v20639_v20, %v20440_v10  ;;  %vm24381_vm1 = vsmask.f32 6400 }
 0x23a   : > { %3280 = vmatprep.subr.bf16.mxu1 %v24315_v13  ;;  %3518 = vmatpush1.bf16.msra.mxu0 %v18350_v32  ;;  %v18354_v58 = vld [vmem:[%s24069_s4 + $0x390] sm:$0xff]   ;;  %v3362_v37 = vmul.f32 %v19816_v42, %v3331_v55  ;;  %v18355_v32 = vld [vmem:[%s24069_s4 + $0x318] sm:$0xff]   ;;  %v20622_v55 = vrot.slane %v20594_v57, 6 }
 0x23b   : > { %3519 = vmatprep.subr.bf16.mxu0 %v24315_v13 }
 0x23c   : > { %v20614_v11 = vpack.c.bf16 %v3364_v36, %v3362_v37  ;;  %24373 = vst [vmem:[#allocation50_spill] sm:$0xff] %v20622_v55  ;;  %v3770_v37 = vld [vmem:[#allocation2 + $0x18] sm:$0xf8] }
 0x23d   : > { %3281 = vmatpush1.bf16.msra.mxu1 %v18351_v60  ;;  %v3333_v60 = vld [vmem:[#allocation2 + $0x40] sm:$0x3]  ;;  %v3797_v0 = vmul.f32 %v20589_v62, %v3770_v37  ;;  %v3803_v37 = vmul.f32 %v24378_v26, %v3772_v19  ;;  %v18363_v19 = vld [vmem:[%s24069_s4 + $0x338] sm:$0xff]  }
 0x23e   : > { %3282 = vmatprep.subr.bf16.mxu1 %v24315_v13  ;;  %3520 = vmatpush1.bf16.msra.mxu0 %v18352_v48  ;;  %v18357_v48 = vld [vmem:[%s24069_s4 + $0x320] sm:$0xff]   ;;  %v3368_v36 = vmul.f32 %v19824_v44, %v3333_v60  ;;  %v18359_v60 = vld [vmem:[%s24069_s4 + $0x328] sm:$0xff]  }
 0x23f   : > { %3521 = vmatprep.subr.bf16.mxu0 %v24315_v13  ;;  %v3805_v56 = vpack.c.bf16 %v3799_v12, %v3797_v0 }
 0x240   : > { %2898 = vmatmul.mubr.bf16.gmra.mrb[60].mxu1 %v2772_v54  ;;  %v18356_v54 = vld [vmem:[%s24069_s4 + $0x398] sm:$0xff]  }
 0x241   : > { %3283 = vmatpush1.bf16.msra.mxu1 %v18353_v22  ;;  %14357 = vmatprep.mubr.msk.bf16.mxu1 %vm24372_vm0, %v3172_v25  ;;  %v18358_v22 = vld [vmem:[%s24069_s4 + $0x3a0] sm:$0xff]   ;;  %v3402_v25 = vshll.u32 %v20614_v11, 16  ;;  %v3851_v12 = vshrl.u32 %v3805_v56, 16  ;;  %v3854_v0 = vshll.u32 %v3805_v56, 16 }
 0x242   : > { %3284 = vmatprep.subr.bf16.mxu1 %v24315_v13  ;;  %3522 = vmatpush1.bf16.msra.mxu0 %v18354_v58  ;;  %v3366_v58 = vmul.f32 %v19820_v39, %v20413_v23  ;;  %v18366_v56 = vld [vmem:[%s24069_s4 + $0x420] sm:$0xff]  }
 0x243   : > { %3523 = vmatprep.subr.bf16.mxu0 %v24315_v13  ;;  %v3856_v43 = vrot.slane %v3854_v0, 2  ;;  %v3563_v0 = vld [vmem:[#allocation2 + $0x18] sm:$0xfc] }
 0x245   : > { %3285 = vmatpush1.bf16.msra.mxu1 %v18355_v32  ;;  %v24375_v32 = vld [vmem:[#allocation17_spill] sm:$0xff] }
 0x246   : > { %3286 = vmatprep.subr.bf16.mxu1 %v24315_v13  ;;  %3524 = vmatpush1.bf16.msra.mxu0 %v18356_v54  ;;  %v24376_v52 = vrot.slane %v24375_v32, 5  ;;  %v3400_v54 = vshrl.u32 %v20614_v11, 16  ;;  %v3404_v32 = vrot.slane %v3402_v25, 1 }
 0x247   : > { %3525 = vmatprep.subr.bf16.mxu0 %v24315_v13 }
 0x248   : > { %v20644_v63 = vsel %vm2023_vm5, %v3786_v5, %v24376_v52  ;;  %v18360_v52 = vld [vmem:[%s24069_s4 + $0x3a8] sm:$0xff]   ;;  %v20658_v5 = vpack.c.bf16 %v3368_v36, %v3366_v58  ;;  %v18362_v36 = vld [vmem:[%s24069_s4 + $0x3b0] sm:$0xff]   ;;  %vm24379_vm5 = vsmask.f32 7424 }
 0x249   : > { %24377 = vst [vmem:[#allocation17_spill] sm:$0xff] %v20644_v63  ;;  %3287 = vmatpush1.bf16.msra.mxu1 %v18357_v48  ;;  %v3801_v11 = vmul.f32 %v20660_v17, %v20644_v63  ;;  %v18361_v48 = vld [vmem:[%s24069_s4 + $0x330] sm:$0xff]  }
 0x24a   : > { %3288 = vmatprep.subr.bf16.mxu1 %v24315_v13  ;;  %3526 = vmatpush1.bf16.msra.mxu0 %v18358_v22  ;;  %v3407_v25 = vshll.u32 %v20658_v5, 16  ;;  %v3426_v22 = vshrl.u32 %v20477_v31, 16 }
 0x24b   : > { %3527 = vmatprep.subr.bf16.mxu0 %v24315_v13  ;;  %v3807_v58 = vpack.c.bf16 %v3803_v37, %v3801_v11  ;;  %v3405_v37 = vor.u32 %v3404_v32, %v3400_v54  ;;  %v3150_v54 = vld [vmem:[#allocation2 + $0x48] sm:$0x1] }
 0x24c   : > { %v3409_v31 = vrot.slane %v3407_v25, 1 }
 0x24d   : > { %3289 = vmatpush1.bf16.msra.mxu1 %v18359_v60  ;;  %v18364_v60 = vld [vmem:[%s24069_s4 + $0x3b8] sm:$0xff]   ;;  %v3859_v9 = vshrl.u32 %v3807_v58, 16  ;;  %v3862_v11 = vshll.u32 %v3807_v58, 16  ;;  %v3853_v58 = vrot.slane %v3851_v12, 1  ;;  %v3170_v12 = vmul.f32 0.0, %v3150_v54 }
 0x24e   : > { %3290 = vmatprep.subr.bf16.mxu1 %v24315_v13  ;;  %3528 = vmatpush1.bf16.msra.mxu0 %v18360_v52  ;;  %v18365_v52 = vld [vmem:[%s24069_s4 + $0x340] sm:$0xff]   ;;  %v3410_v59 = vsel %vm24379_vm5, %v3405_v37, %v3409_v31  ;;  %v24382_v37 = vrot.slane %v20603_v27, 6  ;;  %v24389_v54 = vld [vmem:[#allocation8_spill] sm:$0xff]  ;;  %vm24394_vm5 = vmmov %vm24372_vm0 }
 0x24f   : > { %3529 = vmatprep.subr.bf16.mxu0 %v24315_v13  ;;  %v3864_v25 = vrot.slane %v3862_v11, 2  ;;  %v3857_v32 = vor.u32 %v3856_v43, %v3853_v58  ;;  %v18371_v11 = vld [vmem:[%s24069_s4 + $0x358] sm:$0xff]  }
 0x250   : > { %v24386_v58 = vmov %v24382_v37 }
 0x251   : > { %3291 = vmatpush1.bf16.msra.mxu1 %v18361_v48  ;;  %v18367_v48 = vld [vmem:[%s24069_s4 + $0x348] sm:$0xff]  }
 0x252   : > { %3292 = vmatprep.subr.bf16.mxu1 %v24315_v13  ;;  %3530 = vmatpush1.bf16.msra.mxu0 %v18362_v36  ;;  %v3428_v36 = vor.u32 %v3426_v22, %v20505_v33  ;;  %v3423_v33 = vshrl.u32 %v20658_v5, 16 }
 0x253   : > { %3531 = vmatprep.subr.bf16.mxu0 %v24315_v13 }
 0x254   : > { %v3425_v5 = vor.u32 %v3423_v33, %v3409_v31  ;;  %v18372_v31 = vld [vmem:[%s24069_s4 + $0x438] sm:$0xff]  }
 0x255   : > { %3293 = vmatpush1.bf16.msra.mxu1 %v18363_v19  ;;  %v3861_v19 = vrot.slane %v3859_v9, 1  ;;  %v18369_v9 = vld [vmem:[%s24069_s4 + $0x350] sm:$0xff]  }
 0x256   : > { %3294 = vmatprep.subr.bf16.mxu1 %v24315_v13  ;;  %3532 = vmatpush1.bf16.msra.mxu0 %v18364_v60  ;;  %v18368_v60 = vld [vmem:[%s24069_s4 + $0x428] sm:$0xff]  }
 0x257   : > { %3947 = vmatprep.subr.bf16.mxu0 %v24315_v13  ;;  %v20708_v22 = vor.u32 %v3864_v25, %v3861_v19  ;;  %v3165_v25 = vmul.f32 %v20540_v29, %v20570_v51 }
 0x259   : > { %3295 = vmatpush1.bf16.msra.mxu1 %v18365_v52  ;;  %3542 = vmatmul.mubr.bf16.vlgmr.msra.gmra.mrb[72].mxu0 %v3410_v59  ;;  %v18370_v59 = vld [vmem:[%s24069_s4 + $0x430] sm:$0xff]   ;;  %v3866_v43 = vsel %vm24381_vm1, %v3857_v32, %v20708_v22 }
 0x25a   : > { %3296 = vmatprep.subr.bf16.mxu1 %v24315_v13  ;;  %3948 = vmatpush1.bf16.msra.mxu0 %v18366_v56  ;;  %v3143_v52 = vld [vmem:[#allocation2 + $0x10] sm:$0xff]  ;;  %v3565_v56 = vld [vmem:[#allocation2 + $0x48] sm:$0x7] }
 0x25b   : > { %14399 = vmatprep.mubr.msk.bf16.mxu0 %vm24380_vm13, %v3428_v36  ;;  %3949 = vmatprep.subr.bf16.mxu0 %v24315_v13  ;;  %v24385_v36 = vrot.slane %v20612_v14, 6  ;;  %v3163_v14 = vmul.f32 %v20549_v3, %v3143_v52  ;;  %vm24395_vm13 = vcmp.le.s32.totalorder %v19710_v4, 3  ;;  %v20815_v4 = vld [vmem:[#allocation2 + $0x30] sm:$0xff] }
 0x25d   : > { %3297 = vmatpush1.bf16.msra.mxu1 %v18367_v48  ;;  %v20724_v48 = vsel %vm24383_vm4, %v20622_v55, %v24382_v37  ;;  %v20731_v19 = vsel %vm24387_vm8, %v24386_v58, %v24385_v36  ;;  %v24390_v33 = vmov %v24385_v36  ;;  %v3171_v58 = vpack.c.bf16 %v3165_v25, %v3163_v14  ;;  %vm24401_vm4 = vmmov %vm24372_vm0 }
 0x25e   : > { %3298 = vmatprep.subr.bf16.mxu1 %v24315_v13  ;;  %3950 = vmatpush1.bf16.msra.mxu0 %v18368_v60  ;;  %24384 = vst [vmem:[#allocation52_spill] sm:$0xff] %v20724_v48  ;;  %24388 = vst [vmem:[#allocation53_spill] sm:$0xff] %v20731_v19  ;;  %v3168_v60 = vmul.f32 %v20660_v17, %v20586_v38  ;;  %v20744_v32 = vsel %vm24391_vm12, %v24390_v33, %v24389_v54  ;;  %vm24402_vm8 = vcmp.ge.s32.totalorder %v19466_v45, 2 }
 0x25f   : > { %3951 = vmatprep.subr.bf16.mxu0 %v24315_v13  ;;  %24392 = vst [vmem:[#allocation8_spill] sm:$0xff] %v20744_v32  ;;  %v3592_v27 = vmul.f32 %v20724_v48, %v20440_v10  ;;  %v3594_v37 = vmul.f32 %v20660_v17, %v20731_v19  ;;  %v3596_v36 = vmul.f32 %v20744_v32, %v3565_v56  ;;  %v18373_v10 = vld [vmem:[%s24069_s4 + $0x3c0] sm:$0xff]   ;;  %vm24403_vm12 = vcmp.le.s32.totalorder %v19435_v34, 3 }
 0x261   : > { %3299 = vmatpush1.bf16.msra.mxu1 %v18369_v9  ;;  %3550 = vmatmul.mubr.bf16.gmra.mrb[76].mxu0 %v3425_v5  ;;  %v3590_v9 = vmul.f32 %v20622_v55, %v3563_v0  ;;  %v3174_v5 = vpack.c.bf16 %v3170_v12, %v3168_v60  ;;  %v3149_v0 = vld [vmem:[#allocation2 + $0x40] sm:$0x1]  ;;  %v3600_v33 = vpack.c.bf16 %v3596_v36, %v3594_v37  ;;  %v18377_v60 = vld [vmem:[%s24069_s4 + $0x3d0] sm:$0xff]  }
 0x262   : > { %3300 = vmatprep.subr.bf16.mxu1 %v24315_v13  ;;  %3952 = vmatpush1.bf16.msra.mxu0 %v18370_v59  ;;  %v18374_v59 = vld [vmem:[%s24069_s4 + $0x440] sm:$0xff]   ;;  %v3169_v12 = vmul.f32 0.0, %v3149_v0  ;;  %v3769_v37 = vld [vmem:[#allocation2 + $0x10] sm:$0xf8]  ;;  %v3798_v0 = vmul.f32 %v20639_v20, %v20570_v51  ;;  %v18408_v20 = vld [vmem:[%s24069_s4 + $0x528] sm:$0xff]  }
 0x263   : > { %14480 = vmatprep.mubr.msk.bf16.mxu0 %vm24393_vm2, %v3866_v43  ;;  %3953 = vmatprep.subr.bf16.mxu0 %v24315_v13  ;;  %v3598_v54 = vpack.c.bf16 %v3592_v27, %v3590_v9  ;;  %v20769_v56 = vrot.slane %v3600_v33, 1  ;;  %v18376_v43 = vld [vmem:[%s24069_s4 + $0x448] sm:$0xff]   ;;  %v3771_v36 = vld [vmem:[#allocation2 + $0x40] sm:$0xf]  ;;  %v20803_v33 = vsel %vm24395_vm13, 1.0, %v20535_v2  ;;  %vm20923_vm2 = vmand %vm24403_vm12, %vm24402_vm8  ;;  %vm24415_vm12 = vcmp.le.s32.totalorder %v19474_v50, 2 }
 0x264   : > { %vm24414_vm8 = vmmov %vm24372_vm0 }
 0x265   : > { %3301 = vmatpush1.bf16.msra.mxu1 %v18371_v11  ;;  %v18375_v11 = vld [vmem:[%s24069_s4 + $0x3c8] sm:$0xff]   ;;  %v3633_v52 = vrot.slane %v3598_v54, 1  ;;  %v14521_v54 = vsel %vm2004_vm9, 1.0, %v20535_v2 }
 0x266   : > { %3716 = vmatprep.subr.bf16.mxu1 %v24315_v13  ;;  %3954 = vmatpush1.bf16.msra.mxu0 %v18372_v31  ;;  %v3167_v31 = vmul.f32 %v20586_v38, %v20413_v23  ;;  %v18378_v23 = vld [vmem:[%s24069_s4 + $0x450] sm:$0xff]  }
 0x267   : > { %3955 = vmatprep.subr.bf16.mxu0 %v24315_v13  ;;  %v3635_v14 = vsel %vm1859_vm3, %v3633_v52, %v20769_v56  ;;  %v18380_v52 = vld [vmem:[%s24069_s4 + $0x458] sm:$0xff]  }
 0x268   : > { %3311 = vmatmul.mubr.bf16.vlgmr.msra.gmra.mrb[64].mxu1 %v3171_v58  ;;  %v3173_v9 = vpack.c.bf16 %v3169_v12, %v3167_v31  ;;  %v18379_v58 = vld [vmem:[%s24069_s4 + $0x3d8] sm:$0xff]   ;;  %v14522_v12 = vsel %vm2005_vm11, 1.0, %v20535_v2  ;;  %v3800_v31 = vmul.f32 %v20815_v4, %v20644_v63 }
 0x269   : > { %3717 = vmatpush1.bf16.msra.mxu1 %v18373_v10  ;;  %14358 = vmatprep.mubr.msk.bf16.mxu1 %vm24372_vm0, %v3174_v5 }
 0x26a   : > { %3718 = vmatprep.subr.bf16.mxu1 %v24315_v13  ;;  %3956 = vmatpush1.bf16.msra.mxu0 %v18374_v59  ;;  %v3796_v59 = vmul.f32 %v20589_v62, %v3769_v37  ;;  %v18381_v37 = vld [vmem:[%s24069_s4 + $0x3e0] sm:$0xff]  }
 0x26b   : > { %3957 = vmatprep.subr.bf16.mxu0 %v24315_v13 }
 0x26c   : > { %v20777_v25 = vpop.f32.mrb[40].mxu0 }
 0x26d   : > { %3719 = vmatpush1.bf16.msra.mxu1 %v18375_v11  ;;  %v1777_v27 = vpop.f32.mrb[41].mxu0  ;;  %v3802_v11 = vmul.f32 %v24378_v26, %v3771_v36  ;;  %v4177_v36 = vld [vmem:[#allocation2 + $0x18] sm:$0xe0] }
 0x26e   : > { %3720 = vmatprep.subr.bf16.mxu1 %v24315_v13  ;;  %3958 = vmatpush1.bf16.msra.mxu0 %v18376_v43  ;;  %v20785_v10 = vpop.f32.mrb[42].mxu0  ;;  %v4193_v43 = vrot.slane %v14521_v54, 3  ;;  %v20820_v27 = vrot.slane %v20803_v33, 3  ;;  %v4179_v54 = vld [vmem:[#allocation2 + $0x48] sm:$0x3f] }
 0x26f   : > { %v1780_v5 = vpop.f32.mrb[43].mxu0  ;;  %3959 = vmatprep.subr.bf16.mxu0 %v24315_v13 }
 0x270   : > { %3319 = vmatmul.mubr.bf16.gmra.mrb[68].mxu1 %v3173_v9  ;;  %24396 = vst [vmem:[#allocation54_spill] sm:$0xff] %v20820_v27  ;;  %v3806_v5 = vpack.c.bf16 %v3802_v11, %v3800_v31  ;;  %v18383_v11 = vld [vmem:[%s24069_s4 + $0x3e8] sm:$0xff]  }
 0x271   : > { %3721 = vmatpush1.bf16.msra.mxu1 %v18377_v60  ;;  %14439 = vmatprep.mubr.msk.bf16.mxu1 %vm24394_vm5, %v3635_v14  ;;  %v3804_v60 = vpack.c.bf16 %v3798_v0, %v3796_v59  ;;  %v4195_v14 = vrot.slane %v14522_v12, 3  ;;  %v20833_v12 = vsel %vm2480_vm14, %v20820_v27, %v4193_v43  ;;  %vm24406_vm5 = vcmp.le.s32.totalorder %v19447_v40, 3 }
 0x272   : > { %3722 = vmatprep.subr.bf16.mxu1 %v24315_v13  ;;  %3960 = vmatpush1.bf16.msra.mxu0 %v18378_v23  ;;  %24397 = vst [vmem:[#allocation55_spill] sm:$0xff] %v20833_v12  ;;  %v3842_v38 = vshrl.u32 %v3806_v5, 16  ;;  %v3845_v3 = vshll.u32 %v3806_v5, 16  ;;  %vm20949_vm13 = vmand %vm24406_vm5, %vm1380_vm15 }
 0x273   : > { %3961 = vmatprep.subr.bf16.mxu0 %v24315_v13  ;;  %v3834_v29 = vshrl.u32 %v3804_v60, 16  ;;  %v3837_v31 = vshll.u32 %v3804_v60, 16  ;;  %v20845_v35 = vsel %vm2480_vm14, %v4193_v43, %v4195_v14  ;;  %vm24426_vm5 = vmmov %vm24372_vm0 }
 0x274   : > { %v1783_v9 = vpop.f32.mrb[44].mxu0  ;;  %24398 = vst [vmem:[#allocation56_spill] sm:$0xff] %v20845_v35  ;;  %v4208_v30 = vmul.f32 %v20660_v17, %v20845_v35 }
 0x275   : > { %3723 = vmatpush1.bf16.msra.mxu1 %v18379_v58  ;;  %v1785_v23 = vpop.f32.mrb[45].mxu0  ;;  %v18382_v58 = vld [vmem:[%s24069_s4 + $0x460] sm:$0xff]   ;;  %v3836_v6 = vrot.slane %v3834_v29, 1  ;;  %v3844_v29 = vrot.slane %v3842_v38, 1 }
 0x276   : > { %3724 = vmatprep.subr.bf16.mxu1 %v24315_v13  ;;  %3962 = vmatpush1.bf16.msra.mxu0 %v18380_v52  ;;  %v1786_v0 = vpop.f32.mrb[46].mxu0  ;;  %v4204_v52 = vmul.f32 %v20820_v27, %v4177_v36  ;;  %v20839_v23 = vld [vmem:[#allocation2 + $0x28] sm:$0xff] }
 0x277   : > { %v1788_v59 = vpop.f32.mrb[47].mxu0  ;;  %3963 = vmatprep.subr.bf16.mxu0 %v24315_v13  ;;  %v18384_v36 = vld [vmem:[%s24069_s4 + $0x468] sm:$0xff]  }
 0x278   : > { %v4206_v59 = vmul.f32 %v20839_v23, %v20833_v12 }
 0x279   : > { %3725 = vmatpush1.bf16.msra.mxu1 %v18381_v37  ;;  %v24399_v37 = vrot.slane %v20535_v2, 3 }
 0x27a   : > { %3726 = vmatprep.subr.bf16.mxu1 %v24315_v13  ;;  %3964 = vmatpush1.bf16.msra.mxu0 %v18382_v58  ;;  %v18385_v58 = vld [vmem:[%s24069_s4 + $0x3f0] sm:$0xff]  }
 0x27b   : > { %v20850_v28 = vsel %vm2480_vm14, %v4195_v14, %v24399_v37  ;;  %v1648_v60 = vpop.f32.mrb[32].mxu1  ;;  %3965 = vmatprep.subr.bf16.mxu0 %v24315_v13  ;;  %v4212_v37 = vpack.c.bf16 %v4206_v59, %v4204_v52  ;;  %v18387_v52 = vld [vmem:[%s24069_s4 + $0x3f8] sm:$0xff]   ;;  %v3847_v59 = vrot.slane %v3845_v3, 2 }
 0x27c   : > { %24400 = vst [vmem:[#allocation57_spill] sm:$0xff] %v20850_v28  ;;  %v4210_v24 = vmul.f32 %v20850_v28, %v4179_v54  ;;  %v20859_v5 = vadd.f32 %v20777_v25, %v1648_v60  ;;  %v1650_v43 = vpop.f32.mrb[33].mxu1  ;;  %v3839_v54 = vrot.slane %v3837_v31, 2  ;;  %v18386_v25 = vld [vmem:[%s24069_s4 + $0x470] sm:$0xff]   ;;  %v3564_v60 = vld [vmem:[#allocation2 + $0x40] sm:$0x7] }
 0x27d   : > { %3727 = vmatpush1.bf16.msra.mxu1 %v18383_v11  ;;  %v1651_v14 = vpop.f32.mrb[34].mxu1  ;;  %v4261_v31 = vshll.u32 %v4212_v37, 16 }
 0x27e   : > { %v20866_v16 = vadd.f32 %v20785_v10, %v1651_v14  ;;  %v1653_v26 = vpop.f32.mrb[35].mxu1  ;;  %3728 = vmatprep.subr.bf16.mxu1 %v24315_v13  ;;  %3966 = vmatpush1.bf16.msra.mxu0 %v18384_v36  ;;  %v4214_v11 = vpack.c.bf16 %v4210_v24, %v4208_v30  ;;  %v4258_v10 = vshrl.u32 %v4212_v37, 16  ;;  %v18389_v14 = vld [vmem:[%s24069_s4 + $0x400] sm:$0xff]  }
 0x27f   : > { %3967 = vmatprep.subr.bf16.mxu0 %v24315_v13  ;;  %v18388_v26 = vld [vmem:[%s24069_s4 + $0x478] sm:$0xff]  }
 0x280   : > { %v4266_v24 = vshrl.u32 %v4214_v11, 16  ;;  %v4269_v43 = vshll.u32 %v4214_v11, 16  ;;  %v18391_v11 = vld [vmem:[%s24069_s4 + $0x408] sm:$0xff]  }
 0x281   : > { %3729 = vmatpush1.bf16.msra.mxu1 %v18385_v58  ;;  %v3848_v58 = vor.u32 %v3847_v59, %v3844_v29  ;;  %v18392_v59 = vld [vmem:[%s24069_s4 + $0x4e8] sm:$0xff]  }
 0x282   : > { %3730 = vmatprep.subr.bf16.mxu1 %v24315_v13  ;;  %3968 = vmatpush1.bf16.msra.mxu0 %v18386_v25  ;;  %v3840_v25 = vor.u32 %v3839_v54, %v3836_v6  ;;  %v3562_v6 = vld [vmem:[#allocation2 + $0x10] sm:$0xfc]  ;;  %v3593_v54 = vmul.f32 %v20815_v4, %v20731_v19 }
 0x283   : > { %v1656_v38 = vpop.f32.mrb[36].mxu1  ;;  %3969 = vmatprep.subr.bf16.mxu0 %v24315_v13 }
 0x284   : > { %v20880_v30 = vadd.f32 %v1783_v9, %v1656_v38  ;;  %v1658_v36 = vpop.f32.mrb[37].mxu1  ;;  %v18390_v9 = vld [vmem:[%s24069_s4 + $0x4e0] sm:$0xff]   ;;  %v4260_v38 = vrot.slane %v4258_v10, 2  ;;  %v3849_v29 = vsel %vm24381_vm1, %v3840_v25, %v3848_v58  ;;  %v18393_v10 = vld [vmem:[%s24069_s4 + $0x410] sm:$0xff]   ;;  %vm24409_vm1 = vmmov %vm24372_vm0 }
 0x285   : > { %3731 = vmatpush1.bf16.msra.mxu1 %v18387_v52  ;;  %v1659_v3 = vpop.f32.mrb[38].mxu1  ;;  %v3595_v52 = vmul.f32 %v20744_v32, %v3564_v60  ;;  %v4263_v36 = vrot.slane %v4261_v31, 3  ;;  %v3591_v31 = vmul.f32 %v20724_v48, %v20570_v51  ;;  %v18395_v51 = vld [vmem:[%s24069_s4 + $0x418] sm:$0xff]  }
 0x286   : > { %v20886_v37 = vadd.f32 %v1786_v0, %v1659_v3  ;;  %v1661_v63 = vpop.f32.mrb[39].mxu1  ;;  %3732 = vmatprep.subr.bf16.mxu1 %v24315_v13  ;;  %3970 = vmatpush1.bf16.msra.mxu0 %v18388_v26  ;;  %v4268_v0 = vrot.slane %v4266_v24, 2 }
 0x287   : > { %4354 = vmatprep.subr.bf16.mxu0 %v24315_v13  ;;  %v4271_v63 = vrot.slane %v4269_v43, 3  ;;  %v3599_v26 = vpack.c.bf16 %v3595_v52, %v3593_v54  ;;  %v4264_v60 = vor.u32 %v4263_v36, %v4260_v38  ;;  %v3589_v43 = vmul.f32 %v20622_v55, %v3562_v6  ;;  %v4001_v52 = vld [vmem:[#allocation2 + $0x18] sm:$0xf0]  ;;  %v4003_v38 = vld [vmem:[#allocation2 + $0x48] sm:$0x1f]  ;;  %v18398_v6 = vld [vmem:[%s24069_s4 + $0x500] sm:$0xff]  }
 0x288   : > { %v4176_v54 = vld [vmem:[#allocation2 + $0x10] sm:$0xe0] }
 0x289   : > { %3733 = vmatpush1.bf16.msra.mxu1 %v18389_v14  ;;  %3980 = vmatmul.mubr.bf16.vlgmr.msra.gmra.mrb[80].mxu0 %v3849_v29  ;;  %v20912_v24 = vor.u32 %v4271_v63, %v4268_v0  ;;  %v3631_v14 = vrot.slane %v3599_v26, 1  ;;  %v18397_v0 = vld [vmem:[%s24069_s4 + $0x480] sm:$0xff]   ;;  %v4005_v63 = vpack.c.bf16 %v20839_v23, %v4001_v52  ;;  %v4007_v29 = vpack.c.bf16 %v4003_v38, %v20660_v17  ;;  %v18399_v17 = vld [vmem:[%s24069_s4 + $0x488] sm:$0xff]  }
 0x28a   : > { %3734 = vmatprep.subr.bf16.mxu1 %v24315_v13  ;;  %4355 = vmatpush1.bf16.msra.mxu0 %v18390_v9  ;;  %v3597_v9 = vpack.c.bf16 %v3591_v31, %v3589_v43  ;;  %v20963_v26 = vld [vmem:[#allocation2] sm:$0xff]  ;;  %v20969_v31 = vrot.slane %v20594_v57, 1 }
 0x28b   : > { %14481 = vmatprep.mubr.msk.bf16.mxu0 %vm24401_vm4, %v20708_v22  ;;  %4356 = vmatprep.subr.bf16.mxu0 %v24315_v13  ;;  %v18394_v22 = vld [vmem:[%s24069_s4 + $0x4f0] sm:$0xff]   ;;  %v4273_v25 = vsel %vm2529_vm10, %v4264_v60, %v20912_v24  ;;  %v4040_v60 = vrot.slane %v4005_v63, 2  ;;  %v20977_v43 = vld [vmem:[#allocation2 + $0x20] sm:$0xff]  ;;  %v14604_v3 = vsel %vm20949_vm13, 1.0, %v20963_v26  ;;  %vm24411_vm4 = vcmp.le.s32.totalorder %v19466_v45, 2  ;;  %vm24427_vm13 = vmmov %vm24372_vm0 }
 0x28c   : > { %v3630_v36 = vrot.slane %v3597_v9, 1  ;;  %24410 = vst [vmem:[#allocation58_spill] sm:$0xff] %v20969_v31  ;;  %v4178_v38 = vld [vmem:[#allocation2 + $0x40] sm:$0x3f] }
 0x28d   : > { %3735 = vmatpush1.bf16.msra.mxu1 %v18391_v11  ;;  %v18396_v11 = vld [vmem:[%s24069_s4 + $0x4f8] sm:$0xff]  }
 0x28e   : > { %3736 = vmatprep.subr.bf16.mxu1 %v24315_v13  ;;  %4357 = vmatpush1.bf16.msra.mxu0 %v18392_v59  ;;  %v3632_v59 = vsel %vm1859_vm3, %v3630_v36, %v3631_v14 }
 0x28f   : > { %4358 = vmatprep.subr.bf16.mxu0 %v24315_v13 }
 0x291   : > { %3737 = vmatpush1.bf16.msra.mxu1 %v18393_v10  ;;  %3988 = vmatmul.mubr.bf16.gmra.mrb[84].mxu0 %v3848_v58  ;;  %v14603_v10 = vsel %vm20923_vm2, 1.0, %v20963_v26  ;;  %vm24420_vm2 = vmmov %vm24372_vm0 }
 0x292   : > { %3738 = vmatprep.subr.bf16.mxu1 %v24315_v13  ;;  %4359 = vmatpush1.bf16.msra.mxu0 %v18394_v22  ;;  %v20972_v22 = vrot.slane %v4007_v29, 2  ;;  %v18402_v29 = vld [vmem:[%s24069_s4 + $0x510] sm:$0xff]  }
 0x293   : > { %14559 = vmatprep.mubr.msk.bf16.mxu0 %vm24372_vm0, %v4273_v25  ;;  %4360 = vmatprep.subr.bf16.mxu0 %v24315_v13  ;;  %v18401_v25 = vld [vmem:[%s24069_s4 + $0x490] sm:$0xff]  }
 0x294   : > { %v4042_v36 = vsel %vm2316_vm7, %v4040_v60, %v20972_v22 }
 0x295   : > { %3739 = vmatpush1.bf16.msra.mxu1 %v18395_v51  ;;  %v4205_v51 = vmul.f32 %v20977_v43, %v20833_v12  ;;  %v24418_v12 = vrot.slane %v20963_v26, 1 }
 0x296   : > { %4123 = vmatprep.subr.bf16.mxu1 %v24315_v13  ;;  %4361 = vmatpush1.bf16.msra.mxu0 %v18396_v11  ;;  %v4203_v11 = vmul.f32 %v20820_v27, %v4176_v54  ;;  %v24412_v54 = vld [vmem:[#allocation19_spill] sm:$0xff] }
 0x297   : > { %4362 = vmatprep.subr.bf16.mxu0 %v24315_v13  ;;  %v21008_v60 = vrot.slane %v24412_v54, 2 }
 0x298   : > { %3749 = vmatmul.mubr.bf16.vlgmr.msra.gmra.mrb[72].mxu1 %v3632_v59  ;;  %v21004_v58 = vpack.c.bf16 %v4205_v51, %v4203_v11 }
 0x299   : > { %4124 = vmatpush1.bf16.msra.mxu1 %v18397_v0  ;;  %14440 = vmatprep.mubr.msk.bf16.mxu1 %vm24409_vm1, %v20769_v56  ;;  %v18400_v56 = vld [vmem:[%s24069_s4 + $0x508] sm:$0xff]   ;;  %v20997_v0 = vsel %vm24411_vm4, 1.0, %v20963_v26  ;;  %24413 = vst [vmem:[#allocation59_spill] sm:$0xff] %v21008_v60  ;;  %vm24428_vm1 = vcmp.le.s32.totalorder %v19435_v34, 3  ;;  %vm24429_vm4 = vcmp.le.s32.totalorder %v19447_v40, 3 }
 0x29a   : > { %4125 = vmatprep.subr.bf16.mxu1 %v24315_v13  ;;  %4363 = vmatpush1.bf16.msra.mxu0 %v18398_v6  ;;  %v4639_v6 = vrot.slane %v14603_v10, 1  ;;  %v4241_v11 = vshrl.u32 %v21004_v58, 16  ;;  %v4244_v10 = vshll.u32 %v21004_v58, 16  ;;  %v18407_v58 = vld [vmem:[%s24069_s4 + $0x4a8] sm:$0xff]  }
 0x29b   : > { %4364 = vmatprep.subr.bf16.mxu0 %v24315_v13 }
 0x29c   : > { %v20985_v9 = vpop.f32.mrb[48].mxu0 }
 0x29d   : > { %4126 = vmatpush1.bf16.msra.mxu1 %v18399_v17  ;;  %v2223_v52 = vpop.f32.mrb[49].mxu0  ;;  %v4641_v17 = vrot.slane %v14604_v3, 1  ;;  %v18404_v3 = vld [vmem:[%s24069_s4 + $0x518] sm:$0xff]  }
 0x29e   : > { %4127 = vmatprep.subr.bf16.mxu1 %v24315_v13  ;;  %v20999_v63 = vpop.f32.mrb[50].mxu0  ;;  %4365 = vmatpush1.bf16.msra.mxu0 %v18400_v56  ;;  %v18403_v56 = vld [vmem:[%s24069_s4 + $0x498] sm:$0xff]   ;;  %v4209_v52 = vmul.f32 %v20850_v28, %v4178_v38 }
 0x29f   : > { %v2226_v59 = vpop.f32.mrb[51].mxu0  ;;  %4366 = vmatprep.subr.bf16.mxu0 %v24315_v13  ;;  %v21062_v62 = vsel %vm1859_vm3, %v4641_v17, %v24418_v12 }
 0x2a0   : > { %3757 = vmatmul.mubr.bf16.gmra.mrb[76].mxu1 %v3631_v14  ;;  %v21018_v14 = vsel %vm24415_vm12, 1.0, %v20963_v26  ;;  %24419 = vst [vmem:[#allocation62_spill] sm:$0xff] %v21062_v62 }
 0x2a1   : > { %4128 = vmatpush1.bf16.msra.mxu1 %v18401_v25  ;;  %14518 = vmatprep.mubr.msk.bf16.mxu1 %vm24414_vm8, %v4042_v36  ;;  %v4207_v25 = vmul.f32 %v20815_v4, %v20845_v35  ;;  %v18405_v36 = vld [vmem:[%s24069_s4 + $0x4a0] sm:$0xff]   ;;  %vm24431_vm8 = vcmask 1040384  }
 0x2a2   : > { %4129 = vmatprep.subr.bf16.mxu1 %v24315_v13  ;;  %4367 = vmatpush1.bf16.msra.mxu0 %v18402_v29  ;;  %v4615_v29 = vld [vmem:[#allocation2 + $0x18] sm:$0x80]  ;;  %v18406_v35 = vld [vmem:[%s24069_s4 + $0x520] sm:$0xff]   ;;  %vm24433_vm12 = vmmov %vm24431_vm8 }
 0x2a3   : > { %4368 = vmatprep.subr.bf16.mxu0 %v24315_v13  ;;  %v4213_v59 = vpack.c.bf16 %v4209_v52, %v4207_v25  ;;  %v21047_v52 = vsel %vm1859_vm3, %v20969_v31, %v4639_v6 }
 0x2a4   : > { %v21030_v38 = vpop.f32.mrb[52].mxu0  ;;  %24416 = vst [vmem:[#allocation60_spill] sm:$0xff] %v21047_v52  ;;  %v4652_v25 = vmul.f32 %v20839_v23, %v21047_v52 }
 0x2a5   : > { %4130 = vmatpush1.bf16.msra.mxu1 %v18403_v56  ;;  %v2231_v51 = vpop.f32.mrb[53].mxu0  ;;  %v21043_v56 = vld [vmem:[#allocation2 + $0x48] sm:$0xff]  ;;  %v4252_v12 = vshll.u32 %v4213_v59, 16 }
 0x2a6   : > { %4131 = vmatprep.subr.bf16.mxu1 %v24315_v13  ;;  %v21037_v28 = vpop.f32.mrb[54].mxu0  ;;  %4369 = vmatpush1.bf16.msra.mxu0 %v18404_v3  ;;  %v4249_v51 = vshrl.u32 %v4213_v59, 16  ;;  %v4650_v3 = vmul.f32 %v20969_v31, %v4615_v29  ;;  %v21067_v29 = vld [vmem:[#allocation2 + $0x38] sm:$0xff]  ;;  %v4243_v59 = vrot.slane %v4241_v11, 2 }
 0x2a7   : > { %v2234_v27 = vpop.f32.mrb[55].mxu0  ;;  %4370 = vmatprep.subr.bf16.mxu0 %v24315_v13 }
 0x2a8   : > { %v21057_v27 = vsel %vm1859_vm3, %v4639_v6, %v4641_v17  ;;  %v4656_v6 = vmul.f32 %v21062_v62, %v21043_v56  ;;  %v4658_v48 = vpack.c.bf16 %v4652_v25, %v4650_v3 }
 0x2a9   : > { %4132 = vmatpush1.bf16.msra.mxu1 %v18405_v36  ;;  %24417 = vst [vmem:[#allocation61_spill] sm:$0xff] %v21057_v27  ;;  %v4654_v32 = vmul.f32 %v21067_v29, %v21057_v27 }
 0x2aa   : > { %4133 = vmatprep.subr.bf16.mxu1 %v24315_v13  ;;  %4371 = vmatpush1.bf16.msra.mxu0 %v18406_v35  ;;  %v18409_v35 = vld [vmem:[%s24069_s4 + $0x4b0] sm:$0xff]   ;;  %v4707_v11 = vshll.u32 %v4658_v48, 16 }
 0x2ab   : > { %v1980_v36 = vpop.f32.mrb[40].mxu1  ;;  %4372 = vmatprep.subr.bf16.mxu0 %v24315_v13  ;;  %v4660_v42 = vpack.c.bf16 %v4656_v6, %v4654_v32 }
 0x2ac   : > { %v1995_v19 = vadd.f32 %v1980_v36, %v20859_v5  ;;  %v1982_v55 = vpop.f32.mrb[41].mxu1  ;;  %v18410_v5 = vld [vmem:[%s24069_s4 + $0x530] sm:$0xff]   ;;  %v4251_v36 = vrot.slane %v4249_v51, 2 }
 0x2ad   : > { %v1983_v17 = vpop.f32.mrb[42].mxu1  ;;  %4134 = vmatpush1.bf16.msra.mxu1 %v18407_v58  ;;  %v4426_v55 = vrot.slane %v21018_v14, 2  ;;  %v4246_v58 = vrot.slane %v4244_v10, 3  ;;  %v4712_v10 = vshrl.u32 %v4660_v42, 16  ;;  %v4715_v25 = vshll.u32 %v4660_v42, 16 }
 0x2ae   : > { %v1996_v44 = vadd.f32 %v1983_v17, %v20866_v16  ;;  %v1985_v39 = vpop.f32.mrb[43].mxu1  ;;  %4135 = vmatprep.subr.bf16.mxu1 %v24315_v13  ;;  %v21081_v47 = vadd.f32 %v20985_v9, %v1995_v19  ;;  %4373 = vmatpush1.bf16.msra.mxu0 %v18408_v20  ;;  %v18411_v16 = vld [vmem:[%s24069_s4 + $0x4b8] sm:$0xff]   ;;  %v4704_v9 = vshrl.u32 %v4658_v48, 16 }
 0x2af   : > { %4374 = vmatprep.subr.bf16.mxu0 %v24315_v13  ;;  %v4254_v39 = vrot.slane %v4252_v12, 3  ;;  %v18412_v20 = vld [vmem:[%s24069_s4 + $0x538] sm:$0xff]   ;;  %v4002_v12 = vld [vmem:[#allocation2 + $0x40] sm:$0x1f]  ;;  %v4247_v42 = vor.u32 %v4246_v58, %v4243_v59 }
 0x2b0   : > { %v21092_v19 = vadd.f32 %v20999_v63, %v1996_v44  ;;  %v18413_v63 = vld [vmem:[%s24069_s4 + $0x4c0] sm:$0xff]   ;;  %v4006_v59 = vpack.c.bf16 %v4002_v12, %v20815_v4  ;;  %v18418_v4 = vld [vmem:[%s24069_s4 + $0x5b0] sm:$0xff]   ;;  %v24421_v12 = vrot.slane %v20997_v0, 2 }
 0x2b1   : > { %4136 = vmatpush1.bf16.msra.mxu1 %v18409_v35  ;;  %v4255_v6 = vor.u32 %v4254_v39, %v4251_v36  ;;  %v4706_v36 = vrot.slane %v4704_v9, 3  ;;  %v4714_v39 = vrot.slane %v4712_v10, 3  ;;  %v24205_v9 = vrot.slane %v20963_v26, 2  ;;  %v4408_v10 = vld [vmem:[#allocation2 + $0x18] sm:$0xc0] }
 0x2b2   : > { %4137 = vmatprep.subr.bf16.mxu1 %v24315_v13  ;;  %4375 = vmatpush1.bf16.msra.mxu0 %v18410_v5  ;;  %v18415_v5 = vld [vmem:[%s24069_s4 + $0x4c8] sm:$0xff]  }
 0x2b3   : > { %v1988_v32 = vpop.f32.mrb[44].mxu1  ;;  %4376 = vmatprep.subr.bf16.mxu0 %v24315_v13 }
 0x2b4   : > { %v1997_v51 = vadd.f32 %v1988_v32, %v20880_v30  ;;  %v1990_v3 = vpop.f32.mrb[45].mxu1  ;;  %v18414_v30 = vld [vmem:[%s24069_s4 + $0x5a0] sm:$0xff]   ;;  %v4717_v32 = vrot.slane %v4715_v25, 4  ;;  %v4410_v25 = vld [vmem:[#allocation2 + $0x48] sm:$0x7f] }
 0x2b5   : > { %v1991_v44 = vpop.f32.mrb[46].mxu1  ;;  %4138 = vmatpush1.bf16.msra.mxu1 %v18411_v16  ;;  %v4709_v16 = vrot.slane %v4707_v11, 4  ;;  %v4256_v3 = vsel %vm2529_vm10, %v4247_v42, %v4255_v6  ;;  %v4000_v11 = vld [vmem:[#allocation2 + $0x10] sm:$0xf0] }
 0x2b6   : > { %v1998_v48 = vadd.f32 %v1991_v44, %v20886_v37  ;;  %v1993_v17 = vpop.f32.mrb[47].mxu1  ;;  %4139 = vmatprep.subr.bf16.mxu1 %v24315_v13  ;;  %v21109_v35 = vadd.f32 %v21030_v38, %v1997_v51  ;;  %4377 = vmatpush1.bf16.msra.mxu0 %v18412_v20  ;;  %v18416_v38 = vld [vmem:[%s24069_s4 + $0x5a8] sm:$0xff]   ;;  %v21130_v20 = vor.u32 %v4717_v32, %v4714_v39  ;;  %v18419_v51 = vld [vmem:[%s24069_s4 + $0x4d8] sm:$0xff]   ;;  %v18422_v32 = vld [vmem:[%s24069_s4 + $0x5c0] sm:$0xff]  }
 0x2b7   : > { %4800 = vmatprep.subr.bf16.mxu0 %v24315_v13  ;;  %v4710_v58 = vor.u32 %v4709_v16, %v4706_v36  ;;  %v4004_v44 = vpack.c.bf16 %v20977_v43, %v4000_v11  ;;  %v18420_v17 = vld [vmem:[%s24069_s4 + $0x5b8] sm:$0xff]   ;;  %v4435_v16 = vmul.f32 %v21008_v60, %v4408_v10  ;;  %v18425_v11 = vld [vmem:[%s24069_s4 + $0x550] sm:$0xff]  }
 0x2b8   : > { %v21116_v37 = vadd.f32 %v21037_v28, %v1998_v48  ;;  %v18417_v28 = vld [vmem:[%s24069_s4 + $0x4d0] sm:$0xff]   ;;  %v21148_v48 = vsel %vm2316_vm7, %v21008_v60, %v24421_v12 }
 0x2b9   : > { %4140 = vmatpush1.bf16.msra.mxu1 %v18413_v63  ;;  %4387 = vmatmul.mubr.bf16.vlgmr.msra.gmra.mrb[88].mxu0 %v4256_v3  ;;  %v4719_v63 = vsel %vm2975_vm6, %v4710_v58, %v21130_v20  ;;  %24422 = vst [vmem:[#allocation63_spill] sm:$0xff] %v21148_v48  ;;  %v4437_v36 = vmul.f32 %v20839_v23, %v21148_v48  ;;  %v4037_v14 = vrot.slane %v4004_v44, 2  ;;  %v18421_v23 = vld [vmem:[%s24069_s4 + $0x540] sm:$0xff]   ;;  %v18423_v3 = vld [vmem:[%s24069_s4 + $0x548] sm:$0xff]   ;;  %v18427_v44 = vld [vmem:[%s24069_s4 + $0x558] sm:$0xff]  }
 0x2ba   : > { %4141 = vmatprep.subr.bf16.mxu1 %v24315_v13  ;;  %4801 = vmatpush1.bf16.msra.mxu0 %v18414_v30  ;;  %v24423_v30 = vmov %v24421_v12  ;;  %v18428_v12 = vld [vmem:[%s24069_s4 + $0x5d8] sm:$0xff]  }
 0x2bb   : > { %14560 = vmatprep.mubr.msk.bf16.mxu0 %vm24420_vm2, %v20912_v24  ;;  %4802 = vmatprep.subr.bf16.mxu0 %v24315_v13  ;;  %v4038_v24 = vrot.slane %v4006_v59, 2  ;;  %v21158_v42 = vsel %vm2316_vm7, %v24423_v30, %v4426_v55  ;;  %v18429_v30 = vld [vmem:[%s24069_s4 + $0x560] sm:$0xff]   ;;  %vm24435_vm2 = vmmov %vm24431_vm8 }
 0x2bc   : > { %24424 = vst [vmem:[#allocation64_spill] sm:$0xff] %v21158_v42  ;;  %v4439_v0 = vmul.f32 %v21067_v29, %v21158_v42 }
 0x2bd   : > { %4142 = vmatpush1.bf16.msra.mxu1 %v18415_v5  ;;  %v21165_v5 = vsel %vm2316_vm7, %v4426_v55, %v24205_v9  ;;  %v4443_v55 = vpack.c.bf16 %v4437_v36, %v4435_v16  ;;  %v4039_v29 = vsel %vm2316_vm7, %v4037_v14, %v4038_v24  ;;  %v18430_v14 = vld [vmem:[%s24069_s4 + $0x5e0] sm:$0xff]   ;;  %v5044_v9 = vld [vmem:[#allocation2 + $0x58] sm:$0x3] }
 0x2be   : > { %4143 = vmatprep.subr.bf16.mxu1 %v24315_v13  ;;  %4803 = vmatpush1.bf16.msra.mxu0 %v18416_v38  ;;  %24425 = vst [vmem:[#allocation65_spill] sm:$0xff] %v21165_v5  ;;  %v4441_v39 = vmul.f32 %v21165_v5, %v4410_v25 }
 0x2bf   : > { %4804 = vmatprep.subr.bf16.mxu0 %v24315_v13  ;;  %v4478_v38 = vrot.slane %v4443_v55, 3  ;;  %v21240_v55 = vld [vmem:[#allocation2 + $0x30] sm:$0xff] }
 0x2c1   : > { %4144 = vmatpush1.bf16.msra.mxu1 %v18417_v28  ;;  %4395 = vmatmul.mubr.bf16.gmra.mrb[92].mxu0 %v4255_v6  ;;  %v4445_v6 = vpack.c.bf16 %v4441_v39, %v4439_v0  ;;  %v18424_v28 = vld [vmem:[%s24069_s4 + $0x5c8] sm:$0xff]   ;;  %v4614_v0 = vld [vmem:[#allocation2 + $0x10] sm:$0x80] }
 0x2c2   : > { %4145 = vmatprep.subr.bf16.mxu1 %v24315_v13  ;;  %4805 = vmatpush1.bf16.msra.mxu0 %v18418_v4 }
 0x2c3   : > { %14641 = vmatprep.mubr.msk.bf16.mxu0 %vm24372_vm0, %v4719_v63  ;;  %4806 = vmatprep.subr.bf16.mxu0 %v24315_v13  ;;  %v21191_v59 = vrot.slane %v4445_v6, 3  ;;  %v21216_v63 = vld [vmem:[#allocation2 + $0x40] sm:$0xff]  ;;  %v4653_v6 = vmul.f32 %v21240_v55, %v21057_v27 }
 0x2c4   : > { %v4655_v36 = vmul.f32 %v21062_v62, %v21216_v63 }
 0x2c5   : > { %4146 = vmatpush1.bf16.msra.mxu1 %v18419_v51  ;;  %v4480_v4 = vsel %vm2480_vm14, %v4478_v38, %v21191_v59  ;;  %v18426_v51 = vld [vmem:[%s24069_s4 + $0x5d0] sm:$0xff]   ;;  %v18431_v38 = vld [vmem:[%s24069_s4 + $0x568] sm:$0xff]  }
 0x2c6   : > { %4561 = vmatprep.subr.bf16.mxu1 %v24315_v13  ;;  %4807 = vmatpush1.bf16.msra.mxu0 %v18420_v17 }
 0x2c7   : > { %4808 = vmatprep.subr.bf16.mxu0 %v24315_v13 }
 0x2c8   : > { %4156 = vmatmul.mubr.bf16.vlgmr.msra.gmra.mrb[80].mxu1 %v4039_v29 }
 0x2c9   : > { %4562 = vmatpush1.bf16.msra.mxu1 %v18421_v23  ;;  %14519 = vmatprep.mubr.msk.bf16.mxu1 %vm24426_vm5, %v20972_v22  ;;  %v4651_v23 = vmul.f32 %v20977_v43, %v21047_v52  ;;  %vm24437_vm5 = vsmask.f32 7424 }
 0x2ca   : > { %4563 = vmatprep.subr.bf16.mxu1 %v24315_v13  ;;  %4809 = vmatpush1.bf16.msra.mxu0 %v18422_v32 }
 0x2cb   : > { %4810 = vmatprep.subr.bf16.mxu0 %v24315_v13 }
 0x2cc   : > { %v21197_v58 = vpop.f32.mrb[56].mxu0 }
 0x2cd   : > { %4564 = vmatpush1.bf16.msra.mxu1 %v18423_v3  ;;  %v2680_v22 = vpop.f32.mrb[57].mxu0  ;;  %v14685_v3 = vsel %vm24429_vm4, 1.0, %v20963_v26  ;;  %vm24440_vm4 = vcmp.le.s32.totalorder %v19435_v34, 3 }
 0x2ce   : > { %4565 = vmatprep.subr.bf16.mxu1 %v24315_v13  ;;  %v21205_v10 = vpop.f32.mrb[58].mxu0  ;;  %4811 = vmatpush1.bf16.msra.mxu0 %v18424_v28  ;;  %v4649_v28 = vmul.f32 %v20969_v31, %v4614_v0  ;;  %v21252_v22 = vld [vmem:[#allocation2 + $0x38] sm:$0xff] }
 0x2cf   : > { %v2683_v25 = vpop.f32.mrb[59].mxu0  ;;  %4812 = vmatprep.subr.bf16.mxu0 %v24315_v13 }
 0x2d0   : > { %4164 = vmatmul.mubr.bf16.gmra.mrb[84].mxu1 %v4038_v24  ;;  %v14684_v24 = vsel %vm24428_vm1, 1.0, %v20963_v26  ;;  %v18432_v25 = vld [vmem:[%s24069_s4 + $0x5e8] sm:$0xff]   ;;  %vm24439_vm1 = vcmp.ge.s32.totalorder %v19466_v45, 1 }
 0x2d1   : > { %4566 = vmatpush1.bf16.msra.mxu1 %v18425_v11  ;;  %14600 = vmatprep.mubr.msk.bf16.mxu1 %vm24427_vm13, %v4480_v4  ;;  %v5058_v29 = vrot.slane %v14684_v24, 7  ;;  %v4659_v11 = vpack.c.bf16 %v4655_v36, %v4653_v6  ;;  %v5042_v4 = vld [vmem:[#allocation2 + $0x28] sm:$0xfe]  ;;  %vm24438_vm13 = vmmov %vm24372_vm0 }
 0x2d2   : > { %4567 = vmatprep.subr.bf16.mxu1 %v24315_v13  ;;  %4813 = vmatpush1.bf16.msra.mxu0 %v18426_v51 }
 0x2d3   : > { %4814 = vmatprep.subr.bf16.mxu0 %v24315_v13 }
 0x2d4   : > { %v21225_v17 = vpop.f32.mrb[60].mxu0 }
 0x2d5   : > { %4568 = vmatpush1.bf16.msra.mxu1 %v18427_v44  ;;  %v2688_v16 = vpop.f32.mrb[61].mxu0  ;;  %v4657_v44 = vpack.c.bf16 %v4651_v23, %v4649_v28  ;;  %v18433_v23 = vld [vmem:[%s24069_s4 + $0x570] sm:$0xff]   ;;  %v4698_v28 = vshll.u32 %v4659_v11, 16 }
 0x2d6   : > { %4569 = vmatprep.subr.bf16.mxu1 %v24315_v13  ;;  %v21233_v39 = vpop.f32.mrb[62].mxu0  ;;  %4815 = vmatpush1.bf16.msra.mxu0 %v18428_v12  ;;  %v24430_v12 = vld [vmem:[#allocation7_spill] sm:$0xff] }
 0x2d7   : > { %v2691_v32 = vpop.f32.mrb[63].mxu0  ;;  %4816 = vmatprep.subr.bf16.mxu0 %v24315_v13  ;;  %v21260_v24 = vsel %vm24431_vm8, %v24430_v12, %v5058_v29  ;;  %v5069_v0 = vmul.f32 %v5042_v4, %v24430_v12  ;;  %v4687_v4 = vshrl.u32 %v4657_v44, 16  ;;  %vm4862_vm8 = vmand %vm24440_vm4, %vm24439_vm1  ;;  %vm24451_vm1 = vcmp.le.s32.totalorder %v19447_v40, 3 }
 0x2d8   : > { %24432 = vst [vmem:[#allocation66_spill] sm:$0xff] %v21260_v24  ;;  %v4695_v32 = vshrl.u32 %v4659_v11, 16 }
 0x2d9   : > { %4570 = vmatpush1.bf16.msra.mxu1 %v18429_v30  ;;  %v5060_v30 = vrot.slane %v14685_v3, 7 }
 0x2da   : > { %4571 = vmatprep.subr.bf16.mxu1 %v24315_v13  ;;  %4817 = vmatpush1.bf16.msra.mxu0 %v18430_v14  ;;  %v5071_v14 = vmul.f32 %v21260_v24, %v21252_v22 }
 0x2db   : > { %v2437_v51 = vpop.f32.mrb[48].mxu1  ;;  %4818 = vmatprep.subr.bf16.mxu0 %v24315_v13  ;;  %v21279_v62 = vsel %vm24433_vm12, %v5058_v29, %v5060_v30  ;;  %v21283_v11 = vsel %vm24435_vm2, %v5060_v30, %v19622_v41  ;;  %v18435_v29 = vld [vmem:[%s24069_s4 + $0x578] sm:$0xff]   ;;  %vm24442_vm12 = vmmov %vm24372_vm0 }
 0x2dc   : > { %v2452_v16 = vadd.f32 %v2437_v51, %v21081_v47  ;;  %v2439_v36 = vpop.f32.mrb[49].mxu1  ;;  %24434 = vst [vmem:[#allocation67_spill] sm:$0xff] %v21279_v62  ;;  %24436 = vst [vmem:[#allocation68_spill] sm:$0xff] %v21283_v11 }
 0x2dd   : > { %v2440_v6 = vpop.f32.mrb[50].mxu1  ;;  %4572 = vmatpush1.bf16.msra.mxu1 %v18431_v38  ;;  %v18434_v38 = vld [vmem:[%s24069_s4 + $0x5f0] sm:$0xff]   ;;  %v4690_v36 = vshll.u32 %v4657_v44, 16  ;;  %v4697_v44 = vrot.slane %v4695_v32, 3  ;;  %vm24443_vm2 = vmmov %vm24372_vm0 }
 0x2de   : > { %v2453_v3 = vadd.f32 %v2440_v6, %v21092_v19  ;;  %v2442_v47 = vpop.f32.mrb[51].mxu1  ;;  %4573 = vmatprep.subr.bf16.mxu1 %v24315_v13  ;;  %v21273_v51 = vadd.f32 %v21197_v58, %v2452_v16  ;;  %4819 = vmatpush1.bf16.msra.mxu0 %v18432_v25  ;;  %v5073_v58 = vmul.f32 %v21279_v62, %v21043_v56  ;;  %v4700_v6 = vrot.slane %v4698_v28, 4  ;;  %v18437_v28 = vld [vmem:[%s24069_s4 + $0x580] sm:$0xff]  }
 0x2df   : > { %4820 = vmatprep.subr.bf16.mxu0 %v24315_v13  ;;  %v5075_v25 = vmul.f32 %v21283_v11, %v5044_v9  ;;  %v5077_v16 = vpack.c.bf16 %v5071_v14, %v5069_v0  ;;  %v4692_v47 = vrot.slane %v4690_v36, 4  ;;  %v18438_v36 = vld [vmem:[%s24069_s4 + $0x660] sm:$0xff]  }
 0x2e0   : > { %v21287_v19 = vadd.f32 %v21205_v10, %v2453_v3  ;;  %v18436_v10 = vld [vmem:[%s24069_s4 + $0x5f8] sm:$0xff]   ;;  %v4689_v3 = vrot.slane %v4687_v4, 3 }
 0x2e1   : > { %4574 = vmatpush1.bf16.msra.mxu1 %v18433_v23  ;;  %v21301_v14 = vpack.c.bf16 %v5075_v25, %v5073_v58  ;;  %v5120_v23 = vshll.u32 %v5077_v16, 16  ;;  %v4409_v58 = vld [vmem:[#allocation2 + $0x40] sm:$0x7f] }
 0x2e2   : > { %4575 = vmatprep.subr.bf16.mxu1 %v24315_v13  ;;  %4821 = vmatpush1.bf16.msra.mxu0 %v18434_v38  ;;  %v4701_v38 = vor.u32 %v4700_v6, %v4697_v44  ;;  %v4693_v4 = vor.u32 %v4692_v47, %v4689_v3  ;;  %v18439_v44 = vld [vmem:[%s24069_s4 + $0x588] sm:$0xff]   ;;  %v4436_v3 = vmul.f32 %v20977_v43, %v21148_v48  ;;  %v18443_v43 = vld [vmem:[%s24069_s4 + $0x598] sm:$0xff]  }
 0x2e3   : > { %v2445_v30 = vpop.f32.mrb[52].mxu1  ;;  %4822 = vmatprep.subr.bf16.mxu0 %v24315_v13  ;;  %v4438_v47 = vmul.f32 %v21240_v55, %v21158_v42 }
 0x2e4   : > { %v2454_v9 = vadd.f32 %v2445_v30, %v21109_v35  ;;  %v2447_v0 = vpop.f32.mrb[53].mxu1 }
 0x2e5   : > { %v2448_v32 = vpop.f32.mrb[54].mxu1  ;;  %4576 = vmatpush1.bf16.msra.mxu1 %v18435_v29  ;;  %v5118_v29 = vshrl.u32 %v5077_v16, 16  ;;  %v4407_v16 = vld [vmem:[#allocation2 + $0x10] sm:$0xc0] }
 0x2e6   : > { %v2455_v27 = vadd.f32 %v2448_v32, %v21116_v37  ;;  %v2450_v31 = vpop.f32.mrb[55].mxu1  ;;  %4577 = vmatprep.subr.bf16.mxu1 %v24315_v13  ;;  %v21309_v35 = vadd.f32 %v21225_v17, %v2454_v9  ;;  %4823 = vmatpush1.bf16.msra.mxu0 %v18436_v10  ;;  %v5122_v37 = vrot.slane %v5120_v23, 1  ;;  %v4702_v17 = vsel %vm2975_vm6, %v4693_v4, %v4701_v38  ;;  %v18441_v10 = vld [vmem:[%s24069_s4 + $0x590] sm:$0xff]   ;;  %v18444_v32 = vld [vmem:[%s24069_s4 + $0x678] sm:$0xff]  }
 0x2e7   : > { %5215 = vmatprep.subr.bf16.mxu0 %v24315_v13  ;;  %v5125_v31 = vshll.u32 %v21301_v14, 16  ;;  %v4434_v9 = vmul.f32 %v21008_v60, %v4407_v16 }
 0x2e8   : > { %v21316_v25 = vadd.f32 %v21233_v39, %v2455_v27  ;;  %v18440_v27 = vld [vmem:[%s24069_s4 + $0x668] sm:$0xff]   ;;  %v4440_v39 = vmul.f32 %v21165_v5, %v4409_v58  ;;  %v5123_v6 = vor.u32 %v5122_v37, %v5118_v29  ;;  %v18446_v29 = vld [vmem:[%s24069_s4 + $0x680] sm:$0xff]   ;;  %v21371_v37 = vsel %vm4862_vm8, 1.0, %v20963_v26 }
 0x2e9   : > { %4578 = vmatpush1.bf16.msra.mxu1 %v18437_v28  ;;  %4833 = vmatmul.mubr.bf16.vlgmr.msra.gmra.mrb[96].mxu0 %v4702_v17  ;;  %v21331_v30 = vrot.slane %v5125_v31, 1  ;;  %v4442_v55 = vpack.c.bf16 %v4436_v3, %v4434_v9  ;;  %24441 = vst [vmem:[#allocation69_spill] sm:$0xff] %v21371_v37  ;;  %v18447_v31 = vld [vmem:[%s24069_s4 + $0x608] sm:$0xff]   ;;  %v18450_v3 = vld [vmem:[%s24069_s4 + $0x690] sm:$0xff]   ;;  %vm24454_vm8 = vsmask.f32 6400 }
 0x2ea   : > { %4579 = vmatprep.subr.bf16.mxu1 %v24315_v13  ;;  %5216 = vmatpush1.bf16.msra.mxu0 %v18438_v36  ;;  %v4444_v0 = vpack.c.bf16 %v4440_v39, %v4438_v47  ;;  %v18445_v36 = vld [vmem:[%s24069_s4 + $0x600] sm:$0xff]   ;;  %v21399_v9 = vld [vmem:[#allocation2 + $0x30] sm:$0xff] }
 0x2eb   : > { %14642 = vmatprep.mubr.msk.bf16.mxu0 %vm24372_vm0, %v21130_v20  ;;  %5217 = vmatprep.subr.bf16.mxu0 %v24315_v13  ;;  %v18442_v20 = vld [vmem:[%s24069_s4 + $0x670] sm:$0xff]   ;;  %v5128_v23 = vsel %vm24437_vm5, %v5123_v6, %v21331_v30  ;;  %v4475_v4 = vrot.slane %v4442_v55, 3  ;;  %v18453_v55 = vld [vmem:[%s24069_s4 + $0x620] sm:$0xff]   ;;  %vm24448_vm0 = vmmov %vm24437_vm5 }
 0x2ec   : > { %v4476_v28 = vrot.slane %v4444_v0, 3  ;;  %v18452_v0 = vld [vmem:[%s24069_s4 + $0x698] sm:$0xff]   ;;  %vm24449_vm5 = vmmov %vm24443_vm2 }
 0x2ed   : > { %4580 = vmatpush1.bf16.msra.mxu1 %v18439_v44  ;;  %v4876_v44 = vmul.f32 %v21371_v37, %v21252_v22 }
 0x2ee   : > { %4581 = vmatprep.subr.bf16.mxu1 %v24315_v13  ;;  %5218 = vmatpush1.bf16.msra.mxu0 %v18440_v27  ;;  %v4477_v58 = vsel %vm2480_vm14, %v4475_v4, %v4476_v28  ;;  %v18448_v27 = vld [vmem:[%s24069_s4 + $0x688] sm:$0xff]   ;;  %v5043_v4 = vld [vmem:[#allocation2 + $0x50] sm:$0x3] }
 0x2ef   : > { %5219 = vmatprep.subr.bf16.mxu0 %v24315_v13 }
 0x2f1   : > { %4582 = vmatpush1.bf16.msra.mxu1 %v18441_v10  ;;  %4841 = vmatmul.mubr.bf16.gmra.mrb[100].mxu0 %v4701_v38  ;;  %v4854_v38 = vld [vmem:[#allocation2 + $0x28] sm:$0xff] }
 0x2f2   : > { %4583 = vmatprep.subr.bf16.mxu1 %v24315_v13  ;;  %5220 = vmatpush1.bf16.msra.mxu0 %v18442_v20  ;;  %v4874_v17 = vmul.f32 %v20567_v46, %v4854_v38  ;;  %v18451_v20 = vld [vmem:[%s24069_s4 + $0x618] sm:$0xff]   ;;  %v18454_v38 = vld [vmem:[%s24069_s4 + $0x6a0] sm:$0xff]  }
 0x2f3   : > { %14722 = vmatprep.mubr.msk.bf16.mxu0 %vm24438_vm13, %v5128_v23  ;;  %5221 = vmatprep.subr.bf16.mxu0 %v24315_v13  ;;  %v5041_v23 = vld [vmem:[#allocation2 + $0x20] sm:$0xfe]  ;;  %vm24450_vm13 = vcmp.ge.s32.totalorder %v19474_v50, 1 }
 0x2f4   : > { %v4882_v16 = vpack.c.bf16 %v4876_v44, %v4874_v17  ;;  %v18455_v17 = vld [vmem:[%s24069_s4 + $0x628] sm:$0xff]   ;;  %v5072_v44 = vmul.f32 %v21279_v62, %v21216_v63  ;;  %vm4863_vm4 = vmand %vm24451_vm1, %vm24450_vm13  ;;  %vm5719_vm13 = vcmp.le.s32.totalorder %v19435_v34, 2  ;;  %vm5720_vm1 = vcmp.le.s32.totalorder %v19447_v40, 2 }
 0x2f5   : > { %4584 = vmatpush1.bf16.msra.mxu1 %v18443_v43 }
 0x2f6   : > { %4988 = vmatprep.subr.bf16.mxu1 %v24315_v13  ;;  %5222 = vmatpush1.bf16.msra.mxu0 %v18444_v32  ;;  %v5070_v32 = vmul.f32 %v21260_v24, %v21399_v9  ;;  %v4859_v24 = vld [vmem:[#allocation2 + $0x50] sm:$0x1] }
 0x2f7   : > { %5223 = vmatprep.subr.bf16.mxu0 %v24315_v13 }
 0x2f8   : > { %4594 = vmatmul.mubr.bf16.vlgmr.msra.gmra.mrb[88].mxu1 %v4477_v58  ;;  %v5068_v58 = vmul.f32 %v5041_v23, %v24430_v12 }
 0x2f9   : > { %4989 = vmatpush1.bf16.msra.mxu1 %v18445_v36  ;;  %14601 = vmatprep.mubr.msk.bf16.mxu1 %vm24442_vm12, %v21191_v59  ;;  %v18449_v59 = vld [vmem:[%s24069_s4 + $0x610] sm:$0xff]   ;;  %vm24457_vm12 = vcmask 1041408  }
 0x2fa   : > { %4990 = vmatprep.subr.bf16.mxu1 %v24315_v13  ;;  %5224 = vmatpush1.bf16.msra.mxu0 %v18446_v29 }
 0x2fb   : > { %5225 = vmatprep.subr.bf16.mxu0 %v24315_v13 }
 0x2fc   : > { %v3124_v39 = vpop.f32.mrb[64].mxu0 }
 0x2fd   : > { %4991 = vmatpush1.bf16.msra.mxu1 %v18447_v31  ;;  %v3126_v6 = vpop.f32.mrb[65].mxu0  ;;  %v5480_v31 = vld [vmem:[#allocation2 + $0x28] sm:$0xf8] }
 0x2fe   : > { %4992 = vmatprep.subr.bf16.mxu1 %v24315_v13  ;;  %v3127_v10 = vpop.f32.mrb[66].mxu0  ;;  %5226 = vmatpush1.bf16.msra.mxu0 %v18448_v27  ;;  %v5074_v27 = vmul.f32 %v21283_v11, %v5043_v4  ;;  %v18457_v11 = vld [vmem:[%s24069_s4 + $0x630] sm:$0xff]  }
 0x2ff   : > { %v3129_v47 = vpop.f32.mrb[67].mxu0  ;;  %5227 = vmatprep.subr.bf16.mxu0 %v24315_v13 }
 0x300   : > { %4602 = vmatmul.mubr.bf16.gmra.mrb[92].mxu1 %v4476_v28  ;;  %v24444_v47 = vld [vmem:[#allocation20_spill] sm:$0xff] }
 0x301   : > { %4993 = vmatpush1.bf16.msra.mxu1 %v18449_v59  ;;  %14682 = vmatprep.mubr.msk.bf16.mxu1 %vm24443_vm2, %v4882_v16  ;;  %v5076_v59 = vpack.c.bf16 %v5070_v32, %v5068_v58  ;;  %v5482_v16 = vld [vmem:[#allocation2 + $0x58] sm:$0xf]  ;;  %v24446_v32 = vld [vmem:[#allocation23_spill] sm:$0xff]  ;;  %vm24461_vm2 = vmmov %vm24457_vm12 }
 0x302   : > { %4994 = vmatprep.subr.bf16.mxu1 %v24315_v13  ;;  %5228 = vmatpush1.bf16.msra.mxu0 %v18450_v3  ;;  %v18456_v3 = vld [vmem:[%s24069_s4 + $0x6a8] sm:$0xff]   ;;  %v5515_v4 = vmul.f32 %v24446_v32, %v21043_v56  ;;  %v24447_v58 = vld [vmem:[#allocation24_spill] sm:$0xff]  ;;  %v18458_v56 = vld [vmem:[%s24069_s4 + $0x6b0] sm:$0xff]  }
 0x303   : > { %5229 = vmatprep.subr.bf16.mxu0 %v24315_v13  ;;  %v5108_v62 = vshll.u32 %v5076_v59, 16 }
 0x304   : > { %v21405_v43 = vpop.f32.mrb[68].mxu0 }
 0x305   : > { %4995 = vmatpush1.bf16.msra.mxu1 %v18451_v20  ;;  %v3134_v28 = vpop.f32.mrb[69].mxu0  ;;  %v5511_v20 = vmul.f32 %v24444_v47, %v5480_v31  ;;  %v21441_v31 = vpack.c.bf16 %v5074_v27, %v5072_v44  ;;  %v5110_v27 = vrot.slane %v5108_v62, 1 }
 0x306   : > { %4996 = vmatprep.subr.bf16.mxu1 %v24315_v13  ;;  %v21413_v36 = vpop.f32.mrb[70].mxu0  ;;  %5230 = vmatpush1.bf16.msra.mxu0 %v18452_v0  ;;  %v24445_v0 = vld [vmem:[#allocation21_spill] sm:$0xff] }
 0x307   : > { %v3137_v29 = vpop.f32.mrb[71].mxu0  ;;  %5231 = vmatprep.subr.bf16.mxu0 %v24315_v13  ;;  %v5513_v23 = vmul.f32 %v24445_v0, %v21252_v22 }
 0x308   : > { %v5517_v29 = vmul.f32 %v24447_v58, %v5482_v16 }
 0x309   : > { %4997 = vmatpush1.bf16.msra.mxu1 %v18453_v55 }
 0x30a   : > { %4998 = vmatprep.subr.bf16.mxu1 %v24315_v13  ;;  %5232 = vmatpush1.bf16.msra.mxu0 %v18454_v38  ;;  %v5521_v44 = vpack.c.bf16 %v5517_v29, %v5515_v4 }
 0x30b   : > { %v2891_v6 = vpop.f32.mrb[56].mxu1  ;;  %5233 = vmatprep.subr.bf16.mxu0 %v24315_v13 }
 0x30c   : > { %v2906_v55 = vadd.f32 %v2891_v6, %v21273_v51  ;;  %v2893_v28 = vpop.f32.mrb[57].mxu1  ;;  %v5576_v4 = vshll.u32 %v5521_v44, 16 }
 0x30d   : > { %v2894_v38 = vpop.f32.mrb[58].mxu1  ;;  %4999 = vmatpush1.bf16.msra.mxu1 %v18455_v17  ;;  %v5519_v17 = vpack.c.bf16 %v5513_v23, %v5511_v20  ;;  %v18460_v20 = vld [vmem:[%s24069_s4 + $0x6b8] sm:$0xff]   ;;  %v5106_v23 = vshrl.u32 %v5076_v59, 16  ;;  %v5573_v28 = vshrl.u32 %v5521_v44, 16 }
 0x30e   : > { %v2907_v12 = vadd.f32 %v2894_v38, %v21287_v19  ;;  %v2896_v51 = vpop.f32.mrb[59].mxu1  ;;  %5000 = vmatprep.subr.bf16.mxu1 %v24315_v13  ;;  %v21445_v6 = vadd.f32 %v3124_v39, %v2906_v55  ;;  %5234 = vmatpush1.bf16.msra.mxu0 %v18456_v3  ;;  %v18459_v19 = vld [vmem:[%s24069_s4 + $0x638] sm:$0xff]   ;;  %v5113_v39 = vshll.u32 %v21441_v31, 16  ;;  %v18461_v38 = vld [vmem:[%s24069_s4 + $0x640] sm:$0xff]  }
 0x30f   : > { %5235 = vmatprep.subr.bf16.mxu0 %v24315_v13  ;;  %v5568_v62 = vshll.u32 %v5519_v17, 16  ;;  %v5111_v51 = vor.u32 %v5110_v27, %v5106_v23 }
 0x310   : > { %v21451_v16 = vadd.f32 %v3127_v10, %v2907_v12  ;;  %v5132_v12 = vshrl.u32 %v21301_v14, 16  ;;  %v5565_v10 = vshrl.u32 %v5519_v17, 16  ;;  %v18462_v17 = vld [vmem:[%s24069_s4 + $0x720] sm:$0xff]  }
 0x311   : > { %5001 = vmatpush1.bf16.msra.mxu1 %v18457_v11 }
 0x312   : > { %5002 = vmatprep.subr.bf16.mxu1 %v24315_v13  ;;  %5236 = vmatpush1.bf16.msra.mxu0 %v18458_v56  ;;  %v5115_v56 = vrot.slane %v5113_v39, 1  ;;  %v5134_v44 = vor.u32 %v5132_v12, %v21331_v30  ;;  %v5575_v39 = vrot.slane %v5573_v28, 1  ;;  %v18464_v30 = vld [vmem:[%s24069_s4 + $0x728] sm:$0xff]   ;;  %v18465_v12 = vld [vmem:[%s24069_s4 + $0x650] sm:$0xff]   ;;  %v21507_v28 = vld [vmem:[#allocation2] sm:$0xff] }
 0x313   : > { %v2899_v3 = vpop.f32.mrb[60].mxu1  ;;  %5237 = vmatprep.subr.bf16.mxu0 %v24315_v13 }
 0x314   : > { %v2908_v11 = vadd.f32 %v2899_v3, %v21309_v35  ;;  %v2901_v55 = vpop.f32.mrb[61].mxu1  ;;  %v5578_v3 = vrot.slane %v5576_v4, 2  ;;  %v21510_v4 = vsel %vm4863_vm4, 1.0, %v21507_v28  ;;  %vm24466_vm4 = vcmp.ge.s32.totalorder %v19466_v45, 1 }
 0x315   : > { %v2902_v29 = vpop.f32.mrb[62].mxu1  ;;  %5003 = vmatpush1.bf16.msra.mxu1 %v18459_v19  ;;  %v5567_v19 = vrot.slane %v5565_v10, 1  ;;  %v21500_v10 = vrot.slane %v20803_v33, 6  ;;  %v4860_v55 = vld [vmem:[#allocation2 + $0x58] sm:$0x1]  ;;  %24453 = vst [vmem:[#allocation71_spill] sm:$0xff] %v21510_v4 }
 0x316   : > { %v2909_v59 = vadd.f32 %v2902_v29, %v21316_v25  ;;  %v2904_v14 = vpop.f32.mrb[63].mxu1  ;;  %5004 = vmatprep.subr.bf16.mxu1 %v24315_v13  ;;  %v21470_v35 = vadd.f32 %v21405_v43, %v2908_v11  ;;  %5238 = vmatpush1.bf16.msra.mxu0 %v18460_v20  ;;  %v5570_v25 = vrot.slane %v5568_v62, 2  ;;  %v5116_v43 = vsel %vm24448_vm0, %v5111_v51, %v5115_v56  ;;  %v18463_v20 = vld [vmem:[%s24069_s4 + $0x648] sm:$0xff]   ;;  %v18466_v62 = vld [vmem:[%s24069_s4 + $0x730] sm:$0xff]   ;;  %vm24464_vm0 = vmmov %vm24449_vm5 }
 0x317   : > { %5661 = vmatprep.subr.bf16.mxu0 %v24315_v13  ;;  %v21494_v23 = vor.u32 %v5578_v3, %v5575_v39  ;;  %24452 = vst [vmem:[#allocation70_spill] sm:$0xff] %v21500_v10  ;;  %v5129_v11 = vshrl.u32 %v21441_v31, 16  ;;  %v5269_v29 = vld [vmem:[#allocation2 + $0x28] sm:$0xfc]  ;;  %v24455_v31 = vld [vmem:[#allocation25_spill] sm:$0xff]  ;;  %v4875_v3 = vmul.f32 %v21371_v37, %v21399_v9 }
 0x318   : > { %v21478_v27 = vadd.f32 %v21413_v36, %v2909_v59  ;;  %v5571_v36 = vor.u32 %v5570_v25, %v5567_v19  ;;  %v24456_v14 = vrot.slane %v24455_v31, 6  ;;  %v4853_v39 = vld [vmem:[#allocation2 + $0x20] sm:$0xff] }
 0x319   : > { %5005 = vmatpush1.bf16.msra.mxu1 %v18461_v38  ;;  %5248 = vmatmul.mubr.bf16.vlgmr.msra.gmra.mrb[104].mxu0 %v5116_v43  ;;  %v5271_v38 = vld [vmem:[#allocation2 + $0x58] sm:$0x7]  ;;  %v5131_v51 = vor.u32 %v5129_v11, %v5115_v56  ;;  %v21532_v43 = vld [vmem:[#allocation2 + $0x48] sm:$0xff]  ;;  %v24463_v11 = vld [vmem:[#allocation27_spill] sm:$0xff] }
 0x31a   : > { %5006 = vmatprep.subr.bf16.mxu1 %v24315_v13  ;;  %5662 = vmatpush1.bf16.msra.mxu0 %v18462_v17  ;;  %v5580_v59 = vsel %vm24454_vm8, %v5571_v36, %v21494_v23  ;;  %v21519_v17 = vsel %vm24457_vm12, %v21500_v10, %v24456_v14  ;;  %v18467_v56 = vld [vmem:[%s24069_s4 + $0x658] sm:$0xff]   ;;  %v5304_v31 = vmul.f32 %v21532_v43, %v24463_v11  ;;  %vm21589_vm8 = vmand %vm5719_vm13, %vm24466_vm4  ;;  %vm24469_vm12 = vcmp.ge.s32.totalorder %v19474_v50, 1 }
 0x31b   : > { %14723 = vmatprep.mubr.msk.bf16.mxu0 %vm24449_vm5, %v5134_v44  ;;  %5663 = vmatprep.subr.bf16.mxu0 %v24315_v13  ;;  %24458 = vst [vmem:[#allocation25_spill] sm:$0xff] %v21519_v17  ;;  %v24459_v44 = vld [vmem:[#allocation26_spill] sm:$0xff]  ;;  %v5302_v36 = vmul.f32 %v21519_v17, %v21252_v22  ;;  %vm24465_vm5 = vmmov %vm24464_vm0 }
 0x31c   : > { %v24460_v19 = vrot.slane %v24459_v44, 6  ;;  %v18468_v44 = vld [vmem:[%s24069_s4 + $0x738] sm:$0xff]  }
 0x31d   : > { %5007 = vmatpush1.bf16.msra.mxu1 %v18463_v20  ;;  %v4878_v20 = vmul.f32 %v21532_v43, %v21510_v4 }
 0x31e   : > { %5008 = vmatprep.subr.bf16.mxu1 %v24315_v13  ;;  %5664 = vmatpush1.bf16.msra.mxu0 %v18464_v30  ;;  %v21525_v25 = vsel %vm24461_vm2, %v24460_v19, %v19967_v7  ;;  %v4880_v30 = vmul.f32 0.0, %v4860_v55  ;;  %v4873_v55 = vmul.f32 %v20567_v46, %v4853_v39  ;;  %v4877_v39 = vmul.f32 %v21510_v4, %v21216_v63  ;;  %vm21598_vm2 = vmand %vm5720_vm1, %vm24469_vm12 }
 0x31f   : > { %5665 = vmatprep.subr.bf16.mxu0 %v24315_v13  ;;  %24462 = vst [vmem:[#allocation26_spill] sm:$0xff] %v21525_v25  ;;  %v5306_v14 = vmul.f32 %v21525_v25, %v5271_v38  ;;  %vm24482_vm12 = vsmask.f32 6400 }
 0x320   : > { %v4881_v19 = vpack.c.bf16 %v4875_v3, %v4873_v55  ;;  %v4879_v3 = vmul.f32 0.0, %v4859_v24 }
 0x321   : > { %5009 = vmatpush1.bf16.msra.mxu1 %v18465_v12  ;;  %5256 = vmatmul.mubr.bf16.gmra.mrb[108].mxu0 %v5131_v51  ;;  %v5300_v12 = vmul.f32 %v21500_v10, %v5269_v29  ;;  %v18469_v29 = vld [vmem:[%s24069_s4 + $0x6c0] sm:$0xff]   ;;  %v4884_v51 = vpack.c.bf16 %v4880_v30, %v4878_v20  ;;  %v5310_v38 = vpack.c.bf16 %v5306_v14, %v5304_v31  ;;  %v18473_v31 = vld [vmem:[%s24069_s4 + $0x6d0] sm:$0xff]  }
 0x322   : > { %5010 = vmatprep.subr.bf16.mxu1 %v24315_v13  ;;  %5666 = vmatpush1.bf16.msra.mxu0 %v18466_v62  ;;  %v4883_v14 = vpack.c.bf16 %v4879_v3, %v4877_v39  ;;  %v14848_v39 = vsel %vm21589_vm8, 1.0, %v21507_v28  ;;  %v14849_v3 = vsel %vm21598_vm2, 1.0, %v21507_v28  ;;  %vm21712_vm8 = vmand %vm5720_vm1, %vm1380_vm15  ;;  %vm24484_vm2 = vcmask 1043456  }
 0x323   : > { %14804 = vmatprep.mubr.msk.bf16.mxu0 %vm24464_vm0, %v5580_v59  ;;  %5667 = vmatprep.subr.bf16.mxu0 %v24315_v13  ;;  %v5308_v62 = vpack.c.bf16 %v5302_v36, %v5300_v12  ;;  %v18470_v59 = vld [vmem:[%s24069_s4 + $0x740] sm:$0xff]   ;;  %v21564_v30 = vrot.slane %v5310_v38, 1  ;;  %v18472_v36 = vld [vmem:[%s24069_s4 + $0x748] sm:$0xff]   ;;  %v18475_v38 = vld [vmem:[%s24069_s4 + $0x6d8] sm:$0xff]  }
 0x324   : > { %vm24483_vm15 = vmmov %vm24464_vm0 }
 0x325   : > { %5011 = vmatpush1.bf16.msra.mxu1 %v18467_v56  ;;  %v18471_v56 = vld [vmem:[%s24069_s4 + $0x6c8] sm:$0xff]   ;;  %v5343_v20 = vrot.slane %v5308_v62, 1  ;;  %v18478_v62 = vld [vmem:[%s24069_s4 + $0x760] sm:$0xff]  }
 0x326   : > { %5426 = vmatprep.subr.bf16.mxu1 %v24315_v13  ;;  %5668 = vmatpush1.bf16.msra.mxu0 %v18468_v44 }
 0x327   : > { %5669 = vmatprep.subr.bf16.mxu0 %v24315_v13  ;;  %v5345_v44 = vsel %vm1859_vm3, %v5343_v20, %v21564_v30 }
 0x328   : > { %5021 = vmatmul.mubr.bf16.vlgmr.msra.gmra.mrb[96].mxu1 %v4881_v19 }
 0x329   : > { %5427 = vmatpush1.bf16.msra.mxu1 %v18469_v29  ;;  %14683 = vmatprep.mubr.msk.bf16.mxu1 %vm24465_vm5, %v4884_v51  ;;  %v18474_v29 = vld [vmem:[%s24069_s4 + $0x750] sm:$0xff]   ;;  %v5952_v51 = vrot.slane %v14849_v3, 3  ;;  %vm24477_vm5 = vcmp.ge.s32.totalorder %v19466_v45, 2 }
 0x32a   : > { %5428 = vmatprep.subr.bf16.mxu1 %v24315_v13  ;;  %5670 = vmatpush1.bf16.msra.mxu0 %v18470_v59  ;;  %v5481_v59 = vld [vmem:[#allocation2 + $0x50] sm:$0xf]  ;;  %vm21701_vm4 = vmand %vm5719_vm13, %vm24477_vm5 }
 0x32b   : > { %5671 = vmatprep.subr.bf16.mxu0 %v24315_v13 }
 0x32c   : > { %v21571_v12 = vpop.f32.mrb[72].mxu0 }
 0x32d   : > { %5429 = vmatpush1.bf16.msra.mxu1 %v18471_v56  ;;  %v3545_v24 = vpop.f32.mrb[73].mxu0  ;;  %v18476_v56 = vld [vmem:[%s24069_s4 + $0x758] sm:$0xff]  }
 0x32e   : > { %5430 = vmatprep.subr.bf16.mxu1 %v24315_v13  ;;  %v21580_v55 = vpop.f32.mrb[74].mxu0  ;;  %5672 = vmatpush1.bf16.msra.mxu0 %v18472_v36  ;;  %v18477_v36 = vld [vmem:[%s24069_s4 + $0x6e0] sm:$0xff]   ;;  %v5516_v24 = vmul.f32 %v24447_v58, %v5481_v59  ;;  %v5930_v59 = vld [vmem:[#allocation2 + $0x28] sm:$0xe0]  ;;  %v5932_v58 = vld [vmem:[#allocation2 + $0x58] sm:$0x3f] }
 0x32f   : > { %v3548_v19 = vpop.f32.mrb[75].mxu0  ;;  %5673 = vmatprep.subr.bf16.mxu0 %v24315_v13 }
 0x330   : > { %5029 = vmatmul.mubr.bf16.gmra.mrb[100].mxu1 %v4883_v14 }
 0x331   : > { %5431 = vmatpush1.bf16.msra.mxu1 %v18473_v31  ;;  %14763 = vmatprep.mubr.msk.bf16.mxu1 %vm24464_vm0, %v5345_v44  ;;  %v5514_v31 = vmul.f32 %v24446_v32, %v21216_v63  ;;  %v5479_v44 = vld [vmem:[#allocation2 + $0x20] sm:$0xf8]  ;;  %vm24485_vm0 = vmmov %vm24484_vm2 }
 0x332   : > { %5432 = vmatprep.subr.bf16.mxu1 %v24315_v13  ;;  %5674 = vmatpush1.bf16.msra.mxu0 %v18474_v29  ;;  %v5950_v29 = vrot.slane %v14848_v39, 3  ;;  %v18479_v39 = vld [vmem:[%s24069_s4 + $0x6e8] sm:$0xff]   ;;  %vm24486_vm5 = vmmov %vm24485_vm0 }
 0x333   : > { %5675 = vmatprep.subr.bf16.mxu0 %v24315_v13  ;;  %v5520_v3 = vpack.c.bf16 %v5516_v24, %v5514_v31 }
 0x334   : > { %v21617_v20 = vpop.f32.mrb[76].mxu0 }
 0x335   : > { %5433 = vmatpush1.bf16.msra.mxu1 %v18475_v38  ;;  %v3553_v14 = vpop.f32.mrb[77].mxu0  ;;  %v5512_v38 = vmul.f32 %v24445_v0, %v21399_v9  ;;  %v21647_v0 = vsel %vm2480_vm14, %v5950_v29, %v5952_v51 }
 0x336   : > { %5434 = vmatprep.subr.bf16.mxu1 %v24315_v13  ;;  %v21626_v19 = vpop.f32.mrb[78].mxu0  ;;  %5676 = vmatpush1.bf16.msra.mxu0 %v18476_v56  ;;  %v21635_v14 = vrot.slane %v20567_v46, 3  ;;  %v5510_v56 = vmul.f32 %v24444_v47, %v5479_v44  ;;  %24474 = vst [vmem:[#allocation74_spill] sm:$0xff] %v21647_v0  ;;  %v24475_v44 = vrot.slane %v20535_v2, 3  ;;  %v18481_v2 = vld [vmem:[%s24069_s4 + $0x6f0] sm:$0xff]  }
 0x337   : > { %v3556_v4 = vpop.f32.mrb[79].mxu0  ;;  %5677 = vmatprep.subr.bf16.mxu0 %v24315_v13 }
 0x338   : > { %24472 = vst [vmem:[#allocation72_spill] sm:$0xff] %v21635_v14  ;;  %v21644_v4 = vsel %vm2480_vm14, %v21635_v14, %v5950_v29  ;;  %v5518_v46 = vpack.c.bf16 %v5512_v38, %v5510_v56  ;;  %v21655_v31 = vsel %vm2480_vm14, %v5952_v51, %v24475_v44  ;;  %v5961_v24 = vmul.f32 %v21635_v14, %v5930_v59 }
 0x339   : > { %5435 = vmatpush1.bf16.msra.mxu1 %v18477_v36  ;;  %24473 = vst [vmem:[#allocation73_spill] sm:$0xff] %v21644_v4  ;;  %v18480_v36 = vld [vmem:[%s24069_s4 + $0x768] sm:$0xff]   ;;  %24476 = vst [vmem:[#allocation75_spill] sm:$0xff] %v21655_v31  ;;  %v5963_v47 = vmul.f32 %v21644_v4, %v21252_v22  ;;  %v5967_v38 = vmul.f32 %v21655_v31, %v5932_v58  ;;  %v5556_v51 = vshrl.u32 %v5520_v3, 16  ;;  %v5559_v59 = vshll.u32 %v5520_v3, 16 }
 0x33a   : > { %5436 = vmatprep.subr.bf16.mxu1 %v24315_v13  ;;  %5678 = vmatpush1.bf16.msra.mxu0 %v18478_v62  ;;  %v5965_v62 = vmul.f32 %v21532_v43, %v21647_v0  ;;  %v5548_v58 = vshrl.u32 %v5518_v46, 16 }
 0x33b   : > { %v3312_v32 = vpop.f32.mrb[64].mxu1  ;;  %5679 = vmatprep.subr.bf16.mxu0 %v24315_v13 }
 0x33c   : > { %v3327_v29 = vadd.f32 %v3312_v32, %v21445_v6  ;;  %v3314_v37 = vpop.f32.mrb[65].mxu1  ;;  %v18482_v32 = vld [vmem:[%s24069_s4 + $0x770] sm:$0xff]   ;;  %v5551_v6 = vshll.u32 %v5518_v46, 16  ;;  %v18484_v46 = vld [vmem:[%s24069_s4 + $0x778] sm:$0xff]  }
 0x33d   : > { %v3315_v56 = vpop.f32.mrb[66].mxu1  ;;  %5437 = vmatpush1.bf16.msra.mxu1 %v18479_v39  ;;  %v5969_v39 = vpack.c.bf16 %v5963_v47, %v5961_v24  ;;  %v5550_v47 = vrot.slane %v5548_v58, 1 }
 0x33e   : > { %v3328_v44 = vadd.f32 %v3315_v56, %v21451_v16  ;;  %v3317_v7 = vpop.f32.mrb[67].mxu1  ;;  %5438 = vmatprep.subr.bf16.mxu1 %v24315_v13  ;;  %v21671_v37 = vadd.f32 %v21571_v12, %v3327_v29  ;;  %5680 = vmatpush1.bf16.msra.mxu0 %v18480_v36  ;;  %v5971_v16 = vpack.c.bf16 %v5967_v38, %v5965_v62  ;;  %v5558_v12 = vrot.slane %v5556_v51, 1 }
 0x33f   : > { %5681 = vmatprep.subr.bf16.mxu0 %v24315_v13  ;;  %v18483_v7 = vld [vmem:[%s24069_s4 + $0x6f8] sm:$0xff]   ;;  %v5561_v36 = vrot.slane %v5559_v59, 2  ;;  %v5553_v24 = vrot.slane %v5551_v6, 2  ;;  %v6018_v56 = vshll.u32 %v5969_v39, 16  ;;  %v18490_v6 = vld [vmem:[%s24069_s4 + $0x7f0] sm:$0xff]  }
 0x340   : > { %v21678_v3 = vadd.f32 %v21580_v55, %v3328_v44  ;;  %v6015_v55 = vshrl.u32 %v5969_v39, 16  ;;  %v6026_v51 = vshll.u32 %v5971_v16, 16  ;;  %v18485_v44 = vld [vmem:[%s24069_s4 + $0x700] sm:$0xff]  }
 0x341   : > { %5439 = vmatpush1.bf16.msra.mxu1 %v18481_v2  ;;  %v6023_v2 = vshrl.u32 %v5971_v16, 16  ;;  %v5554_v39 = vor.u32 %v5553_v24, %v5550_v47  ;;  %v18487_v24 = vld [vmem:[%s24069_s4 + $0x708] sm:$0xff]  }
 0x342   : > { %5440 = vmatprep.subr.bf16.mxu1 %v24315_v13  ;;  %5682 = vmatpush1.bf16.msra.mxu0 %v18482_v32  ;;  %v5562_v32 = vor.u32 %v5561_v36, %v5558_v12  ;;  %v6017_v16 = vrot.slane %v6015_v55, 2  ;;  %v6020_v36 = vrot.slane %v6018_v56, 3  ;;  %v14807_v55 = vsel %vm21701_vm4, 1.0, %v21507_v28  ;;  %v5268_v56 = vld [vmem:[#allocation2 + $0x20] sm:$0xfc]  ;;  %vm24487_vm4 = vmmov %vm24483_vm15 }
 0x343   : > { %v3320_v29 = vpop.f32.mrb[68].mxu1  ;;  %5683 = vmatprep.subr.bf16.mxu0 %v24315_v13 }
 0x344   : > { %v3329_v62 = vadd.f32 %v3320_v29, %v21470_v35  ;;  %v3322_v38 = vpop.f32.mrb[69].mxu1  ;;  %v6025_v29 = vrot.slane %v6023_v2, 2  ;;  %v5563_v47 = vsel %vm24482_vm12, %v5554_v39, %v5562_v32  ;;  %v6021_v2 = vor.u32 %v6020_v36, %v6017_v16  ;;  %v5715_v16 = vld [vmem:[#allocation2 + $0x28] sm:$0xf0]  ;;  %vm21822_vm12 = vmand %vm5719_vm13, %vm2004_vm9 }
 0x345   : > { %v3323_v59 = vpop.f32.mrb[70].mxu1  ;;  %5441 = vmatpush1.bf16.msra.mxu1 %v18483_v7  ;;  %v5270_v7 = vld [vmem:[#allocation2 + $0x50] sm:$0x7]  ;;  %v5299_v39 = vmul.f32 %v21500_v10, %v5268_v56  ;;  %vm24493_vm9 = vmmov %vm24487_vm4 }
 0x346   : > { %v3330_v5 = vadd.f32 %v3323_v59, %v21478_v27  ;;  %v3325_v58 = vpop.f32.mrb[71].mxu1  ;;  %5442 = vmatprep.subr.bf16.mxu1 %v24315_v13  ;;  %v21695_v35 = vadd.f32 %v21617_v20, %v3329_v62  ;;  %5684 = vmatpush1.bf16.msra.mxu0 %v18484_v46  ;;  %v18486_v27 = vld [vmem:[%s24069_s4 + $0x7e0] sm:$0xff]   ;;  %v6028_v46 = vrot.slane %v6026_v51, 3  ;;  %v5303_v62 = vmul.f32 %v24463_v11, %v21216_v63  ;;  %v5717_v20 = vld [vmem:[#allocation2 + $0x58] sm:$0x1f] }
 0x347   : > { %6111 = vmatprep.subr.bf16.mxu0 %v24315_v13  ;;  %v5305_v38 = vmul.f32 %v21525_v25, %v5270_v7  ;;  %v5739_v59 = vrot.slane %v14807_v55, 4  ;;  %v21749_v63 = vrot.slane %v20594_v57, 4  ;;  %v18491_v57 = vld [vmem:[%s24069_s4 + $0x718] sm:$0xff]  }
 0x348   : > { %v21718_v12 = vadd.f32 %v21626_v19, %v3330_v5  ;;  %v14808_v5 = vsel %vm21712_vm8, 1.0, %v21507_v28  ;;  %v18488_v19 = vld [vmem:[%s24069_s4 + $0x7e8] sm:$0xff]   ;;  %v21740_v51 = vor.u32 %v6028_v46, %v6025_v29  ;;  %vm24488_vm8 = vmmov %vm24487_vm4 }
 0x349   : > { %5443 = vmatpush1.bf16.msra.mxu1 %v18485_v44  ;;  %5694 = vmatmul.mubr.bf16.vlgmr.msra.gmra.mrb[112].mxu0 %v5563_v47  ;;  %v18489_v44 = vld [vmem:[%s24069_s4 + $0x710] sm:$0xff]   ;;  %v5741_v58 = vrot.slane %v14808_v5, 4  ;;  %v21760_v36 = vsel %vm24484_vm2, %v21749_v63, %v5739_v59  ;;  %v5750_v55 = vmul.f32 %v21749_v63, %v5715_v16  ;;  %vm24498_vm2 = vmmov %vm24487_vm4 }
 0x34a   : > { %5444 = vmatprep.subr.bf16.mxu1 %v24315_v13  ;;  %6112 = vmatpush1.bf16.msra.mxu0 %v18486_v27  ;;  %v5309_v27 = vpack.c.bf16 %v5305_v38, %v5303_v62  ;;  %v6030_v7 = vsel %vm2529_vm10, %v6021_v2, %v21740_v51  ;;  %v18492_v62 = vld [vmem:[%s24069_s4 + $0x7f8] sm:$0xff]   ;;  %v18497_v16 = vld [vmem:[%s24069_s4 + $0x790] sm:$0xff]  }
 0x34b   : > { %14805 = vmatprep.mubr.msk.bf16.mxu0 %vm24483_vm15, %v21494_v23  ;;  %6113 = vmatprep.subr.bf16.mxu0 %v24315_v13  ;;  %v5301_v23 = vmul.f32 %v21519_v17, %v21399_v9  ;;  %v21766_v46 = vsel %vm24485_vm0, %v5739_v59, %v5741_v58  ;;  %v21770_v47 = vsel %vm24486_vm5, %v5741_v58, %v20152_v53  ;;  %vm21831_vm15 = vmand %vm5720_vm1, %vm2005_vm11  ;;  %vm1319_vm11 = vcmask 516096  }
 0x34c   : > { %v5754_v5 = vmul.f32 %v21532_v43, %v21766_v46  ;;  %v5341_v38 = vrot.slane %v5309_v27, 1  ;;  %1320 = vst.msk [vmem:[#allocation2 + $0x68] sm:$0x1] %vm1319_vm11, %v21507_v28  ;;  %vm24503_vm0 = vmmov %vm24498_vm2  ;;  %vm24511_vm11 = vcmp.le.s32.totalorder %v19474_v50, 2  ;;  %v18548_v50 = vld [vmem:[%s24069_s4 + $0x958] sm:$0xff]  }
 0x34d   : > { %5445 = vmatpush1.bf16.msra.mxu1 %v18487_v24  ;;  %v5307_v29 = vpack.c.bf16 %v5301_v23, %v5299_v39  ;;  %v5752_v24 = vmul.f32 %v21760_v36, %v21252_v22  ;;  %v18495_v23 = vld [vmem:[%s24069_s4 + $0x788] sm:$0xff]   ;;  %vm24504_vm5 = vmmov %vm24503_vm0 }
 0x34e   : > { %5446 = vmatprep.subr.bf16.mxu1 %v24315_v13  ;;  %6114 = vmatpush1.bf16.msra.mxu0 %v18488_v19  ;;  %v5756_v19 = vmul.f32 %v21770_v47, %v5717_v20  ;;  %v18496_v39 = vld [vmem:[%s24069_s4 + $0x808] sm:$0xff]  }
 0x34f   : > { %6115 = vmatprep.subr.bf16.mxu0 %v24315_v13  ;;  %v5340_v22 = vrot.slane %v5307_v29, 1  ;;  %v5758_v56 = vpack.c.bf16 %v5752_v24, %v5750_v55  ;;  %v21869_v29 = vrot.slane %v20803_v33, 1  ;;  %v6372_v55 = vld [vmem:[#allocation2 + $0x28] sm:$0x80] }
 0x350   : > { %v5760_v2 = vpack.c.bf16 %v5756_v19, %v5754_v5  ;;  %v18499_v5 = vld [vmem:[%s24069_s4 + $0x798] sm:$0xff]   ;;  %v5931_v19 = vld [vmem:[#allocation2 + $0x50] sm:$0x3f] }
 0x351   : > { %5447 = vmatpush1.bf16.msra.mxu1 %v18489_v44  ;;  %5702 = vmatmul.mubr.bf16.gmra.mrb[116].mxu0 %v5562_v32  ;;  %v18493_v32 = vld [vmem:[%s24069_s4 + $0x780] sm:$0xff]   ;;  %v5342_v59 = vsel %vm1859_vm3, %v5340_v22, %v5341_v38  ;;  %v5793_v58 = vrot.slane %v5758_v56, 2  ;;  %v14930_v22 = vsel %vm21831_vm15, 1.0, %v21507_v28  ;;  %24494 = vst [vmem:[#allocation76_spill] sm:$0xff] %v21869_v29 }
 0x352   : > { %5448 = vmatprep.subr.bf16.mxu1 %v24315_v13  ;;  %6116 = vmatpush1.bf16.msra.mxu0 %v18490_v6  ;;  %v18494_v44 = vld [vmem:[%s24069_s4 + $0x800] sm:$0xff]   ;;  %v21799_v6 = vrot.slane %v5760_v2, 2 }
 0x353   : > { %14886 = vmatprep.mubr.msk.bf16.mxu0 %vm24487_vm4, %v6030_v7  ;;  %6117 = vmatprep.subr.bf16.mxu0 %v24315_v13  ;;  %v18501_v56 = vld [vmem:[%s24069_s4 + $0x7a0] sm:$0xff]   ;;  %vm24505_vm4 = vmmov %vm24503_vm0 }
 0x354   : > { %v5795_v20 = vsel %vm2316_vm7, %v5793_v58, %v21799_v6  ;;  %v21855_v2 = vld [vmem:[#allocation2 + $0x40] sm:$0xff] }
 0x355   : > { %5449 = vmatpush1.bf16.msra.mxu1 %v18491_v57  ;;  %v18498_v57 = vld [vmem:[%s24069_s4 + $0x810] sm:$0xff]   ;;  %v5929_v58 = vld [vmem:[#allocation2 + $0x20] sm:$0xe0] }
 0x356   : > { %5876 = vmatprep.subr.bf16.mxu1 %v24315_v13  ;;  %6118 = vmatpush1.bf16.msra.mxu0 %v18492_v62  ;;  %v18500_v62 = vld [vmem:[%s24069_s4 + $0x818] sm:$0xff]  }
 0x357   : > { %6119 = vmatprep.subr.bf16.mxu0 %v24315_v13 }
 0x358   : > { %5459 = vmatmul.mubr.bf16.vlgmr.msra.gmra.mrb[104].mxu1 %v5342_v59  ;;  %v5964_v59 = vmul.f32 %v21855_v2, %v21647_v0 }
 0x359   : > { %5877 = vmatpush1.bf16.msra.mxu1 %v18493_v32  ;;  %14764 = vmatprep.mubr.msk.bf16.mxu1 %vm24488_vm8, %v21564_v30  ;;  %vm24506_vm8 = vmmov %vm24503_vm0 }
 0x35a   : > { %5878 = vmatprep.subr.bf16.mxu1 %v24315_v13  ;;  %6120 = vmatpush1.bf16.msra.mxu0 %v18494_v44  ;;  %v5966_v44 = vmul.f32 %v21655_v31, %v5931_v19  ;;  %v5960_v19 = vmul.f32 %v21635_v14, %v5929_v58  ;;  %v6403_v58 = vmul.f32 %v21869_v29, %v6372_v55  ;;  %v21895_v14 = vld [vmem:[#allocation2 + $0x38] sm:$0xff]  ;;  %v18505_v55 = vld [vmem:[%s24069_s4 + $0x7b0] sm:$0xff]  }
 0x35b   : > { %6121 = vmatprep.subr.bf16.mxu0 %v24315_v13 }
 0x35c   : > { %v21805_v27 = vpop.f32.mrb[80].mxu0 }
 0x35d   : > { %5879 = vmatpush1.bf16.msra.mxu1 %v18495_v23  ;;  %v3983_v30 = vpop.f32.mrb[81].mxu0 }
 0x35e   : > { %5880 = vmatprep.subr.bf16.mxu1 %v24315_v13  ;;  %v21813_v7 = vpop.f32.mrb[82].mxu0  ;;  %6122 = vmatpush1.bf16.msra.mxu0 %v18496_v39 }
 0x35f   : > { %v3986_v24 = vpop.f32.mrb[83].mxu0  ;;  %6123 = vmatprep.subr.bf16.mxu0 %v24315_v13 }
 0x360   : > { %5467 = vmatmul.mubr.bf16.gmra.mrb[108].mxu1 %v5341_v38  ;;  %v14929_v38 = vsel %vm21822_vm12, 1.0, %v21507_v28  ;;  %vm24507_vm12 = vcmp.le.s32.totalorder %v19466_v45, 2  ;;  %v18538_v45 = vld [vmem:[%s24069_s4 + $0x908] sm:$0xff]  }
 0x361   : > { %5881 = vmatpush1.bf16.msra.mxu1 %v18497_v16  ;;  %14845 = vmatprep.mubr.msk.bf16.mxu1 %vm24493_vm9, %v5795_v20  ;;  %v6392_v39 = vrot.slane %v14929_v38, 1  ;;  %v6394_v16 = vrot.slane %v14930_v22, 1  ;;  %v18502_v20 = vld [vmem:[%s24069_s4 + $0x820] sm:$0xff]   ;;  %v21876_v38 = vld [vmem:[#allocation2 + $0x58] sm:$0xff]  ;;  %vm6615_vm15 = vmand %vm5719_vm13, %vm24507_vm12 }
 0x362   : > { %5882 = vmatprep.subr.bf16.mxu1 %v24315_v13  ;;  %6124 = vmatpush1.bf16.msra.mxu0 %v18498_v57  ;;  %v5962_v57 = vmul.f32 %v21644_v4, %v21399_v9  ;;  %vm24509_vm9 = vmmov %vm24503_vm0 }
 0x363   : > { %6125 = vmatprep.subr.bf16.mxu0 %v24315_v13  ;;  %v21881_v33 = vsel %vm1859_vm3, %v21869_v29, %v6392_v39  ;;  %v21884_v22 = vsel %vm1859_vm3, %v6392_v39, %v6394_v16 }
 0x364   : > { %v21850_v32 = vpop.f32.mrb[84].mxu0  ;;  %24495 = vst [vmem:[#allocation77_spill] sm:$0xff] %v21881_v33  ;;  %24496 = vst [vmem:[#allocation78_spill] sm:$0xff] %v21884_v22  ;;  %v6405_v39 = vmul.f32 %v21895_v14, %v21881_v33 }
 0x365   : > { %5883 = vmatpush1.bf16.msra.mxu1 %v18499_v5  ;;  %v3991_v23 = vpop.f32.mrb[85].mxu0  ;;  %v18503_v5 = vld [vmem:[%s24069_s4 + $0x7a8] sm:$0xff]  }
 0x366   : > { %5884 = vmatprep.subr.bf16.mxu1 %v24315_v13  ;;  %v21861_v30 = vpop.f32.mrb[86].mxu0  ;;  %6126 = vmatpush1.bf16.msra.mxu0 %v18500_v62  ;;  %v5970_v62 = vpack.c.bf16 %v5966_v44, %v5964_v59  ;;  %v24497_v59 = vrot.slane %v20963_v26, 1  ;;  %v6411_v17 = vpack.c.bf16 %v6405_v39, %v6403_v58  ;;  %v18508_v58 = vld [vmem:[%s24069_s4 + $0x838] sm:$0xff]  }
 0x367   : > { %v3994_v24 = vpop.f32.mrb[87].mxu0  ;;  %6127 = vmatprep.subr.bf16.mxu0 %v24315_v13 }
 0x368   : > { %v5968_v24 = vpack.c.bf16 %v5962_v57, %v5960_v19  ;;  %v21892_v44 = vsel %vm1859_vm3, %v6394_v16, %v24497_v59  ;;  %v6407_v57 = vmul.f32 %v21532_v43, %v21884_v22  ;;  %v6006_v59 = vshrl.u32 %v5970_v62, 16 }
 0x369   : > { %5885 = vmatpush1.bf16.msra.mxu1 %v18501_v56  ;;  %v18504_v56 = vld [vmem:[%s24069_s4 + $0x828] sm:$0xff]   ;;  %v6409_v19 = vmul.f32 %v21892_v44, %v21876_v38  ;;  %v6009_v31 = vshll.u32 %v5970_v62, 16  ;;  %v6457_v39 = vshrl.u32 %v6411_v17, 16 }
 0x36a   : > { %5886 = vmatprep.subr.bf16.mxu1 %v24315_v13  ;;  %6128 = vmatpush1.bf16.msra.mxu0 %v18502_v20  ;;  %v6001_v10 = vshll.u32 %v5968_v24, 16 }
 0x36b   : > { %v3750_v23 = vpop.f32.mrb[72].mxu1  ;;  %6129 = vmatprep.subr.bf16.mxu0 %v24315_v13 }
 0x36c   : > { %v3765_v4 = vadd.f32 %v3750_v23, %v21671_v37  ;;  %v3752_v20 = vpop.f32.mrb[73].mxu1 }
 0x36d   : > { %v3753_v16 = vpop.f32.mrb[74].mxu1  ;;  %5887 = vmatpush1.bf16.msra.mxu1 %v18503_v5  ;;  %v18506_v20 = vld [vmem:[%s24069_s4 + $0x830] sm:$0xff]   ;;  %v5998_v5 = vshrl.u32 %v5968_v24, 16 }
 0x36e   : > { %v3766_v0 = vadd.f32 %v3753_v16, %v21678_v3  ;;  %v3755_v37 = vpop.f32.mrb[75].mxu1  ;;  %5888 = vmatprep.subr.bf16.mxu1 %v24315_v13  ;;  %v21911_v23 = vadd.f32 %v21805_v27, %v3765_v4  ;;  %6130 = vmatpush1.bf16.msra.mxu0 %v18504_v56  ;;  %v6413_v3 = vpack.c.bf16 %v6409_v19, %v6407_v57  ;;  %v18507_v4 = vld [vmem:[%s24069_s4 + $0x7b8] sm:$0xff]   ;;  %v6008_v27 = vrot.slane %v6006_v59, 2 }
 0x36f   : > { %6131 = vmatprep.subr.bf16.mxu0 %v24315_v13  ;;  %v6011_v56 = vrot.slane %v6009_v31, 3  ;;  %v6460_v16 = vshll.u32 %v6411_v17, 16  ;;  %v18509_v37 = vld [vmem:[%s24069_s4 + $0x7c0] sm:$0xff]  }
 0x370   : > { %v21918_v62 = vadd.f32 %v21813_v7, %v3766_v0  ;;  %v6000_v0 = vrot.slane %v5998_v5, 2  ;;  %v6003_v7 = vrot.slane %v6001_v10, 3  ;;  %v6468_v59 = vshll.u32 %v6413_v3, 16  ;;  %v18510_v17 = vld [vmem:[%s24069_s4 + $0x8a0] sm:$0xff]  }
 0x371   : > { %5889 = vmatpush1.bf16.msra.mxu1 %v18505_v55  ;;  %v6465_v55 = vshrl.u32 %v6413_v3, 16  ;;  %v6459_v3 = vrot.slane %v6457_v39, 3 }
 0x372   : > { %5890 = vmatprep.subr.bf16.mxu1 %v24315_v13  ;;  %6132 = vmatpush1.bf16.msra.mxu0 %v18506_v20  ;;  %v6012_v20 = vor.u32 %v6011_v56, %v6008_v27 }
 0x373   : > { %v3758_v24 = vpop.f32.mrb[76].mxu1  ;;  %6133 = vmatprep.subr.bf16.mxu0 %v24315_v13  ;;  %v6467_v56 = vrot.slane %v6465_v55, 3 }
 0x374   : > { %v3767_v57 = vadd.f32 %v3758_v24, %v21695_v35  ;;  %v3760_v19 = vpop.f32.mrb[77].mxu1  ;;  %v6004_v35 = vor.u32 %v6003_v7, %v6000_v0  ;;  %v6470_v24 = vrot.slane %v6468_v59, 4  ;;  %v14888_v0 = vsel %vm5719_vm13, 1.0, %v21507_v28  ;;  %v18513_v59 = vld [vmem:[%s24069_s4 + $0x7d0] sm:$0xff]   ;;  %vm24510_vm13 = vmmov %vm24503_vm0 }
 0x375   : > { %v3761_v31 = vpop.f32.mrb[78].mxu1  ;;  %5891 = vmatpush1.bf16.msra.mxu1 %v18507_v4  ;;  %v5716_v4 = vld [vmem:[#allocation2 + $0x50] sm:$0x1f]  ;;  %v5753_v7 = vmul.f32 %v21855_v2, %v21766_v46  ;;  %v6181_v55 = vrot.slane %v14888_v0, 2 }
 0x376   : > { %v3768_v25 = vadd.f32 %v3761_v31, %v21718_v12  ;;  %v3763_v5 = vpop.f32.mrb[79].mxu1  ;;  %5892 = vmatprep.subr.bf16.mxu1 %v24315_v13  ;;  %v21936_v10 = vadd.f32 %v21850_v32, %v3767_v57  ;;  %6134 = vmatpush1.bf16.msra.mxu0 %v18508_v58  ;;  %v6462_v12 = vrot.slane %v6460_v16, 4  ;;  %v6013_v32 = vsel %vm2529_vm10, %v6004_v35, %v6012_v20  ;;  %v18511_v58 = vld [vmem:[%s24069_s4 + $0x7c8] sm:$0xff]   ;;  %v5714_v57 = vld [vmem:[#allocation2 + $0x20] sm:$0xf0] }
 0x377   : > { %6553 = vmatprep.subr.bf16.mxu0 %v24315_v13  ;;  %v5755_v39 = vmul.f32 %v21770_v47, %v5716_v4  ;;  %v21965_v16 = vor.u32 %v6470_v24, %v6467_v56  ;;  %v5749_v5 = vmul.f32 %v21749_v63, %v5714_v57 }
 0x378   : > { %v21943_v27 = vadd.f32 %v21861_v30, %v3768_v25  ;;  %v14889_v25 = vsel %vm5720_vm1, 1.0, %v21507_v28  ;;  %v18512_v30 = vld [vmem:[%s24069_s4 + $0x8a8] sm:$0xff]   ;;  %v6463_v19 = vor.u32 %v6462_v12, %v6459_v3  ;;  %v6167_v3 = vld [vmem:[#allocation2 + $0x58] sm:$0x7f] }
 0x379   : > { %5893 = vmatpush1.bf16.msra.mxu1 %v18509_v37  ;;  %6144 = vmatmul.mubr.bf16.vlgmr.msra.gmra.mrb[120].mxu0 %v6013_v32  ;;  %v6183_v31 = vrot.slane %v14889_v25, 2  ;;  %v18514_v37 = vld [vmem:[%s24069_s4 + $0x8b0] sm:$0xff]   ;;  %v5759_v35 = vpack.c.bf16 %v5755_v39, %v5753_v7  ;;  %v18515_v12 = vld [vmem:[%s24069_s4 + $0x7d8] sm:$0xff]   ;;  %v24501_v32 = vrot.slane %v20963_v26, 2 }
 0x37a   : > { %5894 = vmatprep.subr.bf16.mxu1 %v24315_v13  ;;  %6554 = vmatpush1.bf16.msra.mxu0 %v18510_v17  ;;  %v6165_v17 = vld [vmem:[#allocation2 + $0x28] sm:$0xc0]  ;;  %v6472_v4 = vsel %vm2975_vm6, %v6463_v19, %v21965_v16  ;;  %v18516_v26 = vld [vmem:[%s24069_s4 + $0x8b8] sm:$0xff]  }
 0x37b   : > { %14887 = vmatprep.mubr.msk.bf16.mxu0 %vm24498_vm2, %v21740_v51  ;;  %6555 = vmatprep.subr.bf16.mxu0 %v24315_v13  ;;  %v5751_v51 = vmul.f32 %v21760_v36, %v21399_v9  ;;  %v21982_v9 = vsel %vm2316_vm7, %v20329_v8, %v6181_v55  ;;  %v21988_v24 = vsel %vm2316_vm7, %v6181_v55, %v6183_v31  ;;  %v5791_v39 = vrot.slane %v5759_v35, 2  ;;  %v18518_v55 = vld [vmem:[%s24069_s4 + $0x8c0] sm:$0xff]   ;;  %v18521_v35 = vld [vmem:[%s24069_s4 + $0x850] sm:$0xff]   ;;  %vm6616_vm2 = vmand %vm5720_vm1, %vm24511_vm11 }
 0x37c   : > { %24499 = vst [vmem:[#allocation79_spill] sm:$0xff] %v21982_v9  ;;  %24500 = vst [vmem:[#allocation80_spill] sm:$0xff] %v21988_v24  ;;  %v6194_v0 = vmul.f32 %v21895_v14, %v21982_v9  ;;  %v6192_v25 = vmul.f32 %v6165_v17, %v20329_v8 }
 0x37d   : > { %5895 = vmatpush1.bf16.msra.mxu1 %v18511_v58  ;;  %v5757_v56 = vpack.c.bf16 %v5751_v51, %v5749_v5  ;;  %v21993_v58 = vsel %vm2316_vm7, %v6183_v31, %v24501_v32  ;;  %v18524_v32 = vld [vmem:[%s24069_s4 + $0x8d8] sm:$0xff]   ;;  %vm24513_vm1 = vmmov %vm24503_vm0 }
 0x37e   : > { %5896 = vmatprep.subr.bf16.mxu1 %v24315_v13  ;;  %6556 = vmatpush1.bf16.msra.mxu0 %v18512_v30  ;;  %24502 = vst [vmem:[#allocation81_spill] sm:$0xff] %v21993_v58  ;;  %v6196_v30 = vmul.f32 %v21532_v43, %v21988_v24  ;;  %v6198_v7 = vmul.f32 %v21993_v58, %v6167_v3 }
 0x37f   : > { %6557 = vmatprep.subr.bf16.mxu0 %v24315_v13  ;;  %v5790_v14 = vrot.slane %v5757_v56, 2  ;;  %v6200_v43 = vpack.c.bf16 %v6194_v0, %v6192_v25  ;;  %v18523_v56 = vld [vmem:[%s24069_s4 + $0x858] sm:$0xff]   ;;  %v18525_v25 = vld [vmem:[%s24069_s4 + $0x860] sm:$0xff]  }
 0x380   : > { %v6202_v57 = vpack.c.bf16 %v6198_v7, %v6196_v30  ;;  %v6406_v30 = vmul.f32 %v21855_v2, %v21884_v22  ;;  %v6408_v7 = vmul.f32 %v21507_v28, %v21892_v44  ;;  %v18527_v28 = vld [vmem:[%s24069_s4 + $0x868] sm:$0xff]  }
 0x381   : > { %5897 = vmatpush1.bf16.msra.mxu1 %v18513_v59  ;;  %6152 = vmatmul.mubr.bf16.gmra.mrb[124].mxu0 %v6012_v20  ;;  %v18517_v20 = vld [vmem:[%s24069_s4 + $0x840] sm:$0xff]   ;;  %v5792_v19 = vsel %vm2316_vm7, %v5790_v14, %v5791_v39  ;;  %v18519_v59 = vld [vmem:[%s24069_s4 + $0x848] sm:$0xff]   ;;  %v6235_v51 = vrot.slane %v6200_v43, 3  ;;  %v22058_v43 = vld [vmem:[#allocation2 + $0x30] sm:$0xff] }
 0x382   : > { %5898 = vmatprep.subr.bf16.mxu1 %v24315_v13  ;;  %6558 = vmatpush1.bf16.msra.mxu0 %v18514_v37  ;;  %v22022_v31 = vrot.slane %v6202_v57, 3  ;;  %v18520_v37 = vld [vmem:[%s24069_s4 + $0x8c8] sm:$0xff]   ;;  %v6404_v57 = vmul.f32 %v22058_v43, %v21881_v33 }
 0x383   : > { %14967 = vmatprep.mubr.msk.bf16.mxu0 %vm24503_vm0, %v6472_v4  ;;  %6559 = vmatprep.subr.bf16.mxu0 %v24315_v13  ;;  %v18522_v4 = vld [vmem:[%s24069_s4 + $0x8d0] sm:$0xff]   ;;  %vm24514_vm0 = vcmask 1043456  }
 0x385   : > { %5899 = vmatpush1.bf16.msra.mxu1 %v18515_v12 }
 0x386   : > { %6318 = vmatprep.subr.bf16.mxu1 %v24315_v13  ;;  %6560 = vmatpush1.bf16.msra.mxu0 %v18516_v26 }
 0x387   : > { %6561 = vmatprep.subr.bf16.mxu0 %v24315_v13 }
 0x388   : > { %5909 = vmatmul.mubr.bf16.vlgmr.msra.gmra.mrb[112].mxu1 %v5792_v19 }
 0x389   : > { %6319 = vmatpush1.bf16.msra.mxu1 %v18517_v20  ;;  %14846 = vmatprep.mubr.msk.bf16.mxu1 %vm24504_vm5, %v21799_v6  ;;  %v6237_v6 = vsel %vm2480_vm14, %v6235_v51, %v22022_v31  ;;  %v18526_v20 = vld [vmem:[%s24069_s4 + $0x8e0] sm:$0xff]   ;;  %vm24515_vm5 = vmmov %vm24514_vm0 }
 0x38a   : > { %6320 = vmatprep.subr.bf16.mxu1 %v24315_v13  ;;  %6562 = vmatpush1.bf16.msra.mxu0 %v18518_v55 }
 0x38b   : > { %6563 = vmatprep.subr.bf16.mxu0 %v24315_v13 }
 0x38c   : > { %v4388_v5 = vpop.f32.mrb[88].mxu0 }
 0x38d   : > { %6321 = vmatpush1.bf16.msra.mxu1 %v18519_v59  ;;  %v4390_v17 = vpop.f32.mrb[89].mxu0  ;;  %v6412_v59 = vpack.c.bf16 %v6408_v7, %v6406_v30 }
 0x38e   : > { %6322 = vmatprep.subr.bf16.mxu1 %v24315_v13  ;;  %v4391_v3 = vpop.f32.mrb[90].mxu0  ;;  %6564 = vmatpush1.bf16.msra.mxu0 %v18520_v37  ;;  %v18528_v37 = vld [vmem:[%s24069_s4 + $0x8e8] sm:$0xff]  }
 0x38f   : > { %v4393_v12 = vpop.f32.mrb[91].mxu0  ;;  %6565 = vmatprep.subr.bf16.mxu0 %v24315_v13 }
 0x390   : > { %5917 = vmatmul.mubr.bf16.gmra.mrb[116].mxu1 %v5791_v39  ;;  %v6371_v39 = vld [vmem:[#allocation2 + $0x20] sm:$0x80]  ;;  %v18529_v12 = vld [vmem:[%s24069_s4 + $0x870] sm:$0xff]  }
 0x391   : > { %6323 = vmatpush1.bf16.msra.mxu1 %v18521_v35  ;;  %14926 = vmatprep.mubr.msk.bf16.mxu1 %vm24505_vm4, %v6237_v6  ;;  %v6402_v55 = vmul.f32 %v21869_v29, %v6371_v39  ;;  %vm24516_vm4 = vmmov %vm24514_vm0 }
 0x392   : > { %6324 = vmatprep.subr.bf16.mxu1 %v24315_v13  ;;  %6566 = vmatpush1.bf16.msra.mxu0 %v18522_v4 }
 0x393   : > { %6567 = vmatprep.subr.bf16.mxu0 %v24315_v13  ;;  %v6410_v35 = vpack.c.bf16 %v6404_v57, %v6402_v55 }
 0x394   : > { %v4396_v0 = vpop.f32.mrb[92].mxu0 }
 0x395   : > { %6325 = vmatpush1.bf16.msra.mxu1 %v18523_v56  ;;  %v4398_v26 = vpop.f32.mrb[93].mxu0  ;;  %v6448_v56 = vshrl.u32 %v6412_v59, 16  ;;  %v6443_v39 = vshll.u32 %v6410_v35, 16 }
 0x396   : > { %6326 = vmatprep.subr.bf16.mxu1 %v24315_v13  ;;  %v4399_v14 = vpop.f32.mrb[94].mxu0  ;;  %6568 = vmatpush1.bf16.msra.mxu0 %v18524_v32  ;;  %v6451_v32 = vshll.u32 %v6412_v59, 16  ;;  %v6440_v26 = vshrl.u32 %v6410_v35, 16  ;;  %v18533_v35 = vld [vmem:[%s24069_s4 + $0x880] sm:$0xff]  }
 0x397   : > { %v4401_v19 = vpop.f32.mrb[95].mxu0  ;;  %6569 = vmatprep.subr.bf16.mxu0 %v24315_v13  ;;  %v6450_v57 = vrot.slane %v6448_v56, 3  ;;  %v6445_v59 = vrot.slane %v6443_v39, 4 }
 0x398   : > { %v6453_v19 = vrot.slane %v6451_v32, 4  ;;  %v6442_v55 = vrot.slane %v6440_v26, 3  ;;  %v6193_v26 = vmul.f32 %v22058_v43, %v21982_v9  ;;  %v18537_v43 = vld [vmem:[%s24069_s4 + $0x900] sm:$0xff]  }
 0x399   : > { %6327 = vmatpush1.bf16.msra.mxu1 %v18525_v25 }
 0x39a   : > { %6328 = vmatprep.subr.bf16.mxu1 %v24315_v13  ;;  %6570 = vmatpush1.bf16.msra.mxu0 %v18526_v20  ;;  %v6446_v56 = vor.u32 %v6445_v59, %v6442_v55  ;;  %v22134_v59 = vld [vmem:[#allocation2] sm:$0xff] }
 0x39b   : > { %v4157_v51 = vpop.f32.mrb[80].mxu1  ;;  %6571 = vmatprep.subr.bf16.mxu0 %v24315_v13 }
 0x39c   : > { %v4172_v17 = vadd.f32 %v4157_v51, %v21911_v23  ;;  %v4159_v6 = vpop.f32.mrb[81].mxu1  ;;  %v18530_v23 = vld [vmem:[%s24069_s4 + $0x8f0] sm:$0xff]  }
 0x39d   : > { %v4160_v4 = vpop.f32.mrb[82].mxu1  ;;  %6329 = vmatpush1.bf16.msra.mxu1 %v18527_v28  ;;  %v18532_v28 = vld [vmem:[%s24069_s4 + $0x8f8] sm:$0xff]  }
 0x39e   : > { %v4173_v25 = vadd.f32 %v4160_v4, %v21918_v62  ;;  %v4162_v30 = vpop.f32.mrb[83].mxu1  ;;  %6330 = vmatprep.subr.bf16.mxu1 %v24315_v13  ;;  %v22078_v7 = vadd.f32 %v4388_v5, %v4172_v17  ;;  %6572 = vmatpush1.bf16.msra.mxu0 %v18528_v37  ;;  %v18531_v62 = vld [vmem:[%s24069_s4 + $0x878] sm:$0xff]   ;;  %v6454_v17 = vor.u32 %v6453_v19, %v6450_v57 }
 0x39f   : > { %6573 = vmatprep.subr.bf16.mxu0 %v24315_v13  ;;  %v18534_v30 = vld [vmem:[%s24069_s4 + $0x888] sm:$0xff]  }
 0x3a0   : > { %v22084_v20 = vadd.f32 %v4391_v3, %v4173_v25  ;;  %v6455_v25 = vsel %vm2975_vm6, %v6446_v56, %v6454_v17 }
 0x3a1   : > { %6331 = vmatpush1.bf16.msra.mxu1 %v18529_v12 }
 0x3a2   : > { %6332 = vmatprep.subr.bf16.mxu1 %v24315_v13  ;;  %6574 = vmatpush1.bf16.msra.mxu0 %v18530_v23  ;;  %v18535_v23 = vld [vmem:[%s24069_s4 + $0x890] sm:$0xff]  }
 0x3a3   : > { %v4165_v5 = vpop.f32.mrb[84].mxu1  ;;  %6575 = vmatprep.subr.bf16.mxu0 %v24315_v13 }
 0x3a4   : > { %v4174_v3 = vadd.f32 %v4165_v5, %v21936_v10  ;;  %v4167_v51 = vpop.f32.mrb[85].mxu1  ;;  %v6166_v10 = vld [vmem:[#allocation2 + $0x50] sm:$0x7f]  ;;  %v6607_v5 = vld [vmem:[#allocation2 + $0x38] sm:$0xff] }
 0x3a5   : > { %v4168_v37 = vpop.f32.mrb[86].mxu1  ;;  %6333 = vmatpush1.bf16.msra.mxu1 %v18531_v62  ;;  %v6627_v34 = vmul.f32 %v24412_v54, %v6607_v5  ;;  %v18544_v5 = vld [vmem:[%s24069_s4 + $0x938] sm:$0xff]  }
 0x3a6   : > { %v4175_v6 = vadd.f32 %v4168_v37, %v21943_v27  ;;  %v4170_v4 = vpop.f32.mrb[87].mxu1  ;;  %6334 = vmatprep.subr.bf16.mxu1 %v24315_v13  ;;  %v22100_v12 = vadd.f32 %v4396_v0, %v4174_v3  ;;  %6576 = vmatpush1.bf16.msra.mxu0 %v18532_v28  ;;  %v6195_v27 = vmul.f32 %v21855_v2, %v21988_v24  ;;  %v18536_v2 = vld [vmem:[%s24069_s4 + $0x898] sm:$0xff]   ;;  %v6609_v28 = vld [vmem:[#allocation2 + $0x48] sm:$0xff]  ;;  %v22137_v3 = vsel %vm6615_vm15, 1.0, %v22134_v59 }
 0x3a7   : > { %v6197_v0 = vmul.f32 %v21993_v58, %v6166_v10  ;;  %24508 = vst [vmem:[#allocation82_spill] sm:$0xff] %v22137_v3  ;;  %v6629_v51 = vmul.f32 %v22137_v3, %v6609_v28  ;;  %vm24537_vm15 = vsmask.f32 6400 }
 0x3a8   : > { %v22102_v32 = vadd.f32 %v4399_v14, %v4175_v6  ;;  %v6164_v14 = vld [vmem:[#allocation2 + $0x20] sm:$0xc0] }
 0x3a9   : > { %6335 = vmatpush1.bf16.msra.mxu1 %v18533_v35  ;;  %6586 = vmatmul.mubr.bf16.vlgmr.msra.gmra.mrb[128].mxu0 %v6455_v25  ;;  %v6191_v39 = vmul.f32 %v6164_v14, %v20329_v8  ;;  %v6201_v62 = vpack.c.bf16 %v6197_v0, %v6195_v27  ;;  %v18539_v35 = vld [vmem:[%s24069_s4 + $0x910] sm:$0xff]   ;;  %v18541_v25 = vld [vmem:[%s24069_s4 + $0x920] sm:$0xff]   ;;  %v18542_v14 = vld [vmem:[%s24069_s4 + $0x928] sm:$0xff]  }
 0x3aa   : > { %6336 = vmatprep.subr.bf16.mxu1 %v24315_v13  ;;  %14968 = vmatprep.mubr.msk.bf16.mxu0 %vm24506_vm8, %v21965_v16  ;;  %vm24517_vm8 = vsmask.f32 7424 }
 0x3ab   : > { %v6199_v16 = vpack.c.bf16 %v6193_v26, %v6191_v39  ;;  %v6233_v57 = vrot.slane %v6201_v62, 3  ;;  %vm24531_vm12 = vmmov %vm24517_vm8 }
 0x3ad   : > { %6337 = vmatpush1.bf16.msra.mxu1 %v18534_v30  ;;  %v6232_v19 = vrot.slane %v6199_v16, 3 }
 0x3ae   : > { %6338 = vmatprep.subr.bf16.mxu1 %v24315_v13 }
 0x3af   : > { %v6234_v55 = vsel %vm2480_vm14, %v6232_v19, %v6233_v57 }
 0x3b1   : > { %6339 = vmatpush1.bf16.msra.mxu1 %v18535_v23  ;;  %6594 = vmatmul.mubr.bf16.gmra.mrb[132].mxu0 %v6454_v17  ;;  %v6635_v17 = vpack.c.bf16 %v6629_v51, %v6627_v34 }
 0x3b2   : > { %6340 = vmatprep.subr.bf16.mxu1 %v24315_v13 }
 0x3b5   : > { %6341 = vmatpush1.bf16.msra.mxu1 %v18536_v2  ;;  %v18543_v2 = vld [vmem:[%s24069_s4 + $0x930] sm:$0xff]  }
 0x3b6   : > { %6741 = vmatprep.subr.bf16.mxu1 %v24315_v13 }
 0x3b8   : > { %6351 = vmatmul.mubr.bf16.vlgmr.msra.gmra.mrb[120].mxu1 %v6234_v55 }
 0x3b9   : > { %6742 = vmatpush1.bf16.msra.mxu1 %v18537_v43  ;;  %14927 = vmatprep.mubr.msk.bf16.mxu1 %vm24509_vm9, %v22022_v31  ;;  %v18540_v31 = vld [vmem:[%s24069_s4 + $0x918] sm:$0xff]   ;;  %vm24549_vm9 = vmmov %vm24537_vm15 }
 0x3ba   : > { %6743 = vmatprep.subr.bf16.mxu1 %v24315_v13  ;;  %vm24581_vm11 = vmmov %vm24549_vm9 }
 0x3bc   : > { %v4834_v37 = vpop.f32.mrb[96].mxu0 }
 0x3bd   : > { %6744 = vmatpush1.bf16.msra.mxu1 %v18538_v45  ;;  %v4836_v6 = vpop.f32.mrb[97].mxu0 }
 0x3be   : > { %6745 = vmatprep.subr.bf16.mxu1 %v24315_v13  ;;  %v4837_v4 = vpop.f32.mrb[98].mxu0  ;;  %v22193_v6 = vsel %vm6616_vm2, 1.0, %v22134_v59  ;;  %vm24587_vm2 = vmmov %vm24514_vm0 }
 0x3bf   : > { %v4839_v56 = vpop.f32.mrb[99].mxu0  ;;  %24512 = vst [vmem:[#allocation83_spill] sm:$0xff] %v22193_v6  ;;  %v6631_v40 = vmul.f32 %v22193_v6, %v21876_v38 }
 0x3c0   : > { %6359 = vmatmul.mubr.bf16.gmra.mrb[124].mxu1 %v6233_v57  ;;  %v6606_v56 = vld [vmem:[#allocation2 + $0x30] sm:$0xff] }
 0x3c1   : > { %6746 = vmatpush1.bf16.msra.mxu1 %v18539_v35  ;;  %15008 = vmatprep.mubr.msk.bf16.mxu1 %vm24510_vm13, %v6635_v17  ;;  %v18546_v17 = vld [vmem:[%s24069_s4 + $0x948] sm:$0xff]   ;;  %vm24573_vm13 = vmmov %vm24517_vm8 }
 0x3c2   : > { %6747 = vmatprep.subr.bf16.mxu1 %v24315_v13 }
 0x3c4   : > { %v4842_v10 = vpop.f32.mrb[100].mxu0 }
 0x3c5   : > { %6748 = vmatpush1.bf16.msra.mxu1 %v18540_v31  ;;  %v4844_v30 = vpop.f32.mrb[101].mxu0 }
 0x3c6   : > { %6749 = vmatprep.subr.bf16.mxu1 %v24315_v13  ;;  %v4845_v27 = vpop.f32.mrb[102].mxu0 }
 0x3c7   : > { %v4847_v0 = vpop.f32.mrb[103].mxu0 }
 0x3c9   : > { %6750 = vmatpush1.bf16.msra.mxu1 %v18541_v25  ;;  %v6626_v25 = vmul.f32 %v24412_v54, %v6606_v56 }
 0x3ca   : > { %6751 = vmatprep.subr.bf16.mxu1 %v24315_v13 }
 0x3cb   : > { %v4595_v23 = vpop.f32.mrb[88].mxu1 }
 0x3cc   : > { %v4610_v26 = vadd.f32 %v4595_v23, %v22078_v7  ;;  %v4597_v39 = vpop.f32.mrb[89].mxu1 }
 0x3cd   : > { %v4598_v62 = vpop.f32.mrb[90].mxu1  ;;  %6752 = vmatpush1.bf16.msra.mxu1 %v18542_v14  ;;  %v6630_v14 = vmul.f32 %v22134_v59, %v22193_v6 }
 0x3ce   : > { %v4611_v16 = vadd.f32 %v4598_v62, %v22084_v20  ;;  %v4600_v57 = vpop.f32.mrb[91].mxu1  ;;  %6753 = vmatprep.subr.bf16.mxu1 %v24315_v13  ;;  %v4849_v19 = vadd.f32 %v4834_v37, %v4610_v26  ;;  %v18545_v20 = vld [vmem:[%s24069_s4 + $0x940] sm:$0xff]  }
 0x3d0   : > { %v4850_v43 = vadd.f32 %v4837_v4, %v4611_v16  ;;  %v6608_v4 = vld [vmem:[#allocation2 + $0x40] sm:$0xff] }
 0x3d1   : > { %6754 = vmatpush1.bf16.msra.mxu1 %v18543_v2 }
 0x3d2   : > { %6755 = vmatprep.subr.bf16.mxu1 %v24315_v13 }
 0x3d3   : > { %v4603_v7 = vpop.f32.mrb[92].mxu1 }
 0x3d4   : > { %v4612_v28 = vadd.f32 %v4603_v7, %v22100_v12  ;;  %v4605_v55 = vpop.f32.mrb[93].mxu1  ;;  %v18547_v12 = vld [vmem:[%s24069_s4 + $0x950] sm:$0xff]  }
 0x3d5   : > { %v4606_v45 = vpop.f32.mrb[94].mxu1  ;;  %6756 = vmatpush1.bf16.msra.mxu1 %v18544_v5 }
 0x3d6   : > { %v4613_v34 = vadd.f32 %v4606_v45, %v22102_v32  ;;  %v4608_v51 = vpop.f32.mrb[95].mxu1  ;;  %6757 = vmatprep.subr.bf16.mxu1 %v24315_v13  ;;  %v4851_v37 = vadd.f32 %v4842_v10, %v4612_v28  ;;  %v6613_v32 = vld [vmem:[#allocation2 + $0x68] sm:$0x1]  ;;  %v6628_v10 = vmul.f32 %v22137_v3, %v6608_v4 }
 0x3d7   : > { %v6633_v31 = vmul.f32 0.0, %v6613_v32 }
 0x3d8   : > { %v4852_v35 = vadd.f32 %v4845_v27, %v4613_v34  ;;  %v6612_v27 = vld [vmem:[#allocation2 + $0x60] sm:$0x1]  ;;  %v6634_v0 = vpack.c.bf16 %v6628_v10, %v6626_v25 }
 0x3d9   : > { %6758 = vmatpush1.bf16.msra.mxu1 %v18545_v20  ;;  %v6637_v30 = vpack.c.bf16 %v6633_v31, %v6631_v40  ;;  %v6632_v23 = vmul.f32 0.0, %v6612_v27 }
 0x3da   : > { %6759 = vmatprep.subr.bf16.mxu1 %v24315_v13 }
 0x3db   : > { %v6636_v26 = vpack.c.bf16 %v6632_v23, %v6630_v14 }
 0x3dd   : > { %6760 = vmatpush1.bf16.msra.mxu1 %v18546_v17 }
 0x3de   : > { %6761 = vmatprep.subr.bf16.mxu1 %v24315_v13 }
 0x3e1   : > { %6762 = vmatpush1.bf16.msra.mxu1 %v18547_v12 }
 0x3e2   : > { %6763 = vmatprep.subr.bf16.mxu1 %v24315_v13 }
 0x3e5   : > { %6764 = vmatpush1.bf16.msra.mxu1 %v18548_v50 }
 0x3e8   : > { %6774 = vmatmul.mubr.bf16.vlgmr.msra.gmra.mrb[128].mxu1 %v6634_v0 }
 0x3e9   : > { %15009 = vmatprep.mubr.msk.bf16.mxu1 %vm24513_vm1, %v6637_v30  ;;  %vm24588_vm1 = vmmov %vm24514_vm0 }
 0x3ec   : > { %v5249_v38 = vpop.f32.mrb[104].mxu0 }
 0x3ed   : > { %v5251_v39 = vpop.f32.mrb[105].mxu0 }
 0x3ee   : > { %v5252_v62 = vpop.f32.mrb[106].mxu0 }
 0x3ef   : > { %v5254_v13 = vpop.f32.mrb[107].mxu0 }
 0x3f0   : > { %6782 = vmatmul.mubr.bf16.gmra.mrb[132].mxu1 %v6636_v26 }
 0x3f4   : > { %v5257_v2 = vpop.f32.mrb[108].mxu0 }
 0x3f5   : > { %v5259_v16 = vpop.f32.mrb[109].mxu0 }
 0x3f6   : > { %v5260_v57 = vpop.f32.mrb[110].mxu0 }
 0x3f7   : > { %v5262_v5 = vpop.f32.mrb[111].mxu0 }
 0x3fb   : > { %v5022_v7 = vpop.f32.mrb[96].mxu1 }
 0x3fc   : > { %v5037_v28 = vadd.f32 %v5022_v7, %v4849_v19  ;;  %v5024_v55 = vpop.f32.mrb[97].mxu1 }
 0x3fd   : > { %v5025_v45 = vpop.f32.mrb[98].mxu1 }
 0x3fe   : > { %v5038_v20 = vadd.f32 %v5025_v45, %v4850_v43  ;;  %v5027_v34 = vpop.f32.mrb[99].mxu1  ;;  %v5264_v51 = vadd.f32 %v5249_v38, %v5037_v28 }
 0x3ff   : > { %v18549_v34 = vld [vmem:[%s24071_s6 + $0x40] sm:$0xff]  }
 0x400   : > { %v5265_v17 = vadd.f32 %v5252_v62, %v5038_v20  ;;  %16955 = vmatprep.subr.bf16.mxu0 %v18549_v34 }
 0x401   : > { %16956 = vmatpush3.bf16.msra.mxu0 %v18549_v34 }
 0x403   : > { %v5030_v12 = vpop.f32.mrb[100].mxu1 }
 0x404   : > { %v5039_v32 = vadd.f32 %v5030_v12, %v4851_v37  ;;  %v5032_v4 = vpop.f32.mrb[101].mxu1 }
 0x405   : > { %v5033_v50 = vpop.f32.mrb[102].mxu1  ;;  %v18551_v4 = vld [vmem:[%s24071_s6 + $0x50] sm:$0xff]  }
 0x406   : > { %v5040_v56 = vadd.f32 %v5033_v50, %v4852_v35  ;;  %v5035_v40 = vpop.f32.mrb[103].mxu1  ;;  %v5266_v31 = vadd.f32 %v5257_v2, %v5039_v32  ;;  %v18552_v50 = vld [vmem:[%s24071_s6 + $0x58] sm:$0xff]  }
 0x407   : > { %v18553_v40 = vld [vmem:[%s24071_s6 + $0x60] sm:$0xff]  }
 0x408   : > { %v5267_v10 = vadd.f32 %v5260_v57, %v5040_v56 }
 0x41c   : > { %v5695_v25 = vpop.f32.mrb[112].mxu0 }
 0x41d   : > { %v5697_v30 = vpop.f32.mrb[113].mxu0 }
 0x41e   : > { %v5698_v27 = vpop.f32.mrb[114].mxu0  ;;  %v18554_v30 = vld [vmem:[%s24071_s6 + $0x68] sm:$0xff]  }
 0x41f   : > { %v5700_v0 = vpop.f32.mrb[115].mxu0 }
 0x424   : > { %v5703_v14 = vpop.f32.mrb[116].mxu0 }
 0x425   : > { %v5705_v19 = vpop.f32.mrb[117].mxu0 }
 0x426   : > { %v5706_v23 = vpop.f32.mrb[118].mxu0 }
 0x427   : > { %v5708_v26 = vpop.f32.mrb[119].mxu0 }
 0x42b   : > { %v5460_v43 = vpop.f32.mrb[104].mxu1 }
 0x42c   : > { %v5475_v39 = vadd.f32 %v5460_v43, %v5264_v51  ;;  %v5462_v38 = vpop.f32.mrb[105].mxu1  ;;  %v18550_v51 = vld [vmem:[%s24071_s6 + $0x48] sm:$0xff]  }
 0x42d   : > { %v5463_v62 = vpop.f32.mrb[106].mxu1  ;;  %16957 = vmatprep.subr.bf16.mxu0 %v18550_v51 }
 0x42e   : > { %v5476_v13 = vadd.f32 %v5463_v62, %v5265_v17  ;;  %v5465_v37 = vpop.f32.mrb[107].mxu1  ;;  %v5710_v16 = vadd.f32 %v5695_v25, %v5475_v39  ;;  %16958 = vmatpush3.bf16.msra.mxu0 %v18550_v51  ;;  %v18556_v62 = vld [vmem:[%s24071_s6 + $0x78] sm:$0xff]  }
 0x42f   : > { %16959 = vmatprep.subr.bf16.mxu0 %v18551_v4 }
 0x430   : > { %v5711_v5 = vadd.f32 %v5698_v27, %v5476_v13 }
 0x432   : > { %16960 = vmatpush3.bf16.msra.mxu0 %v18551_v4 }
 0x433   : > { %v5468_v35 = vpop.f32.mrb[108].mxu1  ;;  %16961 = vmatprep.subr.bf16.mxu0 %v18552_v50 }
 0x434   : > { %v5477_v7 = vadd.f32 %v5468_v35, %v5266_v31  ;;  %v5470_v2 = vpop.f32.mrb[109].mxu1  ;;  %v22233_v35 = vld [vmem:[%s24071_s6] sm:$0xff]  }
 0x435   : > { %v5471_v57 = vpop.f32.mrb[110].mxu1 }
 0x436   : > { %v5478_v28 = vadd.f32 %v5471_v57, %v5267_v10  ;;  %v5473_v55 = vpop.f32.mrb[111].mxu1  ;;  %v5712_v45 = vadd.f32 %v5703_v14, %v5477_v7  ;;  %16962 = vmatpush3.bf16.msra.mxu0 %v18552_v50  ;;  %v18555_v14 = vld [vmem:[%s24071_s6 + $0x70] sm:$0xff]  }
 0x437   : > { %16963 = vmatprep.subr.bf16.mxu0 %v18553_v40 }
 0x438   : > { %v5713_v20 = vadd.f32 %v5706_v23, %v5478_v28 }
 0x43a   : > { %16964 = vmatpush3.bf16.msra.mxu0 %v18553_v40 }
 0x43b   : > { %16965 = vmatprep.subr.bf16.mxu0 %v18554_v30 }
 0x43e   : > { %16966 = vmatpush3.bf16.msra.mxu0 %v18554_v30 }
 0x43f   : > { %16967 = vmatprep.subr.bf16.mxu0 %v18555_v14 }
 0x442   : > { %16968 = vmatpush3.bf16.msra.mxu0 %v18555_v14 }
 0x443   : > { %16969 = vmatprep.subr.bf16.mxu0 %v18556_v62 }
 0x446   : > { %16970 = vmatpush3.bf16.msra.mxu0 %v18556_v62 }
 0x447   : > { %16975 = vmatprep.subr.bf16.mxu0 %v22233_v35 }
 0x44c   : > { %v6145_v17 = vpop.f32.mrb[120].mxu0 }
 0x44d   : > { %v6147_v12 = vpop.f32.mrb[121].mxu0 }
 0x44e   : > { %v6148_v32 = vpop.f32.mrb[122].mxu0 }
 0x44f   : > { %v6150_v56 = vpop.f32.mrb[123].mxu0 }
 0x454   : > { %v6153_v31 = vpop.f32.mrb[124].mxu0 }
 0x455   : > { %v6155_v10 = vpop.f32.mrb[125].mxu0 }
 0x456   : > { %v6156_v25 = vpop.f32.mrb[126].mxu0 }
 0x457   : > { %v6158_v27 = vpop.f32.mrb[127].mxu0 }
 0x45b   : > { %v5910_v0 = vpop.f32.mrb[112].mxu1 }
 0x45c   : > { %v5925_v19 = vadd.f32 %v5910_v0, %v5710_v16  ;;  %v5912_v23 = vpop.f32.mrb[113].mxu1 }
 0x45d   : > { %v5913_v26 = vpop.f32.mrb[114].mxu1 }
 0x45e   : > { %v5926_v43 = vadd.f32 %v5913_v26, %v5711_v5  ;;  %v5915_v39 = vpop.f32.mrb[115].mxu1  ;;  %v6160_v38 = vadd.f32 %v6145_v17, %v5925_v19 }
 0x460   : > { %v6161_v13 = vadd.f32 %v6148_v32, %v5926_v43 }
 0x463   : > { %v5918_v37 = vpop.f32.mrb[116].mxu1 }
 0x464   : > { %v5927_v16 = vadd.f32 %v5918_v37, %v5712_v45  ;;  %v5920_v7 = vpop.f32.mrb[117].mxu1 }
 0x465   : > { %v5921_v5 = vpop.f32.mrb[118].mxu1 }
 0x466   : > { %v5928_v2 = vadd.f32 %v5921_v5, %v5713_v20  ;;  %v5923_v57 = vpop.f32.mrb[119].mxu1  ;;  %v6162_v28 = vadd.f32 %v6153_v31, %v5927_v16  ;;  %v15010_v16 = vld [vmem:[%s24070_s5] ss:$0 sm:$0xff] }
 0x468   : > { %v6163_v55 = vadd.f32 %v6156_v25, %v5928_v2 }
 0x47c   : > { %v6587_v34 = vpop.f32.mrb[128].mxu0 }
 0x47d   : > { %v6589_v51 = vpop.f32.mrb[129].mxu0 }
 0x47e   : > { %v6590_v17 = vpop.f32.mrb[130].mxu0 }
 0x47f   : > { %v6592_v12 = vpop.f32.mrb[131].mxu0 }
 0x484   : > { %v6595_v32 = vpop.f32.mrb[132].mxu0 }
 0x485   : > { %v6597_v4 = vpop.f32.mrb[133].mxu0 }
 0x486   : > { %v6598_v50 = vpop.f32.mrb[134].mxu0 }
 0x487   : > { %v6600_v56 = vpop.f32.mrb[135].mxu0 }
 0x48b   : > { %v6352_v40 = vpop.f32.mrb[120].mxu1 }
 0x48c   : > { %v6367_v10 = vadd.f32 %v6352_v40, %v6160_v38  ;;  %v6354_v45 = vpop.f32.mrb[121].mxu1 }
 0x48d   : > { %v6355_v30 = vpop.f32.mrb[122].mxu1 }
 0x48e   : > { %v6368_v27 = vadd.f32 %v6355_v30, %v6161_v13  ;;  %v6357_v20 = vpop.f32.mrb[123].mxu1  ;;  %v6602_v0 = vadd.f32 %v6587_v34, %v6367_v10 }
 0x48f   : > { %v6854_v20 = vld [vmem:[#allocation2] sm:$0xfe] }
 0x490   : > { %v6603_v31 = vadd.f32 %v6590_v17, %v6368_v27 }
 0x493   : > { %v6360_v14 = vpop.f32.mrb[124].mxu1 }
 0x494   : > { %v6369_v19 = vadd.f32 %v6360_v14, %v6162_v28  ;;  %v6362_v23 = vpop.f32.mrb[125].mxu1 }
 0x495   : > { %v6363_v25 = vpop.f32.mrb[126].mxu1 }
 0x496   : > { %v6370_v26 = vadd.f32 %v6363_v25, %v6163_v55  ;;  %v6365_v43 = vpop.f32.mrb[127].mxu1  ;;  %v6604_v39 = vadd.f32 %v6595_v32, %v6369_v19  ;;  %v6856_v19 = vmul.f32 %v6854_v20, %v19622_v41  ;;  %v24519_v20 = vld [vmem:[#allocation16_spill] sm:$0xff] }
 0x498   : > { %v6605_v62 = vadd.f32 %v6598_v50, %v6370_v26 }
 0x4bb   : > { %v6775_v37 = vpop.f32.mrb[128].mxu1 }
 0x4bc   : > { %v6790_v38 = vadd.f32 %v6775_v37, %v6602_v0  ;;  %v6777_v7 = vpop.f32.mrb[129].mxu1 }
 0x4bd   : > { %v6778_v5 = vpop.f32.mrb[130].mxu1 }
 0x4be   : > { %v6801_v13 = vadd.f32 %v15010_v16, %v6790_v38  ;;  %v6791_v2 = vadd.f32 %v6778_v5, %v6603_v31  ;;  %v6780_v57 = vpop.f32.mrb[131].mxu1 }
 0x4c0   : > { %v6805_v34 = vmax.f32 %v6801_v13, 0.0  ;;  %v6802_v51 = vadd.f32 %v15010_v16, %v6791_v2 }
 0x4c2   : > { %v6813_v28 = vrot.slane %v6805_v34, 4  ;;  %v6806_v17 = vmax.f32 %v6802_v51, 0.0 }
 0x4c3   : > { %v6783_v12 = vpop.f32.mrb[132].mxu1 }
 0x4c4   : > { %6824 = vst [vmem:[#allocation2 + $0x10] sm:$0xf0] %v6813_v28  ;;  %v6814_v55 = vrot.slane %v6806_v17, 4  ;;  %v6792_v32 = vadd.f32 %v6783_v12, %v6604_v39  ;;  %v6785_v4 = vpop.f32.mrb[133].mxu1 }
 0x4c5   : > { %v6786_v50 = vpop.f32.mrb[134].mxu1 }
 0x4c6   : > { %v22240_v56 = vsel %vm24514_vm0, %v6813_v28, %v6814_v55  ;;  %v6803_v40 = vadd.f32 %v15010_v16, %v6792_v32  ;;  %v6793_v10 = vadd.f32 %v6786_v50, %v6605_v62  ;;  %v6788_v45 = vpop.f32.mrb[135].mxu1  ;;  %v6832_v28 = vmul.f32 0.0, %v22134_v59 }
 0x4c7   : > { %6825 = vst [vmem:[#allocation2 + $0x20] sm:$0xff] %v22240_v56  ;;  %v6858_v38 = vmul.f32 %v22240_v56, %v19656_v61  ;;  %v7783_v5 = vmul.f32 %v22240_v56, %v20283_v15 }
 0x4c8   : > { %v6807_v30 = vmax.f32 %v6803_v40, 0.0  ;;  %v6804_v27 = vadd.f32 %v15010_v16, %v6793_v10  ;;  %v18558_v10 = vld [vmem:[%s24071_s6 + $0x8] sm:$0xff]  }
 0x4ca   : > { %v6816_v0 = vrot.slane %v6807_v30, 4  ;;  %v6808_v31 = vmax.f32 %v6804_v27, 0.0  ;;  %v24518_v30 = vld [vmem:[#allocation13_spill] sm:$0xff] }
 0x4cb   : > { %v22243_v14 = vld [vmem:[#allocation2 + $0x10] sm:$0xff] }
 0x4cc   : > { %v22247_v23 = vsel %vm24515_vm5, %v6814_v55, %v6816_v0  ;;  %v6818_v25 = vrot.slane %v6808_v31, 4  ;;  %v6857_v26 = vmul.f32 %v22243_v14, %v19639_v49  ;;  %v6833_v17 = vmul.f32 %v19588_v21, %v22243_v14  ;;  %v8052_v4 = vld [vmem:[#allocation2 + $0x10] sm:$0xfe]  ;;  %vm24607_vm5 = vmmov %vm24517_vm8 }
 0x4cd   : > { %6826 = vst [vmem:[#allocation2 + $0x30] sm:$0xff] %v22247_v23  ;;  %v7784_v16 = vmul.f32 %v22247_v23, %v20286_v18  ;;  %v8054_v27 = vmul.f32 %v8052_v4, %v24518_v30  ;;  %v8195_v31 = vld [vmem:[#allocation2 + $0x10] sm:$0xfc]  ;;  %v24527_v4 = vld [vmem:[#allocation49_spill] sm:$0xff] }
 0x4ce   : > { %v6819_v43 = vsel %vm24516_vm4, %v6816_v0, %v6818_v25  ;;  %v6860_v39 = vpack.c.bf16 %v6857_v26, %v6856_v19  ;;  %v6836_v45 = vpack.c.bf16 %v6833_v17, %v6832_v28  ;;  %v8055_v0 = vmul.f32 %v22240_v56, %v24519_v20  ;;  %v18559_v25 = vld [vmem:[%s24071_s6 + $0x10] sm:$0xff]   ;;  %vm24609_vm4 = vmmov %vm24549_vm9 }
 0x4cf   : > { %6827 = vst [vmem:[#allocation2 + $0x40] sm:$0x1f] %v6819_v43  ;;  %v22260_v57 = vpack.c.bf16 %v7784_v16, %v7783_v5  ;;  %v8328_v26 = vld [vmem:[#allocation2 + $0x10] sm:$0xf8]  ;;  %v24520_v43 = vld [vmem:[#allocation14_spill] sm:$0xff] }
 0x4d0   : > { %v6882_v62 = vshll.u32 %v6860_v39, 16  ;;  %v6880_v34 = vshrl.u32 %v6860_v39, 16  ;;  %v8056_v39 = vmul.f32 %v22247_v23, %v24520_v43  ;;  %v8058_v16 = vpack.c.bf16 %v8055_v0, %v8054_v27  ;;  %v24526_v17 = vld [vmem:[#allocation51_spill] sm:$0xff] }
 0x4d2   : > { %v6884_v2 = vrot.slane %v6882_v62, 1  ;;  %v24521_v62 = vld [vmem:[#allocation15_spill] sm:$0xff]  ;;  %v8078_v0 = vshrl.u32 %v8058_v16, 16 }
 0x4d4   : > { %v6855_v37 = vld [vmem:[#allocation2 + $0x30] sm:$0x3]  ;;  %v6885_v12 = vor.u32 %v6884_v2, %v6880_v34  ;;  %v24525_v34 = vld [vmem:[#allocation8_spill] sm:$0xff] }
 0x4d5   : > { %v6859_v7 = vmul.f32 %v6855_v37, %v19660_v1 }
 0x4d6   : > { %v8053_v59 = vld [vmem:[#allocation2 + $0x40] sm:$0x3] }
 0x4d7   : > { %v6861_v13 = vpack.c.bf16 %v6859_v7, %v6858_v38  ;;  %v8196_v19 = vld [vmem:[#allocation2 + $0x40] sm:$0x7]  ;;  %v8057_v37 = vmul.f32 %v8053_v59, %v24521_v62  ;;  %v24522_v38 = vld [vmem:[#allocation52_spill] sm:$0xff]  ;;  %v24523_v7 = vld [vmem:[#allocation50_spill] sm:$0xff] }
 0x4d8   : > { %v8197_v5 = vmul.f32 %v8195_v31, %v24523_v7  ;;  %v8329_v28 = vld [vmem:[#allocation2 + $0x40] sm:$0xf]  ;;  %v18560_v59 = vld [vmem:[%s24071_s6 + $0x18] sm:$0xff]   ;;  %v24530_v7 = vld [vmem:[#allocation18_spill] sm:$0xff] }
 0x4d9   : > { %v6887_v51 = vshll.u32 %v6861_v13, 16  ;;  %v6891_v32 = vshrl.u32 %v6861_v13, 16  ;;  %v24524_v13 = vld [vmem:[#allocation53_spill] sm:$0xff]  ;;  %v8333_v62 = vmul.f32 %v8329_v28, %v24530_v7 }
 0x4da   : > { %v8199_v2 = vmul.f32 %v22247_v23, %v24524_v13  ;;  %v24534_v13 = vld [vmem:[#allocation57_spill] sm:$0xff] }
 0x4db   : > { %v6889_v55 = vrot.slane %v6887_v51, 1  ;;  %v8200_v51 = vmul.f32 %v8196_v19, %v24525_v34  ;;  %v8474_v34 = vld [vmem:[#allocation2 + $0x40] sm:$0x1f] }
 0x4dd   : > { %v6890_v50 = vsel %vm24517_vm8, %v6885_v12, %v6889_v55  ;;  %v6893_v40 = vor.u32 %v6891_v32, %v6889_v55  ;;  %v8331_v12 = vmul.f32 %v22240_v56, %v24526_v17  ;;  %v22287_v55 = vpack.c.bf16 %v8057_v37, %v8056_v39  ;;  %v24529_v37 = vld [vmem:[#allocation17_spill] sm:$0xff]  ;;  %v24533_v17 = vld [vmem:[#allocation56_spill] sm:$0xff]  ;;  %vm24621_vm8 = vmmov %vm24607_vm5 }
 0x4de   : > { %16971 = vmatprep.mubr.bf16.mxu0 %v6890_v50  ;;  %v8080_v32 = vshll.u32 %v8058_v16, 16  ;;  %v8330_v50 = vmul.f32 %v8328_v26, %v24527_v4  ;;  %v8202_v19 = vpack.c.bf16 %v8200_v51, %v8199_v2  ;;  %v8332_v4 = vmul.f32 %v22247_v23, %v24529_v37  ;;  %v8748_v37 = vld [vmem:[#allocation2 + $0x40] sm:$0x7f] }
 0x4df   : > { %16972 = vmatmul.mubr.bf16.vlgmr.msra.gmra.mrb[136].mxu0 %v6893_v40  ;;  %v8473_v40 = vld [vmem:[#allocation2 + $0x10] sm:$0xf0]  ;;  %v8085_v26 = vshll.u32 %v22287_v55, 16  ;;  %v8476_v51 = vpack.c.bf16 %v8474_v34, %v22247_v23 }
 0x4e0   : > { %16976 = vmatpush3.bf16.msra.mxu0 %v22233_v35  ;;  %16991 = vmatprep.mubr.bf16.mxu0 %v6836_v45  ;;  %v8198_v35 = vmul.f32 %v22240_v56, %v24522_v38  ;;  %v24528_v45 = vld [vmem:[#allocation55_spill] sm:$0xff]  ;;  %v8082_v39 = vrot.slane %v8080_v32, 1  ;;  %v8334_v21 = vpack.c.bf16 %v8331_v12, %v8330_v50  ;;  %v8475_v16 = vpack.c.bf16 %v22240_v56, %v8473_v40  ;;  %v8603_v40 = vld [vmem:[#allocation2 + $0x40] sm:$0x3f] }
 0x4e1   : > { %16977 = vmatprep.subr.bf16.mxu0 %v18558_v10  ;;  %v8605_v27 = vmul.f32 %v22240_v56, %v24528_v45  ;;  %v22303_v45 = vrot.slane %v8202_v19, 1  ;;  %v8335_v2 = vpack.c.bf16 %v8333_v62, %v8332_v4  ;;  %v8602_v32 = vld [vmem:[#allocation2 + $0x10] sm:$0xe0] }
 0x4e2   : > { %v8201_v31 = vpack.c.bf16 %v8198_v35, %v8197_v5  ;;  %v8083_v35 = vor.u32 %v8082_v39, %v8078_v0  ;;  %v22306_v5 = vrot.slane %v8085_v26, 1  ;;  %v8354_v12 = vshrl.u32 %v8334_v21, 16  ;;  %v8880_v38 = vld [vmem:[#allocation2 + $0x10] sm:$0x80] }
 0x4e3   : > { %v8357_v50 = vshll.u32 %v8334_v21, 16  ;;  %v8362_v34 = vshrl.u32 %v8335_v2, 16  ;;  %v8365_v4 = vshll.u32 %v8335_v2, 16  ;;  %v8496_v0 = vrot.slane %v8475_v16, 2  ;;  %v18562_v16 = vld [vmem:[%s24071_s6 + $0x28] sm:$0xff]  }
 0x4e4   : > { %16978 = vmatpush3.bf16.msra.mxu0 %v18558_v10  ;;  %v22297_v10 = vmul.f32 %v22240_v56, %v21148_v48  ;;  %v8222_v30 = vrot.slane %v8201_v31, 1  ;;  %v18561_v48 = vld [vmem:[%s24071_s6 + $0x20] sm:$0xff]   ;;  %v22320_v62 = vsel %vm24531_vm12, %v8083_v35, %v22306_v5  ;;  %v8747_v31 = vld [vmem:[#allocation2 + $0x10] sm:$0xc0]  ;;  %v8356_v19 = vrot.slane %v8354_v12, 1  ;;  %vm24628_vm12 = vmmov %vm24609_vm4 }
 0x4e5   : > { %16979 = vmatprep.subr.bf16.mxu0 %v18559_v25  ;;  %v8359_v39 = vrot.slane %v8357_v50, 2  ;;  %v22322_v26 = vrot.slane %v8476_v51, 2  ;;  %v8364_v21 = vrot.slane %v8362_v34, 1  ;;  %v8367_v1 = vrot.slane %v8365_v4, 2  ;;  %v24535_v34 = vld [vmem:[#allocation65_spill] sm:$0xff] }
 0x4e6   : > { %v22314_v28 = vsel %vm1859_vm3, %v8222_v30, %v22303_v45  ;;  %v24532_v30 = vld [vmem:[#allocation54_spill] sm:$0xff]  ;;  %v8607_v35 = vmul.f32 %v8603_v40, %v24534_v13  ;;  %v8751_v40 = vmul.f32 %v22247_v23, %v21158_v42  ;;  %v8752_v4 = vmul.f32 %v8748_v37, %v24535_v34  ;;  %v18563_v37 = vld [vmem:[%s24071_s6 + $0x30] sm:$0xff]  }
 0x4e7   : > { %v8604_v7 = vmul.f32 %v8602_v32, %v24532_v30  ;;  %v8360_v2 = vor.u32 %v8359_v39, %v8356_v19  ;;  %v22333_v51 = vsel %vm2316_vm7, %v8496_v0, %v22322_v26  ;;  %v22336_v12 = vor.u32 %v8367_v1, %v8364_v21  ;;  %v8881_v19 = vld [vmem:[#allocation2 + $0x40] sm:$0xff]  ;;  %v24536_v39 = vld [vmem:[#allocation58_spill] sm:$0xff]  ;;  %v24540_v42 = vld [vmem:[#allocation31_spill] sm:$0xff] }
 0x4e8   : > { %16980 = vmatpush3.bf16.msra.mxu0 %v18559_v25  ;;  %v8883_v25 = vmul.f32 %v22240_v56, %v21047_v52  ;;  %v8606_v52 = vmul.f32 %v22247_v23, %v24533_v17  ;;  %v8882_v43 = vmul.f32 %v8880_v38, %v24536_v39  ;;  %v7090_v0 = vld [vmem:[#allocation2] sm:$0xfc] }
 0x4e9   : > { %16981 = vmatprep.subr.bf16.mxu0 %v18560_v59  ;;  %v8608_v32 = vpack.c.bf16 %v8605_v27, %v8604_v7  ;;  %v7091_v7 = vld [vmem:[#allocation2 + $0x30] sm:$0x7]  ;;  %v22345_v1 = vsel %vm24537_vm15, %v8360_v2, %v22336_v12  ;;  %v24539_v2 = vld [vmem:[#allocation62_spill] sm:$0xff]  ;;  %vm24641_vm15 = vmmov %vm24609_vm4 }
 0x4ea   : > { %v8609_v50 = vpack.c.bf16 %v8607_v35, %v8606_v52  ;;  %v8885_v34 = vmul.f32 %v8881_v19, %v24539_v2  ;;  %v24542_v19 = vld [vmem:[#allocation32_spill] sm:$0xff]  ;;  %v6831_v2 = vld [vmem:[#allocation2 + $0x30] sm:$0x1] }
 0x4eb   : > { %v8628_v13 = vshrl.u32 %v8608_v32, 16  ;;  %v8631_v30 = vshll.u32 %v8608_v32, 16  ;;  %v24538_v32 = vld [vmem:[#allocation61_spill] sm:$0xff] }
 0x4ec   : > { %16982 = vmatpush3.bf16.msra.mxu0 %v18560_v59  ;;  %v8749_v59 = vmul.f32 %v8747_v31, %v21008_v60  ;;  %v8636_v52 = vshrl.u32 %v8609_v50, 16  ;;  %v8639_v27 = vshll.u32 %v8609_v50, 16  ;;  %v8754_v31 = vpack.c.bf16 %v8752_v4, %v8751_v40  ;;  %v24541_v40 = vld [vmem:[#allocation10_spill] sm:$0xff] }
 0x4ed   : > { %16983 = vmatprep.subr.bf16.mxu0 %v18561_v48  ;;  %v8630_v21 = vrot.slane %v8628_v13, 2  ;;  %v7092_v50 = vmul.f32 %v7090_v0, %v24540_v42  ;;  %v7095_v4 = vmul.f32 %v7091_v7, %v24541_v40  ;;  %v8886_v60 = vpack.c.bf16 %v8883_v25, %v8882_v43 }
 0x4ee   : > { %v8753_v17 = vpack.c.bf16 %v22297_v10, %v8749_v59  ;;  %v8633_v10 = vrot.slane %v8631_v30, 3  ;;  %v8638_v38 = vrot.slane %v8636_v52, 2  ;;  %v8641_v59 = vrot.slane %v8639_v27, 3  ;;  %v18564_v30 = vld [vmem:[%s24071_s6 + $0x38] sm:$0xff]  }
 0x4ef   : > { %v22352_v39 = vrot.slane %v8754_v31, 3  ;;  %v7093_v0 = vmul.f32 %v22243_v14, %v24542_v19  ;;  %v24543_v52 = vld [vmem:[#allocation4_spill] sm:$0xff]  ;;  %v8906_v25 = vshrl.u32 %v8886_v60, 16 }
 0x4f0   : > { %16984 = vmatpush3.bf16.msra.mxu0 %v18561_v48  ;;  %v8774_v35 = vrot.slane %v8753_v17, 3  ;;  %v8884_v48 = vmul.f32 %v22247_v23, %v24538_v32  ;;  %v8634_v20 = vor.u32 %v8633_v10, %v8630_v21  ;;  %v22357_v49 = vor.u32 %v8641_v59, %v8638_v38  ;;  %v18565_v38 = vld [vmem:[%s24071_s6 + $0x80] sm:$0xff]  }
 0x4f1   : > { %16985 = vmatprep.subr.bf16.mxu0 %v18562_v16  ;;  %v7094_v43 = vmul.f32 %v22240_v56, %v24543_v52  ;;  %v8908_v21 = vrot.slane %v8906_v25, 3  ;;  %v7096_v59 = vpack.c.bf16 %v7093_v0, %v7092_v50  ;;  %v18566_v50 = vld [vmem:[%s24071_s6 + $0x88] sm:$0xff]   ;;  %v18569_v25 = vld [vmem:[%s24071_s6 + $0xa0] sm:$0xff]  }
 0x4f2   : > { %v22361_v13 = vsel %vm2480_vm14, %v8774_v35, %v22352_v39  ;;  %v8887_v17 = vpack.c.bf16 %v8885_v34, %v8884_v48  ;;  %v22372_v7 = vsel %vm2529_vm10, %v8634_v20, %v22357_v49  ;;  %v24544_v20 = vld [vmem:[#allocation30_spill] sm:$0xff] }
 0x4f3   : > { %v7097_v34 = vpack.c.bf16 %v7095_v4, %v7094_v43  ;;  %v6834_v40 = vmul.f32 %v24544_v20, %v22240_v56  ;;  %v7117_v43 = vrot.slane %v7096_v59, 1 }
 0x4f4   : > { %16986 = vmatpush3.bf16.msra.mxu0 %v18562_v16  ;;  %v8909_v16 = vshll.u32 %v8886_v60, 16  ;;  %v8914_v27 = vshrl.u32 %v8887_v17, 16  ;;  %v8917_v31 = vshll.u32 %v8887_v17, 16 }
 0x4f5   : > { %16987 = vmatprep.subr.bf16.mxu0 %v18563_v37  ;;  %v7118_v17 = vrot.slane %v7097_v34, 1  ;;  %v6837_v4 = vpack.c.bf16 %v6831_v2, %v6834_v40  ;;  %v18568_v2 = vld [vmem:[%s24071_s6 + $0x98] sm:$0xff]   ;;  %v7224_v40 = vld [vmem:[#allocation2 + $0x30] sm:$0xf]  ;;  %v18570_v34 = vld [vmem:[%s24071_s6 + $0xa8] sm:$0xff]  }
 0x4f6   : > { %v8911_v10 = vrot.slane %v8909_v16, 4  ;;  %v8916_v35 = vrot.slane %v8914_v27, 3  ;;  %v8919_v48 = vrot.slane %v8917_v31, 4  ;;  %v7223_v16 = vld [vmem:[#allocation2] sm:$0xf8] }
 0x4f7   : > { %v7119_v0 = vsel %vm1859_vm3, %v7117_v43, %v7118_v17  ;;  %v24545_v27 = vld [vmem:[#allocation29_spill] sm:$0xff] }
 0x4f8   : > { %16988 = vmatpush3.bf16.msra.mxu0 %v18563_v37  ;;  %v8912_v60 = vor.u32 %v8911_v10, %v8908_v21  ;;  %v22377_v32 = vor.u32 %v8919_v48, %v8916_v35  ;;  %v7228_v31 = vmul.f32 %v7224_v40, %v24545_v27  ;;  %v24546_v21 = vld [vmem:[#allocation22_spill] sm:$0xff]  ;;  %v24547_v35 = vld [vmem:[#allocation28_spill] sm:$0xff] }
 0x4f9   : > { %16989 = vmatprep.subr.bf16.mxu0 %v18564_v30  ;;  %v7225_v10 = vmul.f32 %v7223_v16, %v24546_v21  ;;  %v7226_v48 = vmul.f32 %v22243_v14, %v24547_v35 }
 0x4fa   : > { %v22383_v37 = vsel %vm2975_vm6, %v8912_v60, %v22377_v32 }
 0x4fb   : > { %v7229_v43 = vpack.c.bf16 %v7226_v48, %v7225_v10 }
 0x4fc   : > { %16990 = vmatpush3.bf16.msra.mxu0 %v18564_v30  ;;  %v18567_v30 = vld [vmem:[%s24071_s6 + $0x90] sm:$0xff]  }
 0x4fd   : > { %16995 = vmatprep.subr.bf16.mxu0 %v18565_v38  ;;  %v7252_v40 = vshll.u32 %v7229_v43, 16 }
 0x4ff   : > { %16992 = vmatmul.mubr.bf16.vlgmr.msra.gmra.mrb[136].mxu0 %v6837_v4  ;;  %v18571_v4 = vld [vmem:[%s24071_s6 + $0xb0] sm:$0xff]   ;;  %v7254_v10 = vrot.slane %v7252_v40, 2 }
 0x500   : > { %16996 = vmatpush3.bf16.msra.mxu0 %v18565_v38  ;;  %17011 = vmatprep.mubr.bf16.mxu0 %v7119_v0  ;;  %v24548_v38 = vld [vmem:[#allocation5_spill] sm:$0xff] }
 0x501   : > { %16997 = vmatprep.subr.bf16.mxu0 %v18566_v50  ;;  %v7227_v59 = vmul.f32 %v22240_v56, %v24548_v38 }
 0x503   : > { %v7230_v60 = vpack.c.bf16 %v7228_v31, %v7227_v59  ;;  %v18574_v59 = vld [vmem:[%s24071_s6 + $0xc8] sm:$0xff]  }
 0x504   : > { %16998 = vmatpush3.bf16.msra.mxu0 %v18566_v50 }
 0x505   : > { %16999 = vmatprep.subr.bf16.mxu0 %v18567_v30  ;;  %v7257_v50 = vshrl.u32 %v7230_v60, 16  ;;  %v7260_v0 = vshll.u32 %v7230_v60, 16 }
 0x507   : > { %v7259_v16 = vrot.slane %v7257_v50, 1  ;;  %v7262_v20 = vrot.slane %v7260_v0, 2  ;;  %v7369_v50 = vld [vmem:[#allocation2 + $0x30] sm:$0x1f] }
 0x508   : > { %17000 = vmatpush3.bf16.msra.mxu0 %v18567_v30  ;;  %v18572_v30 = vld [vmem:[%s24071_s6 + $0xb8] sm:$0xff]   ;;  %v18579_v0 = vld [vmem:[%s24071_s6 + $0xf0] sm:$0xff]  }
 0x509   : > { %17001 = vmatprep.subr.bf16.mxu0 %v18568_v2  ;;  %v7263_v48 = vor.u32 %v7262_v20, %v7259_v16  ;;  %v18576_v20 = vld [vmem:[%s24071_s6 + $0xd8] sm:$0xff]  }
 0x50a   : > { %v18580_v16 = vld [vmem:[%s24071_s6 + $0xf8] sm:$0xff]  }
 0x50c   : > { %17002 = vmatpush3.bf16.msra.mxu0 %v18568_v2  ;;  %v7249_v2 = vshrl.u32 %v7229_v43, 16  ;;  %v18578_v43 = vld [vmem:[%s24071_s6 + $0xe8] sm:$0xff]  }
 0x50d   : > { %17003 = vmatprep.subr.bf16.mxu0 %v18569_v25 }
 0x50e   : > { %v7251_v31 = vrot.slane %v7249_v2, 1  ;;  %v24550_v2 = vld [vmem:[#allocation38_spill] sm:$0xff] }
 0x50f   : > { %v7373_v40 = vmul.f32 %v7369_v50, %v24550_v2  ;;  %v18582_v50 = vld [vmem:[%s24071_s6 + $0x108] sm:$0xff]  }
 0x510   : > { %17004 = vmatpush3.bf16.msra.mxu0 %v18569_v25  ;;  %v18573_v25 = vld [vmem:[%s24071_s6 + $0xc0] sm:$0xff]  }
 0x511   : > { %17005 = vmatprep.subr.bf16.mxu0 %v18570_v34 }
 0x514   : > { %17006 = vmatpush3.bf16.msra.mxu0 %v18570_v34  ;;  %v7255_v34 = vor.u32 %v7254_v10, %v7251_v31  ;;  %v24551_v31 = vld [vmem:[#allocation37_spill] sm:$0xff] }
 0x515   : > { %17007 = vmatprep.subr.bf16.mxu0 %v18571_v4  ;;  %v7371_v10 = vmul.f32 %v22243_v14, %v24551_v31 }
 0x516   : > { %v7264_v60 = vsel %vm24549_vm9, %v7255_v34, %v7263_v48  ;;  %v24552_v34 = vld [vmem:[#allocation11_spill] sm:$0xff] }
 0x518   : > { %17008 = vmatpush3.bf16.msra.mxu0 %v18571_v4  ;;  %v18575_v4 = vld [vmem:[%s24071_s6 + $0xd0] sm:$0xff]  }
 0x519   : > { %17009 = vmatprep.subr.bf16.mxu0 %v18572_v30 }
 0x51c   : > { %17010 = vmatpush3.bf16.msra.mxu0 %v18572_v30  ;;  %v7368_v30 = vld [vmem:[#allocation2] sm:$0xf0] }
 0x51d   : > { %17015 = vmatprep.subr.bf16.mxu0 %v18573_v25 }
 0x51f   : > { %17012 = vmatmul.mubr.bf16.vlgmr.msra.gmra.mrb[136].mxu0 %v7118_v17  ;;  %v18577_v17 = vld [vmem:[%s24071_s6 + $0xe0] sm:$0xff]  }
 0x520   : > { %17016 = vmatpush3.bf16.msra.mxu0 %v18573_v25  ;;  %17031 = vmatprep.mubr.bf16.mxu0 %v7264_v60  ;;  %v7370_v25 = vmul.f32 %v7368_v30, %v20152_v53 }
 0x521   : > { %17017 = vmatprep.subr.bf16.mxu0 %v18574_v59 }
 0x524   : > { %17018 = vmatpush3.bf16.msra.mxu0 %v18574_v59  ;;  %v7372_v59 = vmul.f32 %v22240_v56, %v24552_v34 }
 0x525   : > { %17019 = vmatprep.subr.bf16.mxu0 %v18575_v4 }
 0x526   : > { %v7375_v60 = vpack.c.bf16 %v7373_v40, %v7372_v59  ;;  %v18584_v40 = vld [vmem:[%s24071_s6 + $0x118] sm:$0xff]  }
 0x528   : > { %17020 = vmatpush3.bf16.msra.mxu0 %v18575_v4  ;;  %v18581_v4 = vld [vmem:[%s24071_s6 + $0x100] sm:$0xff]  }
 0x529   : > { %17021 = vmatprep.subr.bf16.mxu0 %v18576_v20 }
 0x52c   : > { %17022 = vmatpush3.bf16.msra.mxu0 %v18576_v20  ;;  %v7374_v20 = vpack.c.bf16 %v7371_v10, %v7370_v25  ;;  %v7501_v25 = vld [vmem:[#allocation2] sm:$0xe0]  ;;  %v24553_v10 = vld [vmem:[#allocation36_spill] sm:$0xff] }
 0x52d   : > { %17023 = vmatprep.subr.bf16.mxu0 %v18577_v17 }
 0x530   : > { %17024 = vmatpush3.bf16.msra.mxu0 %v18577_v17  ;;  %v7396_v17 = vrot.slane %v7375_v60, 2  ;;  %v18586_v60 = vld [vmem:[%s24071_s6 + $0x128] sm:$0xff]  }
 0x531   : > { %17025 = vmatprep.subr.bf16.mxu0 %v18578_v43 }
 0x534   : > { %17026 = vmatpush3.bf16.msra.mxu0 %v18578_v43  ;;  %v7395_v43 = vrot.slane %v7374_v20, 2 }
 0x535   : > { %17027 = vmatprep.subr.bf16.mxu0 %v18579_v0 }
 0x536   : > { %v7397_v30 = vsel %vm2316_vm7, %v7395_v43, %v7396_v17  ;;  %v24555_v43 = vld [vmem:[#allocation34_spill] sm:$0xff] }
 0x538   : > { %17028 = vmatpush3.bf16.msra.mxu0 %v18579_v0  ;;  %v18583_v0 = vld [vmem:[%s24071_s6 + $0x110] sm:$0xff]  }
 0x539   : > { %17029 = vmatprep.subr.bf16.mxu0 %v18580_v16 }
 0x53c   : > { %17030 = vmatpush3.bf16.msra.mxu0 %v18580_v16  ;;  %v7502_v16 = vld [vmem:[#allocation2 + $0x30] sm:$0x3f] }
 0x53d   : > { %17035 = vmatprep.subr.bf16.mxu0 %v18581_v4  ;;  %v7506_v59 = vmul.f32 %v7502_v16, %v24553_v10 }
 0x53f   : > { %17032 = vmatmul.mubr.bf16.vlgmr.msra.gmra.mrb[136].mxu0 %v7263_v48  ;;  %v18585_v48 = vld [vmem:[%s24071_s6 + $0x120] sm:$0xff]  }
 0x540   : > { %17036 = vmatpush3.bf16.msra.mxu0 %v18581_v4  ;;  %17051 = vmatprep.mubr.bf16.mxu0 %v7397_v30  ;;  %v24554_v4 = vld [vmem:[#allocation33_spill] sm:$0xff]  ;;  %v24556_v30 = vld [vmem:[#allocation35_spill] sm:$0xff] }
 0x541   : > { %17037 = vmatprep.subr.bf16.mxu0 %v18582_v50  ;;  %v7503_v20 = vmul.f32 %v7501_v25, %v24554_v4  ;;  %v18588_v25 = vld [vmem:[%s24071_s6 + $0x138] sm:$0xff]  }
 0x544   : > { %17038 = vmatpush3.bf16.msra.mxu0 %v18582_v50  ;;  %v7504_v50 = vmul.f32 %v22243_v14, %v24555_v43 }
 0x545   : > { %17039 = vmatprep.subr.bf16.mxu0 %v18583_v0 }
 0x546   : > { %v7507_v16 = vpack.c.bf16 %v7504_v50, %v7503_v20 }
 0x548   : > { %17040 = vmatpush3.bf16.msra.mxu0 %v18583_v0  ;;  %v7505_v0 = vmul.f32 %v22240_v56, %v24556_v30  ;;  %v7527_v43 = vshrl.u32 %v7507_v16, 16  ;;  %v7530_v27 = vshll.u32 %v7507_v16, 16 }
 0x549   : > { %17041 = vmatprep.subr.bf16.mxu0 %v18584_v40 }
 0x54a   : > { %v7508_v19 = vpack.c.bf16 %v7506_v59, %v7505_v0  ;;  %v7529_v59 = vrot.slane %v7527_v43, 2  ;;  %v7532_v20 = vrot.slane %v7530_v27, 3  ;;  %v18592_v27 = vld [vmem:[%s24071_s6 + $0x158] sm:$0xff]   ;;  %v18595_v43 = vld [vmem:[%s24071_s6 + $0x170] sm:$0xff]   ;;  %v7646_v0 = vld [vmem:[#allocation2] sm:$0xc0] }
 0x54c   : > { %17042 = vmatpush3.bf16.msra.mxu0 %v18584_v40  ;;  %v18587_v40 = vld [vmem:[%s24071_s6 + $0x130] sm:$0xff]   ;;  %v7535_v10 = vshrl.u32 %v7508_v19, 16  ;;  %v7538_v2 = vshll.u32 %v7508_v19, 16  ;;  %v7533_v19 = vor.u32 %v7532_v20, %v7529_v59 }
 0x54d   : > { %17043 = vmatprep.subr.bf16.mxu0 %v18585_v48  ;;  %v24559_v20 = vld [vmem:[#allocation43_spill] sm:$0xff] }
 0x54e   : > { %v7537_v31 = vrot.slane %v7535_v10, 2  ;;  %v7540_v35 = vrot.slane %v7538_v2, 3  ;;  %v18591_v2 = vld [vmem:[%s24071_s6 + $0x150] sm:$0xff]  }
 0x550   : > { %17044 = vmatpush3.bf16.msra.mxu0 %v18585_v48  ;;  %v18589_v48 = vld [vmem:[%s24071_s6 + $0x140] sm:$0xff]   ;;  %v7541_v50 = vor.u32 %v7540_v35, %v7537_v31  ;;  %v18594_v31 = vld [vmem:[%s24071_s6 + $0x168] sm:$0xff]  }
 0x551   : > { %17045 = vmatprep.subr.bf16.mxu0 %v18586_v60  ;;  %v18593_v35 = vld [vmem:[%s24071_s6 + $0x160] sm:$0xff]  }
 0x552   : > { %v7542_v10 = vsel %vm2529_vm10, %v7533_v19, %v7541_v50  ;;  %v7649_v19 = vmul.f32 %v22243_v14, %v24559_v20 }
 0x554   : > { %17046 = vmatpush3.bf16.msra.mxu0 %v18586_v60  ;;  %v18590_v60 = vld [vmem:[%s24071_s6 + $0x148] sm:$0xff]  }
 0x555   : > { %17047 = vmatprep.subr.bf16.mxu0 %v18587_v40 }
 0x558   : > { %17048 = vmatpush3.bf16.msra.mxu0 %v18587_v40  ;;  %v24557_v40 = vld [vmem:[#allocation44_spill] sm:$0xff] }
 0x559   : > { %17049 = vmatprep.subr.bf16.mxu0 %v18588_v25 }
 0x55c   : > { %17050 = vmatpush3.bf16.msra.mxu0 %v18588_v25  ;;  %v18596_v25 = vld [vmem:[%s24071_s6 + $0x178] sm:$0xff]  }
 0x55d   : > { %17055 = vmatprep.subr.bf16.mxu0 %v18589_v48 }
 0x55f   : > { %17052 = vmatmul.mubr.bf16.vlgmr.msra.gmra.mrb[136].mxu0 %v7396_v17  ;;  %v7647_v17 = vld [vmem:[#allocation2 + $0x30] sm:$0x7f] }
 0x560   : > { %17056 = vmatpush3.bf16.msra.mxu0 %v18589_v48  ;;  %17071 = vmatprep.mubr.bf16.mxu0 %v7542_v10  ;;  %v7651_v16 = vmul.f32 %v7647_v17, %v24557_v40  ;;  %v24558_v48 = vld [vmem:[#allocation42_spill] sm:$0xff] }
 0x561   : > { %17057 = vmatprep.subr.bf16.mxu0 %v18590_v60  ;;  %v7648_v59 = vmul.f32 %v7646_v0, %v24558_v48  ;;  %v18598_v0 = vld [vmem:[%s24071_s6 + $0x188] sm:$0xff]  }
 0x564   : > { %17058 = vmatpush3.bf16.msra.mxu0 %v18590_v60  ;;  %v24560_v60 = vld [vmem:[#allocation12_spill] sm:$0xff] }
 0x565   : > { %17059 = vmatprep.subr.bf16.mxu0 %v18591_v2  ;;  %v7650_v10 = vmul.f32 %v22240_v56, %v24560_v60 }
 0x568   : > { %17060 = vmatpush3.bf16.msra.mxu0 %v18591_v2  ;;  %v7653_v2 = vpack.c.bf16 %v7651_v16, %v7650_v10  ;;  %v18600_v16 = vld [vmem:[%s24071_s6 + $0x198] sm:$0xff]  }
 0x569   : > { %17061 = vmatprep.subr.bf16.mxu0 %v18592_v27 }
 0x56c   : > { %17062 = vmatpush3.bf16.msra.mxu0 %v18592_v27  ;;  %v18597_v27 = vld [vmem:[%s24071_s6 + $0x180] sm:$0xff]  }
 0x56d   : > { %17063 = vmatprep.subr.bf16.mxu0 %v18593_v35 }
 0x570   : > { %17064 = vmatpush3.bf16.msra.mxu0 %v18593_v35  ;;  %v7652_v35 = vpack.c.bf16 %v7649_v19, %v7648_v59  ;;  %v24561_v59 = vld [vmem:[#allocation39_spill] sm:$0xff]  ;;  %v24562_v19 = vld [vmem:[#allocation40_spill] sm:$0xff] }
 0x571   : > { %17065 = vmatprep.subr.bf16.mxu0 %v18594_v31  ;;  %v7782_v10 = vmul.f32 %v22243_v14, %v24562_v19 }
 0x572   : > { %v7673_v17 = vrot.slane %v7652_v35, 3  ;;  %v18603_v35 = vld [vmem:[%s24071_s6 + $0x1b0] sm:$0xff]  }
 0x574   : > { %17066 = vmatpush3.bf16.msra.mxu0 %v18594_v31  ;;  %v7674_v31 = vrot.slane %v7653_v2, 3  ;;  %v18602_v2 = vld [vmem:[%s24071_s6 + $0x1a8] sm:$0xff]  }
 0x575   : > { %17067 = vmatprep.subr.bf16.mxu0 %v18595_v43 }
 0x576   : > { %v7675_v40 = vsel %vm2480_vm14, %v7673_v17, %v7674_v31 }
 0x578   : > { %17068 = vmatpush3.bf16.msra.mxu0 %v18595_v43  ;;  %v18599_v43 = vld [vmem:[%s24071_s6 + $0x190] sm:$0xff]  }
 0x579   : > { %17069 = vmatprep.subr.bf16.mxu0 %v18596_v25 }
 0x57c   : > { %17070 = vmatpush3.bf16.msra.mxu0 %v18596_v25  ;;  %v7779_v25 = vld [vmem:[#allocation2] sm:$0x80] }
 0x57d   : > { %17075 = vmatprep.subr.bf16.mxu0 %v18597_v27 }
 0x57f   : > { %17072 = vmatmul.mubr.bf16.vlgmr.msra.gmra.mrb[136].mxu0 %v7541_v50  ;;  %v18601_v50 = vld [vmem:[%s24071_s6 + $0x1a0] sm:$0xff]  }
 0x580   : > { %17076 = vmatpush3.bf16.msra.mxu0 %v18597_v27  ;;  %17091 = vmatprep.mubr.bf16.mxu0 %v7675_v40  ;;  %v7781_v40 = vmul.f32 %v7779_v25, %v24561_v59  ;;  %v7816_v25 = vshll.u32 %v22260_v57, 16 }
 0x581   : > { %17077 = vmatprep.subr.bf16.mxu0 %v18598_v0 }
 0x582   : > { %v7785_v27 = vpack.c.bf16 %v7782_v10, %v7781_v40  ;;  %v7818_v10 = vrot.slane %v7816_v25, 4  ;;  %v24563_v25 = vld [vmem:[#allocation46_spill] sm:$0xff] }
 0x584   : > { %17078 = vmatpush3.bf16.msra.mxu0 %v18598_v0  ;;  %v7805_v17 = vshrl.u32 %v7785_v27, 16  ;;  %v7808_v0 = vshll.u32 %v7785_v27, 16  ;;  %v18605_v27 = vld [vmem:[%s24071_s6 + $0x1c0] sm:$0xff]  }
 0x585   : > { %17079 = vmatprep.subr.bf16.mxu0 %v18599_v43 }
 0x586   : > { %v7807_v19 = vrot.slane %v7805_v17, 3  ;;  %v7810_v40 = vrot.slane %v7808_v0, 4  ;;  %v18611_v17 = vld [vmem:[%s24071_s6 + $0x1f0] sm:$0xff]   ;;  %v18612_v0 = vld [vmem:[%s24071_s6 + $0x1f8] sm:$0xff]  }
 0x588   : > { %17080 = vmatpush3.bf16.msra.mxu0 %v18599_v43  ;;  %v7813_v43 = vshrl.u32 %v22260_v57, 16  ;;  %v7811_v20 = vor.u32 %v7810_v40, %v7807_v19  ;;  %v18606_v57 = vld [vmem:[%s24071_s6 + $0x1c8] sm:$0xff]   ;;  %v18608_v19 = vld [vmem:[%s24071_s6 + $0x1d8] sm:$0xff]   ;;  %v24564_v40 = vld [vmem:[#allocation45_spill] sm:$0xff] }
 0x589   : > { %17081 = vmatprep.subr.bf16.mxu0 %v18600_v16 }
 0x58c   : > { %17082 = vmatpush3.bf16.msra.mxu0 %v18600_v16  ;;  %v18604_v16 = vld [vmem:[%s24071_s6 + $0x1b8] sm:$0xff]  }
 0x58d   : > { %17083 = vmatprep.subr.bf16.mxu0 %v18601_v50 }
 0x590   : > { %17084 = vmatpush3.bf16.msra.mxu0 %v18601_v50  ;;  %v7815_v50 = vrot.slane %v7813_v43, 3  ;;  %v18613_v43 = vld [vmem:[%s24071_s6 + $0x200] sm:$0xff]  }
 0x591   : > { %17085 = vmatprep.subr.bf16.mxu0 %v18602_v2 }
 0x592   : > { %v7819_v60 = vor.u32 %v7818_v10, %v7815_v50  ;;  %v7929_v50 = vmul.f32 %v24564_v40, %v22240_v56  ;;  %v18614_v10 = vld [vmem:[%s24071_s6 + $0x208] sm:$0xff]   ;;  %v18616_v56 = vld [vmem:[%s24071_s6 + $0x218] sm:$0xff]  }
 0x594   : > { %17086 = vmatpush3.bf16.msra.mxu0 %v18602_v2  ;;  %v7820_v2 = vsel %vm2975_vm6, %v7811_v20, %v7819_v60  ;;  %v18610_v20 = vld [vmem:[%s24071_s6 + $0x1e8] sm:$0xff]  }
 0x595   : > { %17087 = vmatprep.subr.bf16.mxu0 %v18603_v35 }
 0x598   : > { %17088 = vmatpush3.bf16.msra.mxu0 %v18603_v35  ;;  %v18607_v35 = vld [vmem:[%s24071_s6 + $0x1d0] sm:$0xff]  }
 0x599   : > { %17089 = vmatprep.subr.bf16.mxu0 %v18604_v16 }
 0x59c   : > { %17090 = vmatpush3.bf16.msra.mxu0 %v18604_v16  ;;  %v7928_v16 = vmul.f32 %v24563_v25, %v22243_v14  ;;  %v18617_v14 = vld [vmem:[%s24071_s6 + $0x220] sm:$0xff]  }
 0x59d   : > { %17095 = vmatprep.subr.bf16.mxu0 %v18605_v27 }
 0x59f   : > { %17092 = vmatmul.mubr.bf16.vlgmr.msra.gmra.mrb[136].mxu0 %v7674_v31  ;;  %v18609_v31 = vld [vmem:[%s24071_s6 + $0x1e0] sm:$0xff]  }
 0x5a0   : > { %17096 = vmatpush3.bf16.msra.mxu0 %v18605_v27  ;;  %17111 = vmatprep.mubr.bf16.mxu0 %v7820_v2  ;;  %v7932_v27 = vpack.c.bf16 %v7929_v50, %v7928_v16  ;;  %v18619_v2 = vld [vmem:[%s24071_s6 + $0x230] sm:$0xff]   ;;  %v18622_v16 = vld [vmem:[%s24071_s6 + $0x248] sm:$0xff]  }
 0x5a1   : > { %17097 = vmatprep.subr.bf16.mxu0 %v18606_v57  ;;  %v18623_v50 = vld [vmem:[%s24071_s6 + $0x250] sm:$0xff]  }
 0x5a4   : > { %17098 = vmatpush3.bf16.msra.mxu0 %v18606_v57  ;;  %v18615_v57 = vld [vmem:[%s24071_s6 + $0x210] sm:$0xff]  }
 0x5a5   : > { %17099 = vmatprep.subr.bf16.mxu0 %v18607_v35 }
 0x5a8   : > { %17100 = vmatpush3.bf16.msra.mxu0 %v18607_v35  ;;  %v18620_v35 = vld [vmem:[%s24071_s6 + $0x238] sm:$0xff]  }
 0x5a9   : > { %17101 = vmatprep.subr.bf16.mxu0 %v18608_v19 }
 0x5ac   : > { %17102 = vmatpush3.bf16.msra.mxu0 %v18608_v19  ;;  %v7927_v19 = vld [vmem:[#allocation2 + $0x40] sm:$0x1] }
 0x5ad   : > { %17103 = vmatprep.subr.bf16.mxu0 %v18609_v31 }
 0x5b0   : > { %17104 = vmatpush3.bf16.msra.mxu0 %v18609_v31  ;;  %v7931_v31 = vmul.f32 0.0, %v7927_v19  ;;  %v18635_v19 = vld [vmem:[%s24071_s6 + $0x2b0] sm:$0xff]  }
 0x5b1   : > { %17105 = vmatprep.subr.bf16.mxu0 %v18610_v20 }
 0x5b4   : > { %17106 = vmatpush3.bf16.msra.mxu0 %v18610_v20  ;;  %v18621_v20 = vld [vmem:[%s24071_s6 + $0x240] sm:$0xff]  }
 0x5b5   : > { %17107 = vmatprep.subr.bf16.mxu0 %v18611_v17 }
 0x5b8   : > { %17108 = vmatpush3.bf16.msra.mxu0 %v18611_v17  ;;  %v24565_v17 = vld [vmem:[#allocation48_spill] sm:$0xff] }
 0x5b9   : > { %17109 = vmatprep.subr.bf16.mxu0 %v18612_v0 }
 0x5bc   : > { %17110 = vmatpush3.bf16.msra.mxu0 %v18612_v0  ;;  %v7930_v0 = vmul.f32 %v24565_v17, %v22247_v23  ;;  %v18624_v23 = vld [vmem:[%s24071_s6 + $0x258] sm:$0xff]  }
 0x5bd   : > { %17115 = vmatprep.subr.bf16.mxu0 %v18613_v43 }
 0x5bf   : > { %17112 = vmatmul.mubr.bf16.vlgmr.msra.gmra.mrb[136].mxu0 %v7819_v60  ;;  %v18618_v60 = vld [vmem:[%s24071_s6 + $0x228] sm:$0xff]  }
 0x5c0   : > { %17116 = vmatpush3.bf16.msra.mxu0 %v18613_v43  ;;  %17131 = vmatprep.mubr.bf16.mxu0 %v7932_v27  ;;  %v7933_v43 = vpack.c.bf16 %v7931_v31, %v7930_v0  ;;  %v18627_v27 = vld [vmem:[%s24071_s6 + $0x270] sm:$0xff]   ;;  %v18636_v31 = vld [vmem:[%s24071_s6 + $0x2b8] sm:$0xff]   ;;  %v18638_v0 = vld [vmem:[%s24071_s6 + $0x2c8] sm:$0xff]  }
 0x5c1   : > { %17117 = vmatprep.subr.bf16.mxu0 %v18614_v10 }
 0x5c4   : > { %17118 = vmatpush3.bf16.msra.mxu0 %v18614_v10  ;;  %v18625_v10 = vld [vmem:[%s24071_s6 + $0x260] sm:$0xff]  }
 0x5c5   : > { %17119 = vmatprep.subr.bf16.mxu0 %v18615_v57 }
 0x5c8   : > { %17120 = vmatpush3.bf16.msra.mxu0 %v18615_v57  ;;  %v18628_v57 = vld [vmem:[%s24071_s6 + $0x278] sm:$0xff]  }
 0x5c9   : > { %17121 = vmatprep.subr.bf16.mxu0 %v18616_v56 }
 0x5cc   : > { %17122 = vmatpush3.bf16.msra.mxu0 %v18616_v56  ;;  %v18629_v56 = vld [vmem:[%s24071_s6 + $0x280] sm:$0xff]  }
 0x5cd   : > { %17123 = vmatprep.subr.bf16.mxu0 %v18617_v14 }
 0x5d0   : > { %17124 = vmatpush3.bf16.msra.mxu0 %v18617_v14  ;;  %v8089_v14 = vshrl.u32 %v22287_v55, 16  ;;  %v18632_v55 = vld [vmem:[%s24071_s6 + $0x298] sm:$0xff]  }
 0x5d1   : > { %17125 = vmatprep.subr.bf16.mxu0 %v18618_v60 }
 0x5d4   : > { %17126 = vmatpush3.bf16.msra.mxu0 %v18618_v60  ;;  %v8091_v60 = vor.u32 %v8089_v14, %v22306_v5  ;;  %v18633_v5 = vld [vmem:[%s24071_s6 + $0x2a0] sm:$0xff]   ;;  %v18652_v14 = vld [vmem:[%s24071_s6 + $0x338] sm:$0xff]  }
 0x5d5   : > { %17127 = vmatprep.subr.bf16.mxu0 %v18619_v2 }
 0x5d8   : > { %17128 = vmatpush3.bf16.msra.mxu0 %v18619_v2  ;;  %v18630_v2 = vld [vmem:[%s24071_s6 + $0x288] sm:$0xff]  }
 0x5d9   : > { %17129 = vmatprep.subr.bf16.mxu0 %v18620_v35 }
 0x5dc   : > { %17130 = vmatpush3.bf16.msra.mxu0 %v18620_v35  ;;  %v18631_v35 = vld [vmem:[%s24071_s6 + $0x290] sm:$0xff]  }
 0x5dd   : > { %17135 = vmatprep.subr.bf16.mxu0 %v18621_v20 }
 0x5df   : > { %17132 = vmatmul.mubr.bf16.vlgmr.msra.gmra.mrb[136].mxu0 %v7933_v43  ;;  %v18639_v43 = vld [vmem:[%s24071_s6 + $0x2d0] sm:$0xff]  }
 0x5e0   : > { %17136 = vmatpush3.bf16.msra.mxu0 %v18621_v20  ;;  %17151 = vmatprep.mubr.bf16.mxu0 %v22320_v62  ;;  %v18626_v62 = vld [vmem:[%s24071_s6 + $0x268] sm:$0xff]   ;;  %v18637_v20 = vld [vmem:[%s24071_s6 + $0x2c0] sm:$0xff]  }
 0x5e1   : > { %17137 = vmatprep.subr.bf16.mxu0 %v18622_v16 }
 0x5e4   : > { %17138 = vmatpush3.bf16.msra.mxu0 %v18622_v16  ;;  %v18640_v16 = vld [vmem:[%s24071_s6 + $0x2d8] sm:$0xff]  }
 0x5e5   : > { %17139 = vmatprep.subr.bf16.mxu0 %v18623_v50 }
 0x5e8   : > { %17140 = vmatpush3.bf16.msra.mxu0 %v18623_v50  ;;  %v18643_v50 = vld [vmem:[%s24071_s6 + $0x2f0] sm:$0xff]  }
 0x5e9   : > { %17141 = vmatprep.subr.bf16.mxu0 %v18624_v23 }
 0x5ec   : > { %17142 = vmatpush3.bf16.msra.mxu0 %v18624_v23  ;;  %v18644_v23 = vld [vmem:[%s24071_s6 + $0x2f8] sm:$0xff]  }
 0x5ed   : > { %17143 = vmatprep.subr.bf16.mxu0 %v18625_v10 }
 0x5f0   : > { %17144 = vmatpush3.bf16.msra.mxu0 %v18625_v10  ;;  %v18645_v10 = vld [vmem:[%s24071_s6 + $0x300] sm:$0xff]  }
 0x5f1   : > { %17145 = vmatprep.subr.bf16.mxu0 %v18626_v62 }
 0x5f4   : > { %17146 = vmatpush3.bf16.msra.mxu0 %v18626_v62  ;;  %v18646_v62 = vld [vmem:[%s24071_s6 + $0x308] sm:$0xff]  }
 0x5f5   : > { %17147 = vmatprep.subr.bf16.mxu0 %v18627_v27 }
 0x5f8   : > { %17148 = vmatpush3.bf16.msra.mxu0 %v18627_v27  ;;  %v18647_v27 = vld [vmem:[%s24071_s6 + $0x310] sm:$0xff]  }
 0x5f9   : > { %17149 = vmatprep.subr.bf16.mxu0 %v18628_v57 }
 0x5fc   : > { %17150 = vmatpush3.bf16.msra.mxu0 %v18628_v57  ;;  %v18648_v57 = vld [vmem:[%s24071_s6 + $0x318] sm:$0xff]  }
 0x5fd   : > { %17155 = vmatprep.subr.bf16.mxu0 %v18629_v56 }
 0x5ff   : > { %17152 = vmatmul.mubr.bf16.vlgmr.msra.gmra.mrb[136].mxu0 %v8091_v60  ;;  %v18653_v60 = vld [vmem:[%s24071_s6 + $0x340] sm:$0xff]  }
 0x600   : > { %17156 = vmatpush3.bf16.msra.mxu0 %v18629_v56  ;;  %17171 = vmatprep.mubr.bf16.mxu0 %v22314_v28  ;;  %v18634_v28 = vld [vmem:[%s24071_s6 + $0x2a8] sm:$0xff]   ;;  %v18651_v56 = vld [vmem:[%s24071_s6 + $0x330] sm:$0xff]  }
 0x601   : > { %17157 = vmatprep.subr.bf16.mxu0 %v18630_v2 }
 0x604   : > { %17158 = vmatpush3.bf16.msra.mxu0 %v18630_v2  ;;  %v18654_v2 = vld [vmem:[%s24071_s6 + $0x348] sm:$0xff]  }
 0x605   : > { %17159 = vmatprep.subr.bf16.mxu0 %v18631_v35 }
 0x608   : > { %17160 = vmatpush3.bf16.msra.mxu0 %v18631_v35  ;;  %v18655_v35 = vld [vmem:[%s24071_s6 + $0x350] sm:$0xff]  }
 0x609   : > { %17161 = vmatprep.subr.bf16.mxu0 %v18632_v55 }
 0x60c   : > { %17162 = vmatpush3.bf16.msra.mxu0 %v18632_v55  ;;  %v18656_v55 = vld [vmem:[%s24071_s6 + $0x358] sm:$0xff]  }
 0x60d   : > { %17163 = vmatprep.subr.bf16.mxu0 %v18633_v5 }
 0x610   : > { %17164 = vmatpush3.bf16.msra.mxu0 %v18633_v5  ;;  %v18659_v5 = vld [vmem:[%s24071_s6 + $0x370] sm:$0xff]  }
 0x611   : > { %17165 = vmatprep.subr.bf16.mxu0 %v18634_v28 }
 0x614   : > { %17166 = vmatpush3.bf16.msra.mxu0 %v18634_v28  ;;  %v18660_v28 = vld [vmem:[%s24071_s6 + $0x378] sm:$0xff]  }
 0x615   : > { %17167 = vmatprep.subr.bf16.mxu0 %v18635_v19 }
 0x618   : > { %17168 = vmatpush3.bf16.msra.mxu0 %v18635_v19  ;;  %v18661_v19 = vld [vmem:[%s24071_s6 + $0x380] sm:$0xff]  }
 0x619   : > { %17169 = vmatprep.subr.bf16.mxu0 %v18636_v31 }
 0x61c   : > { %17170 = vmatpush3.bf16.msra.mxu0 %v18636_v31  ;;  %v18662_v31 = vld [vmem:[%s24071_s6 + $0x388] sm:$0xff]  }
 0x61d   : > { %17175 = vmatprep.subr.bf16.mxu0 %v18637_v20 }
 0x61f   : > { %17172 = vmatmul.mubr.bf16.vlgmr.msra.gmra.mrb[136].mxu0 %v22303_v45  ;;  %v18641_v45 = vld [vmem:[%s24071_s6 + $0x2e0] sm:$0xff]  }
 0x620   : > { %17176 = vmatpush3.bf16.msra.mxu0 %v18637_v20  ;;  %17191 = vmatprep.mubr.bf16.mxu0 %v22345_v1  ;;  %v18642_v1 = vld [vmem:[%s24071_s6 + $0x2e8] sm:$0xff]   ;;  %v18663_v20 = vld [vmem:[%s24071_s6 + $0x390] sm:$0xff]  }
 0x621   : > { %17177 = vmatprep.subr.bf16.mxu0 %v18638_v0 }
 0x624   : > { %17178 = vmatpush3.bf16.msra.mxu0 %v18638_v0  ;;  %v18664_v0 = vld [vmem:[%s24071_s6 + $0x398] sm:$0xff]  }
 0x625   : > { %17179 = vmatprep.subr.bf16.mxu0 %v18639_v43 }
 0x628   : > { %17180 = vmatpush3.bf16.msra.mxu0 %v18639_v43  ;;  %v18667_v43 = vld [vmem:[%s24071_s6 + $0x3b0] sm:$0xff]  }
 0x629   : > { %17181 = vmatprep.subr.bf16.mxu0 %v18640_v16 }
 0x62c   : > { %17182 = vmatpush3.bf16.msra.mxu0 %v18640_v16  ;;  %v18668_v16 = vld [vmem:[%s24071_s6 + $0x3b8] sm:$0xff]  }
 0x62d   : > { %17183 = vmatprep.subr.bf16.mxu0 %v18641_v45 }
 0x630   : > { %17184 = vmatpush3.bf16.msra.mxu0 %v18641_v45  ;;  %v18669_v45 = vld [vmem:[%s24071_s6 + $0x3c0] sm:$0xff]  }
 0x631   : > { %17185 = vmatprep.subr.bf16.mxu0 %v18642_v1 }
 0x634   : > { %17186 = vmatpush3.bf16.msra.mxu0 %v18642_v1  ;;  %v18670_v1 = vld [vmem:[%s24071_s6 + $0x3c8] sm:$0xff]  }
 0x635   : > { %17187 = vmatprep.subr.bf16.mxu0 %v18643_v50 }
 0x638   : > { %17188 = vmatpush3.bf16.msra.mxu0 %v18643_v50  ;;  %v18671_v50 = vld [vmem:[%s24071_s6 + $0x3d0] sm:$0xff]  }
 0x639   : > { %17189 = vmatprep.subr.bf16.mxu0 %v18644_v23 }
 0x63c   : > { %17190 = vmatpush3.bf16.msra.mxu0 %v18644_v23  ;;  %v18672_v23 = vld [vmem:[%s24071_s6 + $0x3d8] sm:$0xff]  }
 0x63d   : > { %17195 = vmatprep.subr.bf16.mxu0 %v18645_v10 }
 0x63f   : > { %17192 = vmatmul.mubr.bf16.vlgmr.msra.gmra.mrb[136].mxu0 %v22336_v12  ;;  %v18649_v12 = vld [vmem:[%s24071_s6 + $0x320] sm:$0xff]  }
 0x640   : > { %17196 = vmatpush3.bf16.msra.mxu0 %v18645_v10  ;;  %17211 = vmatprep.mubr.bf16.mxu0 %v22333_v51  ;;  %v18650_v51 = vld [vmem:[%s24071_s6 + $0x328] sm:$0xff]   ;;  %v18675_v10 = vld [vmem:[%s24071_s6 + $0x3f0] sm:$0xff]  }
 0x641   : > { %17197 = vmatprep.subr.bf16.mxu0 %v18646_v62 }
 0x644   : > { %17198 = vmatpush3.bf16.msra.mxu0 %v18646_v62  ;;  %v18676_v62 = vld [vmem:[%s24071_s6 + $0x3f8] sm:$0xff]  }
 0x645   : > { %17199 = vmatprep.subr.bf16.mxu0 %v18647_v27 }
 0x648   : > { %17200 = vmatpush3.bf16.msra.mxu0 %v18647_v27  ;;  %v22773_v27 = vld [vmem:[#allocation2 + $0x30] sm:$0xff] }
 0x649   : > { %17201 = vmatprep.subr.bf16.mxu0 %v18648_v57 }
 0x64c   : > { %17202 = vmatpush3.bf16.msra.mxu0 %v18648_v57  ;;  %v18677_v57 = vld [vmem:[%s24071_s6 + $0x400] sm:$0xff]  }
 0x64d   : > { %17203 = vmatprep.subr.bf16.mxu0 %v18649_v12 }
 0x650   : > { %17204 = vmatpush3.bf16.msra.mxu0 %v18649_v12  ;;  %v9025_v12 = vld [vmem:[#allocation2 + $0x20] sm:$0xff] }
 0x651   : > { %17205 = vmatprep.subr.bf16.mxu0 %v18650_v51 }
 0x654   : > { %17206 = vmatpush3.bf16.msra.mxu0 %v18650_v51  ;;  %v24566_v51 = vld [vmem:[#allocation69_spill] sm:$0xff] }
 0x655   : > { %17207 = vmatprep.subr.bf16.mxu0 %v18651_v56 }
 0x658   : > { %17208 = vmatpush3.bf16.msra.mxu0 %v18651_v56  ;;  %v9030_v56 = vmul.f32 %v24566_v51, %v22773_v27  ;;  %v24600_v51 = vld [vmem:[#allocation17_spill] sm:$0xff] }
 0x659   : > { %17209 = vmatprep.subr.bf16.mxu0 %v18652_v14 }
 0x65c   : > { %17210 = vmatpush3.bf16.msra.mxu0 %v18652_v14  ;;  %v24567_v14 = vld [vmem:[#allocation47_spill] sm:$0xff] }
 0x65d   : > { %17215 = vmatprep.subr.bf16.mxu0 %v18653_v60 }
 0x65f   : > { %17212 = vmatmul.mubr.bf16.vlgmr.msra.gmra.mrb[136].mxu0 %v22322_v26  ;;  %v18657_v26 = vld [vmem:[%s24071_s6 + $0x360] sm:$0xff]  }
 0x660   : > { %17216 = vmatpush3.bf16.msra.mxu0 %v18653_v60  ;;  %17231 = vmatprep.mubr.bf16.mxu0 %v22372_v7  ;;  %v18658_v7 = vld [vmem:[%s24071_s6 + $0x368] sm:$0xff]   ;;  %v9029_v60 = vmul.f32 %v24567_v14, %v9025_v12  ;;  %v24572_v12 = vld [vmem:[#allocation71_spill] sm:$0xff] }
 0x661   : > { %17217 = vmatprep.subr.bf16.mxu0 %v18654_v2 }
 0x664   : > { %17218 = vmatpush3.bf16.msra.mxu0 %v18654_v2  ;;  %v18678_v2 = vld [vmem:[%s24071_s6 + $0x408] sm:$0xff]  }
 0x665   : > { %17219 = vmatprep.subr.bf16.mxu0 %v18655_v35 }
 0x668   : > { %17220 = vmatpush3.bf16.msra.mxu0 %v18655_v35  ;;  %v9033_v35 = vpack.c.bf16 %v9030_v56, %v9029_v60 }
 0x669   : > { %17221 = vmatprep.subr.bf16.mxu0 %v18656_v55 }
 0x66c   : > { %17222 = vmatpush3.bf16.msra.mxu0 %v18656_v55  ;;  %v18679_v55 = vld [vmem:[%s24071_s6 + $0x410] sm:$0xff]  }
 0x66d   : > { %17223 = vmatprep.subr.bf16.mxu0 %v18657_v26 }
 0x670   : > { %17224 = vmatpush3.bf16.msra.mxu0 %v18657_v26  ;;  %v18680_v26 = vld [vmem:[%s24071_s6 + $0x418] sm:$0xff]  }
 0x671   : > { %17225 = vmatprep.subr.bf16.mxu0 %v18658_v7 }
 0x674   : > { %17226 = vmatpush3.bf16.msra.mxu0 %v18658_v7  ;;  %v18681_v7 = vld [vmem:[%s24071_s6 + $0x420] sm:$0xff]  }
 0x675   : > { %17227 = vmatprep.subr.bf16.mxu0 %v18659_v5 }
 0x678   : > { %17228 = vmatpush3.bf16.msra.mxu0 %v18659_v5  ;;  %v24568_v5 = vld [vmem:[#allocation66_spill] sm:$0xff] }
 0x679   : > { %17229 = vmatprep.subr.bf16.mxu0 %v18660_v28 }
 0x67c   : > { %17230 = vmatpush3.bf16.msra.mxu0 %v18660_v28  ;;  %v9156_v28 = vmul.f32 %v22773_v27, %v24568_v5 }
 0x67d   : > { %17235 = vmatprep.subr.bf16.mxu0 %v18661_v19 }
 0x67f   : > { %17232 = vmatmul.mubr.bf16.vlgmr.msra.gmra.mrb[136].mxu0 %v22357_v49  ;;  %v18665_v49 = vld [vmem:[%s24071_s6 + $0x3a0] sm:$0xff]  }
 0x680   : > { %17236 = vmatpush3.bf16.msra.mxu0 %v18661_v19  ;;  %17251 = vmatprep.mubr.bf16.mxu0 %v22361_v13  ;;  %v18666_v13 = vld [vmem:[%s24071_s6 + $0x3a8] sm:$0xff]   ;;  %v9154_v19 = vld [vmem:[#allocation2 + $0x50] sm:$0x3] }
 0x681   : > { %17237 = vmatprep.subr.bf16.mxu0 %v18662_v31 }
 0x684   : > { %17238 = vmatpush3.bf16.msra.mxu0 %v18662_v31  ;;  %v18682_v31 = vld [vmem:[%s24071_s6 + $0x428] sm:$0xff]  }
 0x685   : > { %17239 = vmatprep.subr.bf16.mxu0 %v18663_v20 }
 0x688   : > { %17240 = vmatpush3.bf16.msra.mxu0 %v18663_v20  ;;  %v24569_v20 = vld [vmem:[#allocation7_spill] sm:$0xff] }
 0x689   : > { %17241 = vmatprep.subr.bf16.mxu0 %v18664_v0 }
 0x68c   : > { %17242 = vmatpush3.bf16.msra.mxu0 %v18664_v0 }
 0x68d   : > { %17243 = vmatprep.subr.bf16.mxu0 %v18665_v49 }
 0x690   : > { %17244 = vmatpush3.bf16.msra.mxu0 %v18665_v49  ;;  %v22800_v49 = vld [vmem:[#allocation2 + $0x40] sm:$0xff] }
 0x691   : > { %17245 = vmatprep.subr.bf16.mxu0 %v18666_v13  ;;  %v9031_v56 = vmul.f32 %v22800_v49, %v24572_v12 }
 0x694   : > { %17246 = vmatpush3.bf16.msra.mxu0 %v18666_v13  ;;  %v24570_v13 = vld [vmem:[#allocation67_spill] sm:$0xff] }
 0x695   : > { %17247 = vmatprep.subr.bf16.mxu0 %v18667_v43 }
 0x698   : > { %17248 = vmatpush3.bf16.msra.mxu0 %v18667_v43  ;;  %v9157_v43 = vmul.f32 %v22800_v49, %v24570_v13 }
 0x699   : > { %17249 = vmatprep.subr.bf16.mxu0 %v18668_v16 }
 0x69c   : > { %17250 = vmatpush3.bf16.msra.mxu0 %v18668_v16  ;;  %v24571_v16 = vld [vmem:[#allocation68_spill] sm:$0xff] }
 0x69d   : > { %17255 = vmatprep.subr.bf16.mxu0 %v18669_v45 }
 0x69f   : > { %17252 = vmatmul.mubr.bf16.vlgmr.msra.gmra.mrb[136].mxu0 %v22352_v39  ;;  %v18673_v39 = vld [vmem:[%s24071_s6 + $0x3e0] sm:$0xff]  }
 0x6a0   : > { %17256 = vmatpush3.bf16.msra.mxu0 %v18669_v45  ;;  %17271 = vmatprep.mubr.bf16.mxu0 %v22383_v37  ;;  %v18674_v37 = vld [vmem:[%s24071_s6 + $0x3e8] sm:$0xff]   ;;  %v9158_v45 = vmul.f32 %v9154_v19, %v24571_v16  ;;  %v18687_v19 = vld [vmem:[%s24071_s6 + $0x450] sm:$0xff]  }
 0x6a1   : > { %17257 = vmatprep.subr.bf16.mxu0 %v18670_v1 }
 0x6a4   : > { %17258 = vmatpush3.bf16.msra.mxu0 %v18670_v1 }
 0x6a5   : > { %17259 = vmatprep.subr.bf16.mxu0 %v18671_v50 }
 0x6a8   : > { %17260 = vmatpush3.bf16.msra.mxu0 %v18671_v50  ;;  %v18683_v50 = vld [vmem:[%s24071_s6 + $0x430] sm:$0xff]  }
 0x6a9   : > { %17261 = vmatprep.subr.bf16.mxu0 %v18672_v23 }
 0x6ac   : > { %17262 = vmatpush3.bf16.msra.mxu0 %v18672_v23  ;;  %v9160_v23 = vpack.c.bf16 %v9158_v45, %v9157_v43  ;;  %v18690_v43 = vld [vmem:[%s24071_s6 + $0x468] sm:$0xff]   ;;  %v9297_v45 = vld [vmem:[#allocation2 + $0x50] sm:$0x7] }
 0x6ad   : > { %17263 = vmatprep.subr.bf16.mxu0 %v18673_v39 }
 0x6b0   : > { %17264 = vmatpush3.bf16.msra.mxu0 %v18673_v39 }
 0x6b1   : > { %17265 = vmatprep.subr.bf16.mxu0 %v18674_v37 }
 0x6b4   : > { %17266 = vmatpush3.bf16.msra.mxu0 %v18674_v37  ;;  %v18684_v37 = vld [vmem:[%s24071_s6 + $0x438] sm:$0xff]  }
 0x6b5   : > { %17267 = vmatprep.subr.bf16.mxu0 %v18675_v10 }
 0x6b8   : > { %17268 = vmatpush3.bf16.msra.mxu0 %v18675_v10  ;;  %v9028_v10 = vld [vmem:[#allocation2 + $0x50] sm:$0x1] }
 0x6b9   : > { %17269 = vmatprep.subr.bf16.mxu0 %v18676_v62  ;;  %v9032_v60 = vmul.f32 0.0, %v9028_v10  ;;  %v9296_v10 = vld [vmem:[#allocation2 + $0x20] sm:$0xfc] }
 0x6bc   : > { %17270 = vmatpush3.bf16.msra.mxu0 %v18676_v62 }
 0x6bd   : > { %17275 = vmatprep.subr.bf16.mxu0 %v18677_v57 }
 0x6bf   : > { %17272 = vmatmul.mubr.bf16.vlgmr.msra.gmra.mrb[136].mxu0 %v22377_v32  ;;  %v9153_v32 = vld [vmem:[#allocation2 + $0x20] sm:$0xfe] }
 0x6c0   : > { %17276 = vmatpush3.bf16.msra.mxu0 %v18677_v57  ;;  %17291 = vmatprep.mubr.bf16.mxu0 %v9033_v35  ;;  %v9155_v0 = vmul.f32 %v9153_v32, %v24569_v20  ;;  %v9186_v57 = vshll.u32 %v9160_v23, 16  ;;  %v18686_v32 = vld [vmem:[%s24071_s6 + $0x448] sm:$0xff]  }
 0x6c1   : > { %17277 = vmatprep.subr.bf16.mxu0 %v18678_v2 }
 0x6c2   : > { %v9159_v1 = vpack.c.bf16 %v9156_v28, %v9155_v0  ;;  %v18689_v0 = vld [vmem:[%s24071_s6 + $0x460] sm:$0xff]  }
 0x6c4   : > { %17278 = vmatpush3.bf16.msra.mxu0 %v18678_v2  ;;  %v9181_v39 = vshll.u32 %v9159_v1, 16  ;;  %v18685_v2 = vld [vmem:[%s24071_s6 + $0x440] sm:$0xff]   ;;  %v9179_v35 = vshrl.u32 %v9159_v1, 16  ;;  %v18691_v1 = vld [vmem:[%s24071_s6 + $0x470] sm:$0xff]  }
 0x6c5   : > { %17279 = vmatprep.subr.bf16.mxu0 %v18679_v55 }
 0x6c6   : > { %v9183_v62 = vrot.slane %v9181_v39, 1  ;;  %v24574_v39 = vld [vmem:[#allocation26_spill] sm:$0xff] }
 0x6c8   : > { %17280 = vmatpush3.bf16.msra.mxu0 %v18679_v55  ;;  %v9184_v55 = vor.u32 %v9183_v62, %v9179_v35  ;;  %v18692_v62 = vld [vmem:[%s24071_s6 + $0x478] sm:$0xff]  }
 0x6c9   : > { %17281 = vmatprep.subr.bf16.mxu0 %v18680_v26 }
 0x6cc   : > { %17282 = vmatpush3.bf16.msra.mxu0 %v18680_v26  ;;  %v9188_v26 = vrot.slane %v9186_v57, 1  ;;  %v24575_v57 = vld [vmem:[#allocation25_spill] sm:$0xff] }
 0x6cd   : > { %17283 = vmatprep.subr.bf16.mxu0 %v18681_v7 }
 0x6ce   : > { %v9189_v28 = vsel %vm24573_vm13, %v9184_v55, %v9188_v26  ;;  %v18693_v55 = vld [vmem:[%s24071_s6 + $0x480] sm:$0xff]  }
 0x6d0   : > { %17284 = vmatpush3.bf16.msra.mxu0 %v18681_v7  ;;  %v9034_v7 = vpack.c.bf16 %v9032_v60, %v9031_v56  ;;  %v9299_v56 = vmul.f32 %v22773_v27, %v24575_v57  ;;  %v24576_v60 = vld [vmem:[#allocation70_spill] sm:$0xff]  ;;  %v18716_v57 = vld [vmem:[%s24071_s6 + $0x538] sm:$0xff]  }
 0x6d1   : > { %17285 = vmatprep.subr.bf16.mxu0 %v18682_v31 }
 0x6d4   : > { %17286 = vmatpush3.bf16.msra.mxu0 %v18682_v31  ;;  %v18688_v31 = vld [vmem:[%s24071_s6 + $0x458] sm:$0xff]  }
 0x6d5   : > { %17287 = vmatprep.subr.bf16.mxu0 %v18683_v50 }
 0x6d8   : > { %17288 = vmatpush3.bf16.msra.mxu0 %v18683_v50  ;;  %v9300_v50 = vmul.f32 %v22800_v49, %v24463_v11 }
 0x6d9   : > { %17289 = vmatprep.subr.bf16.mxu0 %v18684_v37 }
 0x6dc   : > { %17290 = vmatpush3.bf16.msra.mxu0 %v18684_v37  ;;  %v9301_v37 = vmul.f32 %v9297_v45, %v24574_v39  ;;  %v18695_v45 = vld [vmem:[%s24071_s6 + $0x490] sm:$0xff]  }
 0x6dd   : > { %17295 = vmatprep.subr.bf16.mxu0 %v18685_v2 }
 0x6de   : > { %v9303_v35 = vpack.c.bf16 %v9301_v37, %v9300_v50  ;;  %v24577_v50 = vld [vmem:[#allocation23_spill] sm:$0xff] }
 0x6df   : > { %17292 = vmatmul.mubr.bf16.vlgmr.msra.gmra.mrb[136].mxu0 %v9034_v7  ;;  %v9433_v37 = vmul.f32 %v22800_v49, %v24577_v50 }
 0x6e0   : > { %17296 = vmatpush3.bf16.msra.mxu0 %v18685_v2  ;;  %17311 = vmatprep.mubr.bf16.mxu0 %v9189_v28  ;;  %v9298_v2 = vmul.f32 %v9296_v10, %v24576_v60  ;;  %v9324_v28 = vrot.slane %v9303_v35, 1  ;;  %v24578_v10 = vld [vmem:[#allocation24_spill] sm:$0xff]  ;;  %v24579_v35 = vld [vmem:[#allocation21_spill] sm:$0xff] }
 0x6e1   : > { %17297 = vmatprep.subr.bf16.mxu0 %v18686_v32 }
 0x6e2   : > { %v9302_v7 = vpack.c.bf16 %v9299_v56, %v9298_v2  ;;  %v9429_v56 = vld [vmem:[#allocation2 + $0x20] sm:$0xf8]  ;;  %v18698_v2 = vld [vmem:[%s24071_s6 + $0x4a8] sm:$0xff]  }
 0x6e4   : > { %17298 = vmatpush3.bf16.msra.mxu0 %v18686_v32  ;;  %v9190_v32 = vshrl.u32 %v9160_v23, 16  ;;  %v18696_v23 = vld [vmem:[%s24071_s6 + $0x498] sm:$0xff]  }
 0x6e5   : > { %17299 = vmatprep.subr.bf16.mxu0 %v18687_v19 }
 0x6e8   : > { %17300 = vmatpush3.bf16.msra.mxu0 %v18687_v19  ;;  %v9192_v19 = vor.u32 %v9190_v32, %v9188_v26  ;;  %v9430_v26 = vld [vmem:[#allocation2 + $0x50] sm:$0xf] }
 0x6e9   : > { %17301 = vmatprep.subr.bf16.mxu0 %v18688_v31 }
 0x6ec   : > { %17302 = vmatpush3.bf16.msra.mxu0 %v18688_v31  ;;  %v9323_v31 = vrot.slane %v9302_v7, 1  ;;  %v24580_v7 = vld [vmem:[#allocation20_spill] sm:$0xff] }
 0x6ed   : > { %17303 = vmatprep.subr.bf16.mxu0 %v18689_v0  ;;  %v9431_v32 = vmul.f32 %v9429_v56, %v24580_v7 }
 0x6f0   : > { %17304 = vmatpush3.bf16.msra.mxu0 %v18689_v0  ;;  %v18694_v0 = vld [vmem:[%s24071_s6 + $0x488] sm:$0xff]  }
 0x6f1   : > { %17305 = vmatprep.subr.bf16.mxu0 %v18690_v43 }
 0x6f4   : > { %17306 = vmatpush3.bf16.msra.mxu0 %v18690_v43  ;;  %v9325_v43 = vsel %vm1859_vm3, %v9323_v31, %v9324_v28  ;;  %v18699_v31 = vld [vmem:[%s24071_s6 + $0x4b0] sm:$0xff]  }
 0x6f5   : > { %17307 = vmatprep.subr.bf16.mxu0 %v18691_v1 }
 0x6f8   : > { %17308 = vmatpush3.bf16.msra.mxu0 %v18691_v1  ;;  %v18697_v1 = vld [vmem:[%s24071_s6 + $0x4a0] sm:$0xff]  }
 0x6f9   : > { %17309 = vmatprep.subr.bf16.mxu0 %v18692_v62 }
 0x6fc   : > { %17310 = vmatpush3.bf16.msra.mxu0 %v18692_v62  ;;  %v9434_v62 = vmul.f32 %v9430_v26, %v24578_v10 }
 0x6fd   : > { %17315 = vmatprep.subr.bf16.mxu0 %v18693_v55 }
 0x6ff   : > { %17312 = vmatmul.mubr.bf16.vlgmr.msra.gmra.mrb[136].mxu0 %v9192_v19  ;;  %v9436_v19 = vpack.c.bf16 %v9434_v62, %v9433_v37 }
 0x700   : > { %17316 = vmatpush3.bf16.msra.mxu0 %v18693_v55  ;;  %17331 = vmatprep.mubr.bf16.mxu0 %v9325_v43  ;;  %v9432_v55 = vmul.f32 %v22773_v27, %v24579_v35 }
 0x701   : > { %17317 = vmatprep.subr.bf16.mxu0 %v18694_v0  ;;  %v9463_v43 = vshrl.u32 %v9436_v19, 16 }
 0x703   : > { %v9465_v11 = vrot.slane %v9463_v43, 1  ;;  %v18707_v43 = vld [vmem:[%s24071_s6 + $0x4f0] sm:$0xff]  }
 0x704   : > { %17318 = vmatpush3.bf16.msra.mxu0 %v18694_v0  ;;  %v9435_v0 = vpack.c.bf16 %v9432_v55, %v9431_v32  ;;  %v18702_v32 = vld [vmem:[%s24071_s6 + $0x4c8] sm:$0xff]  }
 0x705   : > { %17319 = vmatprep.subr.bf16.mxu0 %v18695_v45 }
 0x706   : > { %v9455_v26 = vshrl.u32 %v9435_v0, 16  ;;  %v9458_v39 = vshll.u32 %v9435_v0, 16  ;;  %v9575_v0 = vld [vmem:[#allocation2 + $0x50] sm:$0x1f] }
 0x708   : > { %17320 = vmatpush3.bf16.msra.mxu0 %v18695_v45  ;;  %v9466_v45 = vshll.u32 %v9436_v19, 16  ;;  %v9457_v37 = vrot.slane %v9455_v26, 1  ;;  %v9460_v62 = vrot.slane %v9458_v39, 2  ;;  %v18705_v39 = vld [vmem:[%s24071_s6 + $0x4e0] sm:$0xff]  }
 0x709   : > { %17321 = vmatprep.subr.bf16.mxu0 %v18696_v23  ;;  %v9574_v26 = vld [vmem:[#allocation2 + $0x20] sm:$0xf0] }
 0x70a   : > { %v9468_v56 = vrot.slane %v9466_v45, 2  ;;  %v9578_v45 = vmul.f32 %v22800_v49, %v21766_v46 }
 0x70c   : > { %17322 = vmatpush3.bf16.msra.mxu0 %v18696_v23  ;;  %v18700_v23 = vld [vmem:[%s24071_s6 + $0x4b8] sm:$0xff]   ;;  %v9469_v55 = vor.u32 %v9468_v56, %v9465_v11 }
 0x70d   : > { %17323 = vmatprep.subr.bf16.mxu0 %v18697_v1  ;;  %v18704_v11 = vld [vmem:[%s24071_s6 + $0x4d8] sm:$0xff]  }
 0x70e   : > { %v18708_v56 = vld [vmem:[%s24071_s6 + $0x4f8] sm:$0xff]  }
 0x710   : > { %17324 = vmatpush3.bf16.msra.mxu0 %v18697_v1  ;;  %v18701_v1 = vld [vmem:[%s24071_s6 + $0x4c0] sm:$0xff]  }
 0x711   : > { %17325 = vmatprep.subr.bf16.mxu0 %v18698_v2 }
 0x714   : > { %17326 = vmatpush3.bf16.msra.mxu0 %v18698_v2  ;;  %v9461_v2 = vor.u32 %v9460_v62, %v9457_v37  ;;  %v9576_v37 = vmul.f32 %v9574_v26, %v21749_v63  ;;  %v24583_v26 = vld [vmem:[#allocation75_spill] sm:$0xff] }
 0x715   : > { %17327 = vmatprep.subr.bf16.mxu0 %v18699_v31 }
 0x716   : > { %v9470_v19 = vsel %vm24581_vm11, %v9461_v2, %v9469_v55  ;;  %v18709_v2 = vld [vmem:[%s24071_s6 + $0x500] sm:$0xff]  }
 0x718   : > { %17328 = vmatpush3.bf16.msra.mxu0 %v18699_v31  ;;  %v18703_v31 = vld [vmem:[%s24071_s6 + $0x4d0] sm:$0xff]  }
 0x719   : > { %17329 = vmatprep.subr.bf16.mxu0 %v18700_v23 }
 0x71c   : > { %17330 = vmatpush3.bf16.msra.mxu0 %v18700_v23  ;;  %v9579_v23 = vmul.f32 %v9575_v0, %v21770_v47  ;;  %v18712_v0 = vld [vmem:[%s24071_s6 + $0x518] sm:$0xff]  }
 0x71d   : > { %17335 = vmatprep.subr.bf16.mxu0 %v18701_v1 }
 0x71e   : > { %v9581_v62 = vpack.c.bf16 %v9579_v23, %v9578_v45  ;;  %v24582_v45 = vld [vmem:[#allocation74_spill] sm:$0xff] }
 0x71f   : > { %17332 = vmatmul.mubr.bf16.vlgmr.msra.gmra.mrb[136].mxu0 %v9324_v28  ;;  %v18706_v28 = vld [vmem:[%s24071_s6 + $0x4e8] sm:$0xff]   ;;  %v9711_v23 = vmul.f32 %v22800_v49, %v24582_v45 }
 0x720   : > { %17336 = vmatpush3.bf16.msra.mxu0 %v18701_v1  ;;  %17351 = vmatprep.mubr.bf16.mxu0 %v9470_v19  ;;  %v9577_v1 = vmul.f32 %v22773_v27, %v21760_v36  ;;  %v9602_v19 = vrot.slane %v9581_v62, 2  ;;  %v24584_v62 = vld [vmem:[#allocation73_spill] sm:$0xff] }
 0x721   : > { %17337 = vmatprep.subr.bf16.mxu0 %v18702_v32 }
 0x724   : > { %17338 = vmatpush3.bf16.msra.mxu0 %v18702_v32  ;;  %v9580_v32 = vpack.c.bf16 %v9577_v1, %v9576_v37  ;;  %v9707_v1 = vld [vmem:[#allocation2 + $0x20] sm:$0xe0]  ;;  %v18714_v37 = vld [vmem:[%s24071_s6 + $0x528] sm:$0xff]  }
 0x725   : > { %17339 = vmatprep.subr.bf16.mxu0 %v18703_v31 }
 0x728   : > { %17340 = vmatpush3.bf16.msra.mxu0 %v18703_v31  ;;  %v9601_v31 = vrot.slane %v9580_v32, 2  ;;  %v24585_v32 = vld [vmem:[#allocation72_spill] sm:$0xff] }
 0x729   : > { %17341 = vmatprep.subr.bf16.mxu0 %v18704_v11 }
 0x72c   : > { %17342 = vmatpush3.bf16.msra.mxu0 %v18704_v11  ;;  %v18710_v11 = vld [vmem:[%s24071_s6 + $0x508] sm:$0xff]  }
 0x72d   : > { %17343 = vmatprep.subr.bf16.mxu0 %v18705_v39 }
 0x730   : > { %17344 = vmatpush3.bf16.msra.mxu0 %v18705_v39  ;;  %v9603_v39 = vsel %vm2316_vm7, %v9601_v31, %v9602_v19  ;;  %v9709_v31 = vmul.f32 %v9707_v1, %v24585_v32  ;;  %v24606_v32 = vld [vmem:[#allocation36_spill] sm:$0xff] }
 0x731   : > { %17345 = vmatprep.subr.bf16.mxu0 %v18706_v28 }
 0x734   : > { %17346 = vmatpush3.bf16.msra.mxu0 %v18706_v28  ;;  %v18711_v28 = vld [vmem:[%s24071_s6 + $0x510] sm:$0xff]  }
 0x735   : > { %17347 = vmatprep.subr.bf16.mxu0 %v18707_v43 }
 0x738   : > { %17348 = vmatpush3.bf16.msra.mxu0 %v18707_v43  ;;  %v9708_v43 = vld [vmem:[#allocation2 + $0x50] sm:$0x3f] }
 0x739   : > { %17349 = vmatprep.subr.bf16.mxu0 %v18708_v56 }
 0x73c   : > { %17350 = vmatpush3.bf16.msra.mxu0 %v18708_v56  ;;  %v9712_v56 = vmul.f32 %v9708_v43, %v24583_v26 }
 0x73d   : > { %17355 = vmatprep.subr.bf16.mxu0 %v18709_v2 }
 0x73f   : > { %17352 = vmatmul.mubr.bf16.vlgmr.msra.gmra.mrb[136].mxu0 %v9469_v55  ;;  %v18713_v55 = vld [vmem:[%s24071_s6 + $0x520] sm:$0xff]  }
 0x740   : > { %17356 = vmatpush3.bf16.msra.mxu0 %v18709_v2  ;;  %17371 = vmatprep.mubr.bf16.mxu0 %v9603_v39  ;;  %v9710_v2 = vmul.f32 %v22773_v27, %v24584_v62  ;;  %v18715_v39 = vld [vmem:[%s24071_s6 + $0x530] sm:$0xff]  }
 0x741   : > { %17357 = vmatprep.subr.bf16.mxu0 %v18710_v11 }
 0x744   : > { %17358 = vmatpush3.bf16.msra.mxu0 %v18710_v11  ;;  %v9714_v11 = vpack.c.bf16 %v9712_v56, %v9711_v23 }
 0x745   : > { %17359 = vmatprep.subr.bf16.mxu0 %v18711_v28 }
 0x746   : > { %v9744_v43 = vshll.u32 %v9714_v11, 16 }
 0x748   : > { %17360 = vmatpush3.bf16.msra.mxu0 %v18711_v28  ;;  %v9713_v28 = vpack.c.bf16 %v9710_v2, %v9709_v31  ;;  %v9746_v1 = vrot.slane %v9744_v43, 3  ;;  %v18718_v31 = vld [vmem:[%s24071_s6 + $0x548] sm:$0xff]  }
 0x749   : > { %17361 = vmatprep.subr.bf16.mxu0 %v18712_v0 }
 0x74a   : > { %v9733_v60 = vshrl.u32 %v9713_v28, 16  ;;  %v9736_v12 = vshll.u32 %v9713_v28, 16  ;;  %v18723_v28 = vld [vmem:[%s24071_s6 + $0x570] sm:$0xff]  }
 0x74c   : > { %17362 = vmatpush3.bf16.msra.mxu0 %v18712_v0  ;;  %v9741_v0 = vshrl.u32 %v9714_v11, 16  ;;  %v9735_v23 = vrot.slane %v9733_v60, 2  ;;  %v9738_v56 = vrot.slane %v9736_v12, 3  ;;  %v18720_v12 = vld [vmem:[%s24071_s6 + $0x558] sm:$0xff]   ;;  %v18722_v60 = vld [vmem:[%s24071_s6 + $0x568] sm:$0xff]  }
 0x74d   : > { %17363 = vmatprep.subr.bf16.mxu0 %v18713_v55 }
 0x74e   : > { %v9743_v16 = vrot.slane %v9741_v0, 2  ;;  %v9856_v0 = vmul.f32 %v22800_v49, %v21988_v24 }
 0x750   : > { %17364 = vmatpush3.bf16.msra.mxu0 %v18713_v55  ;;  %v18717_v55 = vld [vmem:[%s24071_s6 + $0x540] sm:$0xff]   ;;  %v9747_v2 = vor.u32 %v9746_v1, %v9743_v16  ;;  %v18719_v16 = vld [vmem:[%s24071_s6 + $0x550] sm:$0xff]  }
 0x751   : > { %17365 = vmatprep.subr.bf16.mxu0 %v18714_v37  ;;  %v9852_v1 = vld [vmem:[#allocation2 + $0x20] sm:$0xc0] }
 0x754   : > { %17366 = vmatpush3.bf16.msra.mxu0 %v18714_v37  ;;  %v9739_v37 = vor.u32 %v9738_v56, %v9735_v23  ;;  %v9855_v23 = vmul.f32 %v22773_v27, %v21982_v9  ;;  %v9854_v56 = vmul.f32 %v9852_v1, %v20329_v8  ;;  %v9985_v1 = vld [vmem:[#allocation2 + $0x20] sm:$0x80] }
 0x755   : > { %17367 = vmatprep.subr.bf16.mxu0 %v18715_v39 }
 0x756   : > { %v9748_v11 = vsel %vm2529_vm10, %v9739_v37, %v9747_v2 }
 0x758   : > { %17368 = vmatpush3.bf16.msra.mxu0 %v18715_v39  ;;  %v18749_v39 = vld [vmem:[%s24073_s8 + $0x40] sm:$0xff]  }
 0x759   : > { %17369 = vmatprep.subr.bf16.mxu0 %v18716_v57  ;;  %17455 = vmatprep.subr.bf16.mxu1 %v18749_v39 }
 0x75a   : > { %17456 = vmatpush3.bf16.msra.mxu1 %v18749_v39 }
 0x75c   : > { %17370 = vmatpush3.bf16.msra.mxu0 %v18716_v57  ;;  %v18721_v57 = vld [vmem:[%s24071_s6 + $0x560] sm:$0xff]  }
 0x75d   : > { %17375 = vmatprep.subr.bf16.mxu0 %v18717_v55 }
 0x75f   : > { %17372 = vmatmul.mubr.bf16.vlgmr.msra.gmra.mrb[136].mxu0 %v9602_v19  ;;  %v9853_v19 = vld [vmem:[#allocation2 + $0x50] sm:$0x7f] }
 0x760   : > { %17376 = vmatpush3.bf16.msra.mxu0 %v18717_v55  ;;  %17391 = vmatprep.mubr.bf16.mxu0 %v9748_v11  ;;  %v9857_v43 = vmul.f32 %v9853_v19, %v21993_v58  ;;  %v18724_v55 = vld [vmem:[%s24071_s6 + $0x578] sm:$0xff]   ;;  %v9858_v11 = vpack.c.bf16 %v9855_v23, %v9854_v56  ;;  %v9988_v23 = vmul.f32 %v22773_v27, %v21881_v33 }
 0x761   : > { %17377 = vmatprep.subr.bf16.mxu0 %v18718_v31  ;;  %v18728_v19 = vld [vmem:[%s24071_s6 + $0x598] sm:$0xff]   ;;  %v9987_v56 = vmul.f32 %v9985_v1, %v21869_v29 }
 0x762   : > { %v9859_v37 = vpack.c.bf16 %v9857_v43, %v9856_v0  ;;  %v22989_v0 = vld [vmem:[#allocation2] sm:$0xff] }
 0x763   : > { %v22993_v43 = vmul.f32 %v22989_v0, %v21892_v44  ;;  %v18731_v44 = vld [vmem:[%s24071_s6 + $0x5b0] sm:$0xff]  }
 0x764   : > { %17378 = vmatpush3.bf16.msra.mxu0 %v18718_v31  ;;  %v18725_v31 = vld [vmem:[%s24071_s6 + $0x580] sm:$0xff]   ;;  %v9880_v39 = vrot.slane %v9859_v37, 3  ;;  %v9991_v37 = vpack.c.bf16 %v9988_v23, %v9987_v56  ;;  %v18734_v56 = vld [vmem:[%s24071_s6 + $0x5c8] sm:$0xff]  }
 0x765   : > { %17379 = vmatprep.subr.bf16.mxu0 %v18719_v16  ;;  %24586 = vst [vmem:[#allocation31_spill] sm:$0xff] %v22993_v43 }
 0x768   : > { %17380 = vmatpush3.bf16.msra.mxu0 %v18719_v16  ;;  %v9879_v16 = vrot.slane %v9858_v11, 3 }
 0x769   : > { %17381 = vmatprep.subr.bf16.mxu0 %v18720_v12 }
 0x76c   : > { %17382 = vmatpush3.bf16.msra.mxu0 %v18720_v12  ;;  %v18726_v12 = vld [vmem:[%s24071_s6 + $0x588] sm:$0xff]  }
 0x76d   : > { %17383 = vmatprep.subr.bf16.mxu0 %v18721_v57 }
 0x770   : > { %17384 = vmatpush3.bf16.msra.mxu0 %v18721_v57  ;;  %v9881_v57 = vsel %vm2480_vm14, %v9879_v16, %v9880_v39  ;;  %v18732_v16 = vld [vmem:[%s24071_s6 + $0x5b8] sm:$0xff]  }
 0x771   : > { %17385 = vmatprep.subr.bf16.mxu0 %v18722_v60 }
 0x774   : > { %17386 = vmatpush3.bf16.msra.mxu0 %v18722_v60  ;;  %v18727_v60 = vld [vmem:[%s24071_s6 + $0x590] sm:$0xff]  }
 0x775   : > { %17387 = vmatprep.subr.bf16.mxu0 %v18723_v28 }
 0x778   : > { %17388 = vmatpush3.bf16.msra.mxu0 %v18723_v28  ;;  %v9989_v28 = vmul.f32 %v22800_v49, %v21884_v22 }
 0x779   : > { %17389 = vmatprep.subr.bf16.mxu0 %v18724_v55 }
 0x77a   : > { %v9992_v49 = vpack.c.bf16 %v22993_v43, %v9989_v28 }
 0x77c   : > { %17390 = vmatpush3.bf16.msra.mxu0 %v18724_v55  ;;  %v18730_v55 = vld [vmem:[%s24071_s6 + $0x5a8] sm:$0xff]   ;;  %v10022_v11 = vshll.u32 %v9992_v49, 16 }
 0x77d   : > { %17395 = vmatprep.subr.bf16.mxu0 %v18725_v31 }
 0x77f   : > { %17392 = vmatmul.mubr.bf16.vlgmr.msra.gmra.mrb[136].mxu0 %v9747_v2  ;;  %v18729_v2 = vld [vmem:[%s24071_s6 + $0x5a0] sm:$0xff]  }
 0x780   : > { %17396 = vmatpush3.bf16.msra.mxu0 %v18725_v31  ;;  %17411 = vmatprep.mubr.bf16.mxu0 %v9881_v57  ;;  %v10019_v31 = vshrl.u32 %v9992_v49, 16  ;;  %v10014_v57 = vshll.u32 %v9991_v37, 16 }
 0x781   : > { %17397 = vmatprep.subr.bf16.mxu0 %v18726_v12 }
 0x782   : > { %v10016_v1 = vrot.slane %v10014_v57, 4  ;;  %v18741_v57 = vld [vmem:[%s24071_s6 + $0x600] sm:$0xff]  }
 0x784   : > { %17398 = vmatpush3.bf16.msra.mxu0 %v18726_v12  ;;  %v10011_v12 = vshrl.u32 %v9991_v37, 16  ;;  %v18736_v37 = vld [vmem:[%s24071_s6 + $0x5d8] sm:$0xff]  }
 0x785   : > { %17399 = vmatprep.subr.bf16.mxu0 %v18727_v60 }
 0x786   : > { %v10013_v28 = vrot.slane %v10011_v12, 3  ;;  %v10131_v12 = vld [vmem:[#allocation2 + $0x40] sm:$0xff] }
 0x788   : > { %17400 = vmatpush3.bf16.msra.mxu0 %v18727_v60  ;;  %v10021_v60 = vrot.slane %v10019_v31, 3  ;;  %v18738_v31 = vld [vmem:[%s24071_s6 + $0x5e8] sm:$0xff]  }
 0x789   : > { %17401 = vmatprep.subr.bf16.mxu0 %v18728_v19 }
 0x78c   : > { %17402 = vmatpush3.bf16.msra.mxu0 %v18728_v19  ;;  %v10024_v19 = vrot.slane %v10022_v11, 4  ;;  %v18739_v11 = vld [vmem:[%s24071_s6 + $0x5f0] sm:$0xff]  }
 0x78d   : > { %17403 = vmatprep.subr.bf16.mxu0 %v18729_v2 }
 0x78e   : > { %v10025_v23 = vor.u32 %v10024_v19, %v10021_v60  ;;  %v10135_v60 = vmul.f32 %v22137_v3, %v10131_v12  ;;  %v10134_v19 = vmul.f32 %v24412_v54, %v22773_v27  ;;  %v18744_v27 = vld [vmem:[%s24071_s6 + $0x618] sm:$0xff]   ;;  %v10318_v3 = vld [vmem:[#allocation2] sm:$0xfe] }
 0x78f   : > { %v18752_v12 = vld [vmem:[%s24073_s8 + $0x58] sm:$0xff]   ;;  %v10554_v54 = vld [vmem:[#allocation2] sm:$0xfc] }
 0x790   : > { %17404 = vmatpush3.bf16.msra.mxu0 %v18729_v2  ;;  %v18733_v2 = vld [vmem:[%s24071_s6 + $0x5c0] sm:$0xff]  }
 0x791   : > { %17405 = vmatprep.subr.bf16.mxu0 %v18730_v55 }
 0x794   : > { %17406 = vmatpush3.bf16.msra.mxu0 %v18730_v55  ;;  %v10017_v55 = vor.u32 %v10016_v1, %v10013_v28  ;;  %v10138_v28 = vpack.c.bf16 %v10135_v60, %v10134_v19  ;;  %v18743_v1 = vld [vmem:[%s24071_s6 + $0x610] sm:$0xff]   ;;  %v18754_v60 = vld [vmem:[%s24073_s8 + $0x68] sm:$0xff]  }
 0x795   : > { %17407 = vmatprep.subr.bf16.mxu0 %v18731_v44  ;;  %v18755_v19 = vld [vmem:[%s24073_s8 + $0x70] sm:$0xff]  }
 0x796   : > { %v10026_v49 = vsel %vm2975_vm6, %v10017_v55, %v10025_v23  ;;  %v18745_v55 = vld [vmem:[%s24071_s6 + $0x620] sm:$0xff]  }
 0x798   : > { %17408 = vmatpush3.bf16.msra.mxu0 %v18731_v44  ;;  %v18735_v44 = vld [vmem:[%s24071_s6 + $0x5d0] sm:$0xff]  }
 0x799   : > { %17409 = vmatprep.subr.bf16.mxu0 %v18732_v16 }
 0x79c   : > { %17410 = vmatpush3.bf16.msra.mxu0 %v18732_v16  ;;  %v18740_v16 = vld [vmem:[%s24071_s6 + $0x5f8] sm:$0xff]  }
 0x79d   : > { %17415 = vmatprep.subr.bf16.mxu0 %v18733_v2 }
 0x79f   : > { %17412 = vmatmul.mubr.bf16.vlgmr.msra.gmra.mrb[136].mxu0 %v9880_v39  ;;  %v18737_v39 = vld [vmem:[%s24071_s6 + $0x5e0] sm:$0xff]  }
 0x7a0   : > { %17416 = vmatpush3.bf16.msra.mxu0 %v18733_v2  ;;  %17431 = vmatprep.mubr.bf16.mxu0 %v10026_v49  ;;  %v18742_v2 = vld [vmem:[%s24071_s6 + $0x608] sm:$0xff]   ;;  %v10133_v49 = vld [vmem:[#allocation2 + $0x60] sm:$0x1] }
 0x7a1   : > { %17417 = vmatprep.subr.bf16.mxu0 %v18734_v56 }
 0x7a4   : > { %17418 = vmatpush3.bf16.msra.mxu0 %v18734_v56  ;;  %v18747_v56 = vld [vmem:[%s24071_s6 + $0x630] sm:$0xff]  }
 0x7a5   : > { %17419 = vmatprep.subr.bf16.mxu0 %v18735_v44 }
 0x7a8   : > { %17420 = vmatpush3.bf16.msra.mxu0 %v18735_v44  ;;  %v18748_v44 = vld [vmem:[%s24071_s6 + $0x638] sm:$0xff]  }
 0x7a9   : > { %17421 = vmatprep.subr.bf16.mxu0 %v18736_v37 }
 0x7ac   : > { %17422 = vmatpush3.bf16.msra.mxu0 %v18736_v37  ;;  %v10136_v37 = vmul.f32 %v22989_v0, %v22193_v6 }
 0x7ad   : > { %17423 = vmatprep.subr.bf16.mxu0 %v18737_v39 }
 0x7b0   : > { %17424 = vmatpush3.bf16.msra.mxu0 %v18737_v39  ;;  %v10137_v39 = vmul.f32 0.0, %v10133_v49 }
 0x7b1   : > { %17425 = vmatprep.subr.bf16.mxu0 %v18738_v31 }
 0x7b4   : > { %17426 = vmatpush3.bf16.msra.mxu0 %v18738_v31  ;;  %v10139_v31 = vpack.c.bf16 %v10137_v39, %v10136_v37 }
 0x7b5   : > { %17427 = vmatprep.subr.bf16.mxu0 %v18739_v11 }
 0x7b8   : > { %17428 = vmatpush3.bf16.msra.mxu0 %v18739_v11  ;;  %v18750_v11 = vld [vmem:[%s24073_s8 + $0x48] sm:$0xff]  }
 0x7b9   : > { %17429 = vmatprep.subr.bf16.mxu0 %v18740_v16  ;;  %17457 = vmatprep.subr.bf16.mxu1 %v18750_v11 }
 0x7ba   : > { %17458 = vmatpush3.bf16.msra.mxu1 %v18750_v11 }
 0x7bc   : > { %17430 = vmatpush3.bf16.msra.mxu0 %v18740_v16  ;;  %v18751_v16 = vld [vmem:[%s24073_s8 + $0x50] sm:$0xff]  }
 0x7bd   : > { %17435 = vmatprep.subr.bf16.mxu0 %v18741_v57  ;;  %17459 = vmatprep.subr.bf16.mxu1 %v18751_v16 }
 0x7be   : > { %17460 = vmatpush3.bf16.msra.mxu1 %v18751_v16 }
 0x7bf   : > { %17432 = vmatmul.mubr.bf16.vlgmr.msra.gmra.mrb[136].mxu0 %v10025_v23  ;;  %v18746_v23 = vld [vmem:[%s24071_s6 + $0x628] sm:$0xff]   ;;  %17461 = vmatprep.subr.bf16.mxu1 %v18752_v12 }
 0x7c0   : > { %17436 = vmatpush3.bf16.msra.mxu0 %v18741_v57  ;;  %17451 = vmatprep.mubr.bf16.mxu0 %v10138_v28  ;;  %v18753_v57 = vld [vmem:[%s24073_s8 + $0x60] sm:$0xff]  }
 0x7c1   : > { %17437 = vmatprep.subr.bf16.mxu0 %v18742_v2  ;;  %v23086_v28 = vld [vmem:[%s24073_s8] sm:$0xff]  }
 0x7c2   : > { %17462 = vmatpush3.bf16.msra.mxu1 %v18752_v12 }
 0x7c3   : > { %17463 = vmatprep.subr.bf16.mxu1 %v18753_v57 }
 0x7c4   : > { %17438 = vmatpush3.bf16.msra.mxu0 %v18742_v2  ;;  %v18756_v2 = vld [vmem:[%s24073_s8 + $0x78] sm:$0xff]  }
 0x7c5   : > { %17439 = vmatprep.subr.bf16.mxu0 %v18743_v1 }
 0x7c6   : > { %17464 = vmatpush3.bf16.msra.mxu1 %v18753_v57 }
 0x7c7   : > { %17465 = vmatprep.subr.bf16.mxu1 %v18754_v60 }
 0x7c8   : > { %17440 = vmatpush3.bf16.msra.mxu0 %v18743_v1  ;;  %v15595_v1 = vld [vmem:[%s24072_s7] ss:$0 sm:$0xff] }
 0x7c9   : > { %17441 = vmatprep.subr.bf16.mxu0 %v18744_v27 }
 0x7ca   : > { %17466 = vmatpush3.bf16.msra.mxu1 %v18754_v60 }
 0x7cb   : > { %17467 = vmatprep.subr.bf16.mxu1 %v18755_v19 }
 0x7cc   : > { %17442 = vmatpush3.bf16.msra.mxu0 %v18744_v27 }
 0x7cd   : > { %17443 = vmatprep.subr.bf16.mxu0 %v18745_v55 }
 0x7ce   : > { %17468 = vmatpush3.bf16.msra.mxu1 %v18755_v19 }
 0x7cf   : > { %17469 = vmatprep.subr.bf16.mxu1 %v18756_v2 }
 0x7d0   : > { %17444 = vmatpush3.bf16.msra.mxu0 %v18745_v55 }
 0x7d1   : > { %17445 = vmatprep.subr.bf16.mxu0 %v18746_v23 }
 0x7d2   : > { %17470 = vmatpush3.bf16.msra.mxu1 %v18756_v2 }
 0x7d3   : > { %17475 = vmatprep.subr.bf16.mxu1 %v23086_v28 }
 0x7d4   : > { %17446 = vmatpush3.bf16.msra.mxu0 %v18746_v23 }
 0x7d5   : > { %17447 = vmatprep.subr.bf16.mxu0 %v18747_v56 }
 0x7d8   : > { %17448 = vmatpush3.bf16.msra.mxu0 %v18747_v56 }
 0x7d9   : > { %17449 = vmatprep.subr.bf16.mxu0 %v18748_v44 }
 0x7dc   : > { %17450 = vmatpush3.bf16.msra.mxu0 %v18748_v44 }
 0x7df   : > { %17452 = vmatmul.mubr.bf16.vlgmr.msra.gmra.mrb[136].mxu0 %v10139_v31 }
 0x8b2   : > { %v17453_v27 = vpop.f32.mrb[136].mxu0 }
 0x8b3   : > { %v10267_v55 = vadd.f32 %v17453_v27, %v15595_v1  ;;  %v10239_v23 = vpop.f32.mrb[137].mxu0 }
 0x8b4   : > { %v10265_v56 = vadd.f32 %v15595_v1, %v10239_v23  ;;  %v17454_v49 = vpop.f32.mrb[138].mxu0  ;;  %v10687_v23 = vld [vmem:[#allocation2] sm:$0xf8] }
 0x8b5   : > { %v10271_v44 = vmax.f32 %v10267_v55, 0.0  ;;  %v10268_v37 = vadd.f32 %v17454_v49, %v15595_v1  ;;  %v10242_v39 = vpop.f32.mrb[139].mxu0  ;;  %v11110_v49 = vld [vmem:[#allocation2] sm:$0xc0] }
 0x8b6   : > { %v10269_v31 = vmax.f32 %v10265_v56, 0.0  ;;  %v10266_v11 = vadd.f32 %v15595_v1, %v10242_v39  ;;  %v10832_v1 = vld [vmem:[#allocation2] sm:$0xf0]  ;;  %v23103_v39 = vmul.f32 0.0, %v22989_v0  ;;  %v24591_v0 = vld [vmem:[#allocation12_spill] sm:$0xff] }
 0x8b7   : > { %v10272_v16 = vmax.f32 %v10268_v37, 0.0  ;;  %v10280_v60 = vrot.slane %v10271_v44, 4  ;;  %v10965_v56 = vld [vmem:[#allocation2] sm:$0xe0]  ;;  %v10320_v37 = vmul.f32 %v10318_v3, %v19622_v41 }
 0x8b8   : > { %v10277_v12 = vrot.slane %v10269_v31, 4  ;;  %v10270_v57 = vmax.f32 %v10266_v11, 0.0  ;;  %v11243_v44 = vld [vmem:[#allocation2] sm:$0x80]  ;;  %v10689_v11 = vmul.f32 %v10687_v23, %v24546_v21  ;;  %v24594_v23 = vld [vmem:[#allocation14_spill] sm:$0xff] }
 0x8b9   : > { %v10282_v19 = vrot.slane %v10272_v16, 4  ;;  %v10834_v16 = vmul.f32 %v10832_v1, %v20152_v53 }
 0x8ba   : > { %10288 = vst [vmem:[#allocation2 + $0x10] sm:$0xf0] %v10277_v12  ;;  %v10278_v2 = vrot.slane %v10270_v57, 4 }
 0x8bb   : > { %v10283_v6 = vsel %vm24587_vm2, %v10280_v60, %v10282_v19 }
 0x8bc   : > { %10291 = vst [vmem:[#allocation2 + $0x40] sm:$0x1f] %v10283_v6  ;;  %v23094_v27 = vsel %vm24588_vm1, %v10277_v12, %v10278_v2  ;;  %v23097_v55 = vsel %vm24514_vm0, %v10278_v2, %v10280_v60  ;;  %v23106_v6 = vmul.f32 %v10554_v54, %v24540_v42  ;;  %v10967_v12 = vmul.f32 %v10965_v56, %v24554_v4  ;;  %v24595_v56 = vld [vmem:[#allocation52_spill] sm:$0xff] }
 0x8bd   : > { %10289 = vst [vmem:[#allocation2 + $0x20] sm:$0xff] %v23094_v27  ;;  %10290 = vst [vmem:[#allocation2 + $0x30] sm:$0xff] %v23097_v55  ;;  %v11247_v31 = vmul.f32 %v23094_v27, %v20283_v15  ;;  %v11248_v57 = vmul.f32 %v23097_v55, %v20286_v18  ;;  %v10322_v41 = vmul.f32 %v23094_v27, %v19656_v61 }
 0x8be   : > { %v23119_v3 = vmul.f32 %v23094_v27, %v24543_v52  ;;  %v23122_v54 = vmul.f32 %v11110_v49, %v24558_v48  ;;  %v23125_v15 = vmul.f32 %v11243_v44, %v24561_v59  ;;  %v10691_v53 = vmul.f32 %v23094_v27, %v24548_v38  ;;  %v24589_v52 = vld [vmem:[#allocation6_spill] sm:$0xff]  ;;  %v24590_v48 = vld [vmem:[#allocation28_spill] sm:$0xff] }
 0x8bf   : > { %v10836_v18 = vmul.f32 %v23094_v27, %v24552_v34  ;;  %v10969_v61 = vmul.f32 %v23094_v27, %v24556_v30  ;;  %v23135_v21 = vpack.c.bf16 %v11248_v57, %v11247_v31  ;;  %v23143_v60 = vmul.f32 %v23094_v27, %v24591_v0  ;;  %v24592_v34 = vld [vmem:[#allocation37_spill] sm:$0xff]  ;;  %v24593_v30 = vld [vmem:[#allocation16_spill] sm:$0xff] }
 0x8c0   : > { %v23147_v38 = vmul.f32 %v24564_v40, %v23094_v27  ;;  %v23153_v2 = vmul.f32 %v23094_v27, %v24593_v30  ;;  %v23157_v1 = vmul.f32 %v23097_v55, %v24594_v23  ;;  %v23161_v49 = vmul.f32 %v23094_v27, %v24595_v56  ;;  %v24596_v40 = vld [vmem:[#allocation53_spill] sm:$0xff]  ;;  %v24599_v23 = vld [vmem:[#allocation3_spill] sm:$0xff] }
 0x8c1   : > { %v23127_v42 = vld [vmem:[#allocation2 + $0x10] sm:$0xff] }
 0x8c2   : > { %v10321_v4 = vmul.f32 %v23127_v42, %v24589_v52  ;;  %v10690_v59 = vmul.f32 %v23127_v42, %v24590_v48  ;;  %v10835_v19 = vmul.f32 %v23127_v42, %v24592_v34  ;;  %v23165_v52 = vmul.f32 %v23097_v55, %v24596_v40  ;;  %v24597_v48 = vld [vmem:[#allocation51_spill] sm:$0xff]  ;;  %v24598_v34 = vld [vmem:[#allocation9_spill] sm:$0xff]  ;;  %v24602_v40 = vld [vmem:[#allocation34_spill] sm:$0xff] }
 0x8c3   : > { %v23169_v0 = vmul.f32 %v23094_v27, %v24597_v48  ;;  %v10297_v13 = vmul.f32 %v24599_v23, %v23127_v42  ;;  %v10968_v14 = vmul.f32 %v23127_v42, %v24602_v40  ;;  %v24603_v48 = vld [vmem:[#allocation43_spill] sm:$0xff]  ;;  %v24604_v23 = vld [vmem:[#allocation40_spill] sm:$0xff] }
 0x8c4   : > { %v10319_v44 = vld [vmem:[#allocation2 + $0x30] sm:$0x3]  ;;  %v10324_v31 = vpack.c.bf16 %v10321_v4, %v10320_v37  ;;  %v10693_v57 = vpack.c.bf16 %v10690_v59, %v10689_v11  ;;  %v10838_v56 = vpack.c.bf16 %v10835_v19, %v10834_v16  ;;  %v23176_v37 = vmul.f32 %v23097_v55, %v24600_v51  ;;  %v24601_v4 = vld [vmem:[#allocation29_spill] sm:$0xff]  ;;  %v24605_v51 = vld [vmem:[#allocation38_spill] sm:$0xff] }
 0x8c5   : > { %v10323_v30 = vmul.f32 %v10319_v44, %v24598_v34  ;;  %v10688_v5 = vld [vmem:[#allocation2 + $0x30] sm:$0xf]  ;;  %v11113_v17 = vmul.f32 %v23127_v42, %v24603_v48  ;;  %v11246_v22 = vmul.f32 %v23127_v42, %v24604_v23 }
 0x8c6   : > { %v10833_v20 = vld [vmem:[#allocation2 + $0x30] sm:$0x1f]  ;;  %v10346_v11 = vshll.u32 %v10324_v31, 16  ;;  %v10692_v59 = vmul.f32 %v10688_v5, %v24601_v4  ;;  %v10713_v34 = vshrl.u32 %v10693_v57, 16  ;;  %v10716_v43 = vshll.u32 %v10693_v57, 16 }
 0x8c7   : > { %v10325_v44 = vpack.c.bf16 %v10323_v30, %v10322_v41  ;;  %v10344_v16 = vshrl.u32 %v10324_v31, 16  ;;  %v10837_v29 = vmul.f32 %v10833_v20, %v24605_v51  ;;  %v10966_v24 = vld [vmem:[#allocation2 + $0x30] sm:$0x3f]  ;;  %v10300_v5 = vpack.c.bf16 %v10297_v13, %v23103_v39  ;;  %v18758_v13 = vld [vmem:[%s24073_s8 + $0x8] sm:$0xff]  }
 0x8c8   : > { %v10348_v19 = vrot.slane %v10346_v11, 1  ;;  %v10694_v33 = vpack.c.bf16 %v10692_v59, %v10691_v53  ;;  %v10715_v4 = vrot.slane %v10713_v34, 1  ;;  %v10859_v40 = vrot.slane %v10838_v56, 2  ;;  %v11111_v31 = vld [vmem:[#allocation2 + $0x30] sm:$0x7f] }
 0x8c9   : > { %v10351_v9 = vshll.u32 %v10325_v44, 16  ;;  %v10718_v45 = vrot.slane %v10716_v43, 2  ;;  %v10355_v57 = vshrl.u32 %v10325_v44, 16  ;;  %v10839_v62 = vpack.c.bf16 %v10837_v29, %v10836_v18 }
 0x8ca   : > { %v10349_v8 = vor.u32 %v10348_v19, %v10344_v16  ;;  %v10721_v48 = vshrl.u32 %v10694_v33, 16  ;;  %v10724_v41 = vshll.u32 %v10694_v33, 16  ;;  %v10970_v23 = vmul.f32 %v10966_v24, %v24606_v32  ;;  %v24608_v32 = vld [vmem:[#allocation44_spill] sm:$0xff] }
 0x8cb   : > { %v10353_v30 = vrot.slane %v10351_v9, 1  ;;  %v10719_v11 = vor.u32 %v10718_v45, %v10715_v4  ;;  %v10971_v20 = vpack.c.bf16 %v10968_v14, %v10967_v12  ;;  %v23192_v43 = vrot.slane %v10839_v62, 2  ;;  %v11516_v4 = vld [vmem:[#allocation2 + $0x10] sm:$0xfe] }
 0x8cc   : > { %v10723_v53 = vrot.slane %v10721_v48, 1  ;;  %v10726_v59 = vrot.slane %v10724_v41, 2  ;;  %v10972_v33 = vpack.c.bf16 %v10970_v23, %v10969_v61  ;;  %v11115_v45 = vmul.f32 %v11111_v31, %v24608_v32  ;;  %v11660_v31 = vld [vmem:[#allocation2 + $0x40] sm:$0x7] }
 0x8cd   : > { %v10354_v51 = vsel %vm24607_vm5, %v10349_v8, %v10353_v30  ;;  %v10357_v58 = vor.u32 %v10355_v57, %v10353_v30  ;;  %v10991_v29 = vshrl.u32 %v10971_v20, 16  ;;  %v10994_v24 = vshll.u32 %v10971_v20, 16  ;;  %v11517_v30 = vld [vmem:[#allocation2 + $0x40] sm:$0x3]  ;;  %v11659_v57 = vld [vmem:[#allocation2 + $0x10] sm:$0xfc] }
 0x8ce   : > { %17471 = vmatprep.mubr.bf16.mxu1 %v10354_v51  ;;  %v23194_v9 = vor.u32 %v10726_v59, %v10723_v53  ;;  %v23199_v14 = vsel %vm2316_vm7, %v10859_v40, %v23192_v43  ;;  %v10999_v8 = vshrl.u32 %v10972_v33, 16  ;;  %v11002_v39 = vshll.u32 %v10972_v33, 16  ;;  %v11793_v33 = vld [vmem:[#allocation2 + $0x40] sm:$0xf] }
 0x8cf   : > { %17472 = vmatmul.mubr.bf16.vlgmr.msra.gmra.mrb[136].mxu1 %v10357_v58  ;;  %v11116_v12 = vpack.c.bf16 %v11113_v17, %v23122_v54  ;;  %v10993_v18 = vrot.slane %v10991_v29, 2  ;;  %v10996_v61 = vrot.slane %v10994_v24, 3  ;;  %v11117_v56 = vpack.c.bf16 %v11115_v45, %v23143_v60  ;;  %v18759_v58 = vld [vmem:[%s24073_s8 + $0x10] sm:$0xff]   ;;  %v24611_v24 = vld [vmem:[#allocation13_spill] sm:$0xff] }
 0x8d0   : > { %17476 = vmatpush3.bf16.msra.mxu1 %v23086_v28  ;;  %17491 = vmatprep.mubr.bf16.mxu1 %v10300_v5  ;;  %v23205_v62 = vsel %vm24609_vm4, %v10719_v11, %v23194_v9  ;;  %v11001_v44 = vrot.slane %v10999_v8, 2  ;;  %v11004_v34 = vrot.slane %v11002_v39, 3  ;;  %v11249_v17 = vpack.c.bf16 %v11246_v22, %v23125_v15  ;;  %v24610_v11 = vld [vmem:[#allocation55_spill] sm:$0xff]  ;;  %v24613_v39 = vld [vmem:[#allocation56_spill] sm:$0xff] }
 0x8d1   : > { %17477 = vmatprep.subr.bf16.mxu1 %v18758_v13  ;;  %v11137_v16 = vrot.slane %v11116_v12, 3  ;;  %v10997_v28 = vor.u32 %v10996_v61, %v10993_v18  ;;  %v23212_v54 = vrot.slane %v11117_v56, 3  ;;  %v11277_v19 = vshrl.u32 %v23135_v21, 16  ;;  %v24612_v45 = vld [vmem:[#allocation15_spill] sm:$0xff]  ;;  %v24614_v61 = vld [vmem:[#allocation50_spill] sm:$0xff] }
 0x8d2   : > { %v11280_v5 = vshll.u32 %v23135_v21, 16  ;;  %v23216_v40 = vor.u32 %v11004_v34, %v11001_v44  ;;  %v11269_v60 = vshrl.u32 %v11249_v17, 16  ;;  %v11272_v48 = vshll.u32 %v11249_v17, 16  ;;  %v11792_v21 = vld [vmem:[#allocation2 + $0x10] sm:$0xf8]  ;;  %v24615_v44 = vld [vmem:[#allocation8_spill] sm:$0xff] }
 0x8d3   : > { %v23220_v41 = vmul.f32 %v24563_v25, %v23127_v42  ;;  %v23224_v22 = vsel %vm2480_vm14, %v11137_v16, %v23212_v54  ;;  %v11279_v15 = vrot.slane %v11277_v19, 3  ;;  %v23228_v53 = vmul.f32 %v23094_v27, %v24610_v11  ;;  %v18760_v25 = vld [vmem:[%s24073_s8 + $0x18] sm:$0xff]   ;;  %v24616_v16 = vld [vmem:[#allocation49_spill] sm:$0xff] }
 0x8d4   : > { %17478 = vmatpush3.bf16.msra.mxu1 %v18758_v13  ;;  %v11282_v23 = vrot.slane %v11280_v5, 4  ;;  %v23235_v59 = vsel %vm2529_vm10, %v10997_v28, %v23216_v40  ;;  %v11271_v20 = vrot.slane %v11269_v60, 3  ;;  %v11274_v51 = vrot.slane %v11272_v48, 4  ;;  %v11937_v28 = vld [vmem:[#allocation2 + $0x10] sm:$0xf0]  ;;  %v24617_v19 = vld [vmem:[#allocation32_spill] sm:$0xff] }
 0x8d5   : > { %17479 = vmatprep.subr.bf16.mxu1 %v18759_v58  ;;  %v11396_v13 = vpack.c.bf16 %v23147_v38, %v23220_v41  ;;  %v11518_v32 = vmul.f32 %v11516_v4, %v24611_v24  ;;  %v11521_v8 = vmul.f32 %v11517_v30, %v24612_v45  ;;  %v12070_v12 = vmul.f32 %v23097_v55, %v24613_v39  ;;  %v24618_v48 = vld [vmem:[#allocation18_spill] sm:$0xff]  ;;  %v12067_v39 = vld [vmem:[#allocation2 + $0x40] sm:$0x3f]  ;;  %v18819_v41 = vld [vmem:[%s24073_s8 + $0x230] sm:$0xff]  }
 0x8d6   : > { %v23239_v29 = vor.u32 %v11282_v23, %v11279_v15  ;;  %v11275_v18 = vor.u32 %v11274_v51, %v11271_v20  ;;  %v11661_v56 = vmul.f32 %v11659_v57, %v24614_v61  ;;  %v11664_v34 = vmul.f32 %v11660_v31, %v24615_v44  ;;  %v18761_v57 = vld [vmem:[%s24073_s8 + $0x20] sm:$0xff]   ;;  %v12066_v20 = vld [vmem:[#allocation2 + $0x10] sm:$0xe0]  ;;  %v10555_v51 = vld [vmem:[#allocation2 + $0x30] sm:$0x7] }
 0x8d7   : > { %v11794_v17 = vmul.f32 %v11792_v21, %v24616_v16  ;;  %v23250_v5 = vmul.f32 %v23127_v42, %v24617_v19  ;;  %v11522_v4 = vpack.c.bf16 %v23153_v2, %v11518_v32  ;;  %v23254_v60 = vpack.c.bf16 %v11521_v8, %v23157_v1  ;;  %v11938_v23 = vld [vmem:[#allocation2 + $0x40] sm:$0x1f]  ;;  %v18818_v38 = vld [vmem:[%s24073_s8 + $0x228] sm:$0xff]  }
 0x8d8   : > { %17480 = vmatpush3.bf16.msra.mxu1 %v18759_v58  ;;  %v11797_v30 = vmul.f32 %v11793_v33, %v24618_v48  ;;  %v23262_v15 = vsel %vm2975_vm6, %v11275_v18, %v23239_v29  ;;  %v11665_v58 = vpack.c.bf16 %v23161_v49, %v11661_v56  ;;  %v11666_v42 = vpack.c.bf16 %v11664_v34, %v23165_v52  ;;  %v18762_v18 = vld [vmem:[%s24073_s8 + $0x28] sm:$0xff]  }
 0x8d9   : > { %17481 = vmatprep.subr.bf16.mxu1 %v18760_v25  ;;  %v11798_v2 = vpack.c.bf16 %v23169_v0, %v11794_v17  ;;  %v11542_v1 = vshrl.u32 %v11522_v4, 16  ;;  %v11544_v31 = vshll.u32 %v11522_v4, 16  ;;  %v11549_v21 = vshll.u32 %v23254_v60, 16  ;;  %v24619_v34 = vld [vmem:[#allocation10_spill] sm:$0xff]  ;;  %v12212_v4 = vld [vmem:[#allocation2 + $0x40] sm:$0x7f] }
 0x8da   : > { %v11939_v11 = vpack.c.bf16 %v23094_v27, %v11937_v28  ;;  %v11686_v33 = vrot.slane %v11665_v58, 1  ;;  %v23269_v24 = vrot.slane %v11666_v42, 1  ;;  %v11799_v32 = vpack.c.bf16 %v11797_v30, %v23176_v37  ;;  %v24620_v42 = vld [vmem:[#allocation54_spill] sm:$0xff] }
 0x8db   : > { %v11818_v45 = vshrl.u32 %v11798_v2, 16  ;;  %v11546_v49 = vrot.slane %v11544_v31, 1  ;;  %v23272_v52 = vrot.slane %v11549_v21, 1  ;;  %v11821_v0 = vshll.u32 %v11798_v2, 16 }
 0x8dc   : > { %17482 = vmatpush3.bf16.msra.mxu1 %v18760_v25  ;;  %v11940_v8 = vpack.c.bf16 %v11938_v23, %v23097_v55  ;;  %v23280_v61 = vsel %vm1859_vm3, %v11686_v33, %v23269_v24  ;;  %v11826_v37 = vshrl.u32 %v11799_v32, 16  ;;  %v11829_v44 = vshll.u32 %v11799_v32, 16  ;;  %v12211_v25 = vld [vmem:[#allocation2 + $0x10] sm:$0xc0]  ;;  %v24622_v33 = vld [vmem:[#allocation57_spill] sm:$0xff] }
 0x8dd   : > { %17483 = vmatprep.subr.bf16.mxu1 %v18761_v57  ;;  %v11820_v56 = vrot.slane %v11818_v45, 1  ;;  %v23283_v16 = vmul.f32 %v10555_v51, %v24619_v34  ;;  %v11547_v17 = vor.u32 %v11546_v49, %v11542_v1  ;;  %v11823_v28 = vrot.slane %v11821_v0, 2  ;;  %v12344_v23 = vld [vmem:[#allocation2 + $0x10] sm:$0x80] }
 0x8de   : > { %v11960_v19 = vrot.slane %v11939_v11, 2  ;;  %v11828_v48 = vrot.slane %v11826_v37, 1  ;;  %v11831_v30 = vrot.slane %v11829_v44, 2  ;;  %v23285_v58 = vrot.slane %v11940_v8, 2  ;;  %v24623_v32 = vld [vmem:[#allocation59_spill] sm:$0xff]  ;;  %v24626_v37 = vld [vmem:[#allocation65_spill] sm:$0xff] }
 0x8df   : > { %v12068_v2 = vmul.f32 %v12066_v20, %v24620_v42  ;;  %v23290_v31 = vsel %vm24621_vm8, %v11547_v17, %v23272_v52  ;;  %v11824_v21 = vor.u32 %v11823_v28, %v11820_v56  ;;  %v12071_v51 = vmul.f32 %v12067_v39, %v24622_v33  ;;  %v18763_v11 = vld [vmem:[%s24073_s8 + $0x30] sm:$0xff]   ;;  %v24625_v39 = vld [vmem:[#allocation64_spill] sm:$0xff] }
 0x8e0   : > { %17484 = vmatpush3.bf16.msra.mxu1 %v18761_v57  ;;  %v12213_v1 = vmul.f32 %v12211_v25, %v24623_v32  ;;  %v23297_v45 = vor.u32 %v11831_v30, %v11828_v48  ;;  %v23301_v20 = vsel %vm2316_vm7, %v11960_v19, %v23285_v58  ;;  %v24624_v49 = vld [vmem:[#allocation63_spill] sm:$0xff]  ;;  %v12215_v56 = vmul.f32 %v23097_v55, %v24625_v39  ;;  %v24627_v25 = vld [vmem:[#allocation58_spill] sm:$0xff]  ;;  %v23314_v30 = vld [vmem:[#allocation2 + $0x40] sm:$0xff] }
 0x8e1   : > { %17485 = vmatprep.subr.bf16.mxu1 %v18762_v18  ;;  %v12072_v57 = vpack.c.bf16 %v23228_v53, %v12068_v2  ;;  %v12214_v0 = vmul.f32 %v23094_v27, %v24624_v49  ;;  %v12073_v8 = vpack.c.bf16 %v12071_v51, %v12070_v12  ;;  %v12216_v44 = vmul.f32 %v12212_v4, %v24626_v37  ;;  %v24629_v2 = vld [vmem:[#allocation60_spill] sm:$0xff]  ;;  %v24630_v32 = vld [vmem:[#allocation61_spill] sm:$0xff] }
 0x8e2   : > { %v12346_v34 = vmul.f32 %v12344_v23, %v24627_v25  ;;  %v23312_v17 = vsel %vm24628_vm12, %v11824_v21, %v23297_v45  ;;  %v12347_v33 = vmul.f32 %v23094_v27, %v24629_v2  ;;  %v18764_v4 = vld [vmem:[%s24073_s8 + $0x38] sm:$0xff]   ;;  %v10561_v39 = vpack.c.bf16 %v23283_v16, %v23119_v3  ;;  %v10295_v16 = vld [vmem:[#allocation2 + $0x30] sm:$0x1]  ;;  %v24632_v2 = vld [vmem:[#allocation30_spill] sm:$0xff] }
 0x8e3   : > { %v12092_v28 = vshrl.u32 %v12072_v57, 16  ;;  %v12095_v19 = vshll.u32 %v12072_v57, 16  ;;  %v12217_v48 = vpack.c.bf16 %v12214_v0, %v12213_v1  ;;  %v12100_v53 = vshrl.u32 %v12073_v8, 16  ;;  %v24631_v0 = vld [vmem:[#allocation62_spill] sm:$0xff] }
 0x8e4   : > { %17486 = vmatpush3.bf16.msra.mxu1 %v18762_v18  ;;  %v12103_v42 = vshll.u32 %v12073_v8, 16  ;;  %v12218_v12 = vpack.c.bf16 %v12216_v44, %v12215_v56  ;;  %v12348_v1 = vmul.f32 %v23097_v55, %v24630_v32  ;;  %v12349_v8 = vmul.f32 %v23314_v30, %v24631_v0  ;;  %v23348_v32 = vld [vmem:[#allocation2 + $0x30] sm:$0xff]  ;;  %v18766_v0 = vld [vmem:[%s24073_s8 + $0x88] sm:$0xff]  }
 0x8e5   : > { %17487 = vmatprep.subr.bf16.mxu1 %v18763_v11  ;;  %v12094_v23 = vrot.slane %v12092_v28, 2  ;;  %v12097_v21 = vrot.slane %v12095_v19, 3  ;;  %v12238_v51 = vrot.slane %v12217_v48, 3  ;;  %v12102_v57 = vrot.slane %v12100_v53, 2  ;;  %v18765_v19 = vld [vmem:[%s24073_s8 + $0x80] sm:$0xff]  }
 0x8e6   : > { %v12105_v49 = vrot.slane %v12103_v42, 3  ;;  %v23323_v18 = vrot.slane %v12218_v12, 3  ;;  %v12350_v56 = vpack.c.bf16 %v12347_v33, %v12346_v34  ;;  %v12351_v28 = vpack.c.bf16 %v12349_v8, %v12348_v1  ;;  %v12894_v12 = vld [vmem:[#allocation2 + $0x50] sm:$0xf] }
 0x8e7   : > { %v12098_v37 = vor.u32 %v12097_v21, %v12094_v23  ;;  %v10560_v48 = vpack.c.bf16 %v23250_v5, %v23106_v6  ;;  %v10298_v33 = vmul.f32 %v24632_v2, %v23094_v27  ;;  %v23346_v23 = vrot.slane %v10561_v39, 1  ;;  %v12893_v6 = vld [vmem:[#allocation2 + $0x20] sm:$0xf8]  ;;  %v13317_v2 = vld [vmem:[#allocation2 + $0x50] sm:$0x7f] }
 0x8e8   : > { %17488 = vmatpush3.bf16.msra.mxu1 %v18763_v11  ;;  %v23329_v44 = vor.u32 %v12105_v49, %v12102_v57  ;;  %v23333_v25 = vsel %vm2480_vm14, %v12238_v51, %v23323_v18  ;;  %v12370_v53 = vshrl.u32 %v12350_v56, 16  ;;  %v12373_v3 = vshll.u32 %v12350_v56, 16 }
 0x8e9   : > { %17489 = vmatprep.subr.bf16.mxu1 %v18764_v4  ;;  %v12378_v34 = vshrl.u32 %v12351_v28, 16  ;;  %v12381_v42 = vshll.u32 %v12351_v28, 16  ;;  %v10301_v57 = vpack.c.bf16 %v10295_v16, %v10298_v33  ;;  %v10581_v49 = vrot.slane %v10560_v48, 1  ;;  %v13039_v28 = vld [vmem:[#allocation2 + $0x50] sm:$0x1f] }
 0x8ea   : > { %v23342_v11 = vsel %vm2529_vm10, %v12098_v37, %v23329_v44  ;;  %v12372_v21 = vrot.slane %v12370_v53, 3  ;;  %v12375_v51 = vrot.slane %v12373_v3, 4  ;;  %v12898_v8 = vmul.f32 %v12894_v12, %v24578_v10 }
 0x8eb   : > { %v12380_v5 = vrot.slane %v12378_v34, 3  ;;  %v12383_v1 = vrot.slane %v12381_v42, 4  ;;  %v12895_v56 = vmul.f32 %v12893_v6, %v24580_v7  ;;  %v12896_v37 = vmul.f32 %v23348_v32, %v24579_v35  ;;  %v18767_v35 = vld [vmem:[%s24073_s8 + $0x90] sm:$0xff]  }
 0x8ec   : > { %17490 = vmatpush3.bf16.msra.mxu1 %v18764_v4  ;;  %v12376_v27 = vor.u32 %v12375_v51, %v12372_v21  ;;  %v13038_v4 = vld [vmem:[#allocation2 + $0x20] sm:$0xf0]  ;;  %v10583_v48 = vsel %vm1859_vm3, %v10581_v49, %v23346_v23  ;;  %v12897_v10 = vmul.f32 %v23314_v30, %v24577_v50  ;;  %v13043_v16 = vmul.f32 %v13039_v28, %v21770_v47  ;;  %v13172_v34 = vld [vmem:[#allocation2 + $0x50] sm:$0x3f]  ;;  %v18768_v47 = vld [vmem:[%s24073_s8 + $0x98] sm:$0xff]  }
 0x8ed   : > { %17495 = vmatprep.subr.bf16.mxu1 %v18765_v19  ;;  %v23354_v39 = vor.u32 %v12383_v1, %v12380_v5  ;;  %v12899_v7 = vpack.c.bf16 %v12896_v37, %v12895_v56  ;;  %v13040_v3 = vmul.f32 %v13038_v4, %v21749_v63  ;;  %v13041_v42 = vmul.f32 %v23348_v32, %v21760_v36  ;;  %v13171_v21 = vld [vmem:[#allocation2 + $0x20] sm:$0xe0] }
 0x8ee   : > { %v13042_v12 = vmul.f32 %v23314_v30, %v21766_v46  ;;  %v13176_v63 = vmul.f32 %v13172_v34, %v24583_v26  ;;  %v13316_v49 = vld [vmem:[#allocation2 + $0x20] sm:$0xc0] }
 0x8ef   : > { %17492 = vmatmul.mubr.bf16.vlgmr.msra.gmra.mrb[136].mxu1 %v10301_v57  ;;  %v23363_v53 = vsel %vm2975_vm6, %v12376_v27, %v23354_v39  ;;  %v12919_v50 = vshrl.u32 %v12899_v7, 16  ;;  %v12922_v33 = vshll.u32 %v12899_v7, 16  ;;  %v13044_v5 = vpack.c.bf16 %v13041_v42, %v13040_v3  ;;  %v24633_v46 = vld [vmem:[#allocation81_spill] sm:$0xff]  ;;  %v24636_v3 = vld [vmem:[#allocation74_spill] sm:$0xff] }
 0x8f0   : > { %17496 = vmatpush3.bf16.msra.mxu1 %v18765_v19  ;;  %17511 = vmatprep.mubr.bf16.mxu1 %v10583_v48  ;;  %v12900_v19 = vpack.c.bf16 %v12898_v8, %v12897_v10  ;;  %v13045_v57 = vpack.c.bf16 %v13043_v16, %v13042_v12  ;;  %v13321_v8 = vmul.f32 %v13317_v2, %v24633_v46  ;;  %v13449_v28 = vld [vmem:[#allocation2 + $0x20] sm:$0x80]  ;;  %v24638_v12 = vld [vmem:[#allocation79_spill] sm:$0xff] }
 0x8f1   : > { %17497 = vmatprep.subr.bf16.mxu1 %v18766_v0  ;;  %v12921_v1 = vrot.slane %v12919_v50, 1  ;;  %v12924_v36 = vrot.slane %v12922_v33, 2  ;;  %v13065_v37 = vrot.slane %v13044_v5, 2  ;;  %v24635_v26 = vld [vmem:[#allocation73_spill] sm:$0xff]  ;;  %v13175_v34 = vmul.f32 %v23314_v30, %v24636_v3  ;;  %v24639_v50 = vld [vmem:[#allocation80_spill] sm:$0xff] }
 0x8f2   : > { %v12927_v51 = vshrl.u32 %v12900_v19, 16  ;;  %v12930_v6 = vshll.u32 %v12900_v19, 16  ;;  %v23382_v10 = vrot.slane %v13045_v57, 2  ;;  %v13174_v7 = vmul.f32 %v23348_v32, %v24635_v26  ;;  %v24637_v19 = vld [vmem:[#allocation41_spill] sm:$0xff]  ;;  %v24640_v5 = vld [vmem:[#allocation76_spill] sm:$0xff] }
 0x8f3   : > { %v12925_v48 = vor.u32 %v12924_v36, %v12921_v1  ;;  %v13318_v42 = vmul.f32 %v13316_v49, %v24637_v19  ;;  %v13319_v2 = vmul.f32 %v23348_v32, %v24638_v12  ;;  %v13320_v33 = vmul.f32 %v23314_v30, %v24639_v50  ;;  %v24642_v46 = vld [vmem:[#allocation77_spill] sm:$0xff] }
 0x8f4   : > { %17498 = vmatpush3.bf16.msra.mxu1 %v18766_v0  ;;  %v12929_v27 = vrot.slane %v12927_v51, 1  ;;  %v12932_v56 = vrot.slane %v12930_v6, 2  ;;  %v24634_v0 = vld [vmem:[#allocation72_spill] sm:$0xff]  ;;  %v23400_v51 = vsel %vm2316_vm7, %v13065_v37, %v23382_v10  ;;  %v13178_v6 = vpack.c.bf16 %v13176_v63, %v13175_v34  ;;  %v24643_v63 = vld [vmem:[#allocation78_spill] sm:$0xff]  ;;  %vm24653_vm7 = vmmov %vm24607_vm5 }
 0x8f5   : > { %17499 = vmatprep.subr.bf16.mxu1 %v18767_v35  ;;  %v13173_v4 = vmul.f32 %v13171_v21, %v24634_v0  ;;  %v18769_v21 = vld [vmem:[%s24073_s8 + $0xa0] sm:$0xff]   ;;  %v13451_v1 = vmul.f32 %v13449_v28, %v24640_v5  ;;  %v13322_v57 = vpack.c.bf16 %v13319_v2, %v13318_v42  ;;  %v13323_v49 = vpack.c.bf16 %v13321_v8, %v13320_v33  ;;  %v18770_v8 = vld [vmem:[%s24073_s8 + $0xa8] sm:$0xff]  }
 0x8f6   : > { %v23388_v16 = vor.u32 %v12932_v56, %v12929_v27  ;;  %v13452_v27 = vmul.f32 %v23348_v32, %v24642_v46  ;;  %v13205_v26 = vshrl.u32 %v13178_v6, 16  ;;  %v13208_v3 = vshll.u32 %v13178_v6, 16 }
 0x8f7   : > { %v13343_v37 = vrot.slane %v13322_v57, 3  ;;  %v23409_v19 = vrot.slane %v13323_v49, 3  ;;  %v18771_v49 = vld [vmem:[%s24073_s8 + $0xb0] sm:$0xff]  }
 0x8f8   : > { %17500 = vmatpush3.bf16.msra.mxu1 %v18767_v35  ;;  %v13177_v35 = vpack.c.bf16 %v13174_v7, %v13173_v4  ;;  %v23405_v36 = vsel %vm24641_vm15, %v12925_v48, %v23388_v16  ;;  %v13453_v4 = vmul.f32 %v23314_v30, %v24643_v63  ;;  %v13455_v28 = vpack.c.bf16 %v13452_v27, %v13451_v1  ;;  %v18774_v63 = vld [vmem:[%s24073_s8 + $0xc8] sm:$0xff]  }
 0x8f9   : > { %17501 = vmatprep.subr.bf16.mxu1 %v18768_v47  ;;  %v13207_v34 = vrot.slane %v13205_v26, 2  ;;  %v13210_v42 = vrot.slane %v13208_v3, 3  ;;  %v23418_v12 = vsel %vm2480_vm14, %v13343_v37, %v23409_v19  ;;  %v18773_v37 = vld [vmem:[%s24073_s8 + $0xc0] sm:$0xff]  }
 0x8fa   : > { %v13197_v56 = vshrl.u32 %v13177_v35, 16  ;;  %v13200_v0 = vshll.u32 %v13177_v35, 16  ;;  %v13475_v50 = vshrl.u32 %v13455_v28, 16  ;;  %v13478_v33 = vshll.u32 %v13455_v28, 16  ;;  %v18776_v28 = vld [vmem:[%s24073_s8 + $0xd8] sm:$0xff]  }
 0x8fb   : > { %v23421_v30 = vor.u32 %v13210_v42, %v13207_v34  ;;  %v18782_v34 = vld [vmem:[%s24073_s8 + $0x108] sm:$0xff]   ;;  %v18783_v42 = vld [vmem:[%s24073_s8 + $0x110] sm:$0xff]  }
 0x8fc   : > { %17502 = vmatpush3.bf16.msra.mxu1 %v18768_v47  ;;  %v13199_v48 = vrot.slane %v13197_v56, 2  ;;  %v13202_v7 = vrot.slane %v13200_v0, 3  ;;  %v24644_v47 = vld [vmem:[#allocation31_spill] sm:$0xff]  ;;  %v13477_v6 = vrot.slane %v13475_v50, 3  ;;  %v13480_v5 = vrot.slane %v13478_v33, 4  ;;  %v18788_v50 = vld [vmem:[%s24073_s8 + $0x138] sm:$0xff]  }
 0x8fd   : > { %17503 = vmatprep.subr.bf16.mxu1 %v18769_v21  ;;  %v13456_v2 = vpack.c.bf16 %v24644_v47, %v13453_v4  ;;  %v18775_v4 = vld [vmem:[%s24073_s8 + $0xd0] sm:$0xff]   ;;  %v18784_v47 = vld [vmem:[%s24073_s8 + $0x118] sm:$0xff]   ;;  %v18789_v33 = vld [vmem:[%s24073_s8 + $0x140] sm:$0xff]  }
 0x8fe   : > { %v13203_v35 = vor.u32 %v13202_v7, %v13199_v48  ;;  %v13481_v27 = vor.u32 %v13480_v5, %v13477_v6  ;;  %v18780_v48 = vld [vmem:[%s24073_s8 + $0xf8] sm:$0xff]   ;;  %v18781_v7 = vld [vmem:[%s24073_s8 + $0x100] sm:$0xff]   ;;  %v18791_v6 = vld [vmem:[%s24073_s8 + $0x150] sm:$0xff]  }
 0x8ff   : > { %v13483_v1 = vshrl.u32 %v13456_v2, 16  ;;  %v13486_v57 = vshll.u32 %v13456_v2, 16  ;;  %v18787_v2 = vld [vmem:[%s24073_s8 + $0x130] sm:$0xff]   ;;  %v18792_v5 = vld [vmem:[%s24073_s8 + $0x158] sm:$0xff]  }
 0x900   : > { %17504 = vmatpush3.bf16.msra.mxu1 %v18769_v21  ;;  %v23428_v46 = vsel %vm2529_vm10, %v13203_v35, %v23421_v30  ;;  %v18772_v21 = vld [vmem:[%s24073_s8 + $0xb8] sm:$0xff]   ;;  %v18790_v35 = vld [vmem:[%s24073_s8 + $0x148] sm:$0xff]  }
 0x901   : > { %17505 = vmatprep.subr.bf16.mxu1 %v18770_v8  ;;  %v13485_v56 = vrot.slane %v13483_v1, 3  ;;  %v13488_v0 = vrot.slane %v13486_v57, 4  ;;  %v18795_v1 = vld [vmem:[%s24073_s8 + $0x170] sm:$0xff]   ;;  %v18796_v57 = vld [vmem:[%s24073_s8 + $0x178] sm:$0xff]  }
 0x903   : > { %v23430_v26 = vor.u32 %v13488_v0, %v13485_v56  ;;  %v18799_v56 = vld [vmem:[%s24073_s8 + $0x190] sm:$0xff]   ;;  %v18800_v0 = vld [vmem:[%s24073_s8 + $0x198] sm:$0xff]  }
 0x904   : > { %17506 = vmatpush3.bf16.msra.mxu1 %v18770_v8  ;;  %v18779_v8 = vld [vmem:[%s24073_s8 + $0xf0] sm:$0xff]  }
 0x905   : > { %17507 = vmatprep.subr.bf16.mxu1 %v18771_v49  ;;  %v23437_v3 = vsel %vm2975_vm6, %v13481_v27, %v23430_v26  ;;  %v18798_v27 = vld [vmem:[%s24073_s8 + $0x188] sm:$0xff]  }
 0x908   : > { %17508 = vmatpush3.bf16.msra.mxu1 %v18771_v49  ;;  %v18797_v49 = vld [vmem:[%s24073_s8 + $0x180] sm:$0xff]  }
 0x909   : > { %17509 = vmatprep.subr.bf16.mxu1 %v18772_v21 }
 0x90c   : > { %17510 = vmatpush3.bf16.msra.mxu1 %v18772_v21  ;;  %v18803_v21 = vld [vmem:[%s24073_s8 + $0x1b0] sm:$0xff]  }
 0x90d   : > { %17515 = vmatprep.subr.bf16.mxu1 %v18773_v37 }
 0x90f   : > { %17512 = vmatmul.mubr.bf16.vlgmr.msra.gmra.mrb[136].mxu1 %v23346_v23  ;;  %v18777_v23 = vld [vmem:[%s24073_s8 + $0xe0] sm:$0xff]  }
 0x910   : > { %17516 = vmatpush3.bf16.msra.mxu1 %v18773_v37  ;;  %17531 = vmatprep.mubr.bf16.mxu1 %v23205_v62  ;;  %v18778_v62 = vld [vmem:[%s24073_s8 + $0xe8] sm:$0xff]   ;;  %v18804_v37 = vld [vmem:[%s24073_s8 + $0x1b8] sm:$0xff]  }
 0x911   : > { %17517 = vmatprep.subr.bf16.mxu1 %v18774_v63 }
 0x914   : > { %17518 = vmatpush3.bf16.msra.mxu1 %v18774_v63  ;;  %v18805_v63 = vld [vmem:[%s24073_s8 + $0x1c0] sm:$0xff]  }
 0x915   : > { %17519 = vmatprep.subr.bf16.mxu1 %v18775_v4 }
 0x918   : > { %17520 = vmatpush3.bf16.msra.mxu1 %v18775_v4  ;;  %v18806_v4 = vld [vmem:[%s24073_s8 + $0x1c8] sm:$0xff]  }
 0x919   : > { %17521 = vmatprep.subr.bf16.mxu1 %v18776_v28 }
 0x91c   : > { %17522 = vmatpush3.bf16.msra.mxu1 %v18776_v28  ;;  %v18807_v28 = vld [vmem:[%s24073_s8 + $0x1d0] sm:$0xff]  }
 0x91d   : > { %17523 = vmatprep.subr.bf16.mxu1 %v18777_v23 }
 0x920   : > { %17524 = vmatpush3.bf16.msra.mxu1 %v18777_v23  ;;  %v18808_v23 = vld [vmem:[%s24073_s8 + $0x1d8] sm:$0xff]  }
 0x921   : > { %17525 = vmatprep.subr.bf16.mxu1 %v18778_v62 }
 0x924   : > { %17526 = vmatpush3.bf16.msra.mxu1 %v18778_v62  ;;  %v18811_v62 = vld [vmem:[%s24073_s8 + $0x1f0] sm:$0xff]  }
 0x925   : > { %17527 = vmatprep.subr.bf16.mxu1 %v18779_v8 }
 0x928   : > { %17528 = vmatpush3.bf16.msra.mxu1 %v18779_v8  ;;  %v18812_v8 = vld [vmem:[%s24073_s8 + $0x1f8] sm:$0xff]  }
 0x929   : > { %17529 = vmatprep.subr.bf16.mxu1 %v18780_v48 }
 0x92c   : > { %17530 = vmatpush3.bf16.msra.mxu1 %v18780_v48  ;;  %v18813_v48 = vld [vmem:[%s24073_s8 + $0x200] sm:$0xff]  }
 0x92d   : > { %17535 = vmatprep.subr.bf16.mxu1 %v18781_v7 }
 0x92f   : > { %17532 = vmatmul.mubr.bf16.vlgmr.msra.gmra.mrb[136].mxu1 %v23194_v9  ;;  %v18785_v9 = vld [vmem:[%s24073_s8 + $0x120] sm:$0xff]  }
 0x930   : > { %17536 = vmatpush3.bf16.msra.mxu1 %v18781_v7  ;;  %17551 = vmatprep.mubr.bf16.mxu1 %v23199_v14  ;;  %v18786_v14 = vld [vmem:[%s24073_s8 + $0x128] sm:$0xff]  }
 0x931   : > { %17537 = vmatprep.subr.bf16.mxu1 %v18782_v34  ;;  %v18814_v7 = vld [vmem:[%s24073_s8 + $0x208] sm:$0xff]  }
 0x934   : > { %17538 = vmatpush3.bf16.msra.mxu1 %v18782_v34  ;;  %v18815_v34 = vld [vmem:[%s24073_s8 + $0x210] sm:$0xff]  }
 0x935   : > { %17539 = vmatprep.subr.bf16.mxu1 %v18783_v42 }
 0x938   : > { %17540 = vmatpush3.bf16.msra.mxu1 %v18783_v42  ;;  %v18816_v42 = vld [vmem:[%s24073_s8 + $0x218] sm:$0xff]  }
 0x939   : > { %17541 = vmatprep.subr.bf16.mxu1 %v18784_v47 }
 0x93c   : > { %17542 = vmatpush3.bf16.msra.mxu1 %v18784_v47  ;;  %v11391_v47 = vld [vmem:[#allocation2 + $0x40] sm:$0x1] }
 0x93d   : > { %17543 = vmatprep.subr.bf16.mxu1 %v18785_v9 }
 0x940   : > { %17544 = vmatpush3.bf16.msra.mxu1 %v18785_v9  ;;  %v11395_v9 = vmul.f32 0.0, %v11391_v47  ;;  %v18862_v47 = vld [vmem:[%s24073_s8 + $0x388] sm:$0xff]  }
 0x941   : > { %17545 = vmatprep.subr.bf16.mxu1 %v18786_v14 }
 0x944   : > { %17546 = vmatpush3.bf16.msra.mxu1 %v18786_v14  ;;  %v18821_v14 = vld [vmem:[%s24073_s8 + $0x240] sm:$0xff]  }
 0x945   : > { %17547 = vmatprep.subr.bf16.mxu1 %v18787_v2 }
 0x948   : > { %17548 = vmatpush3.bf16.msra.mxu1 %v18787_v2  ;;  %v24645_v2 = vld [vmem:[#allocation48_spill] sm:$0xff] }
 0x949   : > { %17549 = vmatprep.subr.bf16.mxu1 %v18788_v50 }
 0x94c   : > { %17550 = vmatpush3.bf16.msra.mxu1 %v18788_v50  ;;  %v11394_v50 = vmul.f32 %v24645_v2, %v23097_v55  ;;  %v18824_v55 = vld [vmem:[%s24073_s8 + $0x258] sm:$0xff]   ;;  %v18867_v2 = vld [vmem:[%s24073_s8 + $0x3b0] sm:$0xff]  }
 0x94d   : > { %17555 = vmatprep.subr.bf16.mxu1 %v18789_v33 }
 0x94f   : > { %17552 = vmatmul.mubr.bf16.vlgmr.msra.gmra.mrb[136].mxu1 %v23192_v43  ;;  %v18793_v43 = vld [vmem:[%s24073_s8 + $0x160] sm:$0xff]  }
 0x950   : > { %17556 = vmatpush3.bf16.msra.mxu1 %v18789_v33  ;;  %17571 = vmatprep.mubr.bf16.mxu1 %v23235_v59  ;;  %v18794_v59 = vld [vmem:[%s24073_s8 + $0x168] sm:$0xff]   ;;  %v11397_v33 = vpack.c.bf16 %v11395_v9, %v11394_v50  ;;  %v18863_v9 = vld [vmem:[%s24073_s8 + $0x390] sm:$0xff]   ;;  %v18868_v50 = vld [vmem:[%s24073_s8 + $0x3b8] sm:$0xff]  }
 0x951   : > { %17557 = vmatprep.subr.bf16.mxu1 %v18790_v35 }
 0x954   : > { %17558 = vmatpush3.bf16.msra.mxu1 %v18790_v35  ;;  %v18822_v35 = vld [vmem:[%s24073_s8 + $0x248] sm:$0xff]  }
 0x955   : > { %17559 = vmatprep.subr.bf16.mxu1 %v18791_v6 }
 0x958   : > { %17560 = vmatpush3.bf16.msra.mxu1 %v18791_v6  ;;  %v18823_v6 = vld [vmem:[%s24073_s8 + $0x250] sm:$0xff]  }
 0x959   : > { %17561 = vmatprep.subr.bf16.mxu1 %v18792_v5 }
 0x95c   : > { %17562 = vmatpush3.bf16.msra.mxu1 %v18792_v5  ;;  %v18825_v5 = vld [vmem:[%s24073_s8 + $0x260] sm:$0xff]  }
 0x95d   : > { %17563 = vmatprep.subr.bf16.mxu1 %v18793_v43 }
 0x960   : > { %17564 = vmatpush3.bf16.msra.mxu1 %v18793_v43  ;;  %v18827_v43 = vld [vmem:[%s24073_s8 + $0x270] sm:$0xff]  }
 0x961   : > { %17565 = vmatprep.subr.bf16.mxu1 %v18794_v59 }
 0x964   : > { %17566 = vmatpush3.bf16.msra.mxu1 %v18794_v59  ;;  %v18828_v59 = vld [vmem:[%s24073_s8 + $0x278] sm:$0xff]  }
 0x965   : > { %17567 = vmatprep.subr.bf16.mxu1 %v18795_v1 }
 0x968   : > { %17568 = vmatpush3.bf16.msra.mxu1 %v18795_v1  ;;  %v18829_v1 = vld [vmem:[%s24073_s8 + $0x280] sm:$0xff]  }
 0x969   : > { %17569 = vmatprep.subr.bf16.mxu1 %v18796_v57 }
 0x96c   : > { %17570 = vmatpush3.bf16.msra.mxu1 %v18796_v57  ;;  %v11553_v57 = vshrl.u32 %v23254_v60, 16  ;;  %v18832_v60 = vld [vmem:[%s24073_s8 + $0x298] sm:$0xff]  }
 0x96d   : > { %17575 = vmatprep.subr.bf16.mxu1 %v18797_v49 }
 0x96f   : > { %17572 = vmatmul.mubr.bf16.vlgmr.msra.gmra.mrb[136].mxu1 %v23216_v40  ;;  %v18801_v40 = vld [vmem:[%s24073_s8 + $0x1a0] sm:$0xff]  }
 0x970   : > { %17576 = vmatpush3.bf16.msra.mxu1 %v18797_v49  ;;  %17591 = vmatprep.mubr.bf16.mxu1 %v23224_v22  ;;  %v18802_v22 = vld [vmem:[%s24073_s8 + $0x1a8] sm:$0xff]   ;;  %v11555_v49 = vor.u32 %v11553_v57, %v23272_v52  ;;  %v18833_v52 = vld [vmem:[%s24073_s8 + $0x2a0] sm:$0xff]  }
 0x971   : > { %17577 = vmatprep.subr.bf16.mxu1 %v18798_v27 }
 0x974   : > { %17578 = vmatpush3.bf16.msra.mxu1 %v18798_v27  ;;  %v18830_v27 = vld [vmem:[%s24073_s8 + $0x288] sm:$0xff]  }
 0x975   : > { %17579 = vmatprep.subr.bf16.mxu1 %v18799_v56 }
 0x978   : > { %17580 = vmatpush3.bf16.msra.mxu1 %v18799_v56  ;;  %v18831_v56 = vld [vmem:[%s24073_s8 + $0x290] sm:$0xff]  }
 0x979   : > { %17581 = vmatprep.subr.bf16.mxu1 %v18800_v0 }
 0x97c   : > { %17582 = vmatpush3.bf16.msra.mxu1 %v18800_v0  ;;  %v18835_v0 = vld [vmem:[%s24073_s8 + $0x2b0] sm:$0xff]  }
 0x97d   : > { %17583 = vmatprep.subr.bf16.mxu1 %v18801_v40 }
 0x980   : > { %17584 = vmatpush3.bf16.msra.mxu1 %v18801_v40  ;;  %v18836_v40 = vld [vmem:[%s24073_s8 + $0x2b8] sm:$0xff]  }
 0x981   : > { %17585 = vmatprep.subr.bf16.mxu1 %v18802_v22 }
 0x984   : > { %17586 = vmatpush3.bf16.msra.mxu1 %v18802_v22  ;;  %v18837_v22 = vld [vmem:[%s24073_s8 + $0x2c0] sm:$0xff]  }
 0x985   : > { %17587 = vmatprep.subr.bf16.mxu1 %v18803_v21 }
 0x988   : > { %17588 = vmatpush3.bf16.msra.mxu1 %v18803_v21  ;;  %v18838_v21 = vld [vmem:[%s24073_s8 + $0x2c8] sm:$0xff]  }
 0x989   : > { %17589 = vmatprep.subr.bf16.mxu1 %v18804_v37 }
 0x98c   : > { %17590 = vmatpush3.bf16.msra.mxu1 %v18804_v37  ;;  %v18839_v37 = vld [vmem:[%s24073_s8 + $0x2d0] sm:$0xff]  }
 0x98d   : > { %17595 = vmatprep.subr.bf16.mxu1 %v18805_v63 }
 0x98f   : > { %17592 = vmatmul.mubr.bf16.vlgmr.msra.gmra.mrb[136].mxu1 %v23212_v54  ;;  %v18809_v54 = vld [vmem:[%s24073_s8 + $0x1e0] sm:$0xff]  }
 0x990   : > { %17596 = vmatpush3.bf16.msra.mxu1 %v18805_v63  ;;  %17611 = vmatprep.mubr.bf16.mxu1 %v23262_v15  ;;  %v18810_v15 = vld [vmem:[%s24073_s8 + $0x1e8] sm:$0xff]   ;;  %v18840_v63 = vld [vmem:[%s24073_s8 + $0x2d8] sm:$0xff]  }
 0x991   : > { %17597 = vmatprep.subr.bf16.mxu1 %v18806_v4 }
 0x994   : > { %17598 = vmatpush3.bf16.msra.mxu1 %v18806_v4  ;;  %v18843_v4 = vld [vmem:[%s24073_s8 + $0x2f0] sm:$0xff]  }
 0x995   : > { %17599 = vmatprep.subr.bf16.mxu1 %v18807_v28 }
 0x998   : > { %17600 = vmatpush3.bf16.msra.mxu1 %v18807_v28  ;;  %v18844_v28 = vld [vmem:[%s24073_s8 + $0x2f8] sm:$0xff]  }
 0x999   : > { %17601 = vmatprep.subr.bf16.mxu1 %v18808_v23 }
 0x99c   : > { %17602 = vmatpush3.bf16.msra.mxu1 %v18808_v23  ;;  %v18845_v23 = vld [vmem:[%s24073_s8 + $0x300] sm:$0xff]  }
 0x99d   : > { %17603 = vmatprep.subr.bf16.mxu1 %v18809_v54 }
 0x9a0   : > { %17604 = vmatpush3.bf16.msra.mxu1 %v18809_v54  ;;  %v18846_v54 = vld [vmem:[%s24073_s8 + $0x308] sm:$0xff]  }
 0x9a1   : > { %17605 = vmatprep.subr.bf16.mxu1 %v18810_v15 }
 0x9a4   : > { %17606 = vmatpush3.bf16.msra.mxu1 %v18810_v15  ;;  %v18847_v15 = vld [vmem:[%s24073_s8 + $0x310] sm:$0xff]  }
 0x9a5   : > { %17607 = vmatprep.subr.bf16.mxu1 %v18811_v62 }
 0x9a8   : > { %17608 = vmatpush3.bf16.msra.mxu1 %v18811_v62  ;;  %v18848_v62 = vld [vmem:[%s24073_s8 + $0x318] sm:$0xff]  }
 0x9a9   : > { %17609 = vmatprep.subr.bf16.mxu1 %v18812_v8 }
 0x9ac   : > { %17610 = vmatpush3.bf16.msra.mxu1 %v18812_v8  ;;  %v18851_v8 = vld [vmem:[%s24073_s8 + $0x330] sm:$0xff]  }
 0x9ad   : > { %17615 = vmatprep.subr.bf16.mxu1 %v18813_v48 }
 0x9af   : > { %17612 = vmatmul.mubr.bf16.vlgmr.msra.gmra.mrb[136].mxu1 %v23239_v29  ;;  %v18817_v29 = vld [vmem:[%s24073_s8 + $0x220] sm:$0xff]  }
 0x9b0   : > { %17616 = vmatpush3.bf16.msra.mxu1 %v18813_v48  ;;  %17631 = vmatprep.mubr.bf16.mxu1 %v11396_v13  ;;  %v18820_v13 = vld [vmem:[%s24073_s8 + $0x238] sm:$0xff]  }
 0x9b1   : > { %17617 = vmatprep.subr.bf16.mxu1 %v18814_v7  ;;  %v18852_v48 = vld [vmem:[%s24073_s8 + $0x338] sm:$0xff]  }
 0x9b4   : > { %17618 = vmatpush3.bf16.msra.mxu1 %v18814_v7  ;;  %v18853_v7 = vld [vmem:[%s24073_s8 + $0x340] sm:$0xff]  }
 0x9b5   : > { %17619 = vmatprep.subr.bf16.mxu1 %v18815_v34 }
 0x9b8   : > { %17620 = vmatpush3.bf16.msra.mxu1 %v18815_v34  ;;  %v18854_v34 = vld [vmem:[%s24073_s8 + $0x348] sm:$0xff]  }
 0x9b9   : > { %17621 = vmatprep.subr.bf16.mxu1 %v18816_v42 }
 0x9bc   : > { %17622 = vmatpush3.bf16.msra.mxu1 %v18816_v42  ;;  %v18855_v42 = vld [vmem:[%s24073_s8 + $0x350] sm:$0xff]  }
 0x9bd   : > { %17623 = vmatprep.subr.bf16.mxu1 %v18817_v29 }
 0x9c0   : > { %17624 = vmatpush3.bf16.msra.mxu1 %v18817_v29  ;;  %v18856_v29 = vld [vmem:[%s24073_s8 + $0x358] sm:$0xff]  }
 0x9c1   : > { %17625 = vmatprep.subr.bf16.mxu1 %v18818_v38 }
 0x9c4   : > { %17626 = vmatpush3.bf16.msra.mxu1 %v18818_v38  ;;  %v18859_v38 = vld [vmem:[%s24073_s8 + $0x370] sm:$0xff]  }
 0x9c5   : > { %17627 = vmatprep.subr.bf16.mxu1 %v18819_v41 }
 0x9c8   : > { %17628 = vmatpush3.bf16.msra.mxu1 %v18819_v41  ;;  %v18860_v41 = vld [vmem:[%s24073_s8 + $0x378] sm:$0xff]  }
 0x9c9   : > { %17629 = vmatprep.subr.bf16.mxu1 %v18820_v13 }
 0x9cc   : > { %17630 = vmatpush3.bf16.msra.mxu1 %v18820_v13  ;;  %v18861_v13 = vld [vmem:[%s24073_s8 + $0x380] sm:$0xff]  }
 0x9cd   : > { %17635 = vmatprep.subr.bf16.mxu1 %v18821_v14 }
 0x9cf   : > { %17632 = vmatmul.mubr.bf16.vlgmr.msra.gmra.mrb[136].mxu1 %v11397_v33  ;;  %v18869_v33 = vld [vmem:[%s24073_s8 + $0x3c0] sm:$0xff]  }
 0x9d0   : > { %17636 = vmatpush3.bf16.msra.mxu1 %v18821_v14  ;;  %17651 = vmatprep.mubr.bf16.mxu1 %v23290_v31  ;;  %v18826_v31 = vld [vmem:[%s24073_s8 + $0x268] sm:$0xff]   ;;  %v18864_v14 = vld [vmem:[%s24073_s8 + $0x398] sm:$0xff]  }
 0x9d1   : > { %17637 = vmatprep.subr.bf16.mxu1 %v18822_v35 }
 0x9d4   : > { %17638 = vmatpush3.bf16.msra.mxu1 %v18822_v35  ;;  %v18870_v35 = vld [vmem:[%s24073_s8 + $0x3c8] sm:$0xff]  }
 0x9d5   : > { %17639 = vmatprep.subr.bf16.mxu1 %v18823_v6 }
 0x9d8   : > { %17640 = vmatpush3.bf16.msra.mxu1 %v18823_v6  ;;  %v18871_v6 = vld [vmem:[%s24073_s8 + $0x3d0] sm:$0xff]  }
 0x9d9   : > { %17641 = vmatprep.subr.bf16.mxu1 %v18824_v55 }
 0x9dc   : > { %17642 = vmatpush3.bf16.msra.mxu1 %v18824_v55  ;;  %v18872_v55 = vld [vmem:[%s24073_s8 + $0x3d8] sm:$0xff]  }
 0x9dd   : > { %17643 = vmatprep.subr.bf16.mxu1 %v18825_v5 }
 0x9e0   : > { %17644 = vmatpush3.bf16.msra.mxu1 %v18825_v5  ;;  %v18875_v5 = vld [vmem:[%s24073_s8 + $0x3f0] sm:$0xff]  }
 0x9e1   : > { %17645 = vmatprep.subr.bf16.mxu1 %v18826_v31 }
 0x9e4   : > { %17646 = vmatpush3.bf16.msra.mxu1 %v18826_v31  ;;  %v18876_v31 = vld [vmem:[%s24073_s8 + $0x3f8] sm:$0xff]  }
 0x9e5   : > { %17647 = vmatprep.subr.bf16.mxu1 %v18827_v43 }
 0x9e8   : > { %17648 = vmatpush3.bf16.msra.mxu1 %v18827_v43  ;;  %v12489_v43 = vld [vmem:[#allocation2 + $0x20] sm:$0xff] }
 0x9e9   : > { %17649 = vmatprep.subr.bf16.mxu1 %v18828_v59 }
 0x9ec   : > { %17650 = vmatpush3.bf16.msra.mxu1 %v18828_v59  ;;  %v18877_v59 = vld [vmem:[%s24073_s8 + $0x400] sm:$0xff]  }
 0x9ed   : > { %17655 = vmatprep.subr.bf16.mxu1 %v18829_v1 }
 0x9ef   : > { %17652 = vmatmul.mubr.bf16.vlgmr.msra.gmra.mrb[136].mxu1 %v11555_v49  ;;  %v24647_v49 = vld [vmem:[#allocation69_spill] sm:$0xff] }
 0x9f0   : > { %17656 = vmatpush3.bf16.msra.mxu1 %v18829_v1  ;;  %17671 = vmatprep.mubr.bf16.mxu1 %v23280_v61  ;;  %v18834_v61 = vld [vmem:[%s24073_s8 + $0x2a8] sm:$0xff]   ;;  %v24646_v1 = vld [vmem:[#allocation47_spill] sm:$0xff] }
 0x9f1   : > { %17657 = vmatprep.subr.bf16.mxu1 %v18830_v27  ;;  %v12493_v57 = vmul.f32 %v24646_v1, %v12489_v43 }
 0x9f4   : > { %17658 = vmatpush3.bf16.msra.mxu1 %v18830_v27  ;;  %v12494_v27 = vmul.f32 %v24647_v49, %v23348_v32 }
 0x9f5   : > { %17659 = vmatprep.subr.bf16.mxu1 %v18831_v56 }
 0x9f8   : > { %17660 = vmatpush3.bf16.msra.mxu1 %v18831_v56  ;;  %v18878_v56 = vld [vmem:[%s24073_s8 + $0x408] sm:$0xff]  }
 0x9f9   : > { %17661 = vmatprep.subr.bf16.mxu1 %v18832_v60 }
 0x9fc   : > { %17662 = vmatpush3.bf16.msra.mxu1 %v18832_v60  ;;  %v12497_v60 = vpack.c.bf16 %v12494_v27, %v12493_v57  ;;  %v18892_v57 = vld [vmem:[%s24073_s8 + $0x478] sm:$0xff]  }
 0x9fd   : > { %17663 = vmatprep.subr.bf16.mxu1 %v18833_v52 }
 0xa00   : > { %17664 = vmatpush3.bf16.msra.mxu1 %v18833_v52  ;;  %v18879_v52 = vld [vmem:[%s24073_s8 + $0x410] sm:$0xff]  }
 0xa01   : > { %17665 = vmatprep.subr.bf16.mxu1 %v18834_v61 }
 0xa04   : > { %17666 = vmatpush3.bf16.msra.mxu1 %v18834_v61  ;;  %v18880_v61 = vld [vmem:[%s24073_s8 + $0x418] sm:$0xff]  }
 0xa05   : > { %17667 = vmatprep.subr.bf16.mxu1 %v18835_v0 }
 0xa08   : > { %17668 = vmatpush3.bf16.msra.mxu1 %v18835_v0  ;;  %v12617_v0 = vld [vmem:[#allocation2 + $0x20] sm:$0xfe] }
 0xa09   : > { %17669 = vmatprep.subr.bf16.mxu1 %v18836_v40 }
 0xa0c   : > { %17670 = vmatpush3.bf16.msra.mxu1 %v18836_v40  ;;  %v24648_v40 = vld [vmem:[#allocation7_spill] sm:$0xff] }
 0xa0d   : > { %17675 = vmatprep.subr.bf16.mxu1 %v18837_v22 }
 0xa0f   : > { %17672 = vmatmul.mubr.bf16.vlgmr.msra.gmra.mrb[136].mxu1 %v23269_v24  ;;  %v18841_v24 = vld [vmem:[%s24073_s8 + $0x2e0] sm:$0xff]  }
 0xa10   : > { %17676 = vmatpush3.bf16.msra.mxu1 %v18837_v22  ;;  %17691 = vmatprep.mubr.bf16.mxu1 %v23312_v17  ;;  %v18842_v17 = vld [vmem:[%s24073_s8 + $0x2e8] sm:$0xff]   ;;  %v12619_v22 = vmul.f32 %v12617_v0, %v24648_v40 }
 0xa11   : > { %17677 = vmatprep.subr.bf16.mxu1 %v18838_v21 }
 0xa14   : > { %17678 = vmatpush3.bf16.msra.mxu1 %v18838_v21  ;;  %v24649_v21 = vld [vmem:[#allocation66_spill] sm:$0xff] }
 0xa15   : > { %17679 = vmatprep.subr.bf16.mxu1 %v18839_v37 }
 0xa18   : > { %17680 = vmatpush3.bf16.msra.mxu1 %v18839_v37  ;;  %v12620_v37 = vmul.f32 %v23348_v32, %v24649_v21  ;;  %v18896_v21 = vld [vmem:[%s24073_s8 + $0x498] sm:$0xff]  }
 0xa19   : > { %17681 = vmatprep.subr.bf16.mxu1 %v18840_v63 }
 0xa1c   : > { %17682 = vmatpush3.bf16.msra.mxu1 %v18840_v63  ;;  %v18882_v63 = vld [vmem:[%s24073_s8 + $0x428] sm:$0xff]  }
 0xa1d   : > { %17683 = vmatprep.subr.bf16.mxu1 %v18841_v24 }
 0xa20   : > { %17684 = vmatpush3.bf16.msra.mxu1 %v18841_v24  ;;  %v12618_v24 = vld [vmem:[#allocation2 + $0x50] sm:$0x3] }
 0xa21   : > { %17685 = vmatprep.subr.bf16.mxu1 %v18842_v17 }
 0xa24   : > { %17686 = vmatpush3.bf16.msra.mxu1 %v18842_v17  ;;  %v12623_v17 = vpack.c.bf16 %v12620_v37, %v12619_v22  ;;  %v18895_v22 = vld [vmem:[%s24073_s8 + $0x490] sm:$0xff]   ;;  %v18897_v37 = vld [vmem:[%s24073_s8 + $0x4a0] sm:$0xff]  }
 0xa25   : > { %17687 = vmatprep.subr.bf16.mxu1 %v18843_v4 }
 0xa26   : > { %v12645_v32 = vshll.u32 %v12623_v17, 16 }
 0xa28   : > { %17688 = vmatpush3.bf16.msra.mxu1 %v18843_v4  ;;  %v18883_v4 = vld [vmem:[%s24073_s8 + $0x430] sm:$0xff]  }
 0xa29   : > { %17689 = vmatprep.subr.bf16.mxu1 %v18844_v28 }
 0xa2c   : > { %17690 = vmatpush3.bf16.msra.mxu1 %v18844_v28  ;;  %v18994_v28 = vld [vmem:[#allocation2 + $0x40] sm:$0xff] }
 0xa2d   : > { %17695 = vmatprep.subr.bf16.mxu1 %v18845_v23 }
 0xa2f   : > { %17692 = vmatmul.mubr.bf16.vlgmr.msra.gmra.mrb[136].mxu1 %v23297_v45  ;;  %v18849_v45 = vld [vmem:[%s24073_s8 + $0x320] sm:$0xff]  }
 0xa30   : > { %17696 = vmatpush3.bf16.msra.mxu1 %v18845_v23  ;;  %17711 = vmatprep.mubr.bf16.mxu1 %v23301_v20  ;;  %v18850_v20 = vld [vmem:[%s24073_s8 + $0x328] sm:$0xff]   ;;  %v24650_v23 = vld [vmem:[#allocation67_spill] sm:$0xff] }
 0xa31   : > { %17697 = vmatprep.subr.bf16.mxu1 %v18846_v54 }
 0xa34   : > { %17698 = vmatpush3.bf16.msra.mxu1 %v18846_v54  ;;  %v12621_v54 = vmul.f32 %v18994_v28, %v24650_v23  ;;  %v18903_v23 = vld [vmem:[%s24073_s8 + $0x4d0] sm:$0xff]  }
 0xa35   : > { %17699 = vmatprep.subr.bf16.mxu1 %v18847_v15 }
 0xa38   : > { %17700 = vmatpush3.bf16.msra.mxu1 %v18847_v15  ;;  %v24651_v15 = vld [vmem:[#allocation68_spill] sm:$0xff] }
 0xa39   : > { %17701 = vmatprep.subr.bf16.mxu1 %v18848_v62 }
 0xa3c   : > { %17702 = vmatpush3.bf16.msra.mxu1 %v18848_v62  ;;  %v12622_v62 = vmul.f32 %v12618_v24, %v24651_v15  ;;  %v18899_v24 = vld [vmem:[%s24073_s8 + $0x4b0] sm:$0xff]   ;;  %v18905_v15 = vld [vmem:[%s24073_s8 + $0x4e0] sm:$0xff]  }
 0xa3d   : > { %17703 = vmatprep.subr.bf16.mxu1 %v18849_v45 }
 0xa40   : > { %17704 = vmatpush3.bf16.msra.mxu1 %v18849_v45  ;;  %v18884_v45 = vld [vmem:[%s24073_s8 + $0x438] sm:$0xff]  }
 0xa41   : > { %17705 = vmatprep.subr.bf16.mxu1 %v18850_v20 }
 0xa44   : > { %17706 = vmatpush3.bf16.msra.mxu1 %v18850_v20  ;;  %v12624_v20 = vpack.c.bf16 %v12622_v62, %v12621_v54  ;;  %v18904_v54 = vld [vmem:[%s24073_s8 + $0x4d8] sm:$0xff]   ;;  %v18907_v62 = vld [vmem:[%s24073_s8 + $0x4f0] sm:$0xff]  }
 0xa45   : > { %17707 = vmatprep.subr.bf16.mxu1 %v18851_v8 }
 0xa48   : > { %17708 = vmatpush3.bf16.msra.mxu1 %v18851_v8  ;;  %v12492_v8 = vld [vmem:[#allocation2 + $0x50] sm:$0x1] }
 0xa49   : > { %17709 = vmatprep.subr.bf16.mxu1 %v18852_v48 }
 0xa4c   : > { %17710 = vmatpush3.bf16.msra.mxu1 %v18852_v48  ;;  %v12647_v48 = vrot.slane %v12645_v32, 1  ;;  %v18908_v32 = vld [vmem:[%s24073_s8 + $0x4f8] sm:$0xff]  }
 0xa4d   : > { %17715 = vmatprep.subr.bf16.mxu1 %v18853_v7 }
 0xa4f   : > { %17712 = vmatmul.mubr.bf16.vlgmr.msra.gmra.mrb[136].mxu1 %v23285_v58  ;;  %v18857_v58 = vld [vmem:[%s24073_s8 + $0x360] sm:$0xff]  }
 0xa50   : > { %17716 = vmatpush3.bf16.msra.mxu1 %v18853_v7  ;;  %17731 = vmatprep.mubr.bf16.mxu1 %v23342_v11  ;;  %v18858_v11 = vld [vmem:[%s24073_s8 + $0x368] sm:$0xff]   ;;  %v24652_v7 = vld [vmem:[#allocation71_spill] sm:$0xff] }
 0xa51   : > { %17717 = vmatprep.subr.bf16.mxu1 %v18854_v34 }
 0xa54   : > { %17718 = vmatpush3.bf16.msra.mxu1 %v18854_v34  ;;  %v12495_v34 = vmul.f32 %v18994_v28, %v24652_v7  ;;  %v18915_v7 = vld [vmem:[%s24073_s8 + $0x530] sm:$0xff]  }
 0xa55   : > { %17719 = vmatprep.subr.bf16.mxu1 %v18855_v42 }
 0xa58   : > { %17720 = vmatpush3.bf16.msra.mxu1 %v18855_v42  ;;  %v12496_v42 = vmul.f32 0.0, %v12492_v8  ;;  %v18911_v8 = vld [vmem:[%s24073_s8 + $0x510] sm:$0xff]  }
 0xa59   : > { %17721 = vmatprep.subr.bf16.mxu1 %v18856_v29 }
 0xa5c   : > { %17722 = vmatpush3.bf16.msra.mxu1 %v18856_v29  ;;  %v18885_v29 = vld [vmem:[%s24073_s8 + $0x440] sm:$0xff]  }
 0xa5d   : > { %17723 = vmatprep.subr.bf16.mxu1 %v18857_v58 }
 0xa60   : > { %17724 = vmatpush3.bf16.msra.mxu1 %v18857_v58  ;;  %v12643_v58 = vshrl.u32 %v12623_v17, 16  ;;  %v18900_v17 = vld [vmem:[%s24073_s8 + $0x4b8] sm:$0xff]  }
 0xa61   : > { %17725 = vmatprep.subr.bf16.mxu1 %v18858_v11 }
 0xa64   : > { %17726 = vmatpush3.bf16.msra.mxu1 %v18858_v11  ;;  %v12650_v11 = vshll.u32 %v12624_v20, 16 }
 0xa65   : > { %17727 = vmatprep.subr.bf16.mxu1 %v18859_v38 }
 0xa68   : > { %17728 = vmatpush3.bf16.msra.mxu1 %v18859_v38  ;;  %v12648_v38 = vor.u32 %v12647_v48, %v12643_v58  ;;  %v18912_v48 = vld [vmem:[%s24073_s8 + $0x518] sm:$0xff]   ;;  %v18949_v58 = vld [vmem:[%s24075_s10] sm:$0xff]  }
 0xa69   : > { %17729 = vmatprep.subr.bf16.mxu1 %v18860_v41  ;;  %17955 = vmatprep.subr.bf16.mxu0 %v18949_v58 }
 0xa6a   : > { %17956 = vmatpush3.bf16.msra.mxu0 %v18949_v58 }
 0xa6c   : > { %17730 = vmatpush3.bf16.msra.mxu1 %v18860_v41  ;;  %v12498_v41 = vpack.c.bf16 %v12496_v42, %v12495_v34  ;;  %v18916_v34 = vld [vmem:[%s24073_s8 + $0x538] sm:$0xff]   ;;  %v18917_v42 = vld [vmem:[%s24073_s8 + $0x540] sm:$0xff]  }
 0xa6d   : > { %17735 = vmatprep.subr.bf16.mxu1 %v18861_v13 }
 0xa6f   : > { %17732 = vmatmul.mubr.bf16.vlgmr.msra.gmra.mrb[136].mxu1 %v23329_v44  ;;  %v18865_v44 = vld [vmem:[%s24073_s8 + $0x3a0] sm:$0xff]  }
 0xa70   : > { %17736 = vmatpush3.bf16.msra.mxu1 %v18861_v13  ;;  %17751 = vmatprep.mubr.bf16.mxu1 %v23333_v25  ;;  %v18866_v25 = vld [vmem:[%s24073_s8 + $0x3a8] sm:$0xff]   ;;  %v12652_v13 = vrot.slane %v12650_v11, 1 }
 0xa71   : > { %17737 = vmatprep.subr.bf16.mxu1 %v18862_v47  ;;  %v18950_v11 = vld [vmem:[%s24075_s10 + $0x8] sm:$0xff]  }
 0xa72   : > { %17957 = vmatprep.subr.bf16.mxu0 %v18950_v11 }
 0xa73   : > { %17958 = vmatpush3.bf16.msra.mxu0 %v18950_v11 }
 0xa74   : > { %17738 = vmatpush3.bf16.msra.mxu1 %v18862_v47  ;;  %v18886_v47 = vld [vmem:[%s24073_s8 + $0x448] sm:$0xff]  }
 0xa75   : > { %17739 = vmatprep.subr.bf16.mxu1 %v18863_v9 }
 0xa78   : > { %17740 = vmatpush3.bf16.msra.mxu1 %v18863_v9  ;;  %v12653_v9 = vsel %vm24653_vm7, %v12648_v38, %v12652_v13  ;;  %v18919_v38 = vld [vmem:[%s24073_s8 + $0x550] sm:$0xff]  }
 0xa79   : > { %17741 = vmatprep.subr.bf16.mxu1 %v18864_v14 }
 0xa7c   : > { %17742 = vmatpush3.bf16.msra.mxu1 %v18864_v14  ;;  %v18887_v14 = vld [vmem:[%s24073_s8 + $0x450] sm:$0xff]  }
 0xa7d   : > { %17743 = vmatprep.subr.bf16.mxu1 %v18865_v44 }
 0xa80   : > { %17744 = vmatpush3.bf16.msra.mxu1 %v18865_v44  ;;  %v18888_v44 = vld [vmem:[%s24073_s8 + $0x458] sm:$0xff]  }
 0xa81   : > { %17745 = vmatprep.subr.bf16.mxu1 %v18866_v25 }
 0xa84   : > { %17746 = vmatpush3.bf16.msra.mxu1 %v18866_v25  ;;  %v18889_v25 = vld [vmem:[%s24073_s8 + $0x460] sm:$0xff]  }
 0xa85   : > { %17747 = vmatprep.subr.bf16.mxu1 %v18867_v2 }
 0xa88   : > { %17748 = vmatpush3.bf16.msra.mxu1 %v18867_v2  ;;  %v18890_v2 = vld [vmem:[%s24073_s8 + $0x468] sm:$0xff]  }
 0xa89   : > { %17749 = vmatprep.subr.bf16.mxu1 %v18868_v50 }
 0xa8c   : > { %17750 = vmatpush3.bf16.msra.mxu1 %v18868_v50  ;;  %v12760_v50 = vld [vmem:[#allocation2 + $0x20] sm:$0xfc] }
 0xa8d   : > { %17755 = vmatprep.subr.bf16.mxu1 %v18869_v33 }
 0xa8f   : > { %17752 = vmatmul.mubr.bf16.vlgmr.msra.gmra.mrb[136].mxu1 %v23323_v18  ;;  %v18873_v18 = vld [vmem:[%s24073_s8 + $0x3e0] sm:$0xff]  }
 0xa90   : > { %17756 = vmatpush3.bf16.msra.mxu1 %v18869_v33  ;;  %17771 = vmatprep.mubr.bf16.mxu1 %v23363_v53  ;;  %v18874_v53 = vld [vmem:[%s24073_s8 + $0x3e8] sm:$0xff]   ;;  %v12761_v33 = vld [vmem:[#allocation2 + $0x50] sm:$0x7] }
 0xa91   : > { %17757 = vmatprep.subr.bf16.mxu1 %v18870_v35 }
 0xa94   : > { %17758 = vmatpush3.bf16.msra.mxu1 %v18870_v35  ;;  %v18891_v35 = vld [vmem:[%s24073_s8 + $0x470] sm:$0xff]  }
 0xa95   : > { %17759 = vmatprep.subr.bf16.mxu1 %v18871_v6 }
 0xa98   : > { %17760 = vmatpush3.bf16.msra.mxu1 %v18871_v6  ;;  %v24654_v6 = vld [vmem:[#allocation70_spill] sm:$0xff] }
 0xa99   : > { %17761 = vmatprep.subr.bf16.mxu1 %v18872_v55 }
 0xa9c   : > { %17762 = vmatpush3.bf16.msra.mxu1 %v18872_v55  ;;  %v12762_v55 = vmul.f32 %v12760_v50, %v24654_v6  ;;  %v18926_v50 = vld [vmem:[%s24073_s8 + $0x588] sm:$0xff]   ;;  %v18931_v6 = vld [vmem:[%s24073_s8 + $0x5b0] sm:$0xff]  }
 0xa9d   : > { %17763 = vmatprep.subr.bf16.mxu1 %v18873_v18 }
 0xaa0   : > { %17764 = vmatpush3.bf16.msra.mxu1 %v18873_v18  ;;  %v23838_v18 = vld [vmem:[#allocation2 + $0x30] sm:$0xff] }
 0xaa1   : > { %17765 = vmatprep.subr.bf16.mxu1 %v18874_v53 }
 0xaa4   : > { %17766 = vmatpush3.bf16.msra.mxu1 %v18874_v53  ;;  %v24655_v53 = vld [vmem:[#allocation25_spill] sm:$0xff] }
 0xaa5   : > { %17767 = vmatprep.subr.bf16.mxu1 %v18875_v5 }
 0xaa8   : > { %17768 = vmatpush3.bf16.msra.mxu1 %v18875_v5  ;;  %v12763_v5 = vmul.f32 %v23838_v18, %v24655_v53  ;;  %v18933_v53 = vld [vmem:[%s24073_s8 + $0x5c0] sm:$0xff]  }
 0xaa9   : > { %17769 = vmatprep.subr.bf16.mxu1 %v18876_v31 }
 0xaaa   : > { %v12766_v49 = vpack.c.bf16 %v12763_v5, %v12762_v55  ;;  %v18932_v55 = vld [vmem:[%s24073_s8 + $0x5b8] sm:$0xff]   ;;  %v18934_v5 = vld [vmem:[%s24073_s8 + $0x5c8] sm:$0xff]  }
 0xaac   : > { %17770 = vmatpush3.bf16.msra.mxu1 %v18876_v31  ;;  %v24656_v31 = vld [vmem:[#allocation27_spill] sm:$0xff] }
 0xaad   : > { %17775 = vmatprep.subr.bf16.mxu1 %v18877_v59  ;;  %v12764_v43 = vmul.f32 %v18994_v28, %v24656_v31  ;;  %v18902_v28 = vld [vmem:[%s24073_s8 + $0x4c8] sm:$0xff]   ;;  %v18935_v31 = vld [vmem:[%s24073_s8 + $0x5d0] sm:$0xff]  }
 0xaaf   : > { %17772 = vmatmul.mubr.bf16.vlgmr.msra.gmra.mrb[136].mxu1 %v23354_v39  ;;  %v18881_v39 = vld [vmem:[%s24073_s8 + $0x420] sm:$0xff]  }
 0xab0   : > { %17776 = vmatpush3.bf16.msra.mxu1 %v18877_v59  ;;  %17791 = vmatprep.mubr.bf16.mxu1 %v12497_v60  ;;  %v24657_v59 = vld [vmem:[#allocation26_spill] sm:$0xff]  ;;  %v12654_v60 = vshrl.u32 %v12624_v20, 16 }
 0xab1   : > { %17777 = vmatprep.subr.bf16.mxu1 %v18878_v56  ;;  %v12765_v1 = vmul.f32 %v12761_v33, %v24657_v59  ;;  %v18910_v20 = vld [vmem:[%s24073_s8 + $0x508] sm:$0xff]   ;;  %v18927_v33 = vld [vmem:[%s24073_s8 + $0x590] sm:$0xff]  }
 0xab2   : > { %v12656_v0 = vor.u32 %v12654_v60, %v12652_v13  ;;  %v18921_v13 = vld [vmem:[%s24073_s8 + $0x560] sm:$0xff]   ;;  %v18939_v59 = vld [vmem:[%s24073_s8 + $0x5f0] sm:$0xff]   ;;  %v24659_v60 = vld [vmem:[#allocation82_spill] sm:$0xff] }
 0xab3   : > { %v12767_v27 = vpack.c.bf16 %v12765_v1, %v12764_v43  ;;  %v18936_v43 = vld [vmem:[%s24073_s8 + $0x5d8] sm:$0xff]  }
 0xab4   : > { %17778 = vmatpush3.bf16.msra.mxu1 %v18878_v56  ;;  %v18893_v56 = vld [vmem:[%s24073_s8 + $0x480] sm:$0xff]   ;;  %v18940_v1 = vld [vmem:[%s24073_s8 + $0x5f8] sm:$0xff]  }
 0xab5   : > { %17779 = vmatprep.subr.bf16.mxu1 %v18879_v52 }
 0xab8   : > { %17780 = vmatpush3.bf16.msra.mxu1 %v18879_v52  ;;  %v12787_v52 = vrot.slane %v12766_v49, 1  ;;  %v18941_v49 = vld [vmem:[%s24073_s8 + $0x600] sm:$0xff]  }
 0xab9   : > { %17781 = vmatprep.subr.bf16.mxu1 %v18880_v61 }
 0xabc   : > { %17782 = vmatpush3.bf16.msra.mxu1 %v18880_v61  ;;  %v12788_v61 = vrot.slane %v12767_v27, 1  ;;  %v24658_v27 = vld [vmem:[#allocation19_spill] sm:$0xff] }
 0xabd   : > { %17783 = vmatprep.subr.bf16.mxu1 %v18881_v39 }
 0xabe   : > { %v12789_v40 = vsel %vm1859_vm3, %v12787_v52, %v12788_v61 }
 0xac0   : > { %17784 = vmatpush3.bf16.msra.mxu1 %v18881_v39  ;;  %v18894_v39 = vld [vmem:[%s24073_s8 + $0x488] sm:$0xff]  }
 0xac1   : > { %17785 = vmatprep.subr.bf16.mxu1 %v18882_v63 }
 0xac4   : > { %17786 = vmatpush3.bf16.msra.mxu1 %v18882_v63  ;;  %v18898_v63 = vld [vmem:[%s24073_s8 + $0x4a8] sm:$0xff]  }
 0xac5   : > { %17787 = vmatprep.subr.bf16.mxu1 %v18883_v4 }
 0xac8   : > { %17788 = vmatpush3.bf16.msra.mxu1 %v18883_v4  ;;  %v18901_v4 = vld [vmem:[%s24073_s8 + $0x4c0] sm:$0xff]  }
 0xac9   : > { %17789 = vmatprep.subr.bf16.mxu1 %v18884_v45 }
 0xacc   : > { %17790 = vmatpush3.bf16.msra.mxu1 %v18884_v45  ;;  %v18909_v45 = vld [vmem:[%s24073_s8 + $0x500] sm:$0xff]  }
 0xacd   : > { %17795 = vmatprep.subr.bf16.mxu1 %v18885_v29 }
 0xacf   : > { %17792 = vmatmul.mubr.bf16.vlgmr.msra.gmra.mrb[136].mxu1 %v12498_v41  ;;  %v18920_v41 = vld [vmem:[%s24073_s8 + $0x558] sm:$0xff]  }
 0xad0   : > { %17796 = vmatpush3.bf16.msra.mxu1 %v18885_v29  ;;  %17811 = vmatprep.mubr.bf16.mxu1 %v12653_v9  ;;  %v18918_v29 = vld [vmem:[%s24073_s8 + $0x548] sm:$0xff]  }
 0xad1   : > { %17797 = vmatprep.subr.bf16.mxu1 %v18886_v47  ;;  %v18922_v9 = vld [vmem:[%s24073_s8 + $0x568] sm:$0xff]  }
 0xad4   : > { %17798 = vmatpush3.bf16.msra.mxu1 %v18886_v47  ;;  %v18953_v47 = vld [vmem:[%s24075_s10 + $0x20] sm:$0xff]  }
 0xad5   : > { %17799 = vmatprep.subr.bf16.mxu1 %v18887_v14 }
 0xad8   : > { %17800 = vmatpush3.bf16.msra.mxu1 %v18887_v14  ;;  %v18954_v14 = vld [vmem:[%s24075_s10 + $0x28] sm:$0xff]  }
 0xad9   : > { %17801 = vmatprep.subr.bf16.mxu1 %v18888_v44 }
 0xadc   : > { %17802 = vmatpush3.bf16.msra.mxu1 %v18888_v44  ;;  %v18923_v44 = vld [vmem:[%s24073_s8 + $0x570] sm:$0xff]  }
 0xadd   : > { %17803 = vmatprep.subr.bf16.mxu1 %v18889_v25 }
 0xae0   : > { %17804 = vmatpush3.bf16.msra.mxu1 %v18889_v25  ;;  %v18924_v25 = vld [vmem:[%s24073_s8 + $0x578] sm:$0xff]  }
 0xae1   : > { %17805 = vmatprep.subr.bf16.mxu1 %v18890_v2 }
 0xae4   : > { %17806 = vmatpush3.bf16.msra.mxu1 %v18890_v2  ;;  %v18925_v2 = vld [vmem:[%s24073_s8 + $0x580] sm:$0xff]  }
 0xae5   : > { %17807 = vmatprep.subr.bf16.mxu1 %v18891_v35 }
 0xae8   : > { %17808 = vmatpush3.bf16.msra.mxu1 %v18891_v35  ;;  %v18928_v35 = vld [vmem:[%s24073_s8 + $0x598] sm:$0xff]  }
 0xae9   : > { %17809 = vmatprep.subr.bf16.mxu1 %v18892_v57 }
 0xaec   : > { %17810 = vmatpush3.bf16.msra.mxu1 %v18892_v57  ;;  %v13595_v57 = vld [vmem:[#allocation2 + $0x40] sm:$0xff] }
 0xaed   : > { %17815 = vmatprep.subr.bf16.mxu1 %v18893_v56  ;;  %v13599_v52 = vmul.f32 %v24659_v60, %v13595_v57 }
 0xaef   : > { %17812 = vmatmul.mubr.bf16.vlgmr.msra.gmra.mrb[136].mxu1 %v12656_v0 }
 0xaf0   : > { %17816 = vmatpush3.bf16.msra.mxu1 %v18893_v56  ;;  %17831 = vmatprep.mubr.bf16.mxu1 %v12789_v40  ;;  %v13598_v56 = vmul.f32 %v23838_v18, %v24658_v27  ;;  %v18944_v18 = vld [vmem:[%s24073_s8 + $0x618] sm:$0xff]   ;;  %v18945_v40 = vld [vmem:[%s24073_s8 + $0x620] sm:$0xff]  }
 0xaf1   : > { %17817 = vmatprep.subr.bf16.mxu1 %v18894_v39 }
 0xaf2   : > { %v13602_v0 = vpack.c.bf16 %v13599_v52, %v13598_v56 }
 0xaf4   : > { %17818 = vmatpush3.bf16.msra.mxu1 %v18894_v39  ;;  %v18943_v39 = vld [vmem:[%s24073_s8 + $0x610] sm:$0xff]  }
 0xaf5   : > { %17819 = vmatprep.subr.bf16.mxu1 %v18895_v22 }
 0xaf8   : > { %17820 = vmatpush3.bf16.msra.mxu1 %v18895_v22  ;;  %v18947_v22 = vld [vmem:[%s24073_s8 + $0x630] sm:$0xff]  }
 0xaf9   : > { %17821 = vmatprep.subr.bf16.mxu1 %v18896_v21 }
 0xafc   : > { %17822 = vmatpush3.bf16.msra.mxu1 %v18896_v21  ;;  %v13597_v21 = vld [vmem:[#allocation2 + $0x60] sm:$0x1] }
 0xafd   : > { %17823 = vmatprep.subr.bf16.mxu1 %v18897_v37 }
 0xb00   : > { %17824 = vmatpush3.bf16.msra.mxu1 %v18897_v37  ;;  %v18948_v37 = vld [vmem:[%s24073_s8 + $0x638] sm:$0xff]  }
 0xb01   : > { %17825 = vmatprep.subr.bf16.mxu1 %v18898_v63 }
 0xb04   : > { %17826 = vmatpush3.bf16.msra.mxu1 %v18898_v63  ;;  %v18996_v63 = vld [vmem:[#allocation2] sm:$0xff] }
 0xb05   : > { %17827 = vmatprep.subr.bf16.mxu1 %v18899_v24 }
 0xb08   : > { %17828 = vmatpush3.bf16.msra.mxu1 %v18899_v24  ;;  %v24660_v24 = vld [vmem:[#allocation83_spill] sm:$0xff] }
 0xb09   : > { %17829 = vmatprep.subr.bf16.mxu1 %v18900_v17 }
 0xb0c   : > { %17830 = vmatpush3.bf16.msra.mxu1 %v18900_v17  ;;  %v13600_v17 = vmul.f32 %v18996_v63, %v24660_v24 }
 0xb0d   : > { %17835 = vmatprep.subr.bf16.mxu1 %v18901_v4 }
 0xb0f   : > { %17832 = vmatmul.mubr.bf16.vlgmr.msra.gmra.mrb[136].mxu1 %v12788_v61  ;;  %v18942_v61 = vld [vmem:[%s24073_s8 + $0x608] sm:$0xff]  }
 0xb10   : > { %17836 = vmatpush3.bf16.msra.mxu1 %v18901_v4  ;;  %17851 = vmatprep.mubr.bf16.mxu1 %v23405_v36  ;;  %v18906_v36 = vld [vmem:[%s24073_s8 + $0x4e8] sm:$0xff]   ;;  %v13601_v4 = vmul.f32 0.0, %v13597_v21 }
 0xb11   : > { %17837 = vmatprep.subr.bf16.mxu1 %v18902_v28 }
 0xb14   : > { %17838 = vmatpush3.bf16.msra.mxu1 %v18902_v28  ;;  %v13603_v28 = vpack.c.bf16 %v13601_v4, %v13600_v17 }
 0xb15   : > { %17839 = vmatprep.subr.bf16.mxu1 %v18903_v23 }
 0xb18   : > { %17840 = vmatpush3.bf16.msra.mxu1 %v18903_v23  ;;  %v18955_v23 = vld [vmem:[%s24075_s10 + $0x30] sm:$0xff]  }
 0xb19   : > { %17841 = vmatprep.subr.bf16.mxu1 %v18904_v54 }
 0xb1c   : > { %17842 = vmatpush3.bf16.msra.mxu1 %v18904_v54  ;;  %v18956_v54 = vld [vmem:[%s24075_s10 + $0x38] sm:$0xff]  }
 0xb1d   : > { %17843 = vmatprep.subr.bf16.mxu1 %v18905_v15 }
 0xb20   : > { %17844 = vmatpush3.bf16.msra.mxu1 %v18905_v15  ;;  %v16180_v15 = vld [vmem:[%s24074_s9] ss:$0 sm:$0xff] }
 0xb21   : > { %17845 = vmatprep.subr.bf16.mxu1 %v18906_v36 }
 0xb24   : > { %17846 = vmatpush3.bf16.msra.mxu1 %v18906_v36 }
 0xb25   : > { %17847 = vmatprep.subr.bf16.mxu1 %v18907_v62 }
 0xb28   : > { %17848 = vmatpush3.bf16.msra.mxu1 %v18907_v62 }
 0xb29   : > { %17849 = vmatprep.subr.bf16.mxu1 %v18908_v32 }
 0xb2c   : > { %17850 = vmatpush3.bf16.msra.mxu1 %v18908_v32 }
 0xb2d   : > { %17855 = vmatprep.subr.bf16.mxu1 %v18909_v45 }
 0xb2f   : > { %17852 = vmatmul.mubr.bf16.vlgmr.msra.gmra.mrb[136].mxu1 %v23388_v16  ;;  %v18913_v16 = vld [vmem:[%s24073_s8 + $0x520] sm:$0xff]  }
 0xb30   : > { %17856 = vmatpush3.bf16.msra.mxu1 %v18909_v45  ;;  %17871 = vmatprep.mubr.bf16.mxu1 %v23400_v51  ;;  %v18914_v51 = vld [vmem:[%s24073_s8 + $0x528] sm:$0xff]  }
 0xb31   : > { %17857 = vmatprep.subr.bf16.mxu1 %v18910_v20 }
 0xb34   : > { %17858 = vmatpush3.bf16.msra.mxu1 %v18910_v20 }
 0xb35   : > { %17859 = vmatprep.subr.bf16.mxu1 %v18911_v8 }
 0xb38   : > { %17860 = vmatpush3.bf16.msra.mxu1 %v18911_v8 }
 0xb39   : > { %17861 = vmatprep.subr.bf16.mxu1 %v18912_v48 }
 0xb3c   : > { %17862 = vmatpush3.bf16.msra.mxu1 %v18912_v48 }
 0xb3d   : > { %17863 = vmatprep.subr.bf16.mxu1 %v18913_v16 }
 0xb40   : > { %17864 = vmatpush3.bf16.msra.mxu1 %v18913_v16 }
 0xb41   : > { %17865 = vmatprep.subr.bf16.mxu1 %v18914_v51 }
 0xb44   : > { %17866 = vmatpush3.bf16.msra.mxu1 %v18914_v51 }
 0xb45   : > { %17867 = vmatprep.subr.bf16.mxu1 %v18915_v7 }
 0xb48   : > { %17868 = vmatpush3.bf16.msra.mxu1 %v18915_v7 }
 0xb49   : > { %17869 = vmatprep.subr.bf16.mxu1 %v18916_v34 }
 0xb4c   : > { %17870 = vmatpush3.bf16.msra.mxu1 %v18916_v34 }
 0xb4d   : > { %17875 = vmatprep.subr.bf16.mxu1 %v18917_v42 }
 0xb4f   : > { %17872 = vmatmul.mubr.bf16.vlgmr.msra.gmra.mrb[136].mxu1 %v23382_v10  ;;  %v18951_v10 = vld [vmem:[%s24075_s10 + $0x10] sm:$0xff]  }
 0xb50   : > { %17876 = vmatpush3.bf16.msra.mxu1 %v18917_v42  ;;  %17891 = vmatprep.mubr.bf16.mxu1 %v23428_v46  ;;  %v18952_v46 = vld [vmem:[%s24075_s10 + $0x18] sm:$0xff]  }
 0xb51   : > { %17877 = vmatprep.subr.bf16.mxu1 %v18918_v29  ;;  %17959 = vmatprep.subr.bf16.mxu0 %v18951_v10 }
 0xb52   : > { %17960 = vmatpush3.bf16.msra.mxu0 %v18951_v10 }
 0xb53   : > { %17961 = vmatprep.subr.bf16.mxu0 %v18952_v46 }
 0xb54   : > { %17878 = vmatpush3.bf16.msra.mxu1 %v18918_v29 }
 0xb55   : > { %17879 = vmatprep.subr.bf16.mxu1 %v18919_v38 }
 0xb56   : > { %17962 = vmatpush3.bf16.msra.mxu0 %v18952_v46 }
 0xb57   : > { %17963 = vmatprep.subr.bf16.mxu0 %v18953_v47 }
 0xb58   : > { %17880 = vmatpush3.bf16.msra.mxu1 %v18919_v38 }
 0xb59   : > { %17881 = vmatprep.subr.bf16.mxu1 %v18920_v41 }
 0xb5a   : > { %17964 = vmatpush3.bf16.msra.mxu0 %v18953_v47 }
 0xb5b   : > { %17965 = vmatprep.subr.bf16.mxu0 %v18954_v14 }
 0xb5c   : > { %17882 = vmatpush3.bf16.msra.mxu1 %v18920_v41 }
 0xb5d   : > { %17883 = vmatprep.subr.bf16.mxu1 %v18921_v13 }
 0xb5e   : > { %17966 = vmatpush3.bf16.msra.mxu0 %v18954_v14 }
 0xb5f   : > { %17967 = vmatprep.subr.bf16.mxu0 %v18955_v23 }
 0xb60   : > { %17884 = vmatpush3.bf16.msra.mxu1 %v18921_v13 }
 0xb61   : > { %17885 = vmatprep.subr.bf16.mxu1 %v18922_v9 }
 0xb62   : > { %17968 = vmatpush3.bf16.msra.mxu0 %v18955_v23 }
 0xb63   : > { %17969 = vmatprep.subr.bf16.mxu0 %v18956_v54 }
 0xb64   : > { %17886 = vmatpush3.bf16.msra.mxu1 %v18922_v9 }
 0xb65   : > { %17887 = vmatprep.subr.bf16.mxu1 %v18923_v44 }
 0xb66   : > { %17970 = vmatpush3.bf16.msra.mxu0 %v18956_v54 }
 0xb68   : > { %17888 = vmatpush3.bf16.msra.mxu1 %v18923_v44 }
 0xb69   : > { %17889 = vmatprep.subr.bf16.mxu1 %v18924_v25 }
 0xb6c   : > { %17890 = vmatpush3.bf16.msra.mxu1 %v18924_v25 }
 0xb6d   : > { %17895 = vmatprep.subr.bf16.mxu1 %v18925_v2 }
 0xb6f   : > { %17892 = vmatmul.mubr.bf16.vlgmr.msra.gmra.mrb[136].mxu1 %v23421_v30  ;;  %v18929_v30 = vld [vmem:[%s24073_s8 + $0x5a0] sm:$0xff]  }
 0xb70   : > { %17896 = vmatpush3.bf16.msra.mxu1 %v18925_v2  ;;  %17911 = vmatprep.mubr.bf16.mxu1 %v23418_v12  ;;  %v18930_v12 = vld [vmem:[%s24073_s8 + $0x5a8] sm:$0xff]  }
 0xb71   : > { %17897 = vmatprep.subr.bf16.mxu1 %v18926_v50 }
 0xb74   : > { %17898 = vmatpush3.bf16.msra.mxu1 %v18926_v50 }
 0xb75   : > { %17899 = vmatprep.subr.bf16.mxu1 %v18927_v33 }
 0xb78   : > { %17900 = vmatpush3.bf16.msra.mxu1 %v18927_v33 }
 0xb79   : > { %17901 = vmatprep.subr.bf16.mxu1 %v18928_v35 }
 0xb7c   : > { %17902 = vmatpush3.bf16.msra.mxu1 %v18928_v35 }
 0xb7d   : > { %17903 = vmatprep.subr.bf16.mxu1 %v18929_v30 }
 0xb80   : > { %17904 = vmatpush3.bf16.msra.mxu1 %v18929_v30 }
 0xb81   : > { %17905 = vmatprep.subr.bf16.mxu1 %v18930_v12 }
 0xb84   : > { %17906 = vmatpush3.bf16.msra.mxu1 %v18930_v12 }
 0xb85   : > { %17907 = vmatprep.subr.bf16.mxu1 %v18931_v6 }
 0xb88   : > { %17908 = vmatpush3.bf16.msra.mxu1 %v18931_v6 }
 0xb89   : > { %17909 = vmatprep.subr.bf16.mxu1 %v18932_v55 }
 0xb8c   : > { %17910 = vmatpush3.bf16.msra.mxu1 %v18932_v55 }
 0xb8d   : > { %17915 = vmatprep.subr.bf16.mxu1 %v18933_v53 }
 0xb8f   : > { %17912 = vmatmul.mubr.bf16.vlgmr.msra.gmra.mrb[136].mxu1 %v23409_v19  ;;  %v18937_v19 = vld [vmem:[%s24073_s8 + $0x5e0] sm:$0xff]  }
 0xb90   : > { %17916 = vmatpush3.bf16.msra.mxu1 %v18933_v53  ;;  %17931 = vmatprep.mubr.bf16.mxu1 %v23437_v3  ;;  %v18938_v3 = vld [vmem:[%s24073_s8 + $0x5e8] sm:$0xff]  }
 0xb91   : > { %17917 = vmatprep.subr.bf16.mxu1 %v18934_v5 }
 0xb94   : > { %17918 = vmatpush3.bf16.msra.mxu1 %v18934_v5 }
 0xb95   : > { %17919 = vmatprep.subr.bf16.mxu1 %v18935_v31 }
 0xb98   : > { %17920 = vmatpush3.bf16.msra.mxu1 %v18935_v31 }
 0xb99   : > { %17921 = vmatprep.subr.bf16.mxu1 %v18936_v43 }
 0xb9c   : > { %17922 = vmatpush3.bf16.msra.mxu1 %v18936_v43 }
 0xb9d   : > { %17923 = vmatprep.subr.bf16.mxu1 %v18937_v19 }
 0xba0   : > { %17924 = vmatpush3.bf16.msra.mxu1 %v18937_v19 }
 0xba1   : > { %17925 = vmatprep.subr.bf16.mxu1 %v18938_v3 }
 0xba4   : > { %17926 = vmatpush3.bf16.msra.mxu1 %v18938_v3 }
 0xba5   : > { %17927 = vmatprep.subr.bf16.mxu1 %v18939_v59 }
 0xba8   : > { %17928 = vmatpush3.bf16.msra.mxu1 %v18939_v59 }
 0xba9   : > { %17929 = vmatprep.subr.bf16.mxu1 %v18940_v1 }
 0xbac   : > { %17930 = vmatpush3.bf16.msra.mxu1 %v18940_v1 }
 0xbad   : > { %17935 = vmatprep.subr.bf16.mxu1 %v18941_v49 }
 0xbaf   : > { %17932 = vmatmul.mubr.bf16.vlgmr.msra.gmra.mrb[136].mxu1 %v23430_v26  ;;  %v18946_v26 = vld [vmem:[%s24073_s8 + $0x628] sm:$0xff]  }
 0xbb0   : > { %17936 = vmatpush3.bf16.msra.mxu1 %v18941_v49  ;;  %17951 = vmatprep.mubr.bf16.mxu1 %v13602_v0 }
 0xbb1   : > { %17937 = vmatprep.subr.bf16.mxu1 %v18942_v61 }
 0xbb4   : > { %17938 = vmatpush3.bf16.msra.mxu1 %v18942_v61 }
 0xbb5   : > { %17939 = vmatprep.subr.bf16.mxu1 %v18943_v39 }
 0xbb8   : > { %17940 = vmatpush3.bf16.msra.mxu1 %v18943_v39 }
 0xbb9   : > { %17941 = vmatprep.subr.bf16.mxu1 %v18944_v18 }
 0xbbc   : > { %17942 = vmatpush3.bf16.msra.mxu1 %v18944_v18 }
 0xbbd   : > { %17943 = vmatprep.subr.bf16.mxu1 %v18945_v40 }
 0xbc0   : > { %17944 = vmatpush3.bf16.msra.mxu1 %v18945_v40 }
 0xbc1   : > { %17945 = vmatprep.subr.bf16.mxu1 %v18946_v26 }
 0xbc4   : > { %17946 = vmatpush3.bf16.msra.mxu1 %v18946_v26 }
 0xbc5   : > { %17947 = vmatprep.subr.bf16.mxu1 %v18947_v22 }
 0xbc8   : > { %17948 = vmatpush3.bf16.msra.mxu1 %v18947_v22 }
 0xbc9   : > { %17949 = vmatprep.subr.bf16.mxu1 %v18948_v37 }
 0xbcc   : > { %17950 = vmatpush3.bf16.msra.mxu1 %v18948_v37 }
 0xbcf   : > { %17952 = vmatmul.mubr.bf16.vlgmr.msra.gmra.mrb[136].mxu1 %v13603_v28 }
 0xca2   : > { %v17953_v36 = vpop.f32.mrb[136].mxu1 }
 0xca3   : > { %v13731_v62 = vadd.f32 %v17953_v36, %v16180_v15  ;;  %v13703_v32 = vpop.f32.mrb[137].mxu1 }
 0xca4   : > { %v13729_v45 = vadd.f32 %v16180_v15, %v13703_v32  ;;  %v17954_v20 = vpop.f32.mrb[138].mxu1 }
 0xca5   : > { %v13732_v8 = vadd.f32 %v17954_v20, %v16180_v15  ;;  %v13706_v48 = vpop.f32.mrb[139].mxu1  ;;  %v13735_v51 = vmax.f32 %v13731_v62, 0.0 }
 0xca6   : > { %v13730_v16 = vadd.f32 %v16180_v15, %v13706_v48  ;;  %v13733_v34 = vmax.f32 %v13729_v45, 0.0 }
 0xca7   : > { %v13736_v7 = vmax.f32 %v13732_v8, 0.0 }
 0xca8   : > { %v13734_v42 = vmax.f32 %v13730_v16, 0.0 }
 0xca9   : > { %v13738_v29 = vpack.c.bf16 %v13736_v7, %v13735_v51 }
 0xcaa   : > { %v13737_v58 = vpack.c.bf16 %v13734_v42, %v13733_v34 }
 0xcac   : > { %17971 = vmatprep.mubr.bf16.mxu0 %v13737_v58 }
 0xcad   : > { %17972 = vmatmul.mubr.bf16.vlgmr.msra.gmra.mrb[140].mxu0 %v13738_v29 }
 0xd80   : > { %v17973_v11 = vpop.f32.mrb[140].mxu0 }
 0xd81   : > { %13854 = vst [vmem:[%s406_s29 + $0x10] sm:$0xff] %v17973_v11  ;;  %v13837_v38 = vpop.f32.mrb[141].mxu0 }
 0xd82   : > { %13852 = vst [vmem:[%s406_s29] sm:$0xff] %v13837_v38  ;;  %v17974_v10 = vpop.f32.mrb[142].mxu0 }
 0xd83   : > { %13855 = vst [vmem:[%s406_s29 + $0x18] sm:$0x1] %v17974_v10  ;;  %v13840_v41 = vpop.f32.mrb[143].mxu0 }
 0xd84   : > { %13853 = vst [vmem:[%s406_s29 + $0x8] sm:$0xff] %v13840_v41 }
 0xd85 PF: > { %s21_s17 = sadd.s32 1, %s19003_s17  }
 0xd86   : > { %p18_p4 = scmp.ge.s32.totalorder %s21_s17, 4  }
 0xd88   :  { %20 = sbr.rel (!%p18_p4) target bundleno = 1 (0x1), region = 177 }

</bundles_post_ra>
